<compile_context>
chip_gen: v7x
topology: tpu7x:2x2x1
jax: 0.10.0
libtpu: 0.0.40
codegen_flags: <defaults>
</compile_context>

<pallas_src>
import functools

import jax
import jax.numpy as jnp
from jax.experimental import pallas as pl
from jax.experimental.pallas import tpu as pltpu


# ----------------------------------------------------------------------------
# Epilogue activation (runs in f32 inside the kernels).
# ----------------------------------------------------------------------------
def _apply_act(y, act, leak=0.2):
    if act == "relu":
        return jnp.maximum(y, 0.0)
    if act == "leaky_relu":
        return jnp.where(y > 0, y, leak * y)
    if act == "tanh":
        return jnp.tanh(y)
    return y


# ----------------------------------------------------------------------------
# Kernel 1: fused (x @ w) * scale + shift -> act   (layer 1: 1x1 -> 4x4).
# ----------------------------------------------------------------------------
def _fused_matmul_kernel(x_ref, w_ref, scale_ref, shift_ref, o_ref, *, act):
    acc = jnp.dot(x_ref[...], w_ref[...], preferred_element_type=jnp.float32)
    y = acc * scale_ref[...] + shift_ref[...]
    o_ref[...] = _apply_act(y, act).astype(o_ref.dtype)


def fused_matmul(x, w, scale, shift, *, act, out_dtype, tm=512):
    """x: (M, K) bf16, w: (K, C) bf16, scale/shift: (1, C) f32 -> (M, C)."""
    M, K = x.shape
    C = w.shape[1]
    TM = M if M <= tm else tm          # demo M (=batch) is tiny; tiles at scale
    grid = (pl.cdiv(M, TM),)
    flops = 2 * M * K * C
    bytes_accessed = (M * K + K * C) * 2 + 2 * C * 4 + M * C * jnp.dtype(out_dtype).itemsize
    return pl.pallas_call(
        functools.partial(_fused_matmul_kernel, act=act),
        out_shape=jax.ShapeDtypeStruct((M, C), out_dtype),
        grid=grid,
        in_specs=[
            pl.BlockSpec((TM, K), lambda i: (i, 0)),
            pl.BlockSpec((K, C), lambda i: (0, 0)),    # resident weight
            pl.BlockSpec((1, C), lambda i: (0, 0)),
            pl.BlockSpec((1, C), lambda i: (0, 0)),
        ],
        out_specs=pl.BlockSpec((TM, C), lambda i: (i, 0)),
        compiler_params=pltpu.CompilerParams(
            dimension_semantics=("parallel",),
            vmem_limit_bytes=48 * 1024 * 1024),
        cost_estimate=pl.CostEstimate(
            flops=int(flops),
            transcendentals=int(M * C if act == "tanh" else 0),
            bytes_accessed=int(bytes_accessed)),
    )(x, w, scale, shift)


# ----------------------------------------------------------------------------
# Kernel 2: stride-2 / k=4 / pad=1 ConvTranspose2d via parity decomposition,
# fused with folded BatchNorm and the activation.
# ----------------------------------------------------------------------------
def _deconv2x_kernel(x_ref, w_ref, scale_ref, shift_ref, o_ref, *, H, W, act):
    # x_ref:     (1, H+2, W+2, Cin) bf16 padded NHWC activation (one batch elem)
    # w_ref:     (4, 4*Cin, Cout)   bf16 per-parity 2x2 sub-kernels
    # scale/shift: (1, 4*Cout) f32  folded BN affine, tiled over parities
    # o_ref:     (1, H, W, 4*Cout)  parities packed on the lane dim
    accs = []
    for py in range(2):
        for px in range(2):
            p = py * 2 + px
            # 2x2 tap patches built in VMEM with static slices (no HBM im2col).
            taps = [
                x_ref[0, py + a:py + a + H, px + b:px + b + W, :]
                for a in range(2) for b in range(2)
            ]
            patches = jnp.concatenate(taps, axis=-1)          # (H, W, 4*Cin)
            patches = patches.reshape(H * W, patches.shape[-1])
            accs.append(jnp.dot(patches, w_ref[p],
                                preferred_element_type=jnp.float32))
    acc = jnp.concatenate(accs, axis=-1)                      # (H*W, 4*Cout)
    y = _apply_act(acc * scale_ref[...] + shift_ref[...], act)
    o_ref[0] = y.reshape(H, W, y.shape[-1]).astype(o_ref.dtype)


def deconv2x_fused(xp, w4, scale4, shift4, *, act, out_dtype):
    """Fused stride-2 ConvTranspose2d + BN-fold + activation.

    xp: (N, H+2, W+2, Cin) bf16 padded NHWC activation.
    w4: (4, 4*Cin, Cout)   bf16 parity sub-kernels (see _parity_subkernels).
    Returns (N, H, W, 4*Cout); last dim ordered (py, px, cout), so a reshape
    to (N, H, 2, W, 2, Cout) + one transpose interleaves to (N, 2H, 2W, Cout).
    """
    N, Hp, Wp, Cin = xp.shape
    H, W = Hp - 2, Wp - 2
    Cout = w4.shape[-1]
    C4 = 4 * Cout
    flops = 2 * N * H * W * 4 * (4 * Cin) * Cout
    bytes_accessed = (N * Hp * Wp * Cin * 2 + w4.size * 2 + 2 * C4 * 4
                      + N * H * W * C4 * jnp.dtype(out_dtype).itemsize)
    return pl.pallas_call(
        functools.partial(_deconv2x_kernel, H=H, W=W, act=act),
        out_shape=jax.ShapeDtypeStruct((N, H, W, C4), out_dtype),
        grid=(N,),
        in_specs=[
            pl.BlockSpec((1, Hp, Wp, Cin), lambda n: (n, 0, 0, 0)),
            pl.BlockSpec((4, 4 * Cin, Cout), lambda n: (0, 0, 0)),  # resident
            pl.BlockSpec((1, C4), lambda n: (0, 0)),
            pl.BlockSpec((1, C4), lambda n: (0, 0)),
        ],
        out_specs=pl.BlockSpec((1, H, W, C4), lambda n: (n, 0, 0, 0)),
        compiler_params=pltpu.CompilerParams(
            dimension_semantics=("parallel",),
            vmem_limit_bytes=48 * 1024 * 1024),
        cost_estimate=pl.CostEstimate(
            flops=int(flops),
            transcendentals=int(N * H * W * C4 if act == "tanh" else 0),
            bytes_accessed=int(bytes_accessed)),
    )(xp, w4, scale4, shift4)


def _parity_subkernels(w):
    """w: (Cin, Cout, 4, 4) ConvTranspose2d weight -> (4, 4*Cin, Cout).

    Output parity (py, px) of a stride-2 / k=4 / pad=1 ConvTranspose at pixel
    (2m+py, 2n+px) equals a 2x2 regular conv over the 1-padded input:
        sum_{a,b,ci} w[ci, co, IDX[py][a], IDX[px][b]] * xpad[m+py+a, n+px+b, ci]
    Rows ordered (a, b, ci) to match the in-kernel tap concatenation; parity
    index p = py*2 + px.
    """
    idx = ((3, 1), (2, 0))
    blocks = []
    for py in range(2):
        for px in range(2):
            rows = [w[:, :, idx[py][a], idx[px][b]]
                    for a in range(2) for b in range(2)]     # each (Cin, Cout)
            blocks.append(jnp.concatenate(rows, axis=0))      # (4*Cin, Cout)
    return jnp.stack(blocks, axis=0)                          # (4, 4*Cin, Cout)


# ----------------------------------------------------------------------------
# BaseGenerator (concrete DCGAN generator implied by __init__).
# ----------------------------------------------------------------------------
class BaseGenerator:
    def __init__(self, nz, ngf, nc, ngpu, leakiness=0.2, bias=False, key=None):
        self.nz, self.ngf, self.nc, self.ngpu = nz, ngf, nc, ngpu
        self.leakiness = leakiness   # API parity; generator uses ReLU
        self.bias = bias             # TODO(synk): bias=True not folded (DCGAN uses bias=False)
        key = jax.random.PRNGKey(0) if key is None else key

        # (Cin, Cout, stride, padding, batchnorm?, activation)
        self.cfg = [
            (nz,      ngf * 4, 1, 0, True,  "relu"),
            (ngf * 4, ngf * 2, 2, 1, True,  "relu"),
            (ngf * 2, ngf,     2, 1, True,  "relu"),
            (ngf,     nc,      2, 1, False, "tanh"),
        ]

        eps = 1e-5
        self.raw_params = []   # (w, scale, shift) f32 per layer (reference form)
        for (cin, cout, _, _, bn, _) in self.cfg:
            key, kw, kg = jax.random.split(key, 3)
            w = 0.02 * jax.random.normal(kw, (cin, cout, 4, 4), jnp.float32)
            if bn:
                gamma = 1.0 + 0.02 * jax.random.normal(kg, (cout,), jnp.float32)
                beta = jnp.zeros((cout,), jnp.float32)
                rmean = jnp.zeros((cout,), jnp.float32)
                rvar = jnp.ones((cout,), jnp.float32)
                scale = gamma / jnp.sqrt(rvar + eps)   # eval-mode BatchNorm fold
                shift = beta - rmean * scale
            else:
                scale = jnp.ones((cout,), jnp.float32)
                shift = jnp.zeros((cout,), jnp.float32)
            self.raw_params.append((w, scale, shift))

        # Kernel-ready parameters: bf16 MXU operands, f32 BN fold.
        (w0, s0, b0) = self.raw_params[0]
        c1 = self.cfg[0][1]
        # 1x1-input ConvTranspose is a plain matmul; columns ordered (ky, kx, co).
        w1m = w0.transpose(0, 2, 3, 1).reshape(self.nz, 16 * c1)
        layer1 = (w1m.astype(jnp.bfloat16),
                  jnp.tile(s0, 16).reshape(1, -1),
                  jnp.tile(b0, 16).reshape(1, -1))
        deconvs = []
        for (w, scale, shift) in self.raw_params[1:]:
            deconvs.append((_parity_subkernels(w).astype(jnp.bfloat16),
                            jnp.tile(scale, 4).reshape(1, -1),
                            jnp.tile(shift, 4).reshape(1, -1)))
        self.params = (layer1, tuple(deconvs))
        self._fwd = jax.jit(self._forward_impl)

    def _forward_impl(self, params, z):
        (w1m, s1, b1), deconvs = params
        N = z.shape[0]
        c1 = self.cfg[0][1]
        # Layer 1: matmul + BN + ReLU -> NHWC (N, 4, 4, c1), bf16.
        x = fused_matmul(z.reshape(N, self.nz).astype(jnp.bfloat16),
                         w1m, s1, b1, act="relu", out_dtype=jnp.bfloat16)
        x = x.reshape(N, 4, 4, c1)
        # Layers 2..4: stride-2 deconvs via parity decomposition.
        for i, (w4, s4, b4) in enumerate(deconvs):
            _, cout, _, _, _, act = self.cfg[i + 1]
            Nn, H, W, _ = x.shape
            last = i == len(deconvs) - 1
            xp = jnp.pad(x, ((0, 0), (1, 1), (1, 1), (0, 0)))
            y = deconv2x_fused(xp, w4, s4, b4, act=act,
                               out_dtype=jnp.float32 if last else jnp.bfloat16)
            # Lane-packed parities -> interleaved pixels (activation-sized glue).
            y = y.reshape(Nn, H, W, 2, 2, cout).transpose(0, 1, 3, 2, 4, 5)
            x = y.reshape(Nn, 2 * H, 2 * W, cout)
        return x.transpose(0, 3, 1, 2)   # NHWC -> NCHW, float32

    def forward(self, z):
        """z: (N, nz, 1, 1) -> (N, nc, 32, 32) float32 (NCHW)."""
        return self._fwd(self.params, z)

    __call__ = forward


# ----------------------------------------------------------------------------
# Pure-JAX reference (same bf16 quantization points, f32 math) for validation.
# ----------------------------------------------------------------------------
def _reference_forward(raw_params, cfg, z):
    x = z.astype(jnp.float32)
    for (w, scale, shift), (_, _, s, p, _, act) in zip(raw_params, cfg):
        xq = x.astype(jnp.bfloat16).astype(jnp.float32)
        wq = w.astype(jnp.bfloat16).astype(jnp.float32)
        K = w.shape[2]
        wt = jnp.flip(wq, (2, 3)).transpose(1, 0, 2, 3)      # (Cout, Cin, K, K)
        y = jax.lax.conv_general_dilated(
            xq, wt, window_strides=(1, 1),
            padding=[(K - 1 - p, K - 1 - p)] * 2,
            lhs_dilation=(s, s),
            dimension_numbers=("NCHW", "OIHW", "NCHW"),
            precision=jax.lax.Precision.HIGHEST)
        y = y * scale[None, :, None, None] + shift[None, :, None, None]
        if act == "relu":
            y = jnp.maximum(y, 0.0)
        elif act == "tanh":
            y = jnp.tanh(y)
        x = y
    return x


if __name__ == "__main__":
    nz, ngf, nc, N = 8, 8, 1, 2
    gen = BaseGenerator(nz=nz, ngf=ngf, nc=nc, ngpu=1, leakiness=0.2, bias=False,
                        key=jax.random.PRNGKey(42))
    z = jax.random.normal(jax.random.PRNGKey(0), (N, nz, 1, 1), jnp.float32)

    out = jax.block_until_ready(gen(z))
    assert out.shape == (N, nc, 32, 32), out.shape
    assert out.dtype == jnp.float32
    assert bool(jnp.all(jnp.isfinite(out)))
    assert bool(jnp.all(jnp.abs(out) <= 1.0 + 1e-6))          # tanh output range

    ref = jax.block_until_ready(_reference_forward(gen.raw_params, gen.cfg, z))
    err = float(jnp.max(jnp.abs(out - ref)))
    ref_scale = float(jnp.max(jnp.abs(ref)))
    assert err <= 0.1 * ref_scale + 1e-6, (err, ref_scale)

    print("KERNEL_OK")
</pallas_src>

<mosaic_0001>
module attributes {stable_mosaic.version = 11 : i64} {
  func.func @_fused_matmul_kernel(%arg0: i32, %arg1: memref<2x8xbf16, #tpu.memory_space<vmem>>, %arg2: memref<8x512xbf16, #tpu.memory_space<vmem>>, %arg3: memref<1x512xf32, #tpu.memory_space<vmem>>, %arg4: memref<1x512xf32, #tpu.memory_space<vmem>>, %arg5: memref<2x512xbf16, #tpu.memory_space<vmem>>) attributes {dimension_semantics = [#tpu.dimension_semantics<parallel>], iteration_bounds = array<i64: 1>, scalar_prefetch = 0 : i64, scratch_operands = 0 : i64, tpu.core_type = #tpu.core_type<tc>, window_params = [{transform_indices = @transform_0, window_bounds = array<i64: 2, 8>}, {pipeline_mode = #tpu.pipeline_mode<synchronous>, transform_indices = @transform_1, window_bounds = array<i64: 8, 512>}, {pipeline_mode = #tpu.pipeline_mode<synchronous>, transform_indices = @transform_2, window_bounds = array<i64: 1, 512>}, {pipeline_mode = #tpu.pipeline_mode<synchronous>, transform_indices = @transform_3, window_bounds = array<i64: 1, 512>}, {transform_indices = @transform_4, window_bounds = array<i64: 2, 512>}]} {
    %c0 = arith.constant 0 : index
    %c0_0 = arith.constant 0 : index
    %0 = vector.load %arg1[%c0, %c0_0] : memref<2x8xbf16, #tpu.memory_space<vmem>>, vector<2x8xbf16>
    %c0_1 = arith.constant 0 : index
    %c0_2 = arith.constant 0 : index
    %1 = vector.load %arg2[%c0_1, %c0_2] : memref<8x512xbf16, #tpu.memory_space<vmem>>, vector<8x512xbf16>
    %cst = arith.constant dense<0.000000e+00> : vector<2x512xf32>
    %2 = tpu.matmul %0, %1, %cst {dimension_numbers = #tpu.dot_dimension_numbers<[1], [0], [0], [1], [0, 0, 1, 1], [], []>} : vector<2x8xbf16>, vector<8x512xbf16>, vector<2x512xf32> -> vector<2x512xf32>
    %c0_3 = arith.constant 0 : index
    %c0_4 = arith.constant 0 : index
    %3 = vector.load %arg3[%c0_3, %c0_4] : memref<1x512xf32, #tpu.memory_space<vmem>>, vector<1x512xf32>
    %4 = vector.broadcast %3 : vector<1x512xf32> to vector<2x512xf32>
    %5 = arith.mulf %2, %4 : vector<2x512xf32>
    %c0_5 = arith.constant 0 : index
    %c0_6 = arith.constant 0 : index
    %6 = vector.load %arg4[%c0_5, %c0_6] : memref<1x512xf32, #tpu.memory_space<vmem>>, vector<1x512xf32>
    %7 = vector.broadcast %6 : vector<1x512xf32> to vector<2x512xf32>
    %8 = arith.addf %5, %7 : vector<2x512xf32>
    %cst_7 = arith.constant 0.000000e+00 : f32
    %9 = vector.broadcast %cst_7 : f32 to vector<2x512xf32>
    %10 = arith.maximumf %8, %9 : vector<2x512xf32>
    %11 = arith.truncf %10 : vector<2x512xf32> to vector<2x512xbf16>
    %c0_8 = arith.constant 0 : index
    %c0_9 = arith.constant 0 : index
    %12 = vector.load %arg5[%c0_8, %c0_9] : memref<2x512xbf16, #tpu.memory_space<vmem>>, vector<2x512xbf16>
    tpu.vector_store %arg5[%c0_8, %c0_9], %11 {strides = array<i32>} : memref<2x512xbf16, #tpu.memory_space<vmem>>, vector<2x512xbf16>,
    return
  }
  func.func @transform_0(%arg0: i32) -> (i32, i32) {
    %c0_i32 = arith.constant 0 : i32
    %c0_i32_0 = arith.constant 0 : i32
    return %arg0, %c0_i32 : i32, i32
  }
  func.func @transform_1(%arg0: i32) -> (i32, i32) {
    %c0_i32 = arith.constant 0 : i32
    %c0_i32_0 = arith.constant 0 : i32
    %c0_i32_1 = arith.constant 0 : i32
    return %c0_i32, %c0_i32_0 : i32, i32
  }
  func.func @transform_2(%arg0: i32) -> (i32, i32) {
    %c0_i32 = arith.constant 0 : i32
    %c0_i32_0 = arith.constant 0 : i32
    %c0_i32_1 = arith.constant 0 : i32
    return %c0_i32, %c0_i32_0 : i32, i32
  }
  func.func @transform_3(%arg0: i32) -> (i32, i32) {
    %c0_i32 = arith.constant 0 : i32
    %c0_i32_0 = arith.constant 0 : i32
    %c0_i32_1 = arith.constant 0 : i32
    return %c0_i32, %c0_i32_0 : i32, i32
  }
  func.func @transform_4(%arg0: i32) -> (i32, i32) {
    %c0_i32 = arith.constant 0 : i32
    %c0_i32_0 = arith.constant 0 : i32
    return %arg0, %c0_i32 : i32, i32
  }
}

module attributes {stable_mosaic.version = 11 : i64} {
  func.func @_deconv2x_kernel(%arg0: i32, %arg1: memref<1x6x6x32xbf16, #tpu.memory_space<vmem>>, %arg2: memref<4x128x16xbf16, #tpu.memory_space<vmem>>, %arg3: memref<1x64xf32, #tpu.memory_space<vmem>>, %arg4: memref<1x64xf32, #tpu.memory_space<vmem>>, %arg5: memref<1x4x4x64xbf16, #tpu.memory_space<vmem>>) attributes {dimension_semantics = [#tpu.dimension_semantics<parallel>], iteration_bounds = array<i64: 2>, scalar_prefetch = 0 : i64, scratch_operands = 0 : i64, tpu.core_type = #tpu.core_type<tc>, window_params = [{transform_indices = @transform_0, window_bounds = array<i64: 1, 6, 6, 32>}, {pipeline_mode = #tpu.pipeline_mode<synchronous>, transform_indices = @transform_1, window_bounds = array<i64: 4, 128, 16>}, {pipeline_mode = #tpu.pipeline_mode<synchronous>, transform_indices = @transform_2, window_bounds = array<i64: 1, 64>}, {pipeline_mode = #tpu.pipeline_mode<synchronous>, transform_indices = @transform_3, window_bounds = array<i64: 1, 64>}, {transform_indices = @transform_4, window_bounds = array<i64: 1, 4, 4, 64>}]} {
    %c0 = arith.constant 0 : index
    %c0_0 = arith.constant 0 : index
    %c0_1 = arith.constant 0 : index
    %c0_2 = arith.constant 0 : index
    %0 = vector.load %arg1[%c0, %c0_0, %c0_1, %c0_2] : memref<1x6x6x32xbf16, #tpu.memory_space<vmem>>, vector<1x4x4x32xbf16>
    %1 = vector.shape_cast %0 : vector<1x4x4x32xbf16> to vector<4x4x32xbf16>
    %c0_3 = arith.constant 0 : index
    %c0_4 = arith.constant 0 : index
    %c1 = arith.constant 1 : index
    %c0_5 = arith.constant 0 : index
    %2 = vector.load %arg1[%c0_3, %c0_4, %c1, %c0_5] : memref<1x6x6x32xbf16, #tpu.memory_space<vmem>>, vector<1x4x4x32xbf16>
    %3 = vector.shape_cast %2 : vector<1x4x4x32xbf16> to vector<4x4x32xbf16>
    %c0_6 = arith.constant 0 : index
    %c1_7 = arith.constant 1 : index
    %c0_8 = arith.constant 0 : index
    %c0_9 = arith.constant 0 : index
    %4 = vector.load %arg1[%c0_6, %c1_7, %c0_8, %c0_9] : memref<1x6x6x32xbf16, #tpu.memory_space<vmem>>, vector<1x4x4x32xbf16>
    %5 = vector.shape_cast %4 : vector<1x4x4x32xbf16> to vector<4x4x32xbf16>
    %c0_10 = arith.constant 0 : index
    %c1_11 = arith.constant 1 : index
    %c1_12 = arith.constant 1 : index
    %c0_13 = arith.constant 0 : index
    %6 = vector.load %arg1[%c0_10, %c1_11, %c1_12, %c0_13] : memref<1x6x6x32xbf16, #tpu.memory_space<vmem>>, vector<1x4x4x32xbf16>
    %7 = vector.shape_cast %6 : vector<1x4x4x32xbf16> to vector<4x4x32xbf16>
    %8 = tpu.concatenate %1, %3, %5, %7 in 2 : vector<4x4x32xbf16>, vector<4x4x32xbf16>, vector<4x4x32xbf16>, vector<4x4x32xbf16> -> vector<4x4x128xbf16>
    %9 = vector.shape_cast %8 : vector<4x4x128xbf16> to vector<16x128xbf16>
    %c0_14 = arith.constant 0 : index
    %c0_15 = arith.constant 0 : index
    %c0_16 = arith.constant 0 : index
    %10 = vector.load %arg2[%c0_14, %c0_15, %c0_16] : memref<4x128x16xbf16, #tpu.memory_space<vmem>>, vector<1x128x16xbf16>
    %11 = vector.shape_cast %10 : vector<1x128x16xbf16> to vector<128x16xbf16>
    %cst = arith.constant dense<0.000000e+00> : vector<16x16xf32>
    %12 = tpu.matmul %9, %11, %cst {dimension_numbers = #tpu.dot_dimension_numbers<[1], [0], [0], [1], [0, 0, 1, 1], [], []>} : vector<16x128xbf16>, vector<128x16xbf16>, vector<16x16xf32> -> vector<16x16xf32>
    %c0_17 = arith.constant 0 : index
    %c0_18 = arith.constant 0 : index
    %c1_19 = arith.constant 1 : index
    %c0_20 = arith.constant 0 : index
    %13 = vector.load %arg1[%c0_17, %c0_18, %c1_19, %c0_20] : memref<1x6x6x32xbf16, #tpu.memory_space<vmem>>, vector<1x4x4x32xbf16>
    %14 = vector.shape_cast %13 : vector<1x4x4x32xbf16> to vector<4x4x32xbf16>
    %c0_21 = arith.constant 0 : index
    %c0_22 = arith.constant 0 : index
    %c2 = arith.constant 2 : index
    %c0_23 = arith.constant 0 : index
    %15 = vector.load %arg1[%c0_21, %c0_22, %c2, %c0_23] : memref<1x6x6x32xbf16, #tpu.memory_space<vmem>>, vector<1x4x4x32xbf16>
    %16 = vector.shape_cast %15 : vector<1x4x4x32xbf16> to vector<4x4x32xbf16>
    %c0_24 = arith.constant 0 : index
    %c1_25 = arith.constant 1 : index
    %c1_26 = arith.constant 1 : index
    %c0_27 = arith.constant 0 : index
    %17 = vector.load %arg1[%c0_24, %c1_25, %c1_26, %c0_27] : memref<1x6x6x32xbf16, #tpu.memory_space<vmem>>, vector<1x4x4x32xbf16>
    %18 = vector.shape_cast %17 : vector<1x4x4x32xbf16> to vector<4x4x32xbf16>
    %c0_28 = arith.constant 0 : index
    %c1_29 = arith.constant 1 : index
    %c2_30 = arith.constant 2 : index
    %c0_31 = arith.constant 0 : index
    %19 = vector.load %arg1[%c0_28, %c1_29, %c2_30, %c0_31] : memref<1x6x6x32xbf16, #tpu.memory_space<vmem>>, vector<1x4x4x32xbf16>
    %20 = vector.shape_cast %19 : vector<1x4x4x32xbf16> to vector<4x4x32xbf16>
    %21 = tpu.concatenate %14, %16, %18, %20 in 2 : vector<4x4x32xbf16>, vector<4x4x32xbf16>, vector<4x4x32xbf16>, vector<4x4x32xbf16> -> vector<4x4x128xbf16>
    %22 = vector.shape_cast %21 : vector<4x4x128xbf16> to vector<16x128xbf16>
    %c1_32 = arith.constant 1 : index
    %c0_33 = arith.constant 0 : index
    %c0_34 = arith.constant 0 : index
    %23 = vector.load %arg2[%c1_32, %c0_33, %c0_34] : memref<4x128x16xbf16, #tpu.memory_space<vmem>>, vector<1x128x16xbf16>
    %24 = vector.shape_cast %23 : vector<1x128x16xbf16> to vector<128x16xbf16>
    %cst_35 = arith.constant dense<0.000000e+00> : vector<16x16xf32>
    %25 = tpu.matmul %22, %24, %cst_35 {dimension_numbers = #tpu.dot_dimension_numbers<[1], [0], [0], [1], [0, 0, 1, 1], [], []>} : vector<16x128xbf16>, vector<128x16xbf16>, vector<16x16xf32> -> vector<16x16xf32>
    %c0_36 = arith.constant 0 : index
    %c1_37 = arith.constant 1 : index
    %c0_38 = arith.constant 0 : index
    %c0_39 = arith.constant 0 : index
    %26 = vector.load %arg1[%c0_36, %c1_37, %c0_38, %c0_39] : memref<1x6x6x32xbf16, #tpu.memory_space<vmem>>, vector<1x4x4x32xbf16>
    %27 = vector.shape_cast %26 : vector<1x4x4x32xbf16> to vector<4x4x32xbf16>
    %c0_40 = arith.constant 0 : index
    %c1_41 = arith.constant 1 : index
    %c1_42 = arith.constant 1 : index
    %c0_43 = arith.constant 0 : index
    %28 = vector.load %arg1[%c0_40, %c1_41, %c1_42, %c0_43] : memref<1x6x6x32xbf16, #tpu.memory_space<vmem>>, vector<1x4x4x32xbf16>
    %29 = vector.shape_cast %28 : vector<1x4x4x32xbf16> to vector<4x4x32xbf16>
    %c0_44 = arith.constant 0 : index
    %c2_45 = arith.constant 2 : index
    %c0_46 = arith.constant 0 : index
    %c0_47 = arith.constant 0 : index
    %30 = vector.load %arg1[%c0_44, %c2_45, %c0_46, %c0_47] : memref<1x6x6x32xbf16, #tpu.memory_space<vmem>>, vector<1x4x4x32xbf16>
    %31 = vector.shape_cast %30 : vector<1x4x4x32xbf16> to vector<4x4x32xbf16>
    %c0_48 = arith.constant 0 : index
    %c2_49 = arith.constant 2 : index
    %c1_50 = arith.constant 1 : index
    %c0_51 = arith.constant 0 : index
    %32 = vector.load %arg1[%c0_48, %c2_49, %c1_50, %c0_51] : memref<1x6x6x32xbf16, #tpu.memory_space<vmem>>, vector<1x4x4x32xbf16>
    %33 = vector.shape_cast %32 : vector<1x4x4x32xbf16> to vector<4x4x32xbf16>
    %34 = tpu.concatenate %27, %29, %31, %33 in 2 : vector<4x4x32xbf16>, vector<4x4x32xbf16>, vector<4x4x32xbf16>, vector<4x4x32xbf16> -> vector<4x4x128xbf16>
    %35 = vector.shape_cast %34 : vector<4x4x128xbf16> to vector<16x128xbf16>
    %c2_52 = arith.constant 2 : index
    %c0_53 = arith.constant 0 : index
    %c0_54 = arith.constant 0 : index
    %36 = vector.load %arg2[%c2_52, %c0_53, %c0_54] : memref<4x128x16xbf16, #tpu.memory_space<vmem>>, vector<1x128x16xbf16>
    %37 = vector.shape_cast %36 : vector<1x128x16xbf16> to vector<128x16xbf16>
    %cst_55 = arith.constant dense<0.000000e+00> : vector<16x16xf32>
    %38 = tpu.matmul %35, %37, %cst_55 {dimension_numbers = #tpu.dot_dimension_numbers<[1], [0], [0], [1], [0, 0, 1, 1], [], []>} : vector<16x128xbf16>, vector<128x16xbf16>, vector<16x16xf32> -> vector<16x16xf32>
    %c0_56 = arith.constant 0 : index
    %c1_57 = arith.constant 1 : index
    %c1_58 = arith.constant 1 : index
    %c0_59 = arith.constant 0 : index
    %39 = vector.load %arg1[%c0_56, %c1_57, %c1_58, %c0_59] : memref<1x6x6x32xbf16, #tpu.memory_space<vmem>>, vector<1x4x4x32xbf16>
    %40 = vector.shape_cast %39 : vector<1x4x4x32xbf16> to vector<4x4x32xbf16>
    %c0_60 = arith.constant 0 : index
    %c1_61 = arith.constant 1 : index
    %c2_62 = arith.constant 2 : index
    %c0_63 = arith.constant 0 : index
    %41 = vector.load %arg1[%c0_60, %c1_61, %c2_62, %c0_63] : memref<1x6x6x32xbf16, #tpu.memory_space<vmem>>, vector<1x4x4x32xbf16>
    %42 = vector.shape_cast %41 : vector<1x4x4x32xbf16> to vector<4x4x32xbf16>
    %c0_64 = arith.constant 0 : index
    %c2_65 = arith.constant 2 : index
    %c1_66 = arith.constant 1 : index
    %c0_67 = arith.constant 0 : index
    %43 = vector.load %arg1[%c0_64, %c2_65, %c1_66, %c0_67] : memref<1x6x6x32xbf16, #tpu.memory_space<vmem>>, vector<1x4x4x32xbf16>
    %44 = vector.shape_cast %43 : vector<1x4x4x32xbf16> to vector<4x4x32xbf16>
    %c0_68 = arith.constant 0 : index
    %c2_69 = arith.constant 2 : index
    %c2_70 = arith.constant 2 : index
    %c0_71 = arith.constant 0 : index
    %45 = vector.load %arg1[%c0_68, %c2_69, %c2_70, %c0_71] : memref<1x6x6x32xbf16, #tpu.memory_space<vmem>>, vector<1x4x4x32xbf16>
    %46 = vector.shape_cast %45 : vector<1x4x4x32xbf16> to vector<4x4x32xbf16>
    %47 = tpu.concatenate %40, %42, %44, %46 in 2 : vector<4x4x32xbf16>, vector<4x4x32xbf16>, vector<4x4x32xbf16>, vector<4x4x32xbf16> -> vector<4x4x128xbf16>
    %48 = vector.shape_cast %47 : vector<4x4x128xbf16> to vector<16x128xbf16>
    %c3 = arith.constant 3 : index
    %c0_72 = arith.constant 0 : index
    %c0_73 = arith.constant 0 : index
    %49 = vector.load %arg2[%c3, %c0_72, %c0_73] : memref<4x128x16xbf16, #tpu.memory_space<vmem>>, vector<1x128x16xbf16>
    %50 = vector.shape_cast %49 : vector<1x128x16xbf16> to vector<128x16xbf16>
    %cst_74 = arith.constant dense<0.000000e+00> : vector<16x16xf32>
    %51 = tpu.matmul %48, %50, %cst_74 {dimension_numbers = #tpu.dot_dimension_numbers<[1], [0], [0], [1], [0, 0, 1, 1], [], []>} : vector<16x128xbf16>, vector<128x16xbf16>, vector<16x16xf32> -> vector<16x16xf32>
    %52 = tpu.concatenate %12, %25, %38, %51 in 1 : vector<16x16xf32>, vector<16x16xf32>, vector<16x16xf32>, vector<16x16xf32> -> vector<16x64xf32>
    %c0_75 = arith.constant 0 : index
    %c0_76 = arith.constant 0 : index
    %53 = vector.load %arg3[%c0_75, %c0_76] : memref<1x64xf32, #tpu.memory_space<vmem>>, vector<1x64xf32>
    %54 = vector.broadcast %53 : vector<1x64xf32> to vector<16x64xf32>
    %55 = arith.mulf %52, %54 : vector<16x64xf32>
    %c0_77 = arith.constant 0 : index
    %c0_78 = arith.constant 0 : index
    %56 = vector.load %arg4[%c0_77, %c0_78] : memref<1x64xf32, #tpu.memory_space<vmem>>, vector<1x64xf32>
    %57 = vector.broadcast %56 : vector<1x64xf32> to vector<16x64xf32>
    %58 = arith.addf %55, %57 : vector<16x64xf32>
    %cst_79 = arith.constant 0.000000e+00 : f32
    %59 = vector.broadcast %cst_79 : f32 to vector<16x64xf32>
    %60 = arith.maximumf %58, %59 : vector<16x64xf32>
    %61 = vector.shape_cast %60 : vector<16x64xf32> to vector<4x4x64xf32>
    %62 = arith.truncf %61 : vector<4x4x64xf32> to vector<4x4x64xbf16>
    %c0_80 = arith.constant 0 : index
    %c0_81 = arith.constant 0 : index
    %c0_82 = arith.constant 0 : index
    %c0_83 = arith.constant 0 : index
    %63 = vector.load %arg5[%c0_80, %c0_81, %c0_82, %c0_83] : memref<1x4x4x64xbf16, #tpu.memory_space<vmem>>, vector<1x4x4x64xbf16>
    %64 = vector.shape_cast %63 : vector<1x4x4x64xbf16> to vector<4x4x64xbf16>
    %65 = vector.shape_cast %62 : vector<4x4x64xbf16> to vector<1x4x4x64xbf16>
    tpu.vector_store %arg5[%c0_80, %c0_81, %c0_82, %c0_83], %65 {strides = array<i32>} : memref<1x4x4x64xbf16, #tpu.memory_space<vmem>>, vector<1x4x4x64xbf16>,
    return
  }
  func.func @transform_0(%arg0: i32) -> (i32, i32, i32, i32) {
    %c0_i32 = arith.constant 0 : i32
    %c0_i32_0 = arith.constant 0 : i32
    %c0_i32_1 = arith.constant 0 : i32
    %c0_i32_2 = arith.constant 0 : i32
    return %arg0, %c0_i32, %c0_i32_0, %c0_i32_1 : i32, i32, i32, i32
  }
  func.func @transform_1(%arg0: i32) -> (i32, i32, i32) {
    %c0_i32 = arith.constant 0 : i32
    %c0_i32_0 = arith.constant 0 : i32
    %c0_i32_1 = arith.constant 0 : i32
    %c0_i32_2 = arith.constant 0 : i32
    return %c0_i32, %c0_i32_0, %c0_i32_1 : i32, i32, i32
  }
  func.func @transform_2(%arg0: i32) -> (i32, i32) {
    %c0_i32 = arith.constant 0 : i32
    %c0_i32_0 = arith.constant 0 : i32
    %c0_i32_1 = arith.constant 0 : i32
    return %c0_i32, %c0_i32_0 : i32, i32
  }
  func.func @transform_3(%arg0: i32) -> (i32, i32) {
    %c0_i32 = arith.constant 0 : i32
    %c0_i32_0 = arith.constant 0 : i32
    %c0_i32_1 = arith.constant 0 : i32
    return %c0_i32, %c0_i32_0 : i32, i32
  }
  func.func @transform_4(%arg0: i32) -> (i32, i32, i32, i32) {
    %c0_i32 = arith.constant 0 : i32
    %c0_i32_0 = arith.constant 0 : i32
    %c0_i32_1 = arith.constant 0 : i32
    %c0_i32_2 = arith.constant 0 : i32
    return %arg0, %c0_i32, %c0_i32_0, %c0_i32_1 : i32, i32, i32, i32
  }
}

module attributes {stable_mosaic.version = 11 : i64} {
  func.func @_deconv2x_kernel(%arg0: i32, %arg1: memref<1x10x10x16xbf16, #tpu.memory_space<vmem>>, %arg2: memref<4x64x8xbf16, #tpu.memory_space<vmem>>, %arg3: memref<1x32xf32, #tpu.memory_space<vmem>>, %arg4: memref<1x32xf32, #tpu.memory_space<vmem>>, %arg5: memref<1x8x8x32xbf16, #tpu.memory_space<vmem>>) attributes {dimension_semantics = [#tpu.dimension_semantics<parallel>], iteration_bounds = array<i64: 2>, scalar_prefetch = 0 : i64, scratch_operands = 0 : i64, tpu.core_type = #tpu.core_type<tc>, window_params = [{transform_indices = @transform_0, window_bounds = array<i64: 1, 10, 10, 16>}, {pipeline_mode = #tpu.pipeline_mode<synchronous>, transform_indices = @transform_1, window_bounds = array<i64: 4, 64, 8>}, {pipeline_mode = #tpu.pipeline_mode<synchronous>, transform_indices = @transform_2, window_bounds = array<i64: 1, 32>}, {pipeline_mode = #tpu.pipeline_mode<synchronous>, transform_indices = @transform_3, window_bounds = array<i64: 1, 32>}, {transform_indices = @transform_4, window_bounds = array<i64: 1, 8, 8, 32>}]} {
    %c0 = arith.constant 0 : index
    %c0_0 = arith.constant 0 : index
    %c0_1 = arith.constant 0 : index
    %c0_2 = arith.constant 0 : index
    %0 = vector.load %arg1[%c0, %c0_0, %c0_1, %c0_2] : memref<1x10x10x16xbf16, #tpu.memory_space<vmem>>, vector<1x8x8x16xbf16>
    %1 = vector.shape_cast %0 : vector<1x8x8x16xbf16> to vector<8x8x16xbf16>
    %c0_3 = arith.constant 0 : index
    %c0_4 = arith.constant 0 : index
    %c1 = arith.constant 1 : index
    %c0_5 = arith.constant 0 : index
    %2 = vector.load %arg1[%c0_3, %c0_4, %c1, %c0_5] : memref<1x10x10x16xbf16, #tpu.memory_space<vmem>>, vector<1x8x8x16xbf16>
    %3 = vector.shape_cast %2 : vector<1x8x8x16xbf16> to vector<8x8x16xbf16>
    %c0_6 = arith.constant 0 : index
    %c1_7 = arith.constant 1 : index
    %c0_8 = arith.constant 0 : index
    %c0_9 = arith.constant 0 : index
    %4 = vector.load %arg1[%c0_6, %c1_7, %c0_8, %c0_9] : memref<1x10x10x16xbf16, #tpu.memory_space<vmem>>, vector<1x8x8x16xbf16>
    %5 = vector.shape_cast %4 : vector<1x8x8x16xbf16> to vector<8x8x16xbf16>
    %c0_10 = arith.constant 0 : index
    %c1_11 = arith.constant 1 : index
    %c1_12 = arith.constant 1 : index
    %c0_13 = arith.constant 0 : index
    %6 = vector.load %arg1[%c0_10, %c1_11, %c1_12, %c0_13] : memref<1x10x10x16xbf16, #tpu.memory_space<vmem>>, vector<1x8x8x16xbf16>
    %7 = vector.shape_cast %6 : vector<1x8x8x16xbf16> to vector<8x8x16xbf16>
    %8 = tpu.concatenate %1, %3, %5, %7 in 2 : vector<8x8x16xbf16>, vector<8x8x16xbf16>, vector<8x8x16xbf16>, vector<8x8x16xbf16> -> vector<8x8x64xbf16>
    %9 = vector.shape_cast %8 : vector<8x8x64xbf16> to vector<64x64xbf16>
    %c0_14 = arith.constant 0 : index
    %c0_15 = arith.constant 0 : index
    %c0_16 = arith.constant 0 : index
    %10 = vector.load %arg2[%c0_14, %c0_15, %c0_16] : memref<4x64x8xbf16, #tpu.memory_space<vmem>>, vector<1x64x8xbf16>
    %11 = vector.shape_cast %10 : vector<1x64x8xbf16> to vector<64x8xbf16>
    %cst = arith.constant dense<0.000000e+00> : vector<64x8xf32>
    %12 = tpu.matmul %9, %11, %cst {dimension_numbers = #tpu.dot_dimension_numbers<[1], [0], [0], [1], [0, 0, 1, 1], [], []>} : vector<64x64xbf16>, vector<64x8xbf16>, vector<64x8xf32> -> vector<64x8xf32>
    %c0_17 = arith.constant 0 : index
    %c0_18 = arith.constant 0 : index
    %c1_19 = arith.constant 1 : index
    %c0_20 = arith.constant 0 : index
    %13 = vector.load %arg1[%c0_17, %c0_18, %c1_19, %c0_20] : memref<1x10x10x16xbf16, #tpu.memory_space<vmem>>, vector<1x8x8x16xbf16>
    %14 = vector.shape_cast %13 : vector<1x8x8x16xbf16> to vector<8x8x16xbf16>
    %c0_21 = arith.constant 0 : index
    %c0_22 = arith.constant 0 : index
    %c2 = arith.constant 2 : index
    %c0_23 = arith.constant 0 : index
    %15 = vector.load %arg1[%c0_21, %c0_22, %c2, %c0_23] : memref<1x10x10x16xbf16, #tpu.memory_space<vmem>>, vector<1x8x8x16xbf16>
    %16 = vector.shape_cast %15 : vector<1x8x8x16xbf16> to vector<8x8x16xbf16>
    %c0_24 = arith.constant 0 : index
    %c1_25 = arith.constant 1 : index
    %c1_26 = arith.constant 1 : index
    %c0_27 = arith.constant 0 : index
    %17 = vector.load %arg1[%c0_24, %c1_25, %c1_26, %c0_27] : memref<1x10x10x16xbf16, #tpu.memory_space<vmem>>, vector<1x8x8x16xbf16>
    %18 = vector.shape_cast %17 : vector<1x8x8x16xbf16> to vector<8x8x16xbf16>
    %c0_28 = arith.constant 0 : index
    %c1_29 = arith.constant 1 : index
    %c2_30 = arith.constant 2 : index
    %c0_31 = arith.constant 0 : index
    %19 = vector.load %arg1[%c0_28, %c1_29, %c2_30, %c0_31] : memref<1x10x10x16xbf16, #tpu.memory_space<vmem>>, vector<1x8x8x16xbf16>
    %20 = vector.shape_cast %19 : vector<1x8x8x16xbf16> to vector<8x8x16xbf16>
    %21 = tpu.concatenate %14, %16, %18, %20 in 2 : vector<8x8x16xbf16>, vector<8x8x16xbf16>, vector<8x8x16xbf16>, vector<8x8x16xbf16> -> vector<8x8x64xbf16>
    %22 = vector.shape_cast %21 : vector<8x8x64xbf16> to vector<64x64xbf16>
    %c1_32 = arith.constant 1 : index
    %c0_33 = arith.constant 0 : index
    %c0_34 = arith.constant 0 : index
    %23 = vector.load %arg2[%c1_32, %c0_33, %c0_34] : memref<4x64x8xbf16, #tpu.memory_space<vmem>>, vector<1x64x8xbf16>
    %24 = vector.shape_cast %23 : vector<1x64x8xbf16> to vector<64x8xbf16>
    %cst_35 = arith.constant dense<0.000000e+00> : vector<64x8xf32>
    %25 = tpu.matmul %22, %24, %cst_35 {dimension_numbers = #tpu.dot_dimension_numbers<[1], [0], [0], [1], [0, 0, 1, 1], [], []>} : vector<64x64xbf16>, vector<64x8xbf16>, vector<64x8xf32> -> vector<64x8xf32>
    %c0_36 = arith.constant 0 : index
    %c1_37 = arith.constant 1 : index
    %c0_38 = arith.constant 0 : index
    %c0_39 = arith.constant 0 : index
    %26 = vector.load %arg1[%c0_36, %c1_37, %c0_38, %c0_39] : memref<1x10x10x16xbf16, #tpu.memory_space<vmem>>, vector<1x8x8x16xbf16>
    %27 = vector.shape_cast %26 : vector<1x8x8x16xbf16> to vector<8x8x16xbf16>
    %c0_40 = arith.constant 0 : index
    %c1_41 = arith.constant 1 : index
    %c1_42 = arith.constant 1 : index
    %c0_43 = arith.constant 0 : index
    %28 = vector.load %arg1[%c0_40, %c1_41, %c1_42, %c0_43] : memref<1x10x10x16xbf16, #tpu.memory_space<vmem>>, vector<1x8x8x16xbf16>
    %29 = vector.shape_cast %28 : vector<1x8x8x16xbf16> to vector<8x8x16xbf16>
    %c0_44 = arith.constant 0 : index
    %c2_45 = arith.constant 2 : index
    %c0_46 = arith.constant 0 : index
    %c0_47 = arith.constant 0 : index
    %30 = vector.load %arg1[%c0_44, %c2_45, %c0_46, %c0_47] : memref<1x10x10x16xbf16, #tpu.memory_space<vmem>>, vector<1x8x8x16xbf16>
    %31 = vector.shape_cast %30 : vector<1x8x8x16xbf16> to vector<8x8x16xbf16>
    %c0_48 = arith.constant 0 : index
    %c2_49 = arith.constant 2 : index
    %c1_50 = arith.constant 1 : index
    %c0_51 = arith.constant 0 : index
    %32 = vector.load %arg1[%c0_48, %c2_49, %c1_50, %c0_51] : memref<1x10x10x16xbf16, #tpu.memory_space<vmem>>, vector<1x8x8x16xbf16>
    %33 = vector.shape_cast %32 : vector<1x8x8x16xbf16> to vector<8x8x16xbf16>
    %34 = tpu.concatenate %27, %29, %31, %33 in 2 : vector<8x8x16xbf16>, vector<8x8x16xbf16>, vector<8x8x16xbf16>, vector<8x8x16xbf16> -> vector<8x8x64xbf16>
    %35 = vector.shape_cast %34 : vector<8x8x64xbf16> to vector<64x64xbf16>
    %c2_52 = arith.constant 2 : index
    %c0_53 = arith.constant 0 : index
    %c0_54 = arith.constant 0 : index
    %36 = vector.load %arg2[%c2_52, %c0_53, %c0_54] : memref<4x64x8xbf16, #tpu.memory_space<vmem>>, vector<1x64x8xbf16>
    %37 = vector.shape_cast %36 : vector<1x64x8xbf16> to vector<64x8xbf16>
    %cst_55 = arith.constant dense<0.000000e+00> : vector<64x8xf32>
    %38 = tpu.matmul %35, %37, %cst_55 {dimension_numbers = #tpu.dot_dimension_numbers<[1], [0], [0], [1], [0, 0, 1, 1], [], []>} : vector<64x64xbf16>, vector<64x8xbf16>, vector<64x8xf32> -> vector<64x8xf32>
    %c0_56 = arith.constant 0 : index
    %c1_57 = arith.constant 1 : index
    %c1_58 = arith.constant 1 : index
    %c0_59 = arith.constant 0 : index
    %39 = vector.load %arg1[%c0_56, %c1_57, %c1_58, %c0_59] : memref<1x10x10x16xbf16, #tpu.memory_space<vmem>>, vector<1x8x8x16xbf16>
    %40 = vector.shape_cast %39 : vector<1x8x8x16xbf16> to vector<8x8x16xbf16>
    %c0_60 = arith.constant 0 : index
    %c1_61 = arith.constant 1 : index
    %c2_62 = arith.constant 2 : index
    %c0_63 = arith.constant 0 : index
    %41 = vector.load %arg1[%c0_60, %c1_61, %c2_62, %c0_63] : memref<1x10x10x16xbf16, #tpu.memory_space<vmem>>, vector<1x8x8x16xbf16>
    %42 = vector.shape_cast %41 : vector<1x8x8x16xbf16> to vector<8x8x16xbf16>
    %c0_64 = arith.constant 0 : index
    %c2_65 = arith.constant 2 : index
    %c1_66 = arith.constant 1 : index
    %c0_67 = arith.constant 0 : index
    %43 = vector.load %arg1[%c0_64, %c2_65, %c1_66, %c0_67] : memref<1x10x10x16xbf16, #tpu.memory_space<vmem>>, vector<1x8x8x16xbf16>
    %44 = vector.shape_cast %43 : vector<1x8x8x16xbf16> to vector<8x8x16xbf16>
    %c0_68 = arith.constant 0 : index
    %c2_69 = arith.constant 2 : index
    %c2_70 = arith.constant 2 : index
    %c0_71 = arith.constant 0 : index
    %45 = vector.load %arg1[%c0_68, %c2_69, %c2_70, %c0_71] : memref<1x10x10x16xbf16, #tpu.memory_space<vmem>>, vector<1x8x8x16xbf16>
    %46 = vector.shape_cast %45 : vector<1x8x8x16xbf16> to vector<8x8x16xbf16>
    %47 = tpu.concatenate %40, %42, %44, %46 in 2 : vector<8x8x16xbf16>, vector<8x8x16xbf16>, vector<8x8x16xbf16>, vector<8x8x16xbf16> -> vector<8x8x64xbf16>
    %48 = vector.shape_cast %47 : vector<8x8x64xbf16> to vector<64x64xbf16>
    %c3 = arith.constant 3 : index
    %c0_72 = arith.constant 0 : index
    %c0_73 = arith.constant 0 : index
    %49 = vector.load %arg2[%c3, %c0_72, %c0_73] : memref<4x64x8xbf16, #tpu.memory_space<vmem>>, vector<1x64x8xbf16>
    %50 = vector.shape_cast %49 : vector<1x64x8xbf16> to vector<64x8xbf16>
    %cst_74 = arith.constant dense<0.000000e+00> : vector<64x8xf32>
    %51 = tpu.matmul %48, %50, %cst_74 {dimension_numbers = #tpu.dot_dimension_numbers<[1], [0], [0], [1], [0, 0, 1, 1], [], []>} : vector<64x64xbf16>, vector<64x8xbf16>, vector<64x8xf32> -> vector<64x8xf32>
    %52 = tpu.concatenate %12, %25, %38, %51 in 1 : vector<64x8xf32>, vector<64x8xf32>, vector<64x8xf32>, vector<64x8xf32> -> vector<64x32xf32>
    %c0_75 = arith.constant 0 : index
    %c0_76 = arith.constant 0 : index
    %53 = vector.load %arg3[%c0_75, %c0_76] : memref<1x32xf32, #tpu.memory_space<vmem>>, vector<1x32xf32>
    %54 = vector.broadcast %53 : vector<1x32xf32> to vector<64x32xf32>
    %55 = arith.mulf %52, %54 : vector<64x32xf32>
    %c0_77 = arith.constant 0 : index
    %c0_78 = arith.constant 0 : index
    %56 = vector.load %arg4[%c0_77, %c0_78] : memref<1x32xf32, #tpu.memory_space<vmem>>, vector<1x32xf32>
    %57 = vector.broadcast %56 : vector<1x32xf32> to vector<64x32xf32>
    %58 = arith.addf %55, %57 : vector<64x32xf32>
    %cst_79 = arith.constant 0.000000e+00 : f32
    %59 = vector.broadcast %cst_79 : f32 to vector<64x32xf32>
    %60 = arith.maximumf %58, %59 : vector<64x32xf32>
    %61 = vector.shape_cast %60 : vector<64x32xf32> to vector<8x8x32xf32>
    %62 = arith.truncf %61 : vector<8x8x32xf32> to vector<8x8x32xbf16>
    %c0_80 = arith.constant 0 : index
    %c0_81 = arith.constant 0 : index
    %c0_82 = arith.constant 0 : index
    %c0_83 = arith.constant 0 : index
    %63 = vector.load %arg5[%c0_80, %c0_81, %c0_82, %c0_83] : memref<1x8x8x32xbf16, #tpu.memory_space<vmem>>, vector<1x8x8x32xbf16>
    %64 = vector.shape_cast %63 : vector<1x8x8x32xbf16> to vector<8x8x32xbf16>
    %65 = vector.shape_cast %62 : vector<8x8x32xbf16> to vector<1x8x8x32xbf16>
    tpu.vector_store %arg5[%c0_80, %c0_81, %c0_82, %c0_83], %65 {strides = array<i32>} : memref<1x8x8x32xbf16, #tpu.memory_space<vmem>>, vector<1x8x8x32xbf16>,
    return
  }
  func.func @transform_0(%arg0: i32) -> (i32, i32, i32, i32) {
    %c0_i32 = arith.constant 0 : i32
    %c0_i32_0 = arith.constant 0 : i32
    %c0_i32_1 = arith.constant 0 : i32
    %c0_i32_2 = arith.constant 0 : i32
    return %arg0, %c0_i32, %c0_i32_0, %c0_i32_1 : i32, i32, i32, i32
  }
  func.func @transform_1(%arg0: i32) -> (i32, i32, i32) {
    %c0_i32 = arith.constant 0 : i32
    %c0_i32_0 = arith.constant 0 : i32
    %c0_i32_1 = arith.constant 0 : i32
    %c0_i32_2 = arith.constant 0 : i32
    return %c0_i32, %c0_i32_0, %c0_i32_1 : i32, i32, i32
  }
  func.func @transform_2(%arg0: i32) -> (i32, i32) {
    %c0_i32 = arith.constant 0 : i32
    %c0_i32_0 = arith.constant 0 : i32
    %c0_i32_1 = arith.constant 0 : i32
    return %c0_i32, %c0_i32_0 : i32, i32
  }
  func.func @transform_3(%arg0: i32) -> (i32, i32) {
    %c0_i32 = arith.constant 0 : i32
    %c0_i32_0 = arith.constant 0 : i32
    %c0_i32_1 = arith.constant 0 : i32
    return %c0_i32, %c0_i32_0 : i32, i32
  }
  func.func @transform_4(%arg0: i32) -> (i32, i32, i32, i32) {
    %c0_i32 = arith.constant 0 : i32
    %c0_i32_0 = arith.constant 0 : i32
    %c0_i32_1 = arith.constant 0 : i32
    %c0_i32_2 = arith.constant 0 : i32
    return %arg0, %c0_i32, %c0_i32_0, %c0_i32_1 : i32, i32, i32, i32
  }
}

module attributes {stable_mosaic.version = 11 : i64} {
  func.func @_deconv2x_kernel(%arg0: i32, %arg1: memref<1x18x18x8xbf16, #tpu.memory_space<vmem>>, %arg2: memref<4x32x1xbf16, #tpu.memory_space<vmem>>, %arg3: memref<1x4xf32, #tpu.memory_space<vmem>>, %arg4: memref<1x4xf32, #tpu.memory_space<vmem>>, %arg5: memref<1x16x16x4xf32, #tpu.memory_space<vmem>>) attributes {dimension_semantics = [#tpu.dimension_semantics<parallel>], iteration_bounds = array<i64: 2>, scalar_prefetch = 0 : i64, scratch_operands = 0 : i64, tpu.core_type = #tpu.core_type<tc>, window_params = [{transform_indices = @transform_0, window_bounds = array<i64: 1, 18, 18, 8>}, {pipeline_mode = #tpu.pipeline_mode<synchronous>, transform_indices = @transform_1, window_bounds = array<i64: 4, 32, 1>}, {pipeline_mode = #tpu.pipeline_mode<synchronous>, transform_indices = @transform_2, window_bounds = array<i64: 1, 4>}, {pipeline_mode = #tpu.pipeline_mode<synchronous>, transform_indices = @transform_3, window_bounds = array<i64: 1, 4>}, {transform_indices = @transform_4, window_bounds = array<i64: 1, 16, 16, 4>}]} {
    %c0 = arith.constant 0 : index
    %c0_0 = arith.constant 0 : index
    %c0_1 = arith.constant 0 : index
    %c0_2 = arith.constant 0 : index
    %0 = vector.load %arg1[%c0, %c0_0, %c0_1, %c0_2] : memref<1x18x18x8xbf16, #tpu.memory_space<vmem>>, vector<1x16x16x8xbf16>
    %1 = vector.shape_cast %0 : vector<1x16x16x8xbf16> to vector<16x16x8xbf16>
    %c0_3 = arith.constant 0 : index
    %c0_4 = arith.constant 0 : index
    %c1 = arith.constant 1 : index
    %c0_5 = arith.constant 0 : index
    %2 = vector.load %arg1[%c0_3, %c0_4, %c1, %c0_5] : memref<1x18x18x8xbf16, #tpu.memory_space<vmem>>, vector<1x16x16x8xbf16>
    %3 = vector.shape_cast %2 : vector<1x16x16x8xbf16> to vector<16x16x8xbf16>
    %c0_6 = arith.constant 0 : index
    %c1_7 = arith.constant 1 : index
    %c0_8 = arith.constant 0 : index
    %c0_9 = arith.constant 0 : index
    %4 = vector.load %arg1[%c0_6, %c1_7, %c0_8, %c0_9] : memref<1x18x18x8xbf16, #tpu.memory_space<vmem>>, vector<1x16x16x8xbf16>
    %5 = vector.shape_cast %4 : vector<1x16x16x8xbf16> to vector<16x16x8xbf16>
    %c0_10 = arith.constant 0 : index
    %c1_11 = arith.constant 1 : index
    %c1_12 = arith.constant 1 : index
    %c0_13 = arith.constant 0 : index
    %6 = vector.load %arg1[%c0_10, %c1_11, %c1_12, %c0_13] : memref<1x18x18x8xbf16, #tpu.memory_space<vmem>>, vector<1x16x16x8xbf16>
    %7 = vector.shape_cast %6 : vector<1x16x16x8xbf16> to vector<16x16x8xbf16>
    %8 = tpu.concatenate %1, %3, %5, %7 in 2 : vector<16x16x8xbf16>, vector<16x16x8xbf16>, vector<16x16x8xbf16>, vector<16x16x8xbf16> -> vector<16x16x32xbf16>
    %9 = vector.shape_cast %8 : vector<16x16x32xbf16> to vector<256x32xbf16>
    %c0_14 = arith.constant 0 : index
    %c0_15 = arith.constant 0 : index
    %c0_16 = arith.constant 0 : index
    %10 = vector.load %arg2[%c0_14, %c0_15, %c0_16] : memref<4x32x1xbf16, #tpu.memory_space<vmem>>, vector<1x32x1xbf16>
    %11 = vector.shape_cast %10 : vector<1x32x1xbf16> to vector<32x1xbf16>
    %cst = arith.constant dense<0.000000e+00> : vector<256x1xf32>
    %12 = tpu.matmul %9, %11, %cst {dimension_numbers = #tpu.dot_dimension_numbers<[1], [0], [0], [1], [0, 0, 1, 1], [], []>} : vector<256x32xbf16>, vector<32x1xbf16>, vector<256x1xf32> -> vector<256x1xf32>
    %c0_17 = arith.constant 0 : index
    %c0_18 = arith.constant 0 : index
    %c1_19 = arith.constant 1 : index
    %c0_20 = arith.constant 0 : index
    %13 = vector.load %arg1[%c0_17, %c0_18, %c1_19, %c0_20] : memref<1x18x18x8xbf16, #tpu.memory_space<vmem>>, vector<1x16x16x8xbf16>
    %14 = vector.shape_cast %13 : vector<1x16x16x8xbf16> to vector<16x16x8xbf16>
    %c0_21 = arith.constant 0 : index
    %c0_22 = arith.constant 0 : index
    %c2 = arith.constant 2 : index
    %c0_23 = arith.constant 0 : index
    %15 = vector.load %arg1[%c0_21, %c0_22, %c2, %c0_23] : memref<1x18x18x8xbf16, #tpu.memory_space<vmem>>, vector<1x16x16x8xbf16>
    %16 = vector.shape_cast %15 : vector<1x16x16x8xbf16> to vector<16x16x8xbf16>
    %c0_24 = arith.constant 0 : index
    %c1_25 = arith.constant 1 : index
    %c1_26 = arith.constant 1 : index
    %c0_27 = arith.constant 0 : index
    %17 = vector.load %arg1[%c0_24, %c1_25, %c1_26, %c0_27] : memref<1x18x18x8xbf16, #tpu.memory_space<vmem>>, vector<1x16x16x8xbf16>
    %18 = vector.shape_cast %17 : vector<1x16x16x8xbf16> to vector<16x16x8xbf16>
    %c0_28 = arith.constant 0 : index
    %c1_29 = arith.constant 1 : index
    %c2_30 = arith.constant 2 : index
    %c0_31 = arith.constant 0 : index
    %19 = vector.load %arg1[%c0_28, %c1_29, %c2_30, %c0_31] : memref<1x18x18x8xbf16, #tpu.memory_space<vmem>>, vector<1x16x16x8xbf16>
    %20 = vector.shape_cast %19 : vector<1x16x16x8xbf16> to vector<16x16x8xbf16>
    %21 = tpu.concatenate %14, %16, %18, %20 in 2 : vector<16x16x8xbf16>, vector<16x16x8xbf16>, vector<16x16x8xbf16>, vector<16x16x8xbf16> -> vector<16x16x32xbf16>
    %22 = vector.shape_cast %21 : vector<16x16x32xbf16> to vector<256x32xbf16>
    %c1_32 = arith.constant 1 : index
    %c0_33 = arith.constant 0 : index
    %c0_34 = arith.constant 0 : index
    %23 = vector.load %arg2[%c1_32, %c0_33, %c0_34] : memref<4x32x1xbf16, #tpu.memory_space<vmem>>, vector<1x32x1xbf16>
    %24 = vector.shape_cast %23 : vector<1x32x1xbf16> to vector<32x1xbf16>
    %cst_35 = arith.constant dense<0.000000e+00> : vector<256x1xf32>
    %25 = tpu.matmul %22, %24, %cst_35 {dimension_numbers = #tpu.dot_dimension_numbers<[1], [0], [0], [1], [0, 0, 1, 1], [], []>} : vector<256x32xbf16>, vector<32x1xbf16>, vector<256x1xf32> -> vector<256x1xf32>
    %c0_36 = arith.constant 0 : index
    %c1_37 = arith.constant 1 : index
    %c0_38 = arith.constant 0 : index
    %c0_39 = arith.constant 0 : index
    %26 = vector.load %arg1[%c0_36, %c1_37, %c0_38, %c0_39] : memref<1x18x18x8xbf16, #tpu.memory_space<vmem>>, vector<1x16x16x8xbf16>
    %27 = vector.shape_cast %26 : vector<1x16x16x8xbf16> to vector<16x16x8xbf16>
    %c0_40 = arith.constant 0 : index
    %c1_41 = arith.constant 1 : index
    %c1_42 = arith.constant 1 : index
    %c0_43 = arith.constant 0 : index
    %28 = vector.load %arg1[%c0_40, %c1_41, %c1_42, %c0_43] : memref<1x18x18x8xbf16, #tpu.memory_space<vmem>>, vector<1x16x16x8xbf16>
    %29 = vector.shape_cast %28 : vector<1x16x16x8xbf16> to vector<16x16x8xbf16>
    %c0_44 = arith.constant 0 : index
    %c2_45 = arith.constant 2 : index
    %c0_46 = arith.constant 0 : index
    %c0_47 = arith.constant 0 : index
    %30 = vector.load %arg1[%c0_44, %c2_45, %c0_46, %c0_47] : memref<1x18x18x8xbf16, #tpu.memory_space<vmem>>, vector<1x16x16x8xbf16>
    %31 = vector.shape_cast %30 : vector<1x16x16x8xbf16> to vector<16x16x8xbf16>
    %c0_48 = arith.constant 0 : index
    %c2_49 = arith.constant 2 : index
    %c1_50 = arith.constant 1 : index
    %c0_51 = arith.constant 0 : index
    %32 = vector.load %arg1[%c0_48, %c2_49, %c1_50, %c0_51] : memref<1x18x18x8xbf16, #tpu.memory_space<vmem>>, vector<1x16x16x8xbf16>
    %33 = vector.shape_cast %32 : vector<1x16x16x8xbf16> to vector<16x16x8xbf16>
    %34 = tpu.concatenate %27, %29, %31, %33 in 2 : vector<16x16x8xbf16>, vector<16x16x8xbf16>, vector<16x16x8xbf16>, vector<16x16x8xbf16> -> vector<16x16x32xbf16>
    %35 = vector.shape_cast %34 : vector<16x16x32xbf16> to vector<256x32xbf16>
    %c2_52 = arith.constant 2 : index
    %c0_53 = arith.constant 0 : index
    %c0_54 = arith.constant 0 : index
    %36 = vector.load %arg2[%c2_52, %c0_53, %c0_54] : memref<4x32x1xbf16, #tpu.memory_space<vmem>>, vector<1x32x1xbf16>
    %37 = vector.shape_cast %36 : vector<1x32x1xbf16> to vector<32x1xbf16>
    %cst_55 = arith.constant dense<0.000000e+00> : vector<256x1xf32>
    %38 = tpu.matmul %35, %37, %cst_55 {dimension_numbers = #tpu.dot_dimension_numbers<[1], [0], [0], [1], [0, 0, 1, 1], [], []>} : vector<256x32xbf16>, vector<32x1xbf16>, vector<256x1xf32> -> vector<256x1xf32>
    %c0_56 = arith.constant 0 : index
    %c1_57 = arith.constant 1 : index
    %c1_58 = arith.constant 1 : index
    %c0_59 = arith.constant 0 : index
    %39 = vector.load %arg1[%c0_56, %c1_57, %c1_58, %c0_59] : memref<1x18x18x8xbf16, #tpu.memory_space<vmem>>, vector<1x16x16x8xbf16>
    %40 = vector.shape_cast %39 : vector<1x16x16x8xbf16> to vector<16x16x8xbf16>
    %c0_60 = arith.constant 0 : index
    %c1_61 = arith.constant 1 : index
    %c2_62 = arith.constant 2 : index
    %c0_63 = arith.constant 0 : index
    %41 = vector.load %arg1[%c0_60, %c1_61, %c2_62, %c0_63] : memref<1x18x18x8xbf16, #tpu.memory_space<vmem>>, vector<1x16x16x8xbf16>
    %42 = vector.shape_cast %41 : vector<1x16x16x8xbf16> to vector<16x16x8xbf16>
    %c0_64 = arith.constant 0 : index
    %c2_65 = arith.constant 2 : index
    %c1_66 = arith.constant 1 : index
    %c0_67 = arith.constant 0 : index
    %43 = vector.load %arg1[%c0_64, %c2_65, %c1_66, %c0_67] : memref<1x18x18x8xbf16, #tpu.memory_space<vmem>>, vector<1x16x16x8xbf16>
    %44 = vector.shape_cast %43 : vector<1x16x16x8xbf16> to vector<16x16x8xbf16>
    %c0_68 = arith.constant 0 : index
    %c2_69 = arith.constant 2 : index
    %c2_70 = arith.constant 2 : index
    %c0_71 = arith.constant 0 : index
    %45 = vector.load %arg1[%c0_68, %c2_69, %c2_70, %c0_71] : memref<1x18x18x8xbf16, #tpu.memory_space<vmem>>, vector<1x16x16x8xbf16>
    %46 = vector.shape_cast %45 : vector<1x16x16x8xbf16> to vector<16x16x8xbf16>
    %47 = tpu.concatenate %40, %42, %44, %46 in 2 : vector<16x16x8xbf16>, vector<16x16x8xbf16>, vector<16x16x8xbf16>, vector<16x16x8xbf16> -> vector<16x16x32xbf16>
    %48 = vector.shape_cast %47 : vector<16x16x32xbf16> to vector<256x32xbf16>
    %c3 = arith.constant 3 : index
    %c0_72 = arith.constant 0 : index
    %c0_73 = arith.constant 0 : index
    %49 = vector.load %arg2[%c3, %c0_72, %c0_73] : memref<4x32x1xbf16, #tpu.memory_space<vmem>>, vector<1x32x1xbf16>
    %50 = vector.shape_cast %49 : vector<1x32x1xbf16> to vector<32x1xbf16>
    %cst_74 = arith.constant dense<0.000000e+00> : vector<256x1xf32>
    %51 = tpu.matmul %48, %50, %cst_74 {dimension_numbers = #tpu.dot_dimension_numbers<[1], [0], [0], [1], [0, 0, 1, 1], [], []>} : vector<256x32xbf16>, vector<32x1xbf16>, vector<256x1xf32> -> vector<256x1xf32>
    %52 = tpu.concatenate %12, %25, %38, %51 in 1 : vector<256x1xf32>, vector<256x1xf32>, vector<256x1xf32>, vector<256x1xf32> -> vector<256x4xf32>
    %c0_75 = arith.constant 0 : index
    %c0_76 = arith.constant 0 : index
    %53 = vector.load %arg3[%c0_75, %c0_76] : memref<1x4xf32, #tpu.memory_space<vmem>>, vector<1x4xf32>
    %54 = vector.broadcast %53 : vector<1x4xf32> to vector<256x4xf32>
    %55 = arith.mulf %52, %54 : vector<256x4xf32>
    %c0_77 = arith.constant 0 : index
    %c0_78 = arith.constant 0 : index
    %56 = vector.load %arg4[%c0_77, %c0_78] : memref<1x4xf32, #tpu.memory_space<vmem>>, vector<1x4xf32>
    %57 = vector.broadcast %56 : vector<1x4xf32> to vector<256x4xf32>
    %58 = arith.addf %55, %57 : vector<256x4xf32>
    %59 = math.tanh %58 : vector<256x4xf32>
    %60 = vector.shape_cast %59 : vector<256x4xf32> to vector<16x16x4xf32>
    %c0_79 = arith.constant 0 : index
    %c0_80 = arith.constant 0 : index
    %c0_81 = arith.constant 0 : index
    %c0_82 = arith.constant 0 : index
    %61 = vector.load %arg5[%c0_79, %c0_80, %c0_81, %c0_82] : memref<1x16x16x4xf32, #tpu.memory_space<vmem>>, vector<1x16x16x4xf32>
    %62 = vector.shape_cast %61 : vector<1x16x16x4xf32> to vector<16x16x4xf32>
    %63 = vector.shape_cast %60 : vector<16x16x4xf32> to vector<1x16x16x4xf32>
    tpu.vector_store %arg5[%c0_79, %c0_80, %c0_81, %c0_82], %63 {strides = array<i32>} : memref<1x16x16x4xf32, #tpu.memory_space<vmem>>, vector<1x16x16x4xf32>,
    return
  }
  func.func @transform_0(%arg0: i32) -> (i32, i32, i32, i32) {
    %c0_i32 = arith.constant 0 : i32
    %c0_i32_0 = arith.constant 0 : i32
    %c0_i32_1 = arith.constant 0 : i32
    %c0_i32_2 = arith.constant 0 : i32
    return %arg0, %c0_i32, %c0_i32_0, %c0_i32_1 : i32, i32, i32, i32
  }
  func.func @transform_1(%arg0: i32) -> (i32, i32, i32) {
    %c0_i32 = arith.constant 0 : i32
    %c0_i32_0 = arith.constant 0 : i32
    %c0_i32_1 = arith.constant 0 : i32
    %c0_i32_2 = arith.constant 0 : i32
    return %c0_i32, %c0_i32_0, %c0_i32_1 : i32, i32, i32
  }
  func.func @transform_2(%arg0: i32) -> (i32, i32) {
    %c0_i32 = arith.constant 0 : i32
    %c0_i32_0 = arith.constant 0 : i32
    %c0_i32_1 = arith.constant 0 : i32
    return %c0_i32, %c0_i32_0 : i32, i32
  }
  func.func @transform_3(%arg0: i32) -> (i32, i32) {
    %c0_i32 = arith.constant 0 : i32
    %c0_i32_0 = arith.constant 0 : i32
    %c0_i32_1 = arith.constant 0 : i32
    return %c0_i32, %c0_i32_0 : i32, i32
  }
  func.func @transform_4(%arg0: i32) -> (i32, i32, i32, i32) {
    %c0_i32 = arith.constant 0 : i32
    %c0_i32_0 = arith.constant 0 : i32
    %c0_i32_1 = arith.constant 0 : i32
    %c0_i32_2 = arith.constant 0 : i32
    return %arg0, %c0_i32, %c0_i32_0, %c0_i32_1 : i32, i32, i32, i32
  }
}

</mosaic_0001>

<bundles_post_ra>
// kernel: _forward_impl.4
= control target key start
LH: loop header
LB: loop body
LE: loop exit
PB: predicated region body
PF: predicated region fallthrough
CT: control target
= control target key end

     0   :  { %9 = vsyncpa [#allocation3], 0  ;;  %s279_s15 = smov [#allocation2]   ;;  %s331_s0 = inlined_call_operand.vmem [shape: bf16[2,8], index: 0, kind: input, shape index: {}]   ;;  %s332_s1 = inlined_call_operand.hbm [shape: bf16[8,512], index: 1, kind: input, shape index: {}]   ;;  %s333_s2 = inlined_call_operand.vmem [shape: f32[1,512], index: 2, kind: input, shape index: {}]   ;;  %s334_s3 = inlined_call_operand.vmem [shape: f32[1,512], index: 3, kind: input, shape index: {}]   ;;  %s335_s4 = inlined_call_operand.vmem [shape: bf16[2,512], index: 4, kind: output, shape index: {}]  }
   0x1   :  { %s18_s16 = sshll.u32 %s279_s15, 4  ;;  %s255_s19 = scalar_lea.hbm %s332_s1, 256  ;;  %s19_s16 = int_to_ptr.vmem [resolvable:$true] %s18_s16 }
   0x2   :  { %p256_p0 = scmp.ne.s32.totalorder %s332_s1, %s255_s19  ;;  %p259_p1 = scmp.lt.u32.totalorder %s255_s19, %s332_s1 }
   0x4   :  { %p261_p2 = pnand %p259_p1, %p256_p0 }
   0x6   :  { %264 = shalt.err (!%p261_p2)
}
   0x7   :  { %s265_s24 = scalar_lea.vmem %s19_s16, 256  ;;  %p270_p4 = scmp.lt.s32.totalorder %s19_s16, %s19_s16 }
   0x8   :  { %p266_p3 = scmp.ne.s32.totalorder %s19_s16, %s265_s24  ;;  %p271_p5 = scmp.lt.s32.totalorder %s265_s24, %s265_s24 }
   0xa   :  { %p272_p6 = por %p271_p5, %p270_p4 }
   0xc   :  { %p273_p7 = pnand %p272_p6, %p266_p3 }
   0xe   :  { %276 = shalt.err (!%p273_p7)
}
   0xf   :  { %21 = dma.hbm_to_vmem [thread:$0]  %s332_s1, 256, %s19_s16, [#allocation3]  }
  0x10   :  { %277 = dma.done.wait [#allocation3], 256  }
  0x11   :  { %278 = vsyncadd [#allocation3], 4294967040  ;;  %v280_v0 = vmov 0   ;;  %v31_v1 = vld [vmem:[#allocation2] sm:$0xff]  ;;  %vm47_vm0 = vcmask 1043456   ;;  %v32_v2 = vld [vmem:[#allocation2 + $0x8] sm:$0xff]  ;;  %v144_v10 = vlaneseq }
  0x12   :  { %92 = vmatprep.mubr.bf16.mxu0 %v280_v0  ;;  %133 = vmatprep.mubr.bf16.mxu1 %v280_v0  ;;  %v238_v3 = vcombine.high %v31_v1, %v31_v1  ;;  %v240_v4 = vcombine.high %v32_v2, %v32_v2  ;;  %v237_v5 = vcombine.low %v31_v1, %v31_v1  ;;  %v30_v9 = vld [vmem:[%s331_s0] sm:$0x1]  ;;  %vm43_vm1 = vcmask 64512  }
  0x13   :  { %v239_v6 = vcombine.low %v32_v2, %v32_v2  ;;  %v145_v11 = vshrl.u32 %v144_v10, 7  ;;  %v142_v14 = vld [vmem:[%s333_s2] sm:$0xf]  ;;  %v281_v21 = vmov 1966171168  }
  0x14   :  { %241 = vmatprep.subr.msk.bf16.mxu0 %vm47_vm0, %v238_v3  ;;  %243 = vmatprep.subr.msk.bf16.mxu1 %vm47_vm0, %v240_v4  ;;  %v49_v7 = vsel %vm47_vm0, %v237_v5, 0  ;;  %v168_v17 = vld [vmem:[%s334_s3] sm:$0xf]  ;;  %v209_v22 = vunpack.c.l.s4 %v281_v21 }
  0x15   :  { %v55_v8 = vsel %vm47_vm0, %v239_v6, 0  ;;  %61 = vmatpush1.bf16.msra.mxu0 %v49_v7  ;;  %v146_v12 = vsub.s32 0, %v145_v11  ;;  %v154_v13 = vsub.s32 2, %v145_v11  ;;  %v150_v15 = vsub.s32 1, %v145_v11 }
  0x16   :  { %102 = vmatpush1.bf16.msra.mxu1 %v55_v8  ;;  %v158_v16 = vsub.s32 3, %v145_v11  ;;  %v210_v35 = vunpack.c.0.s8 %v209_v22 }
  0x17   :  { %v147_v18 = vrot.slane %v142_v14, %v146_v12  ;;  %v155_v19 = vrot.slane %v142_v14, %v154_v13  ;;  %v151_v20 = vrot.slane %v142_v14, %v150_v15  ;;  %v173_v24 = vrot.slane %v168_v17, %v146_v12 }
  0x18   :  { %242 = vmatmul.mubr.msk.bf16.vlgmr.msra.gmra.mrb[0].mxu0 %vm43_vm1, %v30_v9  ;;  %v159_v23 = vrot.slane %v142_v14, %v158_v16  ;;  %v181_v25 = vrot.slane %v168_v17, %v154_v13  ;;  %v177_v28 = vrot.slane %v168_v17, %v150_v15  ;;  %v185_v29 = vrot.slane %v168_v17, %v158_v16 }
  0x19   :  { %244 = vmatmul.mubr.msk.bf16.vlgmr.msra.gmra.mrb[0].mxu1 %vm43_vm1, %v30_v9  ;;  %v213_v48 = vsub.s32 %v210_v35, %v145_v11 }
  0xeb   :  { %v94_v26 = vpop.f32.mrb[0].mxu0 }
  0xec   :  { %v135_v27 = vpop.f32.mrb[0].mxu1  ;;  %v164_v30 = vmul.f32 %v147_v18, %v94_v26  ;;  %v96_v32 = vpop.f32.mrb[1].mxu0 }
  0xed   :  { %v166_v31 = vmul.f32 %v155_v19, %v135_v27  ;;  %v137_v33 = vpop.f32.mrb[1].mxu1  ;;  %v165_v34 = vmul.f32 %v151_v20, %v96_v32  ;;  %v98_v37 = vpop.f32.mrb[2].mxu0 }
  0xee   :  { %v167_v36 = vmul.f32 %v159_v23, %v137_v33  ;;  %v139_v38 = vpop.f32.mrb[2].mxu1  ;;  %v190_v39 = vadd.f32 %v173_v24, %v164_v30  ;;  %v99_v41 = vpop.f32.mrb[3].mxu0 }
  0xef   :  { %v192_v40 = vadd.f32 %v181_v25, %v166_v31  ;;  %v140_v42 = vpop.f32.mrb[3].mxu1  ;;  %v191_v43 = vadd.f32 %v177_v28, %v165_v34 }
  0xf0   :  { %v193_v44 = vadd.f32 %v185_v29, %v167_v36  ;;  %v194_v45 = vmax.f32 %v190_v39, 0.0 }
  0xf1   :  { %v196_v46 = vmax.f32 %v192_v40, 0.0  ;;  %v195_v47 = vmax.f32 %v191_v43, 0.0 }
  0xf2   :  { %v197_v49 = vmax.f32 %v193_v44, 0.0 }
  0xf3   :  { %v245_v50 = vpack.c.bf16 %v195_v47, %v194_v45 }
  0xf4   :  { %v246_v51 = vpack.c.bf16 %v197_v49, %v196_v46 }
  0xf5   :  { %v214_v52 = vrot.slane %v245_v50, %v213_v48 }
  0xf6   :  { %v221_v53 = vrot.slane %v246_v51, %v213_v48 }
  0xf8   :  { %v222_v54 = vcombine.low %v214_v52, %v221_v53 }
  0xfa   :  { %247 = vst.sshfl [vmem:[%s335_s4] sm:$0x55 pattern:$0x73625140] %v222_v54 }
  0xfb   :  { %236 = vsyncpa [#allocation3], 1 }

// kernel: _forward_impl.5
= control target key start
LH: loop header
LB: loop body
LE: loop exit
PB: predicated region body
PF: predicated region fallthrough
CT: control target
= control target key end

     0   :  { %s1915_s15 = smov 0   ;;  %s2360_s0 = inlined_call_operand.vmem [shape: bf16[2,6,6,32], index: 0, kind: input, shape index: {}]   ;;  %s2361_s1 = inlined_call_operand.vmem [shape: bf16[4,128,16], index: 1, kind: input, shape index: {}]   ;;  %s2362_s2 = inlined_call_operand.vmem [shape: f32[1,64], index: 2, kind: input, shape index: {}]   ;;  %s2363_s3 = inlined_call_operand.vmem [shape: f32[1,64], index: 3, kind: input, shape index: {}]   ;;  %s2364_s4 = inlined_call_operand.vmem [shape: bf16[2,4,4,64], index: 4, kind: output, shape index: {}]  }
   0x1 LB: > { %s1528_s16 = sadd.s32 4294967295, %s1880_s15   ;;  %p1532_p0 = scmp.ge.s32.totalorder %s1880_s15, 1  ;;  %s1880_s15 = sphi %s1915_s15, %s14_s15  }
   0x2   : > { %p162_p1 = scmp.lt.s32.totalorder %s1880_s15, 3 }
   0x4   : > { %p163_p2 = pnand %p1532_p0, %p162_p1 }
   0x5   : > { %p188_p3 = scmp.lt.s32.totalorder (!%p163_p2), %s1528_s16, 1  ;;  %v1842_v0 = vld [vmem:[%s2361_s1 + $0x40] sm:$0xff] (!%p163_p2)   ;;  %v1882_v1 = vmov (!%p163_p2), 0.0   ;;  %v1843_v2 = vld [vmem:[%s2361_s1 + $0x48] sm:$0xff] (!%p163_p2)   ;;  %s1883_s25 = smov (!%p163_p2), 64   ;;  %v1844_v50 = vld [vmem:[%s2361_s1 + $0x50] sm:$0xff] (!%p163_p2)  }
   0x6   : > { %166 = sbr.rel (%p163_p2) target bundleno = 579 (0x243), region = 36  ;;  %1733 = vmatprep.subr.bf16.mxu1 (!%p163_p2), %v1882_v1  ;;  %1713 = vmatprep.subr.bf16.mxu0 (!%p163_p2), %v1882_v1  ;;  %s1884_s26 = smov (!%p163_p2), 32   ;;  %v1845_v60 = vld [vmem:[%s2361_s1 + $0x58] sm:$0xff] (!%p163_p2)   ;;  %vm1886_vm0 = vmmov (!%p163_p2), 0   ;;  %vm332_vm1 = vcmask (!%p163_p2), 261120   ;;  %vm345_vm2 = vcmask (!%p163_p2), 523264  }
   0x7   : > { %1734 = vmatpush3.bf16.msra.mxu1 (!%p163_p2), %v1842_v0  ;;  %s1885_s5 = smov (!%p163_p2), 96   ;;  %1749 = vmatprep.mubr.msk.bf16.mxu1 (!%p163_p2), %vm1886_vm0, %v1882_v1  ;;  %vm354_vm3 = vcmask (!%p163_p2), 785408   ;;  %vm666_vm4 = vsmask.f32 (!%p163_p2), 1280  ;;  %vm667_vm5 = vsmask.f32 (!%p163_p2), 3336 }
   0x8   : > { %1735 = vmatprep.subr.bf16.mxu1 (!%p163_p2), %v1882_v1  ;;  %1729 = vmatprep.mubr.msk.bf16.mxu0 (!%p163_p2), %vm1886_vm0, %v1882_v1  ;;  %vm669_vm6 = vsmask.f32 (!%p163_p2), 5392  ;;  %vm668_vm7 = vmor (!%p163_p2), %vm666_vm4, %vm667_vm5  ;;  %vm671_vm9 = vsmask.f32 (!%p163_p2), 7448  ;;  %s1888_s18 = smov (!%p163_p2), 16   ;;  %vm1430_vm11 = vcmask (!%p163_p2), 130048  }
   0x9   : > { %vm670_vm8 = vmor (!%p163_p2), %vm668_vm7, %vm669_vm6  ;;  %vm1435_vm12 = vcmask (!%p163_p2), 392192   ;;  %vm1468_vm13 = vcmask (!%p163_p2), 517120  }
   0xa   : > { %vm2197_vm10 = vmor (!%p163_p2), %vm670_vm8, %vm671_vm9 }
   0xb   : > { %1736 = vmatpush3.bf16.msra.mxu1 (!%p163_p2), %v1843_v2 }
   0xc   : > { %1737 = vmatprep.subr.bf16.mxu1 (!%p163_p2), %v1882_v1 }
   0xd   : > { %s2368_s16 = smov (!%p188_p3, %s1528_s16), 1 }
   0xe   : > { %s1793_s19 = smul.u32 24, %s2368_s16  ;;  %s1676_s23 = sshll.u32 %s2368_s16, 3 }
   0xf   : > { %1738 = vmatpush3.bf16.msra.mxu1 %v1844_v50  ;;  %s197_s29 = scalar_lea.vmem %s2364_s4, %s1676_s23 }
  0x10   : > { %s1938_s24 = scalar_lea.vmem %s2360_s0, %s1793_s19  ;;  %1739 = vmatprep.subr.bf16.mxu1 %v1882_v1  ;;  %s1889_s19 = smov 48  }
  0x11   : > { %v1941_v3 = vld [vmem:[%s1938_s24 + $0x8] sm:$0x7]  ;;  %v1944_v4 = vld [vmem:[%s1938_s24 + $0x4] sm:$0x7]  ;;  %v1947_v5 = vld [vmem:[%s1938_s24 + $0x10] sm:$0x7] }
  0x12   : > { %v1951_v6 = vcombine.low %v1941_v3, %v1941_v3  ;;  %v1955_v7 = vcombine.low %v1944_v4, %v1944_v4  ;;  %v1958_v8 = vld [vmem:[%s1938_s24 + $0xc] sm:$0x7]  ;;  %v1814_v9 = vld [vmem:[%s1938_s24 + $0x8] ss:$0 sps:$4 sm:$0x66]   ;;  %v1969_v11 = vcombine.low %v1947_v5, %v1947_v5 }
  0x13   : > { %v1815_v10 = vld [vmem:[%s1938_s24] ss:$0 sps:$4 sm:$0x66]   ;;  %v1973_v12 = vcombine.low %v1958_v8, %v1958_v8  ;;  %v1816_v13 = vld [vmem:[%s1938_s24 + $0xc] ss:$0 sps:$4 sm:$0x66]   ;;  %1740 = vmatpush3.bf16.msra.mxu1 %v1845_v60 }
  0x14   : > { %548 = vrot.lane.b32.xlu1 %v1951_v6, %s1883_s25  ;;  %546 = vrot.lane.b32.xlu0 %v1955_v7, %s1883_s25  ;;  %v525_v14 = vshrl.u32 %v1814_v9, 16  ;;  %v527_v15 = vshll.u32 %v1814_v9, 16  ;;  %v511_v16 = vshrl.u32 %v1815_v10, 16  ;;  %v513_v17 = vshll.u32 %v1815_v10, 16  ;;  %v1985_v36 = vld [vmem:[%s1938_s24 + $0x4] sm:$0x7] }
  0x15   : > { %v532_v18 = vshrl.u32 %v1816_v13, 16  ;;  %v534_v19 = vshll.u32 %v1816_v13, 16  ;;  %v1817_v20 = vld [vmem:[%s1938_s24 + $0x4] ss:$0 sps:$4 sm:$0x66]   ;;  %v1545_v43 = vcombine.low %v1985_v36, %v1985_v36  ;;  %1741 = vmatprep.subr.bf16.mxu1 %v1882_v1  ;;  %v1856_v60 = vld [vmem:[%s2361_s1 + $0x30] sm:$0xff]  }
  0x16   : > { %v529_v21 = vrot.slane %v527_v15, 1  ;;  %v515_v22 = vrot.slane %v513_v17, 1  ;;  %v518_v24 = vshrl.u32 %v1817_v20, 16  ;;  %v520_v25 = vshll.u32 %v1817_v20, 16  ;;  %v1993_v44 = vld [vmem:[%s1938_s24] sm:$0x7] }
  0x17   : > { %v536_v23 = vrot.slane %v534_v19, 1  ;;  %v1818_v26 = vld [vmem:[%s1938_s24 + $0x8] ss:$0 sps:$4 sm:$0x66]   ;;  %v1996_v45 = vld [vmem:[%s1938_s24 + $0xc] sm:$0x7]  ;;  %v1544_v54 = vcombine.low %v1993_v44, %v1993_v44 }
  0x18   : > { %552 = vrot.lane.b32.xlu1 %v1969_v11, %s1883_s25  ;;  %550 = vrot.lane.b32.xlu0 %v1973_v12, %s1883_s25  ;;  %v530_v27 = vor.u32 %v529_v21, %v525_v14  ;;  %v516_v28 = vor.u32 %v515_v22, %v511_v16  ;;  %v1819_v29 = vld [vmem:[%s1938_s24 + $0x4] ss:$0 sps:$4 sm:$0x66]   ;;  %v522_v30 = vrot.slane %v520_v25, 1  ;;  %v574_v31 = vshrl.u32 %v1818_v26, 16 }
  0x19   : > { %v576_v32 = vshll.u32 %v1818_v26, 16  ;;  %v1820_v33 = vld [vmem:[%s1938_s24 + $0x10] ss:$0 sps:$4 sm:$0x66]   ;;  %v537_v34 = vor.u32 %v536_v23, %v532_v18  ;;  %v569_v35 = vshll.u32 %v1819_v29, 16  ;;  %v567_v39 = vshrl.u32 %v1819_v29, 16 }
  0x1a   : > { %v523_v37 = vor.u32 %v522_v30, %v518_v24  ;;  %v590_v40 = vshll.u32 %v1820_v33, 16  ;;  %v1821_v41 = vld [vmem:[%s1938_s24 + $0xc] ss:$0 sps:$4 sm:$0x66]   ;;  %v588_v47 = vshrl.u32 %v1820_v33, 16  ;;  %v238_v53 = vshll.u32 %v1545_v43, 16 }
  0x1b   : > { %v578_v38 = vrot.slane %v576_v32, 1  ;;  %v571_v42 = vrot.slane %v569_v35, 1  ;;  %v583_v48 = vshll.u32 %v1821_v41, 16  ;;  %v2001_v49 = vld [vmem:[%s1938_s24 + $0x8] sm:$0x7]  ;;  %v581_v52 = vshrl.u32 %v1821_v41, 16 }
  0x1c   : > { %542 = vrot.lane.b32.xlu1 %v530_v27, %s1884_s26  ;;  %538 = vrot.lane.b32.xlu0 %v516_v28, %s1884_s26  ;;  %v592_v51 = vrot.slane %v590_v40, 1  ;;  %v1547_v57 = vcombine.low %v1996_v45, %v1996_v45  ;;  %v1546_v58 = vcombine.low %v2001_v49, %v2001_v49  ;;  %v231_v59 = vshll.u32 %v1544_v54, 16  ;;  %v1846_v14 = vld [vmem:[%s2361_s1] sm:$0xff]   ;;  %v2044_v24 = vld [vmem:[%s1938_s24 + $0x8] sm:$0x3] }
  0x1d   : > { %v1998_v46 = vor.u32 %v578_v38, %v574_v31  ;;  %v2010_v55 = vor.u32 %v571_v42, %v567_v39  ;;  %v585_v56 = vrot.slane %v583_v48, 1  ;;  %v236_v61 = vshrl.u32 %v1545_v43, 16  ;;  %1714 = vmatpush3.bf16.msra.mxu0 %v1846_v14  ;;  %v1847_v15 = vld [vmem:[%s2361_s1 + $0x60] sm:$0xff]   ;;  %v2058_v30 = vld [vmem:[%s1938_s24 + $0x10] sm:$0x3]  ;;  %v1848_v32 = vld [vmem:[%s2361_s1 + $0x8] sm:$0xff]  }
  0x1e   : > { %v2020_v62 = vor.u32 %v592_v51, %v588_v47  ;;  %v240_v63 = vrot.slane %v238_v53, 1  ;;  %v229_v0 = vshrl.u32 %v1544_v54, 16  ;;  %v233_v9 = vrot.slane %v231_v59, 1  ;;  %1715 = vmatprep.subr.bf16.mxu0 %v1882_v1  ;;  %1742 = vmatpush3.bf16.msra.mxu1 %v1847_v15  ;;  %v2047_v25 = vld [vmem:[%s1938_s24 + $0x4] sm:$0x3]  ;;  %v1849_v33 = vld [vmem:[%s2361_s1 + $0x68] sm:$0xff]  }
  0x1f   : > { %v2026_v2 = vor.u32 %v585_v56, %v581_v52  ;;  %v252_v10 = vshll.u32 %v1547_v57, 16  ;;  %v245_v13 = vshll.u32 %v1546_v58, 16  ;;  %v250_v16 = vshrl.u32 %v1547_v57, 16  ;;  %1743 = vmatprep.subr.bf16.mxu1 %v1882_v1  ;;  %v2061_v31 = vld [vmem:[%s1938_s24 + $0xc] sm:$0x3]  ;;  %v1850_v39 = vld [vmem:[%s2361_s1 + $0x10] sm:$0xff]  }
  0x20   : > { %544 = vrot.lane.b32.xlu1 %v537_v34, %s1884_s26  ;;  %540 = vrot.lane.b32.xlu0 %v523_v37, %s1884_s26  ;;  %v243_v17 = vshrl.u32 %v1546_v58, 16  ;;  %v241_v18 = vor.u32 %v240_v63, %v236_v61  ;;  %v234_v19 = vor.u32 %v233_v9, %v229_v0  ;;  %v306_v26 = vshll.u32 %v1951_v6, 16  ;;  %v1851_v47 = vld [vmem:[%s2361_s1 + $0x70] sm:$0xff]   ;;  %v1852_v52 = vld [vmem:[%s2361_s1 + $0x18] sm:$0xff]  }
  0x21   : > { %v254_v20 = vrot.slane %v252_v10, 1  ;;  %v247_v21 = vrot.slane %v245_v13, 1  ;;  %v1549_v27 = vcombine.low %v2044_v24, %v2044_v24  ;;  %v1548_v28 = vcombine.low %v2047_v25, %v2047_v25  ;;  %1716 = vmatpush3.bf16.msra.mxu0 %v1848_v32  ;;  %v1853_v53 = vld [vmem:[%s2361_s1 + $0x78] sm:$0xff]   ;;  %v1834_v57 = vld [vmem:[%s1938_s24 + $0xc] ss:$0 sps:$4 sm:$0x66]  }
  0x22   : > { %v299_v29 = vshll.u32 %v1955_v7, 16  ;;  %v304_v34 = vshrl.u32 %v1951_v6, 16  ;;  %v308_v35 = vrot.slane %v306_v26, 1  ;;  %v297_v37 = vshrl.u32 %v1955_v7, 16  ;;  %1717 = vmatprep.subr.bf16.mxu0 %v1882_v1  ;;  %1744 = vmatpush3.bf16.msra.mxu1 %v1849_v33  ;;  %v1855_v58 = vld [vmem:[%s2361_s1 + $0x28] sm:$0xff]   ;;  %v1857_v63 = vld [vmem:[%s2361_s1 + $0x38] sm:$0xff]  }
  0x23   : > { %v255_v22 = vor.u32 %v254_v20, %v250_v16  ;;  %v248_v23 = vor.u32 %v247_v21, %v243_v17  ;;  %v320_v38 = vshll.u32 %v1969_v11, 16  ;;  %v1551_v40 = vcombine.low %v2058_v30, %v2058_v30  ;;  %1745 = vmatprep.subr.bf16.mxu1 %v1882_v1  ;;  %v1835_v59 = vld [vmem:[%s1938_s24 + $0x8] ss:$0 sps:$4 sm:$0x66]  }
  0x24   : > { %596 = vrot.lane.b32.xlu1 %v1998_v46, %s1885_s5  ;;  %594 = vrot.lane.b32.xlu0 %v2010_v55, %s1885_s5  ;;  %v1550_v6 = vcombine.low %v2061_v31, %v2061_v31  ;;  %v301_v41 = vrot.slane %v299_v29, 1  ;;  %v313_v7 = vshll.u32 %v1973_v12, 16  ;;  %v318_v42 = vshrl.u32 %v1969_v11, 16  ;;  %v1830_v0 = vld [vmem:[%s1938_s24 + $0xc] ss:$0 sps:$4 sm:$0x77]  }
  0x25   : > { %v2085_v43 = vor.u32 %v308_v35, %v304_v34  ;;  %1718 = vmatpush3.bf16.msra.mxu0 %v1850_v39  ;;  %v322_v50 = vrot.slane %v320_v38, 1  ;;  %v311_v11 = vshrl.u32 %v1973_v12, 16  ;;  %v1854_v12 = vld [vmem:[%s2361_s1 + $0x20] sm:$0xff]   ;;  %v1136_v61 = vshll.u32 %v1834_v57, 16 }
  0x26   : > { %v2092_v48 = vor.u32 %v301_v41, %v297_v37  ;;  %v315_v51 = vrot.slane %v313_v7, 1  ;;  %1719 = vmatprep.subr.bf16.mxu0 %v1882_v1  ;;  %1746 = vmatpush3.bf16.msra.mxu1 %v1851_v47  ;;  %v1831_v9 = vld [vmem:[%s1938_s24 + $0x8] ss:$0 sps:$4 sm:$0x77]   ;;  %v1134_v15 = vshrl.u32 %v1834_v57, 16  ;;  %v1127_v17 = vshrl.u32 %v1835_v59, 16 }
  0x27   : > { %1747 = vmatprep.subr.bf16.mxu1 %v1882_v1  ;;  %v323_v54 = vor.u32 %v322_v50, %v318_v42  ;;  %v1836_v10 = vld [vmem:[%s1938_s24 + $0x14] ss:$0 sps:$4 sm:$0x66]   ;;  %v1837_v13 = vld [vmem:[%s1938_s24 + $0x10] ss:$0 sps:$4 sm:$0x66]  }
  0x28   : > { %600 = vrot.lane.b32.xlu1 %v2020_v62, %s1885_s5  ;;  %598 = vrot.lane.b32.xlu0 %v2026_v2, %s1885_s5  ;;  %v316_v56 = vor.u32 %v315_v51, %v311_v11  ;;  %v1833_v14 = vld [vmem:[%s1938_s24 + $0x10] ss:$0 sps:$4 sm:$0x77]   ;;  %v1138_v16 = vrot.slane %v1136_v61, 1  ;;  %v1148_v20 = vshrl.u32 %v1836_v10, 16  ;;  %v912_v32 = vshll.u32 %v1830_v0, 16 }
  0x29   : > { %1720 = vmatpush3.bf16.msra.mxu0 %v1852_v52  ;;  %v1838_v29 = vld [vmem:[%s1938_s24 + $0xc] ss:$0 sps:$4 sm:$0x33]   ;;  %v1839_v33 = vld [vmem:[%s1938_s24 + $0x8] ss:$0 sps:$4 sm:$0x33]  }
  0x2a   : > { %1721 = vmatprep.subr.bf16.mxu0 %v1882_v1  ;;  %1748 = vmatpush3.bf16.msra.mxu1 %v1853_v53  ;;  %v905_v34 = vshll.u32 %v1831_v9, 16  ;;  %v1840_v35 = vld [vmem:[%s1938_s24 + $0x14] ss:$0 sps:$4 sm:$0x33]   ;;  %v910_v38 = vshrl.u32 %v1830_v0, 16  ;;  %v914_v39 = vrot.slane %v912_v32, 1 }
  0x2b   : > { %1773 = vmatprep.subr.bf16.mxu1 %v1882_v1  ;;  %v1841_v37 = vld [vmem:[%s1938_s24 + $0x10] ss:$0 sps:$4 sm:$0x33]   ;;  %v919_v7 = vshll.u32 %v1833_v14, 16  ;;  %v917_v50 = vshrl.u32 %v1833_v14, 16 }
  0x2c   : > { %258 = vrot.lane.b32.xlu1 %v241_v18, %s1884_s26  ;;  %256 = vrot.lane.b32.xlu0 %v234_v19, %s1884_s26  ;;  %v1150_v19 = vshll.u32 %v1836_v10, 16  ;;  %v915_v42 = vor.u32 %v914_v39, %v910_v38  ;;  %v1887_v57 = vmov 1983009808  }
  0x2d   : > { %1722 = vmatpush3.bf16.msra.mxu0 %v1854_v12  ;;  %v921_v11 = vrot.slane %v919_v7, 1 }
  0x2e   : > { %1723 = vmatprep.subr.bf16.mxu0 %v1882_v1 }
  0x2f   : > { %v922_v52 = vor.u32 %v921_v11, %v917_v50 }
  0x30   : > { %262 = vrot.lane.b32.xlu1 %v255_v22, %s1884_s26  ;;  %260 = vrot.lane.b32.xlu0 %v248_v23, %s1884_s26  ;;  %v1152_v22 = vrot.slane %v1150_v19, 1  ;;  %v1141_v23 = vshrl.u32 %v1837_v13, 16 }
  0x31   : > { %1724 = vmatpush3.bf16.msra.mxu0 %v1855_v58  ;;  %v386_v58 = vunpack.c.l.s4 %v1887_v57 }
  0x32   : > { %1725 = vmatprep.subr.bf16.mxu0 %v1882_v1 }
  0x34   : > { %278 = vrot.lane.b32.xlu1 %v1549_v27, %s1883_s25  ;;  %276 = vrot.lane.b32.xlu0 %v1548_v28, %s1883_s25  ;;  %v1153_v27 = vor.u32 %v1152_v22, %v1148_v20 }
  0x35   : > { %1726 = vmatpush3.bf16.msra.mxu0 %v1856_v60 }
  0x36   : > { %1727 = vmatprep.subr.bf16.mxu0 %v1882_v1 }
  0x38   : > { %282 = vrot.lane.b32.xlu1 %v1551_v40, %s1883_s25  ;;  %280 = vrot.lane.b32.xlu0 %v1550_v6, %s1883_s25  ;;  %v903_v40 = vshrl.u32 %v1831_v9, 16  ;;  %v907_v6 = vrot.slane %v905_v34, 1 }
  0x39   : > { %1728 = vmatpush3.bf16.msra.mxu0 %v1857_v63  ;;  %v387_v63 = vunpack.c.0.s8 %v386_v58 }
  0x3a   : > { %1753 = vmatprep.subr.bf16.mxu0 %v1882_v1  ;;  %v908_v47 = vor.u32 %v907_v6, %v903_v40 }
  0x3c   : > { %326 = vrot.lane.b32.xlu1 %v2085_v43, %s1885_s5  ;;  %324 = vrot.lane.b32.xlu0 %v2092_v48, %s1885_s5 }
  0x40   : > { %330 = vrot.lane.b32.xlu1 %v323_v54, %s1885_s5  ;;  %328 = vrot.lane.b32.xlu0 %v316_v56, %s1885_s5 }
  0x44   : > { %1100 = vrot.lane.b32.xlu1 %v1998_v46, %s1884_s26  ;;  %1098 = vrot.lane.b32.xlu0 %v2010_v55, %s1884_s26  ;;  %v1129_v46 = vshll.u32 %v1835_v59, 16  ;;  %v1832_v55 = vld [vmem:[%s1938_s24 + $0x14] ss:$0 sps:$4 sm:$0x77]   ;;  %v388_v59 = vlaneseq }
  0x45   : > { %v926_v41 = vshll.u32 %v1832_v55, 16 }
  0x46   : > { %v1131_v18 = vrot.slane %v1129_v46, 1 }
  0x48   : > { %1104 = vrot.lane.b32.xlu1 %v2020_v62, %s1884_s26  ;;  %1102 = vrot.lane.b32.xlu0 %v2026_v2, %s1884_s26  ;;  %v1143_v62 = vshll.u32 %v1837_v13, 16  ;;  %v1139_v2 = vor.u32 %v1138_v16, %v1134_v15  ;;  %v1132_v21 = vor.u32 %v1131_v18, %v1127_v17 }
  0x4a   : > { %v1145_v26 = vrot.slane %v1143_v62, 1 }
  0x4c   : > { %1108 = vrot.lane.b32.xlu1 %v1830_v0, %s1883_s25  ;;  %1106 = vrot.lane.b32.xlu0 %v1831_v9, %s1883_s25  ;;  %v1146_v28 = vor.u32 %v1145_v26, %v1141_v23  ;;  %v389_v0 = vshrl.u32 %v388_v59, 7 }
  0x50   : > { %1112 = vrot.lane.b32.xlu1 %v1832_v55, %s1883_s25  ;;  %1110 = vrot.lane.b32.xlu0 %v1833_v14, %s1883_s25 }
  0x54   : > { %1156 = vrot.lane.b32.xlu1 %v1139_v2, %s1885_s5  ;;  %1154 = vrot.lane.b32.xlu0 %v1132_v21, %s1885_s5 }
  0x58   : > { %1160 = vrot.lane.b32.xlu1 %v1153_v27, %s1885_s5  ;;  %1158 = vrot.lane.b32.xlu0 %v1146_v28, %s1885_s5 }
  0x5c   : > { %864 = vrot.lane.b32.xlu1 %v2085_v43, %s1884_s26  ;;  %862 = vrot.lane.b32.xlu0 %v2092_v48, %s1884_s26  ;;  %v924_v43 = vshrl.u32 %v1832_v55, 16  ;;  %v928_v48 = vrot.slane %v926_v41, 1  ;;  %v2177_v55 = vsub.s32 %v387_v63, %v389_v0 }
  0x5e   : > { %v929_v51 = vor.u32 %v928_v48, %v924_v43 }
  0x60   : > { %868 = vrot.lane.b32.xlu1 %v323_v54, %s1884_s26  ;;  %866 = vrot.lane.b32.xlu0 %v316_v56, %s1884_s26 }
  0x64   : > { %884 = vrot.lane.b32.xlu1 %v1838_v29, %s1883_s25  ;;  %882 = vrot.lane.b32.xlu0 %v1839_v33, %s1883_s25 }
  0x68   : > { %888 = vrot.lane.b32.xlu1 %v1840_v35, %s1883_s25  ;;  %886 = vrot.lane.b32.xlu0 %v1841_v37, %s1883_s25 }
  0x6c   : > { %932 = vrot.lane.b32.xlu1 %v915_v42, %s1885_s5  ;;  %930 = vrot.lane.b32.xlu0 %v908_v47, %s1885_s5 }
  0x70   : > { %936 = vrot.lane.b32.xlu1 %v929_v51, %s1885_s5  ;;  %934 = vrot.lane.b32.xlu0 %v922_v52, %s1885_s5 }
  0x86   : > { %v549_v53 = vpop.permute.xlu1 %548  ;;  %v547_v12 = vpop.permute.xlu0 %546 }
  0x8a   : > { %v553_v54 = vpop.permute.xlu1 %552  ;;  %v551_v56 = vpop.permute.xlu0 %550 }
  0x8e   : > { %v543_v60 = vpop.permute.xlu1 %542  ;;  %v539_v61 = vpop.permute.xlu0 %538 }
  0x8f   : > { %v604_v46 = vsel %vm332_vm1, %v1993_v44, %v539_v61  ;;  %v610_v14 = vsel %vm332_vm1, %v2001_v49, %v543_v60 }
  0x90   : > { %v615_v19 = vsel %vm345_vm2, %v604_v46, %v547_v12 }
  0x92   : > { %v545_v9 = vpop.permute.xlu1 %544  ;;  %v541_v10 = vpop.permute.xlu0 %540 }
  0x93   : > { %v607_v13 = vsel %vm332_vm1, %v1985_v36, %v541_v10  ;;  %v613_v15 = vsel %vm332_vm1, %v1996_v45, %v545_v9  ;;  %v619_v45 = vsel %vm345_vm2, %v610_v14, %v551_v56 }
  0x94   : > { %v617_v17 = vsel %vm345_vm2, %v607_v13, %v549_v53  ;;  %v621_v49 = vsel %vm345_vm2, %v613_v15, %v553_v54 }
  0x96   : > { %v597_v16 = vpop.permute.xlu1 %596  ;;  %v595_v18 = vpop.permute.xlu0 %594 }
  0x97   : > { %v625_v44 = vsel %vm354_vm3, %v617_v17, %v597_v16  ;;  %v623_v36 = vsel %vm354_vm3, %v615_v19, %v595_v18 }
  0x98   : > { %v648_v62 = vrot.slane %v625_v44, %v2177_v55  ;;  %v640_v2 = vrot.slane %v623_v36, %v2177_v55 }
  0x9a   : > { %v649_v20 = vcombine.high %v648_v62, %v648_v62  ;;  %v688_v21 = vshrl.u32 %v648_v62, 16  ;;  %v691_v22 = vshll.u32 %v648_v62, 16  ;;  %v641_v23 = vcombine.high %v640_v2, %v640_v2  ;;  %v601_v26 = vpop.permute.xlu1 %600  ;;  %v599_v27 = vpop.permute.xlu0 %598 }
  0x9b   : > { %v674_v28 = vshrl.u32 %v640_v2, 16  ;;  %v677_v29 = vshll.u32 %v640_v2, 16  ;;  %v629_v32 = vsel %vm354_vm3, %v621_v49, %v601_v26  ;;  %v627_v33 = vsel %vm354_vm3, %v619_v45, %v599_v27 }
  0x9c   : > { %v690_v34 = vrot.slane %v688_v21, 6  ;;  %v693_v35 = vrot.slane %v691_v22, 7  ;;  %v664_v39 = vrot.slane %v629_v32, %v2177_v55  ;;  %v656_v40 = vrot.slane %v627_v33, %v2177_v55  ;;  %v200_v21 = vld [vmem:[%s1938_s24 + $0x4] sm:$0x3]  ;;  %v199_v22 = vld [vmem:[%s1938_s24] sm:$0x3] }
  0x9d   : > { %v676_v37 = vrot.slane %v674_v28, 6  ;;  %v679_v38 = vrot.slane %v677_v29, 7  ;;  %v697_v41 = vshll.u32 %v649_v20, 16  ;;  %v683_v7 = vshll.u32 %v641_v23, 16  ;;  %v1858_v29 = vld [vmem:[%s2361_s1 + $0xc0] sm:$0xff]  }
  0x9e   : > { %v694_v6 = vor.u32 %v693_v35, %v690_v34  ;;  %v259_v42 = vpop.permute.xlu1 %258  ;;  %v257_v43 = vpop.permute.xlu0 %256  ;;  %v665_v48 = vcombine.high %v664_v39, %v664_v39  ;;  %v716_v50 = vshrl.u32 %v664_v39, 16  ;;  %v719_v11 = vshll.u32 %v664_v39, 16  ;;  %v202_v35 = vld [vmem:[%s1938_s24 + $0xc] sm:$0x3] }
  0x9f   : > { %v680_v47 = vor.u32 %v679_v38, %v676_v37  ;;  %v657_v52 = vcombine.high %v656_v40, %v656_v40  ;;  %v702_v53 = vshrl.u32 %v656_v40, 16  ;;  %v705_v12 = vshll.u32 %v656_v40, 16  ;;  %v201_v37 = vld [vmem:[%s1938_s24 + $0x8] sm:$0x3] }
  0xa0   : > { %v695_v51 = vrot.slane %v694_v6, 2  ;;  %v718_v56 = vrot.slane %v716_v50, 6  ;;  %v721_v57 = vrot.slane %v719_v11, 7  ;;  %v725_v58 = vshll.u32 %v665_v48, 16 }
  0xa1   : > { %v681_v54 = vrot.slane %v680_v47, 2  ;;  %v685_v60 = vrot.slane %v683_v7, 7  ;;  %v704_v61 = vrot.slane %v702_v53, 6  ;;  %v707_v63 = vrot.slane %v705_v12, 7 }
  0xa2   : > { %v711_v0 = vshll.u32 %v657_v52, 16  ;;  %v263_v9 = vpop.permute.xlu1 %262  ;;  %v261_v10 = vpop.permute.xlu0 %260  ;;  %v699_v46 = vrot.slane %v697_v41, 7  ;;  %v722_v13 = vor.u32 %v721_v57, %v718_v56  ;;  %v727_v17 = vrot.slane %v725_v58, 7  ;;  %v1860_v56 = vld [vmem:[%s2361_s1 + $0xd0] sm:$0xff]  }
  0xa3   : > { %v708_v14 = vor.u32 %v707_v63, %v704_v61  ;;  %v686_v15 = vsel %vm2197_vm10, %v681_v54, %v685_v60  ;;  %v338_v32 = vsel %vm332_vm1, %v200_v21, %v259_v42  ;;  %v335_v33 = vsel %vm332_vm1, %v199_v22, %v257_v43  ;;  %v1859_v42 = vld [vmem:[%s2361_s1 + $0xc8] sm:$0xff]   ;;  %v1862_v63 = vld [vmem:[%s2361_s1 + $0x80] sm:$0xff]  }
  0xa4   : > { %v723_v16 = vrot.slane %v722_v13, 2  ;;  %v700_v18 = vsel %vm2197_vm10, %v695_v51, %v699_v46  ;;  %v713_v44 = vrot.slane %v711_v0, 7  ;;  %v344_v43 = vsel %vm332_vm1, %v202_v35, %v263_v9  ;;  %v1861_v9 = vld [vmem:[%s2361_s1 + $0xd8] sm:$0xff]   ;;  %v1864_v13 = vld [vmem:[%s2361_s1 + $0x88] sm:$0xff]  }
  0xa5   : > { %v709_v19 = vrot.slane %v708_v14, 2  ;;  %v746_v49 = vcombine.low %v686_v15, %v700_v18  ;;  %v341_v47 = vsel %vm332_vm1, %v201_v37, %v261_v10  ;;  %v1863_v14 = vld [vmem:[%s2361_s1 + $0xe0] sm:$0xff]   ;;  %v1865_v18 = vld [vmem:[%s2361_s1 + $0xe8] sm:$0xff]  }
  0xa6   : > { %v279_v36 = vpop.permute.xlu1 %278  ;;  %v277_v62 = vpop.permute.xlu0 %276  ;;  %v728_v2 = vsel %vm2197_vm10, %v723_v16, %v727_v17  ;;  %v1866_v17 = vld [vmem:[%s2361_s1 + $0x90] sm:$0xff]  }
  0xa7   : > { %v714_v45 = vsel %vm2197_vm10, %v709_v19, %v713_v44  ;;  %v754_v27 = vrot.slane %v746_v49, %v2177_v55  ;;  %v349_v38 = vsel %vm345_vm2, %v338_v32, %v279_v36  ;;  %v347_v39 = vsel %vm345_vm2, %v335_v33, %v277_v62  ;;  %v1868_v36 = vld [vmem:[%s2361_s1 + $0x98] sm:$0xff]   ;;  %v1867_v62 = vld [vmem:[%s2361_s1 + $0xf0] sm:$0xff]  }
  0xa8   : > { %v747_v20 = vcombine.low %v714_v45, %v728_v2 }
  0xaa   : > { %v283_v23 = vpop.permute.xlu1 %282  ;;  %v281_v26 = vpop.permute.xlu0 %280  ;;  %v761_v28 = vrot.slane %v747_v20, %v2177_v55 }
  0xab   : > { %v353_v48 = vsel %vm345_vm2, %v344_v43, %v283_v23  ;;  %v351_v50 = vsel %vm345_vm2, %v341_v47, %v281_v26 }
  0xac   : > { %v762_v34 = vcombine.low %v754_v27, %v761_v28 }
  0xae   : > { %v327_v40 = vpop.permute.xlu1 %326  ;;  %v325_v6 = vpop.permute.xlu0 %324  ;;  %1750 = vmatmul.mubr.bf16.vlgmr.msra.gmra.mrb[0].mxu1 %v762_v34 }
  0xaf   : > { %v358_v41 = vsel %vm354_vm3, %v349_v38, %v327_v40  ;;  %v356_v7 = vsel %vm354_vm3, %v347_v39, %v325_v6  ;;  %1774 = vmatpush3.bf16.msra.mxu1 %v1858_v29  ;;  %1789 = vmatprep.mubr.msk.bf16.mxu1 %vm1886_vm0, %v1882_v1 }
  0xb0   : > { %1775 = vmatprep.subr.bf16.mxu1 %v1882_v1  ;;  %v383_v11 = vcombine.low %v356_v7, %v358_v41 }
  0xb2   : > { %v331_v51 = vpop.permute.xlu1 %330  ;;  %v329_v52 = vpop.permute.xlu0 %328  ;;  %v391_v57 = vrot.slane %v383_v11, %v2177_v55 }
  0xb3   : > { %v362_v53 = vsel %vm354_vm3, %v353_v48, %v331_v51  ;;  %v360_v12 = vsel %vm354_vm3, %v351_v50, %v329_v52  ;;  %1776 = vmatpush3.bf16.msra.mxu1 %v1859_v42  ;;  %v1871_v42 = vld [vmem:[%s2361_s1 + $0xa8] sm:$0xff]  }
  0xb4   : > { %v384_v54 = vcombine.low %v360_v12, %v362_v53  ;;  %1777 = vmatprep.subr.bf16.mxu1 %v1882_v1 }
  0xb6   : > { %v398_v58 = vrot.slane %v384_v54, %v2177_v55  ;;  %v1101_v60 = vpop.permute.xlu1 %1100  ;;  %v1099_v61 = vpop.permute.xlu0 %1098 }
  0xb7   : > { %1778 = vmatpush3.bf16.msra.mxu1 %v1860_v56  ;;  %v1167_v2 = vsel %vm332_vm1, %v1941_v3, %v1101_v60  ;;  %v1164_v49 = vsel %vm332_vm1, %v1944_v4, %v1099_v61  ;;  %v1870_v3 = vld [vmem:[%s2361_s1 + $0xa0] sm:$0xff]  }
  0xb8   : > { %v399_v0 = vcombine.low %v391_v57, %v398_v58  ;;  %1779 = vmatprep.subr.bf16.mxu1 %v1882_v1 }
  0xba   : > { %v1105_v10 = vpop.permute.xlu1 %1104  ;;  %v1103_v46 = vpop.permute.xlu0 %1102  ;;  %1730 = vmatmul.mubr.bf16.vlgmr.msra.gmra.mrb[0].mxu0 %v399_v0 }
  0xbb   : > { %1754 = vmatpush3.bf16.msra.mxu0 %v1862_v63  ;;  %1769 = vmatprep.mubr.msk.bf16.mxu0 %vm1886_vm0, %v1882_v1  ;;  %v1173_v23 = vsel %vm332_vm1, %v1947_v5, %v1105_v10  ;;  %v1170_v4 = vsel %vm332_vm1, %v1958_v8, %v1103_v46  ;;  %v1869_v5 = vld [vmem:[%s2361_s1 + $0xf8] sm:$0xff]   ;;  %v1872_v63 = vld [vmem:[%s2361_s1 + $0xb0] sm:$0xff]  }
  0xbc   : > { %1780 = vmatpush3.bf16.msra.mxu1 %v1861_v9  ;;  %1755 = vmatprep.subr.bf16.mxu0 %v1882_v1 }
  0xbd   : > { %1781 = vmatprep.subr.bf16.mxu1 %v1882_v1 }
  0xbe   : > { %v1109_v15 = vpop.permute.xlu1 %1108  ;;  %v1107_v16 = vpop.permute.xlu0 %1106 }
  0xbf   : > { %1756 = vmatpush3.bf16.msra.mxu0 %v1864_v13  ;;  %v1177_v45 = vsel %vm345_vm2, %v1167_v2, %v1109_v15  ;;  %v1175_v20 = vsel %vm345_vm2, %v1164_v49, %v1107_v16 }
  0xc0   : > { %1782 = vmatpush3.bf16.msra.mxu1 %v1863_v14  ;;  %1757 = vmatprep.subr.bf16.mxu0 %v1882_v1 }
  0xc1   : > { %1783 = vmatprep.subr.bf16.mxu1 %v1882_v1 }
  0xc2   : > { %v1113_v19 = vpop.permute.xlu1 %1112  ;;  %v1111_v44 = vpop.permute.xlu0 %1110 }
  0xc3   : > { %1758 = vmatpush3.bf16.msra.mxu0 %v1866_v17  ;;  %v1181_v32 = vsel %vm345_vm2, %v1173_v23, %v1113_v19  ;;  %v1179_v33 = vsel %vm345_vm2, %v1170_v4, %v1111_v44 }
  0xc4   : > { %1784 = vmatpush3.bf16.msra.mxu1 %v1865_v18  ;;  %1759 = vmatprep.subr.bf16.mxu0 %v1882_v1 }
  0xc5   : > { %1785 = vmatprep.subr.bf16.mxu1 %v1882_v1 }
  0xc6   : > { %v1157_v21 = vpop.permute.xlu1 %1156  ;;  %v1155_v22 = vpop.permute.xlu0 %1154 }
  0xc7   : > { %v1185_v26 = vsel %vm354_vm3, %v1177_v45, %v1157_v21  ;;  %v1183_v27 = vsel %vm354_vm3, %v1175_v20, %v1155_v22  ;;  %1760 = vmatpush3.bf16.msra.mxu0 %v1868_v36  ;;  %v1873_v45 = vld [vmem:[%s2361_s1 + $0xb8] sm:$0xff]  }
  0xc8   : > { %v1208_v28 = vrot.slane %v1185_v26, %v2177_v55  ;;  %v1200_v29 = vrot.slane %v1183_v27, %v2177_v55  ;;  %1786 = vmatpush3.bf16.msra.mxu1 %v1867_v62  ;;  %1761 = vmatprep.subr.bf16.mxu0 %v1882_v1 }
  0xc9   : > { %1787 = vmatprep.subr.bf16.mxu1 %v1882_v1 }
  0xca   : > { %v1209_v34 = vcombine.high %v1208_v28, %v1208_v28  ;;  %v1241_v35 = vshrl.u32 %v1208_v28, 16  ;;  %v1244_v8 = vshll.u32 %v1208_v28, 16  ;;  %v1201_v37 = vcombine.high %v1200_v29, %v1200_v29  ;;  %v1161_v38 = vpop.permute.xlu1 %1160  ;;  %v1159_v39 = vpop.permute.xlu0 %1158 }
  0xcb   : > { %v1227_v40 = vshrl.u32 %v1200_v29, 16  ;;  %v1230_v6 = vshll.u32 %v1200_v29, 16  ;;  %v1189_v41 = vsel %vm354_vm3, %v1181_v32, %v1161_v38  ;;  %v1187_v7 = vsel %vm354_vm3, %v1179_v33, %v1159_v39  ;;  %1762 = vmatpush3.bf16.msra.mxu0 %v1870_v3 }
  0xcc   : > { %v1243_v43 = vrot.slane %v1241_v35, 6  ;;  %v1246_v47 = vrot.slane %v1244_v8, 7  ;;  %1788 = vmatpush3.bf16.msra.mxu1 %v1869_v5  ;;  %1763 = vmatprep.subr.bf16.mxu0 %v1882_v1  ;;  %v1224_v11 = vrot.slane %v1189_v41, %v2177_v55  ;;  %v1216_v51 = vrot.slane %v1187_v7, %v2177_v55 }
  0xcd   : > { %v1229_v48 = vrot.slane %v1227_v40, 6  ;;  %v1232_v50 = vrot.slane %v1230_v6, 7  ;;  %v1250_v53 = vshll.u32 %v1209_v34, 16  ;;  %v1236_v12 = vshll.u32 %v1201_v37, 16 }
  0xce   : > { %v1247_v52 = vor.u32 %v1246_v47, %v1243_v43  ;;  %v865_v54 = vpop.permute.xlu1 %864  ;;  %v863_v56 = vpop.permute.xlu0 %862  ;;  %v1225_v58 = vcombine.high %v1224_v11, %v1224_v11  ;;  %v1269_v60 = vshrl.u32 %v1224_v11, 16  ;;  %v1272_v61 = vshll.u32 %v1224_v11, 16 }
  0xcf   : > { %v1233_v57 = vor.u32 %v1232_v50, %v1229_v48  ;;  %1764 = vmatpush3.bf16.msra.mxu0 %v1871_v42  ;;  %v1217_v9 = vcombine.high %v1216_v51, %v1216_v51  ;;  %v1255_v10 = vshrl.u32 %v1216_v51, 16  ;;  %v1258_v46 = vshll.u32 %v1216_v51, 16 }
  0xd0   : > { %v1248_v0 = vrot.slane %v1247_v52, 2  ;;  %1765 = vmatprep.subr.bf16.mxu0 %v1882_v1  ;;  %v1271_v14 = vrot.slane %v1269_v60, 6  ;;  %v1274_v15 = vrot.slane %v1272_v61, 7  ;;  %v1278_v16 = vshll.u32 %v1225_v58, 16 }
  0xd1   : > { %v1234_v13 = vrot.slane %v1233_v57, 2  ;;  %v1238_v17 = vrot.slane %v1236_v12, 7  ;;  %v1257_v18 = vrot.slane %v1255_v10, 6  ;;  %v1260_v19 = vrot.slane %v1258_v46, 7 }
  0xd2   : > { %v1264_v44 = vshll.u32 %v1217_v9, 16  ;;  %v869_v36 = vpop.permute.xlu1 %868  ;;  %v867_v62 = vpop.permute.xlu0 %866  ;;  %v1252_v2 = vrot.slane %v1250_v53, 7  ;;  %v1275_v49 = vor.u32 %v1274_v15, %v1271_v14  ;;  %v1280_v23 = vrot.slane %v1278_v16, 7 }
  0xd3   : > { %1766 = vmatpush3.bf16.msra.mxu0 %v1872_v63  ;;  %v1261_v20 = vor.u32 %v1260_v19, %v1257_v18  ;;  %v1239_v21 = vsel %vm2197_vm10, %v1234_v13, %v1238_v17  ;;  %v943_v37 = vsel %vm332_vm1, %v2044_v24, %v865_v54  ;;  %v940_v38 = vsel %vm332_vm1, %v2047_v25, %v863_v56 }
  0xd4   : > { %1767 = vmatprep.subr.bf16.mxu0 %v1882_v1  ;;  %v1276_v22 = vrot.slane %v1275_v49, 2  ;;  %v1253_v26 = vsel %vm2197_vm10, %v1248_v0, %v1252_v2  ;;  %v1266_v3 = vrot.slane %v1264_v44, 7  ;;  %v949_v43 = vsel %vm332_vm1, %v2058_v30, %v869_v36 }
  0xd5   : > { %v1262_v27 = vrot.slane %v1261_v20, 2  ;;  %v1299_v5 = vcombine.low %v1239_v21, %v1253_v26  ;;  %v946_v24 = vsel %vm332_vm1, %v2061_v31, %v867_v62  ;;  %v1672_v62 = vld [vmem:[%s2362_s2] ss:$0 sm:$0xff] }
  0xd6   : > { %v885_v4 = vpop.permute.xlu1 %884  ;;  %v883_v28 = vpop.permute.xlu0 %882  ;;  %v1281_v29 = vsel %vm2197_vm10, %v1276_v22, %v1280_v23  ;;  %v1673_v20 = vld [vmem:[%s2363_s3] ss:$0 sm:$0xff] }
  0xd7   : > { %1768 = vmatpush3.bf16.msra.mxu0 %v1873_v45  ;;  %v1267_v32 = vsel %vm2197_vm10, %v1262_v27, %v1266_v3  ;;  %v1307_v35 = vrot.slane %v1299_v5, %v2177_v55  ;;  %v953_v40 = vsel %vm345_vm2, %v943_v37, %v885_v4  ;;  %v951_v6 = vsel %vm345_vm2, %v940_v38, %v883_v28 }
  0xd8   : > { %v1300_v33 = vcombine.low %v1267_v32, %v1281_v29 }
  0xda   : > { %v889_v34 = vpop.permute.xlu1 %888  ;;  %v887_v1 = vpop.permute.xlu0 %886  ;;  %v1314_v8 = vrot.slane %v1300_v33, %v2177_v55 }
  0xdb   : > { %v957_v25 = vsel %vm345_vm2, %v949_v43, %v889_v34  ;;  %v955_v47 = vsel %vm345_vm2, %v946_v24, %v887_v1 }
  0xdc   : > { %v1315_v39 = vcombine.low %v1307_v35, %v1314_v8 }
  0xde   : > { %v933_v59 = vpop.permute.xlu1 %932  ;;  %v931_v41 = vpop.permute.xlu0 %930  ;;  %1790 = vmatmul.mubr.bf16.vlgmr.msra.gmra.mrb[4].mxu1 %v1315_v39 }
  0xdf   : > { %v961_v7 = vsel %vm354_vm3, %v953_v40, %v933_v59  ;;  %v959_v42 = vsel %vm354_vm3, %v951_v6, %v931_v41 }
  0xe0   : > { %v987_v48 = vcombine.low %v959_v42, %v961_v7 }
  0xe2   : > { %v937_v50 = vpop.permute.xlu1 %936  ;;  %v935_v11 = vpop.permute.xlu0 %934  ;;  %v995_v12 = vrot.slane %v987_v48, %v2177_v55 }
  0xe3   : > { %v965_v51 = vsel %vm354_vm3, %v957_v25, %v937_v50  ;;  %v963_v52 = vsel %vm354_vm3, %v955_v47, %v935_v11 }
  0xe4   : > { %v988_v53 = vcombine.low %v963_v52, %v965_v51 }
  0xe6   : > { %v1002_v54 = vrot.slane %v988_v53, %v2177_v55 }
  0xe8   : > { %v1003_v30 = vcombine.low %v995_v12, %v1002_v54 }
  0xea   : > { %1770 = vmatmul.mubr.bf16.vlgmr.msra.gmra.mrb[4].mxu0 %v1003_v30 }
 0x181   : > { %v846_v56 = vpop.f32.mrb[0].mxu1 }
 0x182   : > { %v1751_v31 = vpop.f32.mrb[1].mxu1  ;;  %1408 = vrot.lane.b32.xlu0 %v846_v56, %s1888_s18 }
 0x183   : > { %v849_v57 = vpop.f32.mrb[2].mxu1 }
 0x184   : > { %1410 = vrot.lane.b32.xlu1 %v849_v57, %s1888_s18  ;;  %v1752_v58 = vpop.f32.mrb[3].mxu1 }
 0x18d   : > { %v483_v60 = vpop.f32.mrb[0].mxu0 }
 0x18e   : > { %v1731_v61 = vpop.f32.mrb[1].mxu0 }
 0x18f   : > { %v486_v63 = vpop.f32.mrb[2].mxu0 }
 0x190   : > { %v1732_v0 = vpop.f32.mrb[3].mxu0 }
 0x1b1   : > { %v1399_v9 = vpop.f32.mrb[4].mxu1 }
 0x1b2   : > { %v1791_v10 = vpop.f32.mrb[5].mxu1 }
 0x1b3   : > { %v1402_v46 = vpop.f32.mrb[6].mxu1 }
 0x1b4   : > { %v1792_v13 = vpop.f32.mrb[7].mxu1 }
 0x1bd   : > { %v1087_v14 = vpop.f32.mrb[4].mxu0 }
 0x1be   : > { %1416 = vrot.lane.b32.xlu0 %v1087_v14, %s1884_s26  ;;  %v1771_v55 = vpop.f32.mrb[5].mxu0 }
 0x1bf   : > { %v1090_v15 = vpop.f32.mrb[6].mxu0 }
 0x1c0   : > { %1418 = vrot.lane.b32.xlu1 %v1090_v15, %s1884_s26  ;;  %v1772_v16 = vpop.f32.mrb[7].mxu0 }
 0x1c2   : > { %1424 = vrot.lane.b32.xlu0 %v1399_v9, %s1889_s19 }
 0x1c4   : > { %1426 = vrot.lane.b32.xlu1 %v1402_v46, %s1889_s19 }
 0x1f4   : > { %v1409_v17 = vpop.permute.xlu0 %1408 }
 0x1f5   : > { %v1431_v36 = vsel %vm1430_vm11, %v483_v60, %v1409_v17 }
 0x1f6   : > { %v1411_v18 = vpop.permute.xlu1 %1410 }
 0x1f7   : > { %v1432_v45 = vsel %vm1430_vm11, %v486_v63, %v1411_v18 }
 0x230   : > { %v1417_v19 = vpop.permute.xlu0 %1416 }
 0x231   : > { %v1433_v2 = vsel %vm332_vm1, %v1431_v36, %v1417_v19 }
 0x232   : > { %v1419_v44 = vpop.permute.xlu1 %1418 }
 0x233   : > { %v1434_v22 = vsel %vm332_vm1, %v1432_v45, %v1419_v44 }
 0x234   : > { %v1425_v49 = vpop.permute.xlu0 %1424 }
 0x235   : > { %v1436_v21 = vsel %vm1435_vm12, %v1433_v2, %v1425_v49 }
 0x236   : > { %v1445_v23 = vmul.f32 %v1672_v62, %v1436_v21  ;;  %v1427_v26 = vpop.permute.xlu1 %1426 }
 0x237   : > { %v1437_v27 = vsel %vm1435_vm12, %v1434_v22, %v1427_v26 }
 0x238   : > { %v1454_v3 = vadd.f32 %v1673_v20, %v1445_v23  ;;  %v1446_v4 = vmul.f32 %v1672_v62, %v1437_v27 }
 0x23a   : > { %v1456_v28 = vmax.f32 %v1454_v3, 0.0  ;;  %v1455_v29 = vadd.f32 %v1673_v20, %v1446_v4 }
 0x23c   : > { %v1460_v5 = vcombine.high %v1456_v28, %v1456_v28  ;;  %v1464_v32 = vpack.c.bf16 %v1456_v28, %v1456_v28  ;;  %v1457_v33 = vmax.f32 %v1455_v29, 0.0 }
 0x23e   : > { %v1465_v34 = vpack.c.bf16 %v1460_v5, %v1460_v5  ;;  %1469 = vst.msk [vmem:[%s197_s29] sm:$0x3] %vm1468_vm13, %v1464_v32  ;;  %v1461_v1 = vcombine.high %v1457_v33, %v1457_v33  ;;  %v1466_v35 = vpack.c.bf16 %v1457_v33, %v1457_v33 }
 0x240   : > { %1470 = vst.msk [vmem:[%s197_s29 + $0x2] sm:$0x3] %vm1468_vm13, %v1465_v34  ;;  %v1467_v8 = vpack.c.bf16 %v1461_v1, %v1461_v1  ;;  %1471 = vst.msk [vmem:[%s197_s29 + $0x4] sm:$0x3] %vm1468_vm13, %v1466_v35 }
 0x242   : > { %1472 = vst.msk [vmem:[%s197_s29 + $0x6] sm:$0x3] %vm1468_vm13, %v1467_v8 }
 0x243 PF: > { %s14_s15 = sadd.s32 1, %s1880_s15  }
 0x244   : > { %p11_p4 = scmp.ge.s32.totalorder %s14_s15, 4  }
 0x246   :  { %13 = sbr.rel (!%p11_p4) target bundleno = 1 (0x1), region = 71 }

// kernel: _forward_impl.6
= control target key start
LH: loop header
LB: loop body
LE: loop exit
PB: predicated region body
PF: predicated region fallthrough
CT: control target
= control target key end

     0   :  { %s2730_s15 = smov 0   ;;  %s3647_s0 = inlined_call_operand.vmem [shape: bf16[2,10,10,16], index: 0, kind: input, shape index: {}]   ;;  %s3648_s1 = inlined_call_operand.vmem [shape: bf16[4,64,8], index: 1, kind: input, shape index: {}]   ;;  %s3649_s2 = inlined_call_operand.vmem [shape: f32[1,32], index: 2, kind: input, shape index: {}]   ;;  %s3650_s3 = inlined_call_operand.vmem [shape: f32[1,32], index: 3, kind: input, shape index: {}]   ;;  %s3651_s4 = inlined_call_operand.vmem [shape: bf16[2,8,8,32], index: 4, kind: output, shape index: {}]  }
   0x1 LB: > { %s2263_s16 = sadd.s32 4294967295, %s2698_s15   ;;  %p2267_p0 = scmp.ge.s32.totalorder %s2698_s15, 1  ;;  %s2698_s15 = sphi %s2730_s15, %s14_s15  }
   0x2   : > { %p162_p1 = scmp.lt.s32.totalorder %s2698_s15, 3 }
   0x4   : > { %p163_p2 = pnand %p2267_p0, %p162_p1 }
   0x6   : > { %166 = sbr.rel (%p163_p2) target bundleno = 689 (0x2b1), region = 36 }
   0xd   : > { %p188_p3 = scmp.lt.s32.totalorder %s2263_s16, 1  ;;  %s2700_s21 = smov 32   ;;  %v2654_v35 = vld [vmem:[%s3648_s1 + $0x20] sm:$0xff]   ;;  %v2659_v62 = vld [vmem:[%s3648_s1 + $0x28] sm:$0xff]   ;;  %vm480_vm0 = vcmask 130048   ;;  %vm505_vm1 = vcmask 261120  }
   0xe   : > { %2540 = vmatprep.subr.bf16.mxu1 %v2654_v35  ;;  %s2701_s24 = smov 16   ;;  %s2702_s29 = smov 48   ;;  %vm522_vm2 = vcmask 392192   ;;  %vm981_vm3 = vsmask.f32 3328  ;;  %vm591_vm5 = vcmask 523264  }
   0xf   : > { %s3681_s16 = smov (!%p188_p3, %s2263_s16), 1  ;;  %2541 = vmatpush3.bf16.msra.mxu1 %v2654_v35  ;;  %vm982_vm4 = vsmask.f32 7440  ;;  %vm2127_vm7 = vcmask 64512   ;;  %vm2144_vm8 = vcmask 195584   ;;  %vm2199_vm9 = vcmask 257024  }
  0x10   : > { %s2588_s17 = smul.u32 80, %s3681_s16  ;;  %2542 = vmatprep.subr.bf16.mxu1 %v2659_v62  ;;  %vm3231_vm6 = vmor %vm981_vm3, %vm982_vm4  ;;  %s2491_s12 = sshll.u32 %s3681_s16, 5 }
  0x11   : > { %s3603_s14 = scalar_lea.vmem %s3651_s4, %s2491_s12 }
  0x12   : > { %s2744_s20 = scalar_lea.vmem %s3647_s0, %s2588_s17 }
  0x13   : > { %v2747_v0 = vld [vmem:[%s2744_s20 + $0x10] sm:$0xf]  ;;  %v2280_v1 = vld [vmem:[%s2744_s20 + $0x14] sm:$0x1]  ;;  %v2751_v2 = vld [vmem:[%s2744_s20 + $0x8] sm:$0xf]  ;;  %2543 = vmatpush3.bf16.msra.mxu1 %v2659_v62 }
  0x14   : > { %v2754_v3 = vcombine.low %v2747_v0, %v2280_v1  ;;  %v2279_v4 = vld [vmem:[%s2744_s20 + $0xc] sm:$0x1]  ;;  %v2758_v5 = vld [vmem:[%s2744_s20 + $0x20] sm:$0xf]  ;;  %v2282_v6 = vld [vmem:[%s2744_s20 + $0x24] sm:$0x1] }
  0x15   : > { %v2762_v7 = vcombine.low %v2751_v2, %v2279_v4  ;;  %v2765_v8 = vld [vmem:[%s2744_s20 + $0x18] sm:$0xf]  ;;  %v2281_v9 = vld [vmem:[%s2744_s20 + $0x1c] sm:$0x1]  ;;  %v2769_v10 = vld [vmem:[%s2744_s20 + $0x14] sm:$0x1]  ;;  %v2774_v11 = vcombine.low %v2758_v5, %v2282_v6 }
  0x16   : > { %783 = vrot.lane.b32.xlu1 %v2754_v3, %s2700_s21  ;;  %v671_v12 = vld [vmem:[%s2744_s20 + $0x10] sm:$0xe]  ;;  %v2778_v13 = vld [vmem:[%s2744_s20 + $0x4] sm:$0x1]  ;;  %v2783_v14 = vcombine.low %v2765_v8, %v2281_v9  ;;  %v669_v16 = vld [vmem:[%s2744_s20] sm:$0xe] }
  0x17   : > { %781 = vrot.lane.b32.xlu0 %v2762_v7, %s2700_s21  ;;  %v2333_v15 = vcombine.low %v671_v12, %v2769_v10  ;;  %v2788_v17 = vld [vmem:[%s2744_s20 + $0x1c] sm:$0x1]  ;;  %v2331_v18 = vcombine.low %v669_v16, %v2778_v13  ;;  %v672_v19 = vld [vmem:[%s2744_s20 + $0x18] sm:$0xe]  ;;  %v2793_v20 = vld [vmem:[%s2744_s20 + $0xc] sm:$0x1] }
  0x18   : > { %v2334_v23 = vcombine.low %v672_v19, %v2788_v17  ;;  %v670_v24 = vld [vmem:[%s2744_s20 + $0x8] sm:$0xe]  ;;  %v2324_v28 = vld [vmem:[%s2744_s20 + $0x10] sm:$0xe]  ;;  %v2326_v34 = vld [vmem:[%s2744_s20 + $0x20] sm:$0xe] }
  0x19   : > { %v724_v21 = vshrl.u32 %v2333_v15, 16  ;;  %v726_v22 = vshll.u32 %v2333_v15, 16  ;;  %v710_v25 = vshrl.u32 %v2331_v18, 16  ;;  %v712_v26 = vshll.u32 %v2331_v18, 16  ;;  %v2323_v29 = vld [vmem:[%s2744_s20 + $0x8] sm:$0xe] }
  0x1a   : > { %787 = vrot.lane.b32.xlu1 %v2774_v11, %s2700_s21  ;;  %v2332_v27 = vcombine.low %v670_v24, %v2793_v20  ;;  %v731_v31 = vshrl.u32 %v2334_v23, 16  ;;  %v733_v32 = vshll.u32 %v2334_v23, 16  ;;  %v2340_v33 = vcombine.low %v2324_v28, %v2280_v1  ;;  %v2325_v40 = vld [vmem:[%s2744_s20 + $0x18] sm:$0xe]  ;;  %v2810_v44 = vld [vmem:[%s2744_s20 + $0x2c] sm:$0x1] }
  0x1b   : > { %785 = vrot.lane.b32.xlu0 %v2783_v14, %s2700_s21  ;;  %v728_v30 = vrot.slane %v726_v22, 1  ;;  %v714_v36 = vrot.slane %v712_v26, 1  ;;  %v2339_v39 = vcombine.low %v2323_v29, %v2279_v4  ;;  %v674_v49 = vld [vmem:[%s2744_s20 + $0x28] sm:$0xe]  ;;  %v2342_v52 = vcombine.low %v2326_v34, %v2282_v6  ;;  %v2817_v58 = vld [vmem:[%s2744_s20 + $0x24] sm:$0x1] }
  0x1c   : > { %v717_v37 = vshrl.u32 %v2332_v27, 16  ;;  %v719_v38 = vshll.u32 %v2332_v27, 16  ;;  %v735_v42 = vrot.slane %v733_v32, 1  ;;  %v831_v43 = vshll.u32 %v2340_v33, 16  ;;  %v673_v59 = vld [vmem:[%s2744_s20 + $0x20] sm:$0xe] }
  0x1d   : > { %v729_v41 = vor.u32 %v728_v30, %v724_v21  ;;  %v715_v45 = vor.u32 %v714_v36, %v710_v25  ;;  %v829_v47 = vshrl.u32 %v2340_v33, 16  ;;  %v824_v48 = vshll.u32 %v2339_v39, 16  ;;  %v2821_v61 = vld [vmem:[%s2744_s20 + $0x3c] sm:$0x1]  ;;  %v676_v6 = vld [vmem:[%s2744_s20 + $0x38] sm:$0xe] }
  0x1e   : > { %v721_v46 = vrot.slane %v719_v38, 1  ;;  %v736_v50 = vor.u32 %v735_v42, %v731_v31  ;;  %v833_v51 = vrot.slane %v831_v43, 1  ;;  %v2341_v53 = vcombine.low %v2325_v40, %v2281_v9  ;;  %v2833_v18 = vld [vmem:[%s2744_s20 + $0x34] sm:$0x1]  ;;  %v675_v23 = vld [vmem:[%s2744_s20 + $0x30] sm:$0xe] }
  0x1f   : > { %769 = vrot.lane.b32.xlu1 %v729_v41, %s2701_s24  ;;  %765 = vrot.lane.b32.xlu0 %v715_v45, %s2701_s24  ;;  %v822_v55 = vshrl.u32 %v2339_v39, 16  ;;  %v826_v56 = vrot.slane %v824_v48, 1  ;;  %v2336_v57 = vcombine.low %v674_v49, %v2810_v44  ;;  %v845_v60 = vshll.u32 %v2342_v52, 16  ;;  %v2660_v25 = vld [vmem:[%s3648_s1 + $0x30] sm:$0xff]   ;;  %v200_v31 = vld [vmem:[%s2744_s20 + $0x8] sm:$0xf] }
  0x20   : > { %v722_v54 = vor.u32 %v721_v46, %v717_v37  ;;  %v2826_v63 = vor.u32 %v833_v51, %v829_v47  ;;  %v843_v1 = vshrl.u32 %v2342_v52, 16  ;;  %v838_v4 = vshll.u32 %v2341_v53, 16  ;;  %2544 = vmatprep.subr.bf16.mxu1 %v2660_v25  ;;  %v199_v36 = vld [vmem:[%s2744_s20] sm:$0xf]  ;;  %v2661_v37 = vld [vmem:[%s3648_s1 + $0x38] sm:$0xff]  }
  0x21   : > { %v847_v9 = vrot.slane %v845_v60, 1  ;;  %v747_v12 = vshll.u32 %v2336_v57, 16  ;;  %v2335_v15 = vcombine.low %v673_v59, %v2817_v58  ;;  %v2338_v16 = vcombine.low %v676_v6, %v2821_v61  ;;  %2545 = vmatpush3.bf16.msra.mxu1 %v2660_v25  ;;  %v2868_v47 = vld [vmem:[%s2744_s20 + $0x30] sm:$0xf]  ;;  %v2284_v49 = vld [vmem:[%s2744_s20 + $0x34] sm:$0x1] }
  0x22   : > { %v2836_v19 = vor.u32 %v826_v56, %v822_v55  ;;  %v836_v21 = vshrl.u32 %v2341_v53, 16  ;;  %v840_v22 = vrot.slane %v838_v4, 1  ;;  %v2337_v26 = vcombine.low %v675_v23, %v2833_v18  ;;  %2546 = vmatprep.subr.bf16.mxu1 %v2661_v37  ;;  %v2328_v51 = vld [vmem:[%s2744_s20 + $0x30] sm:$0xe]  ;;  %v2876_v52 = vld [vmem:[%s2744_s20 + $0x28] sm:$0xf] }
  0x23   : > { %771 = vrot.lane.b32.xlu1 %v736_v50, %s2701_s24  ;;  %767 = vrot.lane.b32.xlu0 %v722_v54, %s2701_s24  ;;  %v740_v24 = vshll.u32 %v2335_v15, 16  ;;  %v2845_v27 = vor.u32 %v847_v9, %v843_v1  ;;  %v745_v28 = vshrl.u32 %v2336_v57, 16  ;;  %v749_v29 = vrot.slane %v747_v12, 1  ;;  %v2283_v53 = vld [vmem:[%s2744_s20 + $0x2c] sm:$0x1] }
  0x24   : > { %v761_v30 = vshll.u32 %v2338_v16, 16  ;;  %v2850_v32 = vor.u32 %v840_v22, %v836_v21  ;;  %v738_v33 = vshrl.u32 %v2335_v15, 16  ;;  %v754_v35 = vshll.u32 %v2337_v26, 16  ;;  %v2327_v54 = vld [vmem:[%s2744_s20 + $0x28] sm:$0xe] }
  0x25   : > { %v742_v34 = vrot.slane %v740_v24, 1  ;;  %v2857_v38 = vcombine.low %v200_v31, %v2793_v20  ;;  %v750_v39 = vor.u32 %v749_v29, %v745_v28  ;;  %v759_v40 = vshrl.u32 %v2338_v16, 16  ;;  %2547 = vmatpush3.bf16.msra.mxu1 %v2661_v37  ;;  %v2886_v60 = vld [vmem:[%s2744_s20 + $0x18] sm:$0xf]  ;;  %v2894_v9 = vld [vmem:[%s2744_s20 + $0x10] sm:$0xf] }
  0x26   : > { %v763_v41 = vrot.slane %v761_v30, 1  ;;  %v2862_v42 = vcombine.low %v199_v36, %v2778_v13  ;;  %v752_v43 = vshrl.u32 %v2337_v26, 16  ;;  %v756_v45 = vrot.slane %v754_v35, 1  ;;  %v2903_v16 = vld [vmem:[%s2744_s20 + $0x40] sm:$0xf] }
  0x27   : > { %879 = vrot.lane.b32.xlu1 %v2826_v63, %s2702_s29  ;;  %877 = vrot.lane.b32.xlu0 %v2836_v19, %s2702_s29  ;;  %v743_v20 = vor.u32 %v742_v34, %v738_v33  ;;  %v282_v48 = vshll.u32 %v2857_v38, 16  ;;  %v2882_v55 = vcombine.low %v2868_v47, %v2284_v49  ;;  %v280_v56 = vshrl.u32 %v2857_v38, 16  ;;  %v2286_v21 = vld [vmem:[%s2744_s20 + $0x44] sm:$0x1]  ;;  %v2913_v25 = vld [vmem:[%s2744_s20 + $0x38] sm:$0xf] }
  0x28   : > { %v764_v46 = vor.u32 %v763_v41, %v759_v40  ;;  %v757_v13 = vor.u32 %v756_v45, %v752_v43  ;;  %v275_v50 = vshll.u32 %v2862_v42, 16  ;;  %v2344_v59 = vcombine.low %v2328_v51, %v2284_v49  ;;  %v2285_v26 = vld [vmem:[%s2744_s20 + $0x3c] sm:$0x1]  ;;  %v2330_v33 = vld [vmem:[%s2744_s20 + $0x40] sm:$0xe] }
  0x29   : > { %3660 = vst [vmem:[#allocation2_spill] sm:$0xff] %v2882_v55  ;;  %v284_v57 = vrot.slane %v282_v48, 1  ;;  %v2890_v62 = vcombine.low %v2876_v52, %v2283_v53  ;;  %v273_v1 = vshrl.u32 %v2862_v42, 16  ;;  %v2343_v6 = vcombine.low %v2327_v54, %v2283_v53  ;;  %v2329_v37 = vld [vmem:[%s2744_s20 + $0x38] sm:$0xe]  ;;  %v2667_v54 = vld [vmem:[%s3648_s1 + $0x8] sm:$0xff]  }
  0x2a   : > { %v277_v4 = vrot.slane %v275_v50, 1  ;;  %v2898_v12 = vcombine.low %v2886_v60, %v2788_v17  ;;  %v859_v22 = vshll.u32 %v2344_v59, 16  ;;  %v2908_v23 = vcombine.low %v2894_v9, %v2769_v10 }
  0x2b   : > { %883 = vrot.lane.b32.xlu1 %v2845_v27, %s2702_s29  ;;  %881 = vrot.lane.b32.xlu0 %v2850_v32, %s2702_s29  ;;  %3661 = vst [vmem:[#allocation3_spill] sm:$0xff] %v2890_v62  ;;  %v285_v15 = vor.u32 %v284_v57, %v280_v56  ;;  %v852_v17 = vshll.u32 %v2343_v6, 16  ;;  %v2917_v28 = vcombine.low %v2903_v16, %v2286_v21  ;;  %v857_v29 = vshrl.u32 %v2344_v59, 16 }
  0x2c   : > { %v278_v24 = vor.u32 %v277_v4, %v273_v1  ;;  %v861_v30 = vrot.slane %v859_v22, 1  ;;  %v850_v31 = vshrl.u32 %v2343_v6, 16  ;;  %v296_v10 = vshll.u32 %v2898_v12, 16 }
  0x2d   : > { %3662 = vst [vmem:[#allocation4_spill] sm:$0xff] %v2917_v28  ;;  %v2924_v34 = vcombine.low %v2913_v25, %v2285_v26  ;;  %v854_v35 = vrot.slane %v852_v17, 1  ;;  %v289_v36 = vshll.u32 %v2908_v23, 16  ;;  %v294_v40 = vshrl.u32 %v2898_v12, 16 }
  0x2e   : > { %v298_v41 = vrot.slane %v296_v10, 1  ;;  %v287_v45 = vshrl.u32 %v2908_v23, 16  ;;  %v2345_v48 = vcombine.low %v2329_v37, %v2285_v26  ;;  %v2296_v56 = vcombine.low %v2747_v0, %v2747_v0 }
  0x2f   : > { %775 = vrot.lane.b32.xlu1 %v750_v39, %s2701_s24  ;;  %773 = vrot.lane.b32.xlu0 %v743_v20, %s2701_s24  ;;  %3663 = vst [vmem:[#allocation5_spill] sm:$0xff] %v2924_v34  ;;  %v2930_v39 = vor.u32 %v861_v30, %v857_v29  ;;  %v2346_v20 = vcombine.low %v2330_v33, %v2286_v21  ;;  %v418_v0 = vshll.u32 %v2754_v3, 16  ;;  %v416_v26 = vshrl.u32 %v2754_v3, 16 }
  0x30   : > { %v2935_v43 = vor.u32 %v854_v35, %v850_v31  ;;  %v299_v49 = vor.u32 %v298_v41, %v294_v40  ;;  %v866_v53 = vshll.u32 %v2345_v48, 16  ;;  %v2295_v1 = vcombine.low %v2751_v2, %v2751_v2 }
  0x31   : > { %v873_v50 = vshll.u32 %v2346_v20, 16  ;;  %v871_v57 = vshrl.u32 %v2346_v20, 16  ;;  %v864_v4 = vshrl.u32 %v2345_v48, 16  ;;  %v411_v2 = vshll.u32 %v2762_v7, 16  ;;  %v3000_v48 = vld [vmem:[%s2744_s20 + $0x20] sm:$0xf] }
  0x32   : > { %v868_v6 = vrot.slane %v866_v53, 1  ;;  %v2298_v17 = vcombine.low %v2758_v5, %v2758_v5  ;;  %v420_v29 = vrot.slane %v418_v0, 1  ;;  %v432_v30 = vshll.u32 %v2774_v11, 16  ;;  %3665 = vst [vmem:[#allocation7_spill] sm:$0xff] %v3000_v48  ;;  %v2436_v53 = vld [vmem:[%s2744_s20 + $0x18] sm:$0xe] }
  0x33   : > { %779 = vrot.lane.b32.xlu1 %v764_v46, %s2701_s24  ;;  %777 = vrot.lane.b32.xlu0 %v757_v13, %s2701_s24  ;;  %v291_v46 = vrot.slane %v289_v36, 1  ;;  %v2666_v13 = vld [vmem:[%s3648_s1] sm:$0xff]   ;;  %v875_v59 = vrot.slane %v873_v50, 1  ;;  %v2297_v31 = vcombine.low %v2765_v8, %v2765_v8  ;;  %v409_v10 = vshrl.u32 %v2762_v7, 16  ;;  %v3017_v50 = vld [vmem:[%s2744_s20 + $0x18] sm:$0xf] }
  0x34   : > { %2524 = vmatprep.subr.bf16.mxu0 %v2666_v13  ;;  %v2962_v22 = vor.u32 %v868_v6, %v864_v4  ;;  %v413_v33 = vrot.slane %v411_v2, 1  ;;  %v425_v35 = vshll.u32 %v2783_v14, 16  ;;  %v2981_v5 = vor.u32 %v420_v29, %v416_v26  ;;  %v3037_v4 = vld [vmem:[%s2744_s20 + $0x38] sm:$0xf]  ;;  %v3046_v2 = vld [vmem:[%s2744_s20 + $0x30] sm:$0xf] }
  0x35   : > { %v292_v51 = vor.u32 %v291_v46, %v287_v45  ;;  %2525 = vmatpush3.bf16.msra.mxu0 %v2666_v13  ;;  %v2958_v21 = vor.u32 %v875_v59, %v871_v57  ;;  %v430_v36 = vshrl.u32 %v2774_v11, 16  ;;  %v434_v37 = vrot.slane %v432_v30, 1  ;;  %v2993_v45 = vld [vmem:[%s2744_s20 + $0x28] sm:$0xf]  ;;  %v2435_v57 = vld [vmem:[%s2744_s20 + $0x10] sm:$0xe] }
  0x36   : > { %2526 = vmatprep.subr.bf16.mxu0 %v2667_v54  ;;  %v2985_v8 = vor.u32 %v413_v33, %v409_v10  ;;  %v423_v40 = vshrl.u32 %v2783_v14, 16  ;;  %v427_v41 = vrot.slane %v425_v35, 1  ;;  %3664 = vst [vmem:[#allocation6_spill] sm:$0xff] %v2993_v45  ;;  %v3004_v13 = vcombine.low %v2993_v45, %v2810_v44  ;;  %v2392_v44 = vld [vmem:[%s2744_s20 + $0x1c] sm:$0x1]  ;;  %3666 = vst [vmem:[#allocation8_spill] sm:$0xff] %v3037_v4 }
  0x37   : > { %791 = vrot.lane.b32.xlu1 %v2882_v55, %s2700_s21  ;;  %789 = vrot.lane.b32.xlu0 %v2890_v62, %s2700_s21  ;;  %v2990_v20 = vor.u32 %v434_v37, %v430_v36  ;;  %v2444_v59 = vcombine.low %v2436_v53, %v2392_v44  ;;  %3667 = vst [vmem:[#allocation9_spill] sm:$0xff] %v3046_v2  ;;  %v3061_v30 = vld [vmem:[%s2744_s20 + $0x28] sm:$0xf]  ;;  %v3065_v10 = vld [vmem:[%s2744_s20 + $0x20] sm:$0xf] }
  0x38   : > { %v2997_v46 = vor.u32 %v427_v41, %v423_v40  ;;  %v3056_v26 = vcombine.low %v3046_v2, %v2833_v18  ;;  %v2393_v33 = vld [vmem:[%s2744_s20 + $0x24] sm:$0x1]  ;;  %v2438_v40 = vld [vmem:[%s2744_s20 + $0x28] sm:$0xe] }
  0x39   : > { %2527 = vmatpush3.bf16.msra.mxu0 %v2667_v54  ;;  %v3026_v54 = vld [vmem:[%s2744_s20 + $0x10] sm:$0xf]  ;;  %v1645_v36 = vshrl.u32 %v2444_v59, 16  ;;  %v3076_v41 = vcombine.low %v3065_v10, %v2393_v33 }
  0x3a   : > { %v317_v53 = vshll.u32 %v3056_v26, 16 }
  0x3b   : > { %330 = vrot.lane.b32.xlu1 %v285_v15, %s2701_s24  ;;  %328 = vrot.lane.b32.xlu0 %v278_v24, %s2701_s24  ;;  %v2670_v15 = vld [vmem:[%s3648_s1 + $0x10] sm:$0xff]   ;;  %v2673_v24 = vld [vmem:[%s3648_s1 + $0x18] sm:$0xff]  }
  0x3c   : > { %2528 = vmatprep.subr.bf16.mxu0 %v2670_v15 }
  0x3d   : > { %2529 = vmatpush3.bf16.msra.mxu0 %v2670_v15 }
  0x3e   : > { %2530 = vmatprep.subr.bf16.mxu0 %v2673_v24 }
  0x3f   : > { %795 = vrot.lane.b32.xlu1 %v2917_v28, %s2700_s21  ;;  %793 = vrot.lane.b32.xlu0 %v2924_v34, %s2700_s21 }
  0x41   : > { %2531 = vmatpush3.bf16.msra.mxu0 %v2673_v24  ;;  %v3050_v24 = vcombine.low %v3037_v4, %v2821_v61 }
  0x43   : > { %887 = vrot.lane.b32.xlu1 %v2930_v39, %s2702_s29  ;;  %885 = vrot.lane.b32.xlu0 %v2935_v43, %s2702_s29  ;;  %v324_v37 = vshll.u32 %v3050_v24, 16 }
  0x47   : > { %334 = vrot.lane.b32.xlu1 %v299_v49, %s2701_s24  ;;  %332 = vrot.lane.b32.xlu0 %v292_v51, %s2701_s24  ;;  %v3010_v49 = vcombine.low %v3000_v48, %v2817_v58  ;;  %v310_v51 = vshll.u32 %v3004_v13, 16 }
  0x49   : > { %v303_v58 = vshll.u32 %v3010_v49, 16  ;;  %v301_v15 = vshrl.u32 %v3010_v49, 16 }
  0x4b   : > { %370 = vrot.lane.b32.xlu1 %v2296_v56, %s2700_s21  ;;  %368 = vrot.lane.b32.xlu0 %v2295_v1, %s2700_s21  ;;  %v2391_v56 = vld [vmem:[%s2744_s20 + $0x14] sm:$0x1]  ;;  %v308_v1 = vshrl.u32 %v3004_v13, 16  ;;  %v305_v0 = vrot.slane %v303_v58, 1  ;;  %v2437_v58 = vld [vmem:[%s2744_s20 + $0x20] sm:$0xe] }
  0x4c   : > { %v3042_v6 = vcombine.low %v3026_v54, %v2391_v56 }
  0x4d   : > { %v306_v29 = vor.u32 %v305_v0, %v301_v15  ;;  %v315_v0 = vshrl.u32 %v3056_v26, 16 }
  0x4f   : > { %891 = vrot.lane.b32.xlu1 %v2958_v21, %s2702_s29  ;;  %889 = vrot.lane.b32.xlu0 %v2962_v22, %s2702_s29 }
  0x53   : > { %374 = vrot.lane.b32.xlu1 %v2298_v17, %s2700_s21  ;;  %372 = vrot.lane.b32.xlu0 %v2297_v31, %s2700_s21  ;;  %v2394_v31 = vld [vmem:[%s2744_s20 + $0x2c] sm:$0x1] }
  0x54   : > { %v3070_v35 = vcombine.low %v3061_v30, %v2394_v31 }
  0x57   : > { %466 = vrot.lane.b32.xlu1 %v2981_v5, %s2702_s29  ;;  %464 = vrot.lane.b32.xlu0 %v2985_v8, %s2702_s29 }
  0x5b   : > { %470 = vrot.lane.b32.xlu1 %v2990_v20, %s2702_s29  ;;  %468 = vrot.lane.b32.xlu0 %v2997_v46, %s2702_s29 }
  0x5f   : > { %1583 = vrot.lane.b32.xlu1 %v2826_v63, %s2701_s24  ;;  %1581 = vrot.lane.b32.xlu0 %v2836_v19, %s2701_s24  ;;  %v3033_v63 = vcombine.low %v3017_v50, %v2392_v44  ;;  %v312_v19 = vrot.slane %v310_v51, 1 }
  0x61   : > { %v313_v17 = vor.u32 %v312_v19, %v308_v1  ;;  %v326_v1 = vrot.slane %v324_v37, 1  ;;  %v2445_v19 = vcombine.low %v2437_v58, %v2393_v33  ;;  %v2300_v33 = vcombine.low %v2868_v47, %v2868_v47 }
  0x62   : > { %v2299_v37 = vcombine.low %v2876_v52, %v2876_v52  ;;  %v2302_v47 = vcombine.low %v2903_v16, %v2903_v16  ;;  %v458_v16 = vshrl.u32 %v2917_v28, 16 }
  0x63   : > { %1587 = vrot.lane.b32.xlu1 %v2845_v27, %s2701_s24  ;;  %1585 = vrot.lane.b32.xlu0 %v2850_v32, %s2701_s24  ;;  %v2443_v27 = vcombine.low %v2435_v57, %v2391_v56  ;;  %v1647_v32 = vshll.u32 %v2444_v59, 16  ;;  %v2446_v56 = vcombine.low %v2438_v40, %v2394_v31  ;;  %v322_v59 = vshrl.u32 %v3050_v24, 16 }
  0x64   : > { %v1652_v40 = vshrl.u32 %v2445_v19, 16 }
  0x65   : > { %v1640_v61 = vshll.u32 %v2443_v27, 16  ;;  %v1649_v18 = vrot.slane %v1647_v32, 1  ;;  %v1638_v51 = vshrl.u32 %v2443_v27, 16  ;;  %v319_v27 = vrot.slane %v317_v53, 1 }
  0x66   : > { %v327_v32 = vor.u32 %v326_v1, %v322_v59  ;;  %v446_v53 = vshll.u32 %v2882_v55, 16  ;;  %v460_v59 = vshll.u32 %v2917_v28, 16  ;;  %v2301_v1 = vcombine.low %v2913_v25, %v2913_v25 }
  0x67   : > { %1599 = vrot.lane.b32.xlu1 %v3033_v63, %s2700_s21  ;;  %1597 = vrot.lane.b32.xlu0 %v3042_v6, %s2700_s21  ;;  %v1642_v44 = vrot.slane %v1640_v61, 1  ;;  %v1650_v57 = vor.u32 %v1649_v18, %v1645_v36  ;;  %v320_v31 = vor.u32 %v319_v27, %v315_v0  ;;  %v1654_v61 = vshll.u32 %v2445_v19, 16 }
  0x68   : > { %v1659_v36 = vshrl.u32 %v2446_v56, 16  ;;  %v448_v52 = vrot.slane %v446_v53, 1  ;;  %v437_v19 = vshrl.u32 %v2890_v62, 16  ;;  %v453_v0 = vshll.u32 %v2924_v34, 16  ;;  %v2396_v53 = vld [vmem:[%s2744_s20 + $0x3c] sm:$0x1] }
  0x69   : > { %v1643_v15 = vor.u32 %v1642_v44, %v1638_v51  ;;  %v1656_v51 = vrot.slane %v1654_v61, 1  ;;  %v451_v25 = vshrl.u32 %v2924_v34, 16 }
  0x6b   : > { %338 = vrot.lane.b32.xlu1 %v313_v17, %s2701_s24  ;;  %336 = vrot.lane.b32.xlu0 %v306_v29, %s2701_s24  ;;  %v3089_v17 = vld [vmem:[%s3648_s1 + $0x60] sm:$0xff]   ;;  %v1661_v29 = vshll.u32 %v2446_v56, 16  ;;  %v1657_v58 = vor.u32 %v1656_v51, %v1652_v40  ;;  %v444_v56 = vshrl.u32 %v2882_v55, 16  ;;  %v2440_v51 = vld [vmem:[%s2744_s20 + $0x38] sm:$0xe] }
  0x6c   : > { %2572 = vmatprep.subr.bf16.mxu1 %v3089_v17 }
  0x6d   : > { %v1663_v18 = vrot.slane %v1661_v29, 1  ;;  %v3115_v27 = vor.u32 %v448_v52, %v444_v56  ;;  %v3150_v52 = vld [vmem:[%s2744_s20 + $0x30] sm:$0xf] }
  0x6f   : > { %1603 = vrot.lane.b32.xlu1 %v3070_v35, %s2700_s21  ;;  %1601 = vrot.lane.b32.xlu0 %v3076_v41, %s2700_s21  ;;  %v1664_v44 = vor.u32 %v1663_v18, %v1659_v36 }
  0x73   : > { %1695 = vrot.lane.b32.xlu1 %v1650_v57, %s2702_s29  ;;  %1693 = vrot.lane.b32.xlu0 %v1643_v15, %s2702_s29  ;;  %v439_v57 = vshll.u32 %v2890_v62, 16 }
  0x75   : > { %v441_v15 = vrot.slane %v439_v57, 1  ;;  %v2448_v57 = vcombine.low %v2440_v51, %v2396_v53 }
  0x77   : > { %342 = vrot.lane.b32.xlu1 %v327_v32, %s2701_s24  ;;  %340 = vrot.lane.b32.xlu0 %v320_v31, %s2701_s24  ;;  %v462_v32 = vrot.slane %v460_v59, 1  ;;  %v3119_v29 = vor.u32 %v441_v15, %v437_v19  ;;  %v455_v31 = vrot.slane %v453_v0, 1  ;;  %v3158_v19 = vld [vmem:[%s2744_s20 + $0x48] sm:$0xf]  ;;  %v2398_v15 = vld [vmem:[%s2744_s20 + $0x4c] sm:$0x1] }
  0x78   : > { %v2442_v0 = vld [vmem:[%s2744_s20 + $0x48] sm:$0xe]  ;;  %v1673_v62 = vshrl.u32 %v2448_v57, 16 }
  0x79   : > { %v3124_v61 = vor.u32 %v462_v32, %v458_v16  ;;  %v3128_v36 = vor.u32 %v455_v31, %v451_v25  ;;  %v1675_v16 = vshll.u32 %v2448_v57, 16  ;;  %v3168_v25 = vld [vmem:[%s2744_s20 + $0x40] sm:$0xf]  ;;  %v2397_v31 = vld [vmem:[%s2744_s20 + $0x44] sm:$0x1]  ;;  %v3183_v34 = vcombine.low %v2442_v0, %v2398_v15 }
  0x7a   : > { %v3186_v28 = vcombine.low %v3168_v25, %v2397_v31 }
  0x7b   : > { %378 = vrot.lane.b32.xlu1 %v2300_v33, %s2700_s21  ;;  %376 = vrot.lane.b32.xlu0 %v2299_v37, %s2700_s21 }
  0x7f   : > { %1699 = vrot.lane.b32.xlu1 %v1664_v44, %s2702_s29  ;;  %1697 = vrot.lane.b32.xlu0 %v1657_v58, %s2702_s29  ;;  %v2439_v44 = vld [vmem:[%s2744_s20 + $0x30] sm:$0xe]  ;;  %v3146_v58 = vld [vmem:[%s2744_s20 + $0x38] sm:$0xf] }
  0x83   : > { %382 = vrot.lane.b32.xlu1 %v2302_v47, %s2700_s21  ;;  %380 = vrot.lane.b32.xlu0 %v2301_v1, %s2700_s21  ;;  %v2395_v47 = vld [vmem:[%s2744_s20 + $0x34] sm:$0x1] }
  0x84   : > { %v2447_v59 = vcombine.low %v2439_v44, %v2395_v47  ;;  %v2441_v44 = vld [vmem:[%s2744_s20 + $0x40] sm:$0xe] }
  0x86   : > { %v1666_v55 = vshrl.u32 %v2447_v59, 16 }
  0x87   : > { %474 = vrot.lane.b32.xlu1 %v3115_v27, %s2702_s29  ;;  %472 = vrot.lane.b32.xlu0 %v3119_v29, %s2702_s29 }
  0x88   : > { %v784_v33 = vpop.permute.xlu1 %783 }
  0x89   : > { %v782_v18 = vpop.permute.xlu0 %781 }
  0x8b   : > { %478 = vrot.lane.b32.xlu1 %v3124_v61, %s2702_s29  ;;  %476 = vrot.lane.b32.xlu0 %v3128_v36, %s2702_s29 }
  0x8c   : > { %v3134_v37 = vpop.permute.xlu1 %787 }
  0x8d   : > { %v3136_v40 = vpop.permute.xlu0 %785 }
  0x8f   : > { %1591 = vrot.lane.b32.xlu1 %v2930_v39, %s2701_s24  ;;  %1589 = vrot.lane.b32.xlu0 %v2935_v43, %s2701_s24  ;;  %v3155_v39 = vcombine.low %v3146_v58, %v2396_v53  ;;  %v3163_v43 = vcombine.low %v3150_v52, %v2395_v47  ;;  %v3179_v47 = vcombine.low %v3158_v19, %v2398_v15 }
  0x91   : > { %v770_v56 = vpop.permute.xlu1 %769  ;;  %v766_v1 = vpop.permute.xlu0 %765 }
  0x92   : > { %v894_v53 = vsel %vm480_vm0, %v2862_v42, %v766_v1  ;;  %v1677_v42 = vrot.slane %v1675_v16, 1 }
  0x93   : > { %1595 = vrot.lane.b32.xlu1 %v2958_v21, %s2701_s24  ;;  %1593 = vrot.lane.b32.xlu0 %v2962_v22, %s2701_s24  ;;  %v1668_v21 = vshll.u32 %v2447_v59, 16  ;;  %v910_v48 = vsel %vm505_vm1, %v894_v53, %v782_v18 }
  0x95   : > { %v772_v32 = vpop.permute.xlu1 %771  ;;  %v768_v51 = vpop.permute.xlu0 %767  ;;  %v1670_v2 = vrot.slane %v1668_v21, 1 }
  0x96   : > { %v896_v22 = vsel %vm480_vm0, %v2857_v38, %v768_v51  ;;  %v3189_v51 = vcombine.low %v2441_v44, %v2397_v31  ;;  %v900_v4 = vsel %vm480_vm0, %v2898_v12, %v772_v32  ;;  %v1678_v32 = vor.u32 %v1677_v42, %v1673_v62 }
  0x97   : > { %1607 = vrot.lane.b32.xlu1 %v3155_v39, %s2700_s21  ;;  %1605 = vrot.lane.b32.xlu0 %v3163_v43, %s2700_s21  ;;  %v912_v38 = vsel %vm505_vm1, %v896_v22, %v784_v33  ;;  %v898_v33 = vsel %vm480_vm0, %v2908_v23, %v770_v56  ;;  %v916_v23 = vsel %vm505_vm1, %v900_v4, %v3134_v37 }
  0x98   : > { %v1671_v56 = vor.u32 %v1670_v2, %v1666_v55  ;;  %v1680_v45 = vshrl.u32 %v3189_v51, 16 }
  0x99   : > { %v880_v1 = vpop.permute.xlu1 %879  ;;  %v878_v0 = vpop.permute.xlu0 %877 }
  0x9a   : > { %v928_v15 = vsel %vm522_vm2, %v912_v38, %v880_v1  ;;  %v926_v31 = vsel %vm522_vm2, %v910_v48, %v878_v0 }
  0x9b   : > { %v2349_v16 = vcombine.low %v928_v15, %v928_v15  ;;  %v2350_v22 = vcombine.high %v928_v15, %v928_v15  ;;  %1237 = vrot.lane.b32.xlu1 %v2981_v5, %s2701_s24  ;;  %v2347_v59 = vcombine.low %v926_v31, %v926_v31  ;;  %v2348_v12 = vcombine.high %v926_v31, %v926_v31 }
  0x9c   : > { %1235 = vrot.lane.b32.xlu0 %v2985_v8, %s2701_s24  ;;  %v914_v15 = vsel %vm505_vm1, %v898_v33, %v3136_v40 }
  0x9d   : > { %v999_v21 = vshrl.u32 %v2349_v16, 16  ;;  %v1002_v44 = vshll.u32 %v2349_v16, 16  ;;  %v884_v53 = vpop.permute.xlu1 %883  ;;  %v985_v48 = vshrl.u32 %v2347_v59, 16  ;;  %v988_v1 = vshll.u32 %v2347_v59, 16  ;;  %v882_v38 = vpop.permute.xlu0 %881 }
  0x9e   : > { %v932_v5 = vsel %vm522_vm2, %v916_v23, %v884_v53  ;;  %v1008_v42 = vshll.u32 %v2350_v22, 16  ;;  %v994_v4 = vshll.u32 %v2348_v12, 16  ;;  %v930_v40 = vsel %vm522_vm2, %v914_v15, %v882_v38  ;;  %v3224_v12 = vld [vmem:[%s3648_s1 + $0x40] sm:$0xff]  }
  0x9f   : > { %v1001_v8 = vrot.slane %v999_v21, 4  ;;  %v1004_v62 = vrot.slane %v1002_v44, 5  ;;  %v2353_v0 = vcombine.low %v932_v5, %v932_v5  ;;  %1611 = vrot.lane.b32.xlu1 %v3179_v47, %s2700_s21  ;;  %v987_v16 = vrot.slane %v985_v48, 4  ;;  %2556 = vmatprep.subr.bf16.mxu0 %v3224_v12 }
  0xa0   : > { %v990_v31 = vrot.slane %v988_v1, 5  ;;  %v2354_v55 = vcombine.high %v932_v5, %v932_v5  ;;  %1609 = vrot.lane.b32.xlu0 %v3186_v28, %s2700_s21  ;;  %v2351_v21 = vcombine.low %v930_v40, %v930_v40  ;;  %v2352_v44 = vcombine.high %v930_v40, %v930_v40 }
  0xa1   : > { %v1005_v2 = vor.u32 %v1004_v62, %v1001_v8  ;;  %v1027_v37 = vshrl.u32 %v2353_v0, 16  ;;  %v1030_v59 = vshll.u32 %v2353_v0, 16  ;;  %v3216_v33 = vpop.permute.xlu1 %775  ;;  %v3218_v53 = vpop.permute.xlu0 %773  ;;  %v1687_v23 = vshrl.u32 %v3183_v34, 16 }
  0xa2   : > { %v991_v22 = vor.u32 %v990_v31, %v987_v16  ;;  %v1689_v5 = vshll.u32 %v3183_v34, 16  ;;  %v1682_v38 = vshll.u32 %v3189_v51, 16  ;;  %v1010_v15 = vrot.slane %v1008_v42, 5 }
  0xa3   : > { %v1029_v48 = vrot.slane %v1027_v37, 4  ;;  %v1032_v1 = vrot.slane %v1030_v59, 5  ;;  %1703 = vrot.lane.b32.xlu1 %v1678_v32, %s2702_s29  ;;  %v1036_v62 = vshll.u32 %v2354_v55, 16  ;;  %v1013_v0 = vshrl.u32 %v2351_v21, 16 }
  0xa4   : > { %v1016_v16 = vshll.u32 %v2351_v21, 16  ;;  %1701 = vrot.lane.b32.xlu0 %v1671_v56, %s2702_s29  ;;  %v996_v31 = vrot.slane %v994_v4, 5  ;;  %v992_v34 = vrot.slane %v991_v22, 4  ;;  %v1006_v59 = vrot.slane %v1005_v2, 4 }
  0xa5   : > { %v1033_v32 = vor.u32 %v1032_v1, %v1029_v48  ;;  %v3237_v37 = vpop.permute.xlu1 %779  ;;  %v1015_v42 = vrot.slane %v1013_v0, 4  ;;  %v1022_v18 = vshll.u32 %v2352_v44, 16  ;;  %v3239_v57 = vpop.permute.xlu0 %777  ;;  %v1691_v21 = vrot.slane %v1689_v5, 1 }
  0xa6   : > { %v1018_v40 = vrot.slane %v1016_v16, 5  ;;  %v997_v56 = vsel %vm3231_vm6, %v992_v34, %v996_v31  ;;  %v1011_v4 = vsel %vm3231_vm6, %v1006_v59, %v1010_v15  ;;  %v1038_v22 = vrot.slane %v1036_v62, 5 }
  0xa7   : > { %v1034_v55 = vrot.slane %v1033_v32, 4  ;;  %1241 = vrot.lane.b32.xlu1 %v2990_v20, %s2701_s24  ;;  %v2371_v44 = vcombine.low %v997_v56, %v1011_v4  ;;  %v1684_v48 = vrot.slane %v1682_v38, 1  ;;  %v1024_v20 = vrot.slane %v1022_v18, 5 }
  0xa8   : > { %v1019_v2 = vor.u32 %v1018_v40, %v1015_v42  ;;  %1239 = vrot.lane.b32.xlu0 %v2997_v46, %s2701_s24  ;;  %v3670_v5 = vcombine.low %v3017_v50, %v3017_v50  ;;  %v1692_v15 = vor.u32 %v1691_v21, %v1687_v23  ;;  %v1325_v62 = vshll.u32 %v3033_v63, 16  ;;  %v2675_v50 = vld [vmem:[%s3648_s1 + $0x68] sm:$0xff]  }
  0xa9   : > { %v792_v1 = vpop.permute.xlu1 %791  ;;  %v1039_v51 = vsel %vm3231_vm6, %v1034_v55, %v1038_v22  ;;  %2548 = vmatprep.mubr.msk.bf16.mxu1 %vm591_vm5, %v2371_v44  ;;  %v790_v16 = vpop.permute.xlu0 %789  ;;  %v3671_v38 = vcombine.low %v3026_v54, %v3026_v54  ;;  %v1685_v18 = vor.u32 %v1684_v48, %v1680_v45  ;;  %v1318_v31 = vshll.u32 %v3042_v6, 16 }
  0xaa   : > { %v1020_v0 = vrot.slane %v1019_v2, 4  ;;  %v2402_v54 = vcombine.low %v3061_v30, %v3061_v30  ;;  %v1323_v45 = vshrl.u32 %v3033_v63, 16  ;;  %v1327_v59 = vrot.slane %v1325_v62, 1  ;;  %v2676_v63 = vld [vmem:[%s3648_s1 + $0x70] sm:$0xff]  }
  0xab   : > { %1277 = vrot.lane.b32.xlu1 %v3670_v5, %s2700_s21  ;;  %v1339_v42 = vshll.u32 %v3070_v35, 16  ;;  %v2401_v40 = vcombine.low %v3065_v10, %v3065_v10  ;;  %v1316_v55 = vshrl.u32 %v3042_v6, 16  ;;  %v1320_v56 = vrot.slane %v1318_v31, 1 }
  0xac   : > { %v1025_v46 = vsel %vm3231_vm6, %v1020_v0, %v1024_v20  ;;  %1275 = vrot.lane.b32.xlu0 %v3671_v38, %s2700_s21  ;;  %v1332_v4 = vshll.u32 %v3076_v41, 16  ;;  %v1328_v22 = vor.u32 %v1327_v59, %v1323_v45  ;;  %v1337_v10 = vshrl.u32 %v3070_v35, 16  ;;  %v2677_v35 = vld [vmem:[%s3648_s1 + $0x78] sm:$0xff]  }
  0xad   : > { %v2372_v32 = vcombine.low %v1025_v46, %v1039_v51  ;;  %v3265_v34 = vpop.permute.xlu1 %330  ;;  %v3270_v23 = vpop.permute.xlu0 %328  ;;  %v1341_v6 = vrot.slane %v1339_v42, 1  ;;  %v904_v2 = vsel %vm480_vm0, %v3004_v13, %v3216_v33  ;;  %v1330_v44 = vshrl.u32 %v3076_v41, 16 }
  0xae   : > { %v1334_v48 = vrot.slane %v1332_v4, 1  ;;  %v902_v51 = vsel %vm480_vm0, %v3010_v49, %v3218_v53  ;;  %v920_v0 = vsel %vm505_vm1, %v904_v2, %v792_v1  ;;  %v2406_v2 = vcombine.low %v3158_v19, %v3158_v19 }
  0xaf   : > { %2549 = vmatmul.mubr.msk.bf16.vlgmr.msra.gmra.mrb[0].mxu1 %vm591_vm5, %v2372_v32  ;;  %1707 = vrot.lane.b32.xlu1 %v1692_v15, %s2702_s29  ;;  %v918_v13 = vsel %vm505_vm1, %v902_v51, %v790_v16  ;;  %v1342_v49 = vor.u32 %v1341_v6, %v1337_v10  ;;  %v2404_v10 = vcombine.low %v3146_v58, %v3146_v58  ;;  %v1351_v51 = vshrl.u32 %v3155_v39, 16 }
  0xb0   : > { %1705 = vrot.lane.b32.xlu0 %v1685_v18, %s2702_s29  ;;  %2573 = vmatpush3.bf16.msra.mxu1 %v3089_v17  ;;  %v1321_v17 = vor.u32 %v1320_v56, %v1316_v55  ;;  %v1335_v46 = vor.u32 %v1334_v48, %v1330_v44  ;;  %v2403_v6 = vcombine.low %v3150_v52, %v3150_v52  ;;  %v1353_v52 = vshll.u32 %v3155_v39, 16 }
  0xb1   : > { %v3284_v21 = vpop.permute.xlu1 %795  ;;  %2574 = vmatprep.subr.bf16.mxu1 %v2675_v50  ;;  %v3289_v30 = vpop.permute.xlu0 %793  ;;  %v2405_v48 = vcombine.low %v3168_v25, %v3168_v25  ;;  %v908_v58 = vsel %vm480_vm0, %v3050_v24, %v3237_v37  ;;  %v1346_v24 = vshll.u32 %v3163_v43, 16 }
  0xb3   : > { %1281 = vrot.lane.b32.xlu1 %v2402_v54, %s2700_s21 }
  0xb4   : > { %1279 = vrot.lane.b32.xlu0 %v2401_v40, %s2700_s21  ;;  %2575 = vmatpush3.bf16.msra.mxu1 %v2675_v50 }
  0xb5   : > { %v888_v20 = vpop.permute.xlu1 %887  ;;  %2576 = vmatprep.subr.bf16.mxu1 %v2676_v63  ;;  %v886_v5 = vpop.permute.xlu0 %885 }
  0xb6   : > { %v936_v33 = vsel %vm522_vm2, %v920_v0, %v888_v20  ;;  %v934_v62 = vsel %vm522_vm2, %v918_v13, %v886_v5 }
  0xb7   : > { %v2357_v41 = vcombine.low %v936_v33, %v936_v33  ;;  %v2358_v15 = vcombine.high %v936_v33, %v936_v33  ;;  %1373 = vrot.lane.b32.xlu1 %v1328_v22, %s2702_s29  ;;  %v2355_v53 = vcombine.low %v934_v62, %v934_v62  ;;  %v2356_v1 = vcombine.high %v934_v62, %v934_v62 }
  0xb8   : > { %1371 = vrot.lane.b32.xlu0 %v1321_v17, %s2702_s29  ;;  %2577 = vmatpush3.bf16.msra.mxu1 %v2676_v63 }
  0xb9   : > { %v1055_v38 = vshrl.u32 %v2357_v41, 16  ;;  %v1058_v18 = vshll.u32 %v2357_v41, 16  ;;  %v3310_v31 = vpop.permute.xlu1 %334  ;;  %2578 = vmatprep.subr.bf16.mxu1 %v2677_v35  ;;  %v1041_v16 = vshrl.u32 %v2355_v53, 16  ;;  %v1044_v32 = vshll.u32 %v2355_v53, 16  ;;  %v3312_v50 = vpop.permute.xlu0 %332 }
  0xba   : > { %v1064_v59 = vshll.u32 %v2358_v15, 16  ;;  %v1050_v55 = vshll.u32 %v2356_v1, 16  ;;  %v1365_v53 = vshrl.u32 %v3179_v47, 16 }
  0xbb   : > { %v1057_v54 = vrot.slane %v1055_v38, 4  ;;  %v1060_v45 = vrot.slane %v1058_v18, 5  ;;  %1377 = vrot.lane.b32.xlu1 %v1342_v49, %s2702_s29  ;;  %v1043_v42 = vrot.slane %v1041_v16, 4  ;;  %v1046_v40 = vrot.slane %v1044_v32, 5 }
  0xbc   : > { %1375 = vrot.lane.b32.xlu0 %v1335_v46, %s2702_s29  ;;  %2579 = vmatpush3.bf16.msra.mxu1 %v2677_v35  ;;  %v1066_v44 = vrot.slane %v1064_v59, 5  ;;  %v1052_v20 = vrot.slane %v1050_v55, 5  ;;  %v924_v35 = vsel %vm505_vm1, %v908_v58, %v3284_v21  ;;  %v1355_v18 = vrot.slane %v1353_v52, 1 }
  0xbd   : > { %v1061_v56 = vor.u32 %v1060_v45, %v1057_v54  ;;  %v371_v4 = vpop.permute.xlu1 %370  ;;  %v1047_v63 = vor.u32 %v1046_v40, %v1043_v42  ;;  %v3316_v22 = vpop.permute.xlu0 %368  ;;  %v1358_v16 = vshrl.u32 %v3186_v28, 16  ;;  %v1348_v45 = vrot.slane %v1346_v24, 1  ;;  %v2682_v40 = vld [vmem:[%s2744_s20 + $0x8] sm:$0xf] }
  0xbe   : > { %v486_v55 = vsel %vm480_vm0, %v2682_v40, %v3265_v34  ;;  %v1356_v52 = vor.u32 %v1355_v18, %v1351_v51 }
  0xbf   : > { %v1062_v17 = vrot.slane %v1061_v56, 4  ;;  %1245 = vrot.lane.b32.xlu1 %v3115_v27, %s2701_s24  ;;  %v1048_v0 = vrot.slane %v1047_v63, 4  ;;  %v906_v27 = vsel %vm480_vm0, %v3056_v26, %v3239_v57  ;;  %v1367_v26 = vshll.u32 %v3179_v47, 16 }
  0xc0   : > { %1243 = vrot.lane.b32.xlu0 %v3119_v29, %s2701_s24  ;;  %v922_v37 = vsel %vm505_vm1, %v906_v27, %v3289_v30  ;;  %v1344_v30 = vshrl.u32 %v3163_v43, 16 }
  0xc1   : > { %v1067_v13 = vsel %vm3231_vm6, %v1062_v17, %v1066_v44  ;;  %v892_v33 = vpop.permute.xlu1 %891  ;;  %v1053_v29 = vsel %vm3231_vm6, %v1048_v0, %v1052_v20  ;;  %v890_v5 = vpop.permute.xlu0 %889  ;;  %v1369_v47 = vrot.slane %v1367_v26, 1  ;;  %v2683_v44 = vld [vmem:[%s2744_s20] sm:$0xf] }
  0xc2   : > { %v940_v39 = vsel %vm522_vm2, %v924_v35, %v892_v33  ;;  %v938_v21 = vsel %vm522_vm2, %v922_v37, %v890_v5  ;;  %v2373_v15 = vcombine.low %v1053_v29, %v1067_v13  ;;  %v483_v58 = vsel %vm480_vm0, %v2683_v44, %v3270_v23 }
  0xc3   : > { %v2361_v57 = vcombine.low %v940_v39, %v940_v39  ;;  %v2362_v41 = vcombine.high %v940_v39, %v940_v39  ;;  %1249 = vrot.lane.b32.xlu1 %v3124_v61, %s2701_s24  ;;  %v2359_v62 = vcombine.low %v938_v21, %v938_v21  ;;  %v2360_v49 = vcombine.high %v938_v21, %v938_v21 }
  0xc4   : > { %1247 = vrot.lane.b32.xlu0 %v3128_v36, %s2701_s24  ;;  %2552 = vmatprep.mubr.msk.bf16.mxu1 %vm591_vm5, %v2373_v15  ;;  %v1360_v36 = vshll.u32 %v3186_v28, 16  ;;  %v509_v28 = vsel %vm505_vm1, %v486_v55, %v371_v4  ;;  %v1349_v23 = vor.u32 %v1348_v45, %v1344_v30  ;;  %v492_v4 = vsel %vm480_vm0, %v2886_v60, %v3310_v31 }
  0xc5   : > { %v1083_v1 = vshrl.u32 %v2361_v57, 16  ;;  %v1086_v46 = vshll.u32 %v2361_v57, 16  ;;  %v375_v38 = vpop.permute.xlu1 %374  ;;  %v1069_v61 = vshrl.u32 %v2359_v62, 16  ;;  %v1072_v32 = vshll.u32 %v2359_v62, 16  ;;  %v373_v54 = vpop.permute.xlu0 %372  ;;  %v2680_v62 = vld [vmem:[%s3648_s1 + $0x50] sm:$0xff]  }
  0xc6   : > { %v1092_v42 = vshll.u32 %v2362_v41, 16  ;;  %v1078_v17 = vshll.u32 %v2360_v49, 16  ;;  %v1362_v13 = vrot.slane %v1360_v36, 1  ;;  %v489_v29 = vsel %vm480_vm0, %v2894_v9, %v3312_v50  ;;  %v2679_v41 = vld [vmem:[%s3648_s1 + $0x48] sm:$0xff]  }
  0xc7   : > { %v1085_v59 = vrot.slane %v1083_v1, 4  ;;  %v1088_v43 = vrot.slane %v1086_v46, 5  ;;  %1285 = vrot.lane.b32.xlu1 %v2404_v10, %s2700_s21  ;;  %v1071_v56 = vrot.slane %v1069_v61, 4  ;;  %v1074_v63 = vrot.slane %v1072_v32, 5 }
  0xc8   : > { %1283 = vrot.lane.b32.xlu0 %v2403_v6, %s2700_s21  ;;  %v507_v10 = vsel %vm505_vm1, %v483_v58, %v3316_v22  ;;  %v1094_v24 = vrot.slane %v1092_v42, 5  ;;  %v1080_v51 = vrot.slane %v1078_v17, 5  ;;  %v511_v31 = vsel %vm505_vm1, %v489_v29, %v373_v54 }
  0xc9   : > { %v1089_v0 = vor.u32 %v1088_v43, %v1085_v59  ;;  %v467_v20 = vpop.permute.xlu1 %466  ;;  %v1075_v27 = vor.u32 %v1074_v63, %v1071_v56  ;;  %v465_v35 = vpop.permute.xlu0 %464  ;;  %v1370_v50 = vor.u32 %v1369_v47, %v1365_v53  ;;  %v1363_v57 = vor.u32 %v1362_v13, %v1358_v16  ;;  %v2681_v53 = vld [vmem:[%s3648_s1 + $0x58] sm:$0xff]  }
  0xca   : > { %v526_v34 = vsel %vm522_vm2, %v509_v28, %v467_v20  ;;  %v524_v6 = vsel %vm522_vm2, %v507_v10, %v465_v35 }
  0xcb   : > { %v1090_v33 = vrot.slane %v1089_v0, 4  ;;  %1289 = vrot.lane.b32.xlu1 %v2406_v2, %s2700_s21  ;;  %v1076_v22 = vrot.slane %v1075_v27, 4  ;;  %v2311_v37 = vcombine.low %v524_v6, %v526_v34  ;;  %v513_v2 = vsel %vm505_vm1, %v492_v4, %v375_v38 }
  0xcc   : > { %1287 = vrot.lane.b32.xlu0 %v2405_v48, %s2700_s21 }
  0xcd   : > { %v1095_v19 = vsel %vm3231_vm6, %v1090_v33, %v1094_v24  ;;  %v471_v39 = vpop.permute.xlu1 %470  ;;  %v1081_v60 = vsel %vm3231_vm6, %v1076_v22, %v1080_v51  ;;  %2532 = vmatprep.mubr.msk.bf16.mxu0 %vm591_vm5, %v2311_v37  ;;  %v469_v25 = vpop.permute.xlu0 %468 }
  0xce   : > { %v530_v5 = vsel %vm522_vm2, %v513_v2, %v471_v39  ;;  %v528_v48 = vsel %vm522_vm2, %v511_v31, %v469_v25  ;;  %v2374_v9 = vcombine.low %v1081_v60, %v1095_v19 }
  0xcf   : > { %1381 = vrot.lane.b32.xlu1 %v1356_v52, %s2702_s29  ;;  %v2312_v26 = vcombine.low %v528_v48, %v530_v5 }
  0xd0   : > { %1379 = vrot.lane.b32.xlu0 %v1349_v23, %s2702_s29  ;;  %2553 = vmatmul.mubr.msk.bf16.gmra.mrb[4].mxu1 %vm591_vm5, %v2374_v9 }
  0xd1   : > { %v1584_v21 = vpop.permute.xlu1 %1583  ;;  %2533 = vmatmul.mubr.msk.bf16.vlgmr.msra.gmra.mrb[0].mxu0 %vm591_vm5, %v2312_v26  ;;  %v1582_v15 = vpop.permute.xlu0 %1581 }
  0xd2   : > { %2557 = vmatpush3.bf16.msra.mxu0 %v3224_v12  ;;  %v1712_v61 = vsel %vm480_vm0, %v2754_v3, %v1584_v21  ;;  %v1710_v32 = vsel %vm480_vm0, %v2762_v7, %v1582_v15 }
  0xd3   : > { %1385 = vrot.lane.b32.xlu1 %v1370_v50, %s2702_s29  ;;  %2558 = vmatprep.subr.bf16.mxu0 %v2679_v41 }
  0xd4   : > { %1383 = vrot.lane.b32.xlu0 %v1363_v57, %s2702_s29  ;;  %s2704_s29 = smov 24  }
  0xd5   : > { %v1588_v49 = vpop.permute.xlu1 %1587  ;;  %v1586_v30 = vpop.permute.xlu0 %1585 }
  0xd6   : > { %2559 = vmatpush3.bf16.msra.mxu0 %v2679_v41  ;;  %v1716_v23 = vsel %vm480_vm0, %v2774_v11, %v1588_v49  ;;  %v1714_v51 = vsel %vm480_vm0, %v2783_v14, %v1586_v30 }
  0xd7   : > { %2560 = vmatprep.subr.bf16.mxu0 %v2680_v62 }
  0xd9   : > { %v1600_v1 = vpop.permute.xlu1 %1599  ;;  %v1598_v46 = vpop.permute.xlu0 %1597 }
  0xda   : > { %2561 = vmatpush3.bf16.msra.mxu0 %v2680_v62  ;;  %v1728_v54 = vsel %vm505_vm1, %v1712_v61, %v1600_v1  ;;  %v1726_v36 = vsel %vm505_vm1, %v1710_v32, %v1598_v46  ;;  %v3673_v61 = vld [vmem:[#allocation7_spill] sm:$0xff] }
  0xdb   : > { %2562 = vmatprep.subr.bf16.mxu0 %v2681_v53 }
  0xdd   : > { %v3411_v12 = vpop.permute.xlu1 %338  ;;  %v3413_v38 = vpop.permute.xlu0 %336 }
  0xde   : > { %2563 = vmatpush3.bf16.msra.mxu0 %v2681_v53  ;;  %v3672_v53 = vld [vmem:[#allocation6_spill] sm:$0xff]  ;;  %v495_v32 = vsel %vm480_vm0, %v3673_v61, %v3413_v38 }
  0xdf   : > { %v498_v1 = vsel %vm480_vm0, %v3672_v53, %v3411_v12 }
  0xe1   : > { %v1604_v18 = vpop.permute.xlu1 %1603  ;;  %v1602_v16 = vpop.permute.xlu0 %1601 }
  0xe2   : > { %v1732_v37 = vsel %vm505_vm1, %v1716_v23, %v1604_v18  ;;  %v1730_v2 = vsel %vm505_vm1, %v1714_v51, %v1602_v16 }
  0xe5   : > { %v1696_v45 = vpop.permute.xlu1 %1695  ;;  %v1694_v43 = vpop.permute.xlu0 %1693 }
  0xe6   : > { %v1744_v59 = vsel %vm522_vm2, %v1728_v54, %v1696_v45  ;;  %v1742_v40 = vsel %vm522_vm2, %v1726_v36, %v1694_v43 }
  0xe7   : > { %v2453_v42 = vcombine.low %v1744_v59, %v1744_v59  ;;  %v2454_v47 = vcombine.high %v1744_v59, %v1744_v59  ;;  %v2451_v55 = vcombine.low %v1742_v40, %v1742_v40  ;;  %v2452_v56 = vcombine.high %v1742_v40, %v1742_v40 }
  0xe9   : > { %v1812_v63 = vshrl.u32 %v2453_v42, 16  ;;  %v1815_v17 = vshll.u32 %v2453_v42, 16  ;;  %v343_v3 = vpop.permute.xlu1 %342  ;;  %v1798_v44 = vshrl.u32 %v2451_v55, 16  ;;  %v1801_v58 = vshll.u32 %v2451_v55, 16  ;;  %v341_v7 = vpop.permute.xlu0 %340 }
  0xea   : > { %v1821_v20 = vshll.u32 %v2454_v47, 16  ;;  %v1807_v27 = vshll.u32 %v2452_v56, 16  ;;  %v3674_v56 = vld [vmem:[#allocation8_spill] sm:$0xff] }
  0xeb   : > { %v1814_v28 = vrot.slane %v1812_v63, 4  ;;  %v1817_v0 = vrot.slane %v1815_v17, 5  ;;  %v1800_v52 = vrot.slane %v1798_v44, 4  ;;  %v1803_v10 = vrot.slane %v1801_v58, 5  ;;  %v3675_v58 = vld [vmem:[#allocation9_spill] sm:$0xff] }
  0xec   : > { %v1823_v6 = vrot.slane %v1821_v20, 5  ;;  %v1809_v22 = vrot.slane %v1807_v27, 5  ;;  %v504_v63 = vsel %vm480_vm0, %v3674_v56, %v343_v3  ;;  %v3679_v56 = vld [vmem:[#allocation5_spill] sm:$0xff] }
  0xed   : > { %v1818_v34 = vor.u32 %v1817_v0, %v1814_v28  ;;  %v379_v35 = vpop.permute.xlu1 %378  ;;  %v1804_v13 = vor.u32 %v1803_v10, %v1800_v52  ;;  %v377_v33 = vpop.permute.xlu0 %376  ;;  %v501_v28 = vsel %vm480_vm0, %v3675_v58, %v341_v7 }
  0xee   : > { %v517_v54 = vsel %vm505_vm1, %v498_v1, %v379_v35  ;;  %v515_v59 = vsel %vm505_vm1, %v495_v32, %v377_v33 }
  0xef   : > { %v1819_v24 = vrot.slane %v1818_v34, 4  ;;  %v1805_v4 = vrot.slane %v1804_v13, 4 }
  0xf1   : > { %v1824_v29 = vsel %vm3231_vm6, %v1819_v24, %v1823_v6  ;;  %v1700_v19 = vpop.permute.xlu1 %1699  ;;  %v1810_v39 = vsel %vm3231_vm6, %v1805_v4, %v1809_v22  ;;  %v1698_v31 = vpop.permute.xlu0 %1697 }
  0xf2   : > { %v1748_v60 = vsel %vm522_vm2, %v1732_v37, %v1700_v19  ;;  %v1746_v25 = vsel %vm522_vm2, %v1730_v2, %v1698_v31  ;;  %v2475_v48 = vcombine.low %v1810_v39, %v1824_v29  ;;  %v3676_v2 = vld [vmem:[#allocation2_spill] sm:$0xff] }
  0xf3   : > { %v2457_v11 = vcombine.low %v1748_v60, %v1748_v60  ;;  %v2458_v5 = vcombine.high %v1748_v60, %v1748_v60  ;;  %v2455_v14 = vcombine.low %v1746_v25, %v1746_v25  ;;  %v2456_v9 = vcombine.high %v1746_v25, %v1746_v25  ;;  %v3677_v60 = vld [vmem:[#allocation3_spill] sm:$0xff] }
  0xf4   : > { %2580 = vmatprep.mubr.msk.bf16.mxu1 %vm591_vm5, %v2475_v48 }
  0xf5   : > { %v1840_v50 = vshrl.u32 %v2457_v11, 16  ;;  %v1843_v26 = vshll.u32 %v2457_v11, 16  ;;  %v383_v57 = vpop.permute.xlu1 %382  ;;  %v1826_v41 = vshrl.u32 %v2455_v14, 16  ;;  %v1829_v21 = vshll.u32 %v2455_v14, 16  ;;  %v381_v15 = vpop.permute.xlu0 %380 }
  0xf6   : > { %v1849_v30 = vshll.u32 %v2458_v5, 16  ;;  %v1835_v16 = vshll.u32 %v2456_v9, 16  ;;  %v521_v20 = vsel %vm505_vm1, %v504_v63, %v383_v57  ;;  %v519_v27 = vsel %vm505_vm1, %v501_v28, %v381_v15 }
  0xf7   : > { %v1842_v62 = vrot.slane %v1840_v50, 4  ;;  %v1845_v49 = vrot.slane %v1843_v26, 5  ;;  %v1828_v46 = vrot.slane %v1826_v41, 4  ;;  %v1831_v18 = vrot.slane %v1829_v21, 5 }
  0xf8   : > { %v1851_v55 = vrot.slane %v1849_v30, 5  ;;  %v1837_v44 = vrot.slane %v1835_v16, 5 }
  0xf9   : > { %v1846_v45 = vor.u32 %v1845_v49, %v1842_v62  ;;  %v475_v36 = vpop.permute.xlu1 %474  ;;  %v1832_v43 = vor.u32 %v1831_v18, %v1828_v46  ;;  %v473_v47 = vpop.permute.xlu0 %472 }
  0xfa   : > { %v534_v42 = vsel %vm522_vm2, %v517_v54, %v475_v36  ;;  %v532_v12 = vsel %vm522_vm2, %v515_v59, %v473_v47  ;;  %v3678_v47 = vld [vmem:[#allocation4_spill] sm:$0xff] }
  0xfb   : > { %v1847_v40 = vrot.slane %v1846_v45, 4  ;;  %v1833_v17 = vrot.slane %v1832_v43, 4  ;;  %v2313_v38 = vcombine.low %v532_v12, %v534_v42 }
  0xfd   : > { %v1852_v0 = vsel %vm3231_vm6, %v1847_v40, %v1851_v55  ;;  %v479_v52 = vpop.permute.xlu1 %478  ;;  %v1838_v10 = vsel %vm3231_vm6, %v1833_v17, %v1837_v44  ;;  %2536 = vmatprep.mubr.msk.bf16.mxu0 %vm591_vm5, %v2313_v38  ;;  %v477_v3 = vpop.permute.xlu0 %476 }
  0xfe   : > { %v538_v34 = vsel %vm522_vm2, %v521_v20, %v479_v52  ;;  %v2476_v35 = vcombine.low %v1838_v10, %v1852_v0  ;;  %v536_v13 = vsel %vm522_vm2, %v519_v27, %v477_v3 }
  0xff   : > { %v2314_v7 = vcombine.low %v536_v13, %v538_v34 }
 0x100   : > { %2581 = vmatmul.mubr.msk.bf16.vlgmr.msra.gmra.mrb[8].mxu1 %vm591_vm5, %v2476_v35 }
 0x101   : > { %v1592_v33 = vpop.permute.xlu1 %1591  ;;  %2537 = vmatmul.mubr.msk.bf16.gmra.mrb[4].mxu0 %vm591_vm5, %v2314_v7  ;;  %v1590_v24 = vpop.permute.xlu0 %1589 }
 0x102   : > { %v1720_v39 = vsel %vm480_vm0, %v3676_v2, %v1592_v33  ;;  %v1718_v31 = vsel %vm480_vm0, %v3677_v60, %v1590_v24 }
 0x105   : > { %v1596_v6 = vpop.permute.xlu1 %1595  ;;  %v1594_v23 = vpop.permute.xlu0 %1593 }
 0x106   : > { %v1724_v40 = vsel %vm480_vm0, %v3678_v47, %v1596_v6  ;;  %v1722_v63 = vsel %vm480_vm0, %v3679_v56, %v1594_v23 }
 0x109   : > { %v1608_v4 = vpop.permute.xlu1 %1607  ;;  %v1606_v22 = vpop.permute.xlu0 %1605 }
 0x10a   : > { %v1736_v11 = vsel %vm505_vm1, %v1720_v39, %v1608_v4  ;;  %v1734_v25 = vsel %vm505_vm1, %v1718_v31, %v1606_v22 }
 0x10d   : > { %v3461_v51 = vpop.permute.xlu1 %1237 }
 0x10e   : > { %v3463_v37 = vpop.permute.xlu0 %1235 }
 0x111   : > { %v1612_v29 = vpop.permute.xlu1 %1611 }
 0x112   : > { %v1610_v19 = vpop.permute.xlu0 %1609  ;;  %v1740_v17 = vsel %vm505_vm1, %v1724_v40, %v1612_v29 }
 0x113   : > { %v1738_v58 = vsel %vm505_vm1, %v1722_v63, %v1610_v19  ;;  %v2684_v19 = vld [vmem:[%s2744_s20 + $0x10] sm:$0xf] }
 0x114   : > { %v1392_v2 = vsel %vm480_vm0, %v2684_v19, %v3461_v51 }
 0x115   : > { %v1704_v5 = vpop.permute.xlu1 %1703 }
 0x116   : > { %v1752_v48 = vsel %vm522_vm2, %v1736_v11, %v1704_v5  ;;  %v1702_v14 = vpop.permute.xlu0 %1701  ;;  %v2685_v11 = vld [vmem:[%s2744_s20 + $0x8] sm:$0xf] }
 0x117   : > { %v2461_v9 = vcombine.low %v1752_v48, %v1752_v48  ;;  %v2462_v50 = vcombine.high %v1752_v48, %v1752_v48  ;;  %v1750_v26 = vsel %vm522_vm2, %v1734_v25, %v1702_v14  ;;  %v1389_v5 = vsel %vm480_vm0, %v2685_v11, %v3463_v37 }
 0x118   : > { %v2459_v57 = vcombine.low %v1750_v26, %v1750_v26  ;;  %v2460_v41 = vcombine.high %v1750_v26, %v1750_v26 }
 0x119   : > { %v1868_v21 = vshrl.u32 %v2461_v9, 16  ;;  %v1871_v15 = vshll.u32 %v2461_v9, 16  ;;  %v1242_v62 = vpop.permute.xlu1 %1241  ;;  %v1877_v18 = vshll.u32 %v2462_v50, 16 }
 0x11a   : > { %v1854_v49 = vshrl.u32 %v2459_v57, 16  ;;  %v1857_v30 = vshll.u32 %v2459_v57, 16  ;;  %v3473_v53 = vpop.permute.xlu0 %1239  ;;  %v1863_v32 = vshll.u32 %v2460_v41, 16 }
 0x11b   : > { %v1870_v1 = vrot.slane %v1868_v21, 4  ;;  %v1873_v46 = vrot.slane %v1871_v15, 5  ;;  %v1879_v42 = vrot.slane %v1877_v18, 5  ;;  %v2686_v15 = vld [vmem:[%s2744_s20 + $0x20] sm:$0xf] }
 0x11c   : > { %v1856_v16 = vrot.slane %v1854_v49, 4  ;;  %v1859_v61 = vrot.slane %v1857_v30, 5  ;;  %v1865_v12 = vrot.slane %v1863_v32, 5  ;;  %v1398_v49 = vsel %vm480_vm0, %v2686_v15, %v1242_v62 }
 0x11d   : > { %v1874_v54 = vor.u32 %v1873_v46, %v1870_v1  ;;  %v1278_v45 = vpop.permute.xlu1 %1277  ;;  %v2687_v46 = vld [vmem:[%s2744_s20 + $0x18] sm:$0xf] }
 0x11e   : > { %v1860_v36 = vor.u32 %v1859_v61, %v1856_v16  ;;  %v1276_v59 = vpop.permute.xlu0 %1275  ;;  %v1414_v25 = vsel %vm505_vm1, %v1392_v2, %v1278_v45  ;;  %v1395_v18 = vsel %vm480_vm0, %v2687_v46, %v3473_v53 }
 0x11f   : > { %v1875_v43 = vrot.slane %v1874_v54, 4  ;;  %v1412_v9 = vsel %vm505_vm1, %v1389_v5, %v1276_v59 }
 0x120   : > { %v1861_v55 = vrot.slane %v1860_v36, 4 }
 0x121   : > { %v1880_v44 = vsel %vm3231_vm6, %v1875_v43, %v1879_v42  ;;  %v1708_v38 = vpop.permute.xlu1 %1707 }
 0x122   : > { %v1866_v28 = vsel %vm3231_vm6, %v1861_v55, %v1865_v12  ;;  %v1756_v0 = vsel %vm522_vm2, %v1740_v17, %v1708_v38  ;;  %v1706_v20 = vpop.permute.xlu0 %1705  ;;  %v2688_v17 = vld [vmem:[%s2744_s20 + $0x30] sm:$0xf]  ;;  %v2689_v38 = vld [vmem:[%s2744_s20 + $0x28] sm:$0xf] }
 0x123   : > { %v2465_v52 = vcombine.low %v1756_v0, %v1756_v0  ;;  %v2466_v10 = vcombine.high %v1756_v0, %v1756_v0  ;;  %v1754_v27 = vsel %vm522_vm2, %v1738_v58, %v1706_v20  ;;  %v2477_v34 = vcombine.low %v1866_v28, %v1880_v44 }
 0x124   : > { %v2463_v3 = vcombine.low %v1754_v27, %v1754_v27  ;;  %v2464_v35 = vcombine.high %v1754_v27, %v1754_v27 }
 0x125   : > { %v1896_v13 = vshrl.u32 %v2465_v52, 16  ;;  %v1899_v7 = vshll.u32 %v2465_v52, 16  ;;  %2584 = vmatprep.mubr.msk.bf16.mxu1 %vm591_vm5, %v2477_v34  ;;  %v1282_v33 = vpop.permute.xlu1 %1281  ;;  %v1905_v29 = vshll.u32 %v2466_v10, 16  ;;  %v2690_v34 = vld [vmem:[%s2744_s20 + $0x40] sm:$0xf] }
 0x126   : > { %v1882_v24 = vshrl.u32 %v2463_v3, 16  ;;  %v1885_v6 = vshll.u32 %v2463_v3, 16  ;;  %v1280_v23 = vpop.permute.xlu0 %1279  ;;  %v1891_v31 = vshll.u32 %v2464_v35, 16  ;;  %v1418_v61 = vsel %vm505_vm1, %v1398_v49, %v1282_v33 }
 0x127   : > { %v1898_v4 = vrot.slane %v1896_v13, 4  ;;  %v1901_v22 = vrot.slane %v1899_v7, 5  ;;  %v1907_v41 = vrot.slane %v1905_v29, 5  ;;  %v1416_v45 = vsel %vm505_vm1, %v1395_v18, %v1280_v23  ;;  %v2691_v13 = vld [vmem:[%s2744_s20 + $0x38] sm:$0xf]  ;;  %s2703_s20 = smov 8  }
 0x128   : > { %v1884_v39 = vrot.slane %v1882_v24, 4  ;;  %v1887_v60 = vrot.slane %v1885_v6, 5  ;;  %v1893_v37 = vrot.slane %v1891_v31, 5 }
 0x129   : > { %v1902_v48 = vor.u32 %v1901_v22, %v1898_v4  ;;  %v1374_v14 = vpop.permute.xlu1 %1373 }
 0x12a   : > { %v1888_v50 = vor.u32 %v1887_v60, %v1884_v39  ;;  %v1430_v26 = vsel %vm522_vm2, %v1414_v25, %v1374_v14  ;;  %v1372_v57 = vpop.permute.xlu0 %1371 }
 0x12b   : > { %v1903_v51 = vrot.slane %v1902_v48, 4  ;;  %v1428_v21 = vsel %vm522_vm2, %v1412_v9, %v1372_v57 }
 0x12c   : > { %v1889_v30 = vrot.slane %v1888_v50, 4  ;;  %v2423_v1 = vcombine.low %v1428_v21, %v1430_v26 }
 0x12d   : > { %v1908_v16 = vsel %vm3231_vm6, %v1903_v51, %v1907_v41  ;;  %v1378_v32 = vpop.permute.xlu1 %1377 }
 0x12e   : > { %v1894_v54 = vsel %vm3231_vm6, %v1889_v30, %v1893_v37  ;;  %v1434_v62 = vsel %vm522_vm2, %v1418_v61, %v1378_v32  ;;  %2564 = vmatprep.mubr.msk.bf16.mxu0 %vm591_vm5, %v2423_v1  ;;  %v1376_v36 = vpop.permute.xlu0 %1375 }
 0x12f   : > { %v1432_v53 = vsel %vm522_vm2, %v1416_v45, %v1376_v36  ;;  %v2478_v59 = vcombine.low %v1894_v54, %v1908_v16 }
 0x130   : > { %v2424_v43 = vcombine.low %v1432_v53, %v1434_v62 }
 0x131   : > { %2585 = vmatmul.mubr.msk.bf16.gmra.mrb[12].mxu1 %vm591_vm5, %v2478_v59  ;;  %v1246_v42 = vpop.permute.xlu1 %1245 }
 0x132   : > { %2565 = vmatmul.mubr.msk.bf16.vlgmr.msra.gmra.mrb[8].mxu0 %vm591_vm5, %v2424_v43  ;;  %v1244_v8 = vpop.permute.xlu0 %1243  ;;  %v1404_v44 = vsel %vm480_vm0, %v2688_v17, %v1246_v42 }
 0x133   : > { %v1401_v58 = vsel %vm480_vm0, %v2689_v38, %v1244_v8 }
 0x135   : > { %v1250_v47 = vpop.permute.xlu1 %1249 }
 0x136   : > { %v1248_v40 = vpop.permute.xlu0 %1247  ;;  %v1410_v3 = vsel %vm480_vm0, %v2690_v34, %v1250_v47 }
 0x137   : > { %v1407_v7 = vsel %vm480_vm0, %v2691_v13, %v1248_v40 }
 0x139   : > { %v1286_v55 = vpop.permute.xlu1 %1285 }
 0x13a   : > { %v1284_v12 = vpop.permute.xlu0 %1283  ;;  %v1422_v28 = vsel %vm505_vm1, %v1404_v44, %v1286_v55 }
 0x13b   : > { %v1420_v20 = vsel %vm505_vm1, %v1401_v58, %v1284_v12 }
 0x13d   : > { %v1290_v56 = vpop.permute.xlu1 %1289 }
 0x13e   : > { %v1288_v63 = vpop.permute.xlu0 %1287  ;;  %v1426_v33 = vsel %vm505_vm1, %v1410_v3, %v1290_v56  ;;  %v3577_v3 = vld [vmem:[%s3650_s3] ss:$0 sm:$0xff] }
 0x13f   : > { %v1424_v6 = vsel %vm505_vm1, %v1407_v7, %v1288_v63 }
 0x141   : > { %v1382_v0 = vpop.permute.xlu1 %1381 }
 0x142   : > { %v1438_v52 = vsel %vm522_vm2, %v1422_v28, %v1382_v0  ;;  %v1380_v10 = vpop.permute.xlu0 %1379 }
 0x143   : > { %v1436_v27 = vsel %vm522_vm2, %v1420_v20, %v1380_v10 }
 0x144   : > { %v2425_v35 = vcombine.low %v1436_v27, %v1438_v52  ;;  %v3569_v52 = vld [vmem:[%s3649_s2] ss:$0 sm:$0xff] }
 0x145   : > { %v1386_v24 = vpop.permute.xlu1 %1385 }
 0x146   : > { %v1442_v23 = vsel %vm522_vm2, %v1426_v33, %v1386_v24  ;;  %2568 = vmatprep.mubr.msk.bf16.mxu0 %vm591_vm5, %v2425_v35  ;;  %v1384_v4 = vpop.permute.xlu0 %1383 }
 0x147   : > { %v1440_v22 = vsel %vm522_vm2, %v1424_v6, %v1384_v4 }
 0x148   : > { %v2426_v29 = vcombine.low %v1440_v22, %v1442_v23 }
 0x14a   : > { %2569 = vmatmul.mubr.msk.bf16.gmra.mrb[12].mxu0 %vm591_vm5, %v2426_v29 }
 0x182   : > { %v2550_v19 = vpop.f32.mrb[0].mxu1 }
 0x183   : > { %v1187_v2 = vpop.f32.mrb[1].mxu1  ;;  %2043 = vrot.lane.b32.xlu0 %v2550_v19, %s2703_s20 }
 0x184   : > { %v2551_v39 = vpop.f32.mrb[2].mxu1 }
 0x185   : > { %2045 = vrot.lane.b32.xlu1 %v2551_v39, %s2703_s20  ;;  %v1190_v60 = vpop.f32.mrb[3].mxu1 }
 0x187   : > { %2039 = vrot.lane.b32.xlu0 %v1187_v2, %s2703_s20 }
 0x189   : > { %2041 = vrot.lane.b32.xlu1 %v1190_v60, %s2703_s20 }
 0x1a3   : > { %v2554_v31 = vpop.f32.mrb[4].mxu1 }
 0x1a4   : > { %v3536_v11 = vpop.f32.mrb[0].mxu0  ;;  %v1203_v5 = vpop.f32.mrb[5].mxu1 }
 0x1a5   : > { %v3538_v25 = vpop.f32.mrb[1].mxu0  ;;  %v2555_v48 = vpop.f32.mrb[6].mxu1 }
 0x1a6   : > { %v3540_v14 = vpop.f32.mrb[2].mxu0  ;;  %v1206_v9 = vpop.f32.mrb[7].mxu1 }
 0x1a7   : > { %v3542_v50 = vpop.f32.mrb[3].mxu0 }
 0x1d3   : > { %v2582_v26 = vpop.f32.mrb[8].mxu1 }
 0x1d4   : > { %v3544_v57 = vpop.f32.mrb[4].mxu0  ;;  %v2000_v51 = vpop.f32.mrb[9].mxu1 }
 0x1d5   : > { %v3546_v41 = vpop.f32.mrb[5].mxu0  ;;  %v2583_v21 = vpop.f32.mrb[10].mxu1 }
 0x1d6   : > { %v3548_v15 = vpop.f32.mrb[6].mxu0  ;;  %v2003_v49 = vpop.f32.mrb[11].mxu1 }
 0x1d7   : > { %v3550_v30 = vpop.f32.mrb[7].mxu0 }
 0x1f5   : > { %v2044_v59 = vpop.permute.xlu0 %2043 }
 0x1f6   : > { %v2130_v20 = vsel %vm2127_vm7, %v3536_v11, %v2044_v59 }
 0x1f7   : > { %v2046_v43 = vpop.permute.xlu1 %2045 }
 0x1f8   : > { %v2131_v34 = vsel %vm2127_vm7, %v3540_v14, %v2046_v43 }
 0x1f9   : > { %v2040_v42 = vpop.permute.xlu0 %2039 }
 0x1fa   : > { %v2128_v24 = vsel %vm2127_vm7, %v3538_v25, %v2040_v42 }
 0x1fb   : > { %v2042_v8 = vpop.permute.xlu1 %2041 }
 0x1fc   : > { %v2129_v23 = vsel %vm2127_vm7, %v3542_v50, %v2042_v8 }
 0x204   : > { %v2586_v37 = vpop.f32.mrb[12].mxu1 }
 0x205   : > { %v2566_v1 = vpop.f32.mrb[8].mxu0  ;;  %v2016_v46 = vpop.f32.mrb[13].mxu1 }
 0x206   : > { %v2587_v18 = vpop.f32.mrb[14].mxu1  ;;  %2075 = vrot.lane.b32.xlu0 %v2566_v1, %s2701_s24  ;;  %v1542_v16 = vpop.f32.mrb[9].mxu0 }
 0x207   : > { %v2567_v61 = vpop.f32.mrb[10].mxu0  ;;  %v2019_v32 = vpop.f32.mrb[15].mxu1 }
 0x208   : > { %2077 = vrot.lane.b32.xlu1 %v2567_v61, %s2701_s24  ;;  %v1545_v54 = vpop.f32.mrb[11].mxu0 }
 0x20a   : > { %2071 = vrot.lane.b32.xlu0 %v1542_v16, %s2701_s24 }
 0x20c   : > { %2073 = vrot.lane.b32.xlu1 %v1545_v54, %s2701_s24 }
 0x20e   : > { %2051 = vrot.lane.b32.xlu0 %v2554_v31, %s2703_s20 }
 0x210   : > { %2053 = vrot.lane.b32.xlu1 %v2555_v48, %s2703_s20 }
 0x212   : > { %2047 = vrot.lane.b32.xlu0 %v1203_v5, %s2703_s20 }
 0x214   : > { %2049 = vrot.lane.b32.xlu1 %v1206_v9, %s2703_s20 }
 0x21d   : > { %v2570_v45 = vpop.f32.mrb[12].mxu0 }
 0x21e   : > { %2083 = vrot.lane.b32.xlu0 %v2570_v45, %s2701_s24  ;;  %v1558_v62 = vpop.f32.mrb[13].mxu0 }
 0x21f   : > { %v2571_v36 = vpop.f32.mrb[14].mxu0 }
 0x220   : > { %2085 = vrot.lane.b32.xlu1 %v2571_v36, %s2701_s24  ;;  %v1561_v53 = vpop.f32.mrb[15].mxu0 }
 0x222   : > { %2079 = vrot.lane.b32.xlu0 %v1558_v62, %s2701_s24 }
 0x224   : > { %2081 = vrot.lane.b32.xlu1 %v1561_v53, %s2701_s24 }
 0x226   : > { %2107 = vrot.lane.b32.xlu0 %v2582_v26, %s2704_s29 }
 0x228   : > { %2109 = vrot.lane.b32.xlu1 %v2583_v21, %s2704_s29 }
 0x22a   : > { %2103 = vrot.lane.b32.xlu0 %v2000_v51, %s2704_s29 }
 0x22c   : > { %2105 = vrot.lane.b32.xlu1 %v2003_v49, %s2704_s29 }
 0x22e   : > { %2111 = vrot.lane.b32.xlu0 %v2016_v46, %s2704_s29 }
 0x230   : > { %2113 = vrot.lane.b32.xlu1 %v2019_v32, %s2704_s29 }
 0x232   : > { %2115 = vrot.lane.b32.xlu0 %v2586_v37, %s2704_s29 }
 0x234   : > { %2117 = vrot.lane.b32.xlu1 %v2587_v18, %s2704_s29 }
 0x278   : > { %v2076_v47 = vpop.permute.xlu0 %2075 }
 0x279   : > { %v2138_v10 = vsel %vm480_vm0, %v2130_v20, %v2076_v47 }
 0x27a   : > { %v2078_v40 = vpop.permute.xlu1 %2077 }
 0x27b   : > { %v2139_v13 = vsel %vm480_vm0, %v2131_v34, %v2078_v40 }
 0x27c   : > { %v2072_v55 = vpop.permute.xlu0 %2071 }
 0x27d   : > { %v2136_v4 = vsel %vm480_vm0, %v2128_v24, %v2072_v55 }
 0x27e   : > { %v2074_v12 = vpop.permute.xlu1 %2073 }
 0x27f   : > { %v2137_v2 = vsel %vm480_vm0, %v2129_v23, %v2074_v12 }
 0x280   : > { %v2052_v56 = vpop.permute.xlu0 %2051 }
 0x281   : > { %v2134_v49 = vsel %vm2127_vm7, %v3544_v57, %v2052_v56 }
 0x282   : > { %v2054_v63 = vpop.permute.xlu1 %2053 }
 0x283   : > { %v2135_v32 = vsel %vm2127_vm7, %v3548_v15, %v2054_v63 }
 0x284   : > { %v2048_v17 = vpop.permute.xlu0 %2047 }
 0x285   : > { %v2132_v60 = vsel %vm2127_vm7, %v3546_v41, %v2048_v17 }
 0x286   : > { %v2050_v44 = vpop.permute.xlu1 %2049 }
 0x287   : > { %v2133_v48 = vsel %vm2127_vm7, %v3550_v30, %v2050_v44 }
 0x290   : > { %v2084_v38 = vpop.permute.xlu0 %2083 }
 0x291   : > { %v2142_v54 = vsel %vm480_vm0, %v2134_v49, %v2084_v38 }
 0x292   : > { %v2086_v58 = vpop.permute.xlu1 %2085 }
 0x293   : > { %v2143_v43 = vsel %vm480_vm0, %v2135_v32, %v2086_v58 }
 0x294   : > { %v2080_v28 = vpop.permute.xlu0 %2079 }
 0x295   : > { %v2140_v14 = vsel %vm480_vm0, %v2132_v60, %v2080_v28 }
 0x296   : > { %v2082_v0 = vpop.permute.xlu1 %2081 }
 0x297   : > { %v2141_v30 = vsel %vm480_vm0, %v2133_v48, %v2082_v0 }
 0x298   : > { %v2108_v27 = vpop.permute.xlu0 %2107 }
 0x299   : > { %v2147_v35 = vsel %vm2144_vm8, %v2138_v10, %v2108_v27 }
 0x29a   : > { %v2162_v7 = vmul.f32 %v3569_v52, %v2147_v35  ;;  %v2110_v33 = vpop.permute.xlu1 %2109 }
 0x29b   : > { %v2148_v6 = vsel %vm2144_vm8, %v2139_v13, %v2110_v33 }
 0x29c   : > { %v2177_v22 = vadd.f32 %v3577_v3, %v2162_v7  ;;  %v2163_v29 = vmul.f32 %v3569_v52, %v2148_v6  ;;  %v2104_v19 = vpop.permute.xlu0 %2103 }
 0x29d   : > { %v2145_v39 = vsel %vm2144_vm8, %v2136_v4, %v2104_v19 }
 0x29e   : > { %v2185_v31 = vmax.f32 %v2177_v22, 0.0  ;;  %v2178_v11 = vadd.f32 %v3577_v3, %v2163_v29  ;;  %v2160_v5 = vmul.f32 %v3569_v52, %v2145_v39  ;;  %v2106_v25 = vpop.permute.xlu1 %2105 }
 0x29f   : > { %v2146_v9 = vsel %vm2144_vm8, %v2137_v2, %v2106_v25 }
 0x2a0   : > { %v2193_v50 = vpack.c.bf16 %v2185_v31, %v2185_v31  ;;  %v2186_v26 = vmax.f32 %v2178_v11, 0.0  ;;  %v2175_v51 = vadd.f32 %v3577_v3, %v2160_v5  ;;  %v2161_v41 = vmul.f32 %v3569_v52, %v2146_v9  ;;  %v2112_v21 = vpop.permute.xlu0 %2111 }
 0x2a1   : > { %v2149_v37 = vsel %vm2144_vm8, %v2140_v14, %v2112_v21 }
 0x2a2   : > { %2202 = vst.msk [vmem:[%s3603_s14 + $0x8] sm:$0xf] %vm2199_vm9, %v2193_v50  ;;  %v2194_v1 = vpack.c.bf16 %v2186_v26, %v2186_v26  ;;  %v2183_v46 = vmax.f32 %v2175_v51, 0.0  ;;  %v2176_v18 = vadd.f32 %v3577_v3, %v2161_v41  ;;  %v2164_v16 = vmul.f32 %v3569_v52, %v2149_v37  ;;  %v2114_v61 = vpop.permute.xlu1 %2113 }
 0x2a3   : > { %v2150_v57 = vsel %vm2144_vm8, %v2141_v30, %v2114_v61 }
 0x2a4   : > { %2203 = vst.msk [vmem:[%s3603_s14 + $0xc] sm:$0xf] %vm2199_vm9, %v2194_v1  ;;  %v2191_v45 = vpack.c.bf16 %v2183_v46, %v2183_v46  ;;  %v2184_v62 = vmax.f32 %v2176_v18, 0.0  ;;  %v2179_v36 = vadd.f32 %v3577_v3, %v2164_v16  ;;  %v2165_v53 = vmul.f32 %v3569_v52, %v2150_v57  ;;  %v2116_v59 = vpop.permute.xlu0 %2115 }
 0x2a5   : > { %v2151_v42 = vsel %vm2144_vm8, %v2142_v54, %v2116_v59 }
 0x2a6   : > { %2200 = vst.msk [vmem:[%s3603_s14] sm:$0xf] %vm2199_vm9, %v2191_v45  ;;  %v2192_v15 = vpack.c.bf16 %v2184_v62, %v2184_v62  ;;  %v2187_v8 = vmax.f32 %v2179_v36, 0.0  ;;  %v2180_v47 = vadd.f32 %v3577_v3, %v2165_v53  ;;  %v2166_v40 = vmul.f32 %v3569_v52, %v2151_v42  ;;  %v2118_v55 = vpop.permute.xlu1 %2117 }
 0x2a7   : > { %v2152_v12 = vsel %vm2144_vm8, %v2143_v43, %v2118_v55 }
 0x2a8   : > { %2201 = vst.msk [vmem:[%s3603_s14 + $0x4] sm:$0xf] %vm2199_vm9, %v2192_v15  ;;  %v2195_v56 = vpack.c.bf16 %v2187_v8, %v2187_v8  ;;  %v2188_v63 = vmax.f32 %v2180_v47, 0.0  ;;  %v2181_v17 = vadd.f32 %v3577_v3, %v2166_v40  ;;  %v2167_v44 = vmul.f32 %v3569_v52, %v2152_v12 }
 0x2aa   : > { %2204 = vst.msk [vmem:[%s3603_s14 + $0x10] sm:$0xf] %vm2199_vm9, %v2195_v56  ;;  %v2196_v38 = vpack.c.bf16 %v2188_v63, %v2188_v63  ;;  %v2189_v58 = vmax.f32 %v2181_v17, 0.0  ;;  %v2182_v28 = vadd.f32 %v3577_v3, %v2167_v44 }
 0x2ac   : > { %2205 = vst.msk [vmem:[%s3603_s14 + $0x14] sm:$0xf] %vm2199_vm9, %v2196_v38  ;;  %v2197_v0 = vpack.c.bf16 %v2189_v58, %v2189_v58  ;;  %v2190_v20 = vmax.f32 %v2182_v28, 0.0 }
 0x2ae   : > { %2206 = vst.msk [vmem:[%s3603_s14 + $0x18] sm:$0xf] %vm2199_vm9, %v2197_v0  ;;  %v2198_v10 = vpack.c.bf16 %v2190_v20, %v2190_v20 }
 0x2b0   : > { %2207 = vst.msk [vmem:[%s3603_s14 + $0x1c] sm:$0xf] %vm2199_vm9, %v2198_v10 }
 0x2b1 PF: > { %s14_s15 = sadd.s32 1, %s2698_s15  }
 0x2b2   : > { %p11_p4 = scmp.ge.s32.totalorder %s14_s15, 4  }
 0x2b4   :  { %13 = sbr.rel (!%p11_p4) target bundleno = 1 (0x1), region = 71 }

// kernel: _forward_impl.7
= control target key start
LH: loop header
LB: loop body
LE: loop exit
PB: predicated region body
PF: predicated region fallthrough
CT: control target
= control target key end

     0   :  { %s5811_s15 = smov 0   ;;  %s8855_s0 = inlined_call_operand.vmem [shape: bf16[2,18,18,8], index: 0, kind: input, shape index: {}]   ;;  %s8856_s1 = inlined_call_operand.vmem [shape: bf16[4,32,1], index: 1, kind: input, shape index: {}]   ;;  %s8857_s2 = inlined_call_operand.vmem [shape: f32[1,4], index: 2, kind: input, shape index: {}]   ;;  %s8858_s3 = inlined_call_operand.vmem [shape: f32[1,4], index: 3, kind: input, shape index: {}]   ;;  %s8859_s4 = inlined_call_operand.vmem [shape: f32[2,16,16,4], index: 4, kind: output, shape index: {}]  }
   0x1 LB: > { %s4910_s16 = sadd.s32 4294967295, %s5778_s15   ;;  %p4914_p0 = scmp.ge.s32.totalorder %s5778_s15, 1  ;;  %s5778_s15 = sphi %s5811_s15, %s14_s15  }
   0x2   : > { %p162_p1 = scmp.lt.s32.totalorder %s5778_s15, 3 }
   0x4   : > { %p163_p2 = pnand %p4914_p0, %p162_p1 }
   0x6   : > { %166 = sbr.rel (%p163_p2) target bundleno = 1077 (0x435), region = 36 }
   0xd   : > { %p188_p3 = scmp.lt.s32.totalorder %s4910_s16, 1  ;;  %vm424_vm0 = vsmask.f32 7424  ;;  %s5780_s21 = smov 8   ;;  %vm1033_vm1 = vcmask 64512   ;;  %vm1066_vm2 = vcmask 130048  }
   0xe   : > { %s5781_s22 = smov 16   ;;  %s5782_s27 = smov 24   ;;  %vm1099_vm3 = vcmask 195584   ;;  %vm1148_vm4 = vcmask 261120   ;;  %vm4613_vm5 = vcmask 7168   ;;  %vm4646_vm6 = vcmask 15360  }
   0xf   : > { %s9452_s16 = smov (!%p188_p3, %s4910_s16), 1  ;;  %s5783_s14 = smov 1   ;;  %vm4679_vm7 = vcmask 23552   ;;  %vm4822_vm8 = vcmask 31744  }
  0x10   : > { %s5495_s17 = smul.u32 216, %s9452_s16  ;;  %s5785_s18 = smov 3  }
  0x11   : > { %s5278_s23 = sshll.u32 %s9452_s16, 8 }
  0x12   : > { %s5825_s20 = scalar_lea.vmem %s8855_s0, %s5495_s17  ;;  %s5784_s17 = smov 2  }
  0x13   : > { %v203_v0 = vld [vmem:[%s5825_s20 + $0x18] sm:$0xf]  ;;  %v5829_v1 = vld [vmem:[%s5825_s20 + $0x1c] sm:$0xf]  ;;  %v199_v4 = vld [vmem:[%s5825_s20] sm:$0xf]  ;;  %s8636_s25 = scalar_lea.vmem %s8859_s4, %s5278_s23 }
  0x14   : > { %v5832_v2 = vcombine.low %v203_v0, %v5829_v1  ;;  %v5835_v3 = vld [vmem:[%s5825_s20 + $0x20] ss:$0 sps:$4 sm:$0x11]   ;;  %v5839_v5 = vld [vmem:[%s5825_s20 + $0x4] sm:$0xf] }
  0x15   : > { %v205_v6 = vld [vmem:[%s5825_s20 + $0x24] sm:$0xf]  ;;  %v457_v9 = vshll.u32 %v5835_v3, 16  ;;  %v5846_v10 = vcombine.low %v199_v4, %v5839_v5  ;;  %v5849_v11 = vld [vmem:[%s5825_s20 + $0x8] ss:$0 sps:$4 sm:$0x11]  }
  0x16   : > { %9038 = vst [vmem:[#allocation2_spill] sm:$0xff] %v5832_v2  ;;  %v450_v7 = vshrl.u32 %v5832_v2, 16  ;;  %v452_v8 = vshll.u32 %v5832_v2, 16  ;;  %v5852_v12 = vld [vmem:[%s5825_s20 + $0x28] sm:$0xf]  ;;  %v433_v19 = vshll.u32 %v5849_v11, 16 }
  0x17   : > { %9039 = vst [vmem:[#allocation3_spill] sm:$0xff] %v5846_v10  ;;  %v201_v13 = vld [vmem:[%s5825_s20 + $0xc] sm:$0xf]  ;;  %v5855_v15 = vrot.slane %v457_v9, 1  ;;  %v426_v16 = vshrl.u32 %v5846_v10, 16  ;;  %v428_v17 = vshll.u32 %v5846_v10, 16  ;;  %v5864_v20 = vcombine.low %v205_v6, %v5852_v12 }
  0x18   : > { %v454_v14 = vrot.slane %v452_v8, 1  ;;  %v5860_v18 = vld [vmem:[%s5825_s20 + $0x10] sm:$0xf]  ;;  %v5867_v21 = vld [vmem:[%s5825_s20 + $0x2c] ss:$0 sps:$4 sm:$0x11]  }
  0x19   : > { %9040 = vst [vmem:[#allocation4_spill] sm:$0xff] %v5864_v20  ;;  %v5870_v22 = vcombine.low %v201_v13, %v5860_v18  ;;  %v430_v24 = vrot.slane %v428_v17, 1  ;;  %v5873_v25 = vld [vmem:[%s5825_s20 + $0x14] ss:$0 sps:$4 sm:$0x11]   ;;  %v5876_v27 = vrot.slane %v433_v19, 1 }
  0x1a   : > { %v455_v23 = vor.u32 %v454_v14, %v450_v7  ;;  %v209_v26 = vld [vmem:[%s5825_s20 + $0x3c] sm:$0xf]  ;;  %v462_v28 = vshrl.u32 %v5864_v20, 16  ;;  %v464_v29 = vshll.u32 %v5864_v20, 16  ;;  %v469_v30 = vshll.u32 %v5867_v21, 16 }
  0x1b   : > { %9041 = vst [vmem:[#allocation5_spill] sm:$0xff] %v5870_v22  ;;  %v5882_v31 = vld [vmem:[%s5825_s20 + $0x40] sm:$0xf]  ;;  %v431_v33 = vor.u32 %v430_v24, %v426_v16  ;;  %v438_v34 = vshrl.u32 %v5870_v22, 16  ;;  %v440_v35 = vshll.u32 %v5870_v22, 16  ;;  %v445_v39 = vshll.u32 %v5873_v25, 16 }
  0x1c   : > { %v460_v32 = vsel %vm424_vm0, %v455_v23, %v5855_v15  ;;  %v207_v36 = vld [vmem:[%s5825_s20 + $0x30] sm:$0xf]  ;;  %v466_v37 = vrot.slane %v464_v29, 1  ;;  %v5890_v38 = vrot.slane %v469_v30, 1  ;;  %v5894_v40 = vcombine.low %v209_v26, %v5882_v31  ;;  %v5902_v44 = vld [vmem:[%s5825_s20 + $0x34] sm:$0xf] }
  0x1d   : > { %621 = vrot.lane.b32.xlu1 %v460_v32, %s5780_s21  ;;  %v5897_v41 = vld [vmem:[%s5825_s20 + $0x44] ss:$0 sps:$4 sm:$0x11]   ;;  %v436_v42 = vsel %vm424_vm0, %v431_v33, %v5876_v27  ;;  %v442_v43 = vrot.slane %v440_v35, 1  ;;  %v5905_v46 = vrot.slane %v445_v39, 1  ;;  %v5914_v52 = vcombine.low %v207_v36, %v5902_v44 }
  0x1e   : > { %9042 = vst [vmem:[#allocation6_spill] sm:$0xff] %v5894_v40  ;;  %617 = vrot.lane.b32.xlu0 %v436_v42, %s5780_s21  ;;  %v467_v45 = vor.u32 %v466_v37, %v462_v28  ;;  %v486_v47 = vshrl.u32 %v5894_v40, 16  ;;  %v488_v48 = vshll.u32 %v5894_v40, 16  ;;  %v5910_v49 = vld [vmem:[%s5825_s20 + $0x38] ss:$0 sps:$4 sm:$0x11]  }
  0x1f   : > { %v443_v50 = vor.u32 %v442_v43, %v438_v34  ;;  %v493_v51 = vshll.u32 %v5897_v41, 16  ;;  %9043 = vst [vmem:[#allocation7_spill] sm:$0xff] %v5914_v52  ;;  %v213_v53 = vld [vmem:[%s5825_s20 + $0x54] sm:$0xf]  ;;  %v5918_v54 = vld [vmem:[%s5825_s20 + $0x58] sm:$0xf] }
  0x20   : > { %v472_v55 = vsel %vm424_vm0, %v467_v45, %v5890_v38  ;;  %v490_v56 = vrot.slane %v488_v48, 1  ;;  %v481_v57 = vshll.u32 %v5910_v49, 16  ;;  %v5924_v58 = vcombine.low %v213_v53, %v5918_v54  ;;  %v211_v59 = vld [vmem:[%s5825_s20 + $0x48] sm:$0xf]  ;;  %v5943_v9 = vld [vmem:[%s5825_s20 + $0x4c] sm:$0xf] }
  0x21   : > { %623 = vrot.lane.b32.xlu1 %v472_v55, %s5780_s21  ;;  %v448_v60 = vsel %vm424_vm0, %v443_v50, %v5905_v46  ;;  %v5930_v61 = vrot.slane %v493_v51, 1  ;;  %v474_v62 = vshrl.u32 %v5914_v52, 16  ;;  %v476_v63 = vshll.u32 %v5914_v52, 16  ;;  %v5935_v0 = vld [vmem:[%s5825_s20 + $0x5c] ss:$0 sps:$4 sm:$0x11]  }
  0x22   : > { %9044 = vst [vmem:[#allocation8_spill] sm:$0xff] %v5924_v58  ;;  %9045 = vst [vmem:[#allocation9_spill] sm:$0xff] %v5935_v0  ;;  %619 = vrot.lane.b32.xlu0 %v448_v60, %s5780_s21  ;;  %v491_v4 = vor.u32 %v490_v56, %v486_v47  ;;  %v5938_v6 = vrot.slane %v481_v57, 1  ;;  %v510_v7 = vshrl.u32 %v5924_v58, 16  ;;  %v512_v8 = vshll.u32 %v5924_v58, 16 }
  0x23   : > { %v478_v13 = vrot.slane %v476_v63, 1  ;;  %v517_v14 = vshll.u32 %v5935_v0, 16  ;;  %v5947_v16 = vcombine.low %v211_v59, %v5943_v9  ;;  %v217_v17 = vld [vmem:[%s5825_s20 + $0x6c] sm:$0xf]  ;;  %v5956_v26 = vld [vmem:[%s5825_s20 + $0x70] sm:$0xf] }
  0x24   : > { %v496_v19 = vsel %vm424_vm0, %v491_v4, %v5930_v61  ;;  %v514_v23 = vrot.slane %v512_v8, 1  ;;  %v5953_v24 = vld [vmem:[%s5825_s20 + $0x50] ss:$0 sps:$4 sm:$0x11]   ;;  %v5965_v35 = vcombine.low %v217_v17, %v5956_v26  ;;  %v215_v37 = vld [vmem:[%s5825_s20 + $0x60] sm:$0xf] }
  0x25   : > { %9046 = vst [vmem:[#allocation10_spill] sm:$0xff] %v5947_v16  ;;  %627 = vrot.lane.b32.xlu1 %v496_v19, %s5780_s21  ;;  %v479_v28 = vor.u32 %v478_v13, %v474_v62  ;;  %v5959_v29 = vrot.slane %v517_v14, 1  ;;  %v498_v30 = vshrl.u32 %v5947_v16, 16  ;;  %v500_v32 = vshll.u32 %v5947_v16, 16  ;;  %v5974_v43 = vld [vmem:[%s5825_s20 + $0x64] sm:$0xf] }
  0x26   : > { %v515_v33 = vor.u32 %v514_v23, %v510_v7  ;;  %v505_v34 = vshll.u32 %v5953_v24, 16  ;;  %9048 = vst [vmem:[#allocation12_spill] sm:$0xff] %v5965_v35  ;;  %v5968_v36 = vld [vmem:[%s5825_s20 + $0x74] ss:$0 sps:$4 sm:$0x11]   ;;  %v534_v48 = vshrl.u32 %v5965_v35, 16  ;;  %v5989_v56 = vcombine.low %v215_v37, %v5974_v43 }
  0x27   : > { %9047 = vst [vmem:[#allocation11_spill] sm:$0xff] %v5959_v29  ;;  %9049 = vst [vmem:[#allocation13_spill] sm:$0xff] %v5968_v36  ;;  %v484_v39 = vsel %vm424_vm0, %v479_v28, %v5938_v6  ;;  %v502_v42 = vrot.slane %v500_v32, 1  ;;  %v536_v50 = vshll.u32 %v5965_v35, 16  ;;  %v541_v55 = vshll.u32 %v5968_v36, 16 }
  0x28   : > { %625 = vrot.lane.b32.xlu0 %v484_v39, %s5780_s21  ;;  %v520_v45 = vsel %vm424_vm0, %v515_v33, %v5959_v29  ;;  %v5979_v47 = vrot.slane %v505_v34, 1  ;;  %v5984_v51 = vld [vmem:[%s5825_s20 + $0x68] ss:$0 sps:$4 sm:$0x11]   ;;  %9052 = vst [vmem:[#allocation16_spill] sm:$0xff] %v5989_v56  ;;  %v522_v13 = vshrl.u32 %v5989_v56, 16 }
  0x29   : > { %9051 = vst [vmem:[#allocation15_spill] sm:$0xff] %v5984_v51  ;;  %631 = vrot.lane.b32.xlu1 %v520_v45, %s5780_s21  ;;  %v503_v53 = vor.u32 %v502_v42, %v498_v30  ;;  %v221_v57 = vld [vmem:[%s5825_s20 + $0x84] sm:$0xf]  ;;  %v5993_v59 = vld [vmem:[%s5825_s20 + $0x88] sm:$0xf]  ;;  %v538_v60 = vrot.slane %v536_v50, 1 }
  0x2a   : > { %9050 = vst [vmem:[#allocation14_spill] sm:$0xff] %v5979_v47  ;;  %9053 = vst [vmem:[#allocation17_spill] sm:$0xff] %v5993_v59  ;;  %v529_v62 = vshll.u32 %v5984_v51, 16  ;;  %v5997_v63 = vcombine.low %v221_v57, %v5993_v59  ;;  %v219_v4 = vld [vmem:[%s5825_s20 + $0x78] sm:$0xf]  ;;  %v6002_v8 = vrot.slane %v541_v55, 1 }
  0x2b   : > { %v508_v7 = vsel %vm424_vm0, %v503_v53, %v5979_v47  ;;  %v524_v14 = vshll.u32 %v5989_v56, 16  ;;  %v6007_v17 = vld [vmem:[%s5825_s20 + $0x8c] ss:$0 sps:$4 sm:$0x11]   ;;  %v539_v19 = vor.u32 %v538_v60, %v534_v48  ;;  %v6015_v32 = vld [vmem:[%s5825_s20 + $0x7c] sm:$0xf] }
  0x2c   : > { %9054 = vst [vmem:[#allocation18_spill] sm:$0xff] %v5997_v63  ;;  %9055 = vst [vmem:[#allocation19_spill] sm:$0xff] %v6002_v8  ;;  %629 = vrot.lane.b32.xlu0 %v508_v7, %s5780_s21  ;;  %v6010_v23 = vrot.slane %v529_v62, 1  ;;  %v558_v28 = vshrl.u32 %v5997_v63, 16  ;;  %v560_v30 = vshll.u32 %v5997_v63, 16  ;;  %v565_v34 = vshll.u32 %v6007_v17, 16 }
  0x2d   : > { %9056 = vst [vmem:[#allocation20_spill] sm:$0xff] %v6007_v17  ;;  %9058 = vst [vmem:[#allocation22_spill] sm:$0xff] %v6015_v32  ;;  %v526_v33 = vrot.slane %v524_v14, 1  ;;  %v6019_v37 = vcombine.low %v219_v4, %v6015_v32  ;;  %v225_v39 = vld [vmem:[%s5825_s20 + $0x9c] sm:$0xf]  ;;  %v544_v42 = vsel %vm424_vm0, %v539_v19, %v6002_v8  ;;  %v5591_v17 = vld [vmem:[%s8856_s1 + $0x8] sm:$0xff]  }
  0x2e   : > { %9057 = vst [vmem:[#allocation21_spill] sm:$0xff] %v6010_v23  ;;  %v562_v45 = vrot.slane %v560_v30, 1  ;;  %v6025_v48 = vld [vmem:[%s5825_s20 + $0x80] ss:$0 sps:$4 sm:$0x11]   ;;  %635 = vrot.lane.b32.xlu1 %v544_v42, %s5780_s21  ;;  %v6031_v55 = vrot.slane %v565_v34, 1 }
  0x2f   : > { %9059 = vst [vmem:[#allocation23_spill] sm:$0xff] %v6019_v37  ;;  %9060 = vst [vmem:[#allocation24_spill] sm:$0xff] %v6025_v48  ;;  %v6028_v50 = vld [vmem:[%s5825_s20 + $0xa0] sm:$0xf]  ;;  %v527_v53 = vor.u32 %v526_v33, %v522_v13  ;;  %v546_v57 = vshrl.u32 %v6019_v37, 16  ;;  %v548_v60 = vshll.u32 %v6019_v37, 16 }
  0x30   : > { %9061 = vst [vmem:[#allocation25_spill] sm:$0xff] %v6028_v50  ;;  %9062 = vst [vmem:[#allocation26_spill] sm:$0xff] %v6031_v55  ;;  %v563_v62 = vor.u32 %v562_v45, %v558_v28  ;;  %v553_v4 = vshll.u32 %v6025_v48, 16  ;;  %v6037_v7 = vcombine.low %v225_v39, %v6028_v50  ;;  %v6040_v14 = vld [vmem:[%s5825_s20 + $0xa4] ss:$0 sps:$4 sm:$0x11]  }
  0x31   : > { %9064 = vst [vmem:[#allocation28_spill] sm:$0xff] %v6040_v14  ;;  %v223_v19 = vld [vmem:[%s5825_s20 + $0x90] sm:$0xf]  ;;  %v532_v13 = vsel %vm424_vm0, %v527_v53, %v6010_v23  ;;  %v550_v30 = vrot.slane %v548_v60, 1  ;;  %v6046_v33 = vld [vmem:[%s5825_s20 + $0x94] sm:$0xf] }
  0x32   : > { %9063 = vst [vmem:[#allocation27_spill] sm:$0xff] %v6037_v7  ;;  %633 = vrot.lane.b32.xlu0 %v532_v13, %s5780_s21  ;;  %v568_v28 = vsel %vm424_vm0, %v563_v62, %v6031_v55  ;;  %v6051_v34 = vrot.slane %v553_v4, 1  ;;  %v582_v39 = vshrl.u32 %v6037_v7, 16  ;;  %v584_v42 = vshll.u32 %v6037_v7, 16  ;;  %v229_v13 = vld [vmem:[%s5825_s20 + $0xb4] sm:$0xf] }
  0x33   : > { %v6056_v45 = vld [vmem:[%s5825_s20 + $0x98] ss:$0 sps:$4 sm:$0x11]   ;;  %639 = vrot.lane.b32.xlu1 %v568_v28, %s5780_s21  ;;  %v551_v53 = vor.u32 %v550_v30, %v546_v57  ;;  %v589_v60 = vshll.u32 %v6040_v14, 16  ;;  %v6061_v63 = vcombine.low %v223_v19, %v6046_v33  ;;  %v227_v35 = vld [vmem:[%s5825_s20 + $0xa8] sm:$0xf] }
  0x34   : > { %9065 = vst [vmem:[#allocation29_spill] sm:$0xff] %v6051_v34  ;;  %9066 = vst [vmem:[#allocation30_spill] sm:$0xff] %v6056_v45  ;;  %v6065_v62 = vld [vmem:[%s5825_s20 + $0xb8] sm:$0xf]  ;;  %v586_v4 = vrot.slane %v584_v42, 1  ;;  %v577_v37 = vshll.u32 %v6056_v45, 16 }
  0x35   : > { %9067 = vst [vmem:[#allocation31_spill] sm:$0xff] %v6061_v63  ;;  %9068 = vst [vmem:[#allocation32_spill] sm:$0xff] %v6065_v62  ;;  %v6069_v7 = vcombine.low %v229_v13, %v6065_v62  ;;  %v556_v28 = vsel %vm424_vm0, %v551_v53, %v6051_v34  ;;  %v6074_v57 = vrot.slane %v589_v60, 1  ;;  %v570_v19 = vshrl.u32 %v6061_v63, 16  ;;  %v6085_v16 = vld [vmem:[%s5825_s20 + $0xac] sm:$0xf] }
  0x36   : > { %v572_v30 = vshll.u32 %v6061_v63, 16  ;;  %v6079_v56 = vld [vmem:[%s5825_s20 + $0xbc] ss:$0 sps:$4 sm:$0x11]   ;;  %637 = vrot.lane.b32.xlu0 %v556_v28, %s5780_s21  ;;  %v587_v42 = vor.u32 %v586_v4, %v582_v39  ;;  %v6087_v60 = vrot.slane %v577_v37, 1  ;;  %v6091_v63 = vcombine.low %v227_v35, %v6085_v16 }
  0x37   : > { %9069 = vst [vmem:[#allocation33_spill] sm:$0xff] %v6069_v7  ;;  %9070 = vst [vmem:[#allocation34_spill] sm:$0xff] %v6074_v57  ;;  %v606_v58 = vshrl.u32 %v6069_v7, 16  ;;  %v608_v13 = vshll.u32 %v6069_v7, 16  ;;  %v613_v40 = vshll.u32 %v6079_v56, 16 }
  0x38   : > { %9071 = vst [vmem:[#allocation35_spill] sm:$0xff] %v6079_v56  ;;  %v574_v53 = vrot.slane %v572_v30, 1  ;;  %9072 = vst [vmem:[#allocation36_spill] sm:$0xff] %v6091_v63  ;;  %v592_v28 = vsel %vm424_vm0, %v587_v42, %v6074_v57  ;;  %v6096_v4 = vld [vmem:[%s5825_s20 + $0xb0] ss:$0 sps:$4 sm:$0x11]  }
  0x39   : > { %v610_v39 = vrot.slane %v608_v13, 1  ;;  %9073 = vst [vmem:[#allocation37_spill] sm:$0xff] %v6096_v4  ;;  %643 = vrot.lane.b32.xlu1 %v592_v28, %s5780_s21  ;;  %v6099_v52 = vrot.slane %v613_v40, 1  ;;  %v594_v37 = vshrl.u32 %v6091_v63, 16  ;;  %v596_v30 = vshll.u32 %v6091_v63, 16 }
  0x3a   : > { %v575_v7 = vor.u32 %v574_v53, %v570_v19  ;;  %v601_v20 = vshll.u32 %v6096_v4, 16  ;;  %v4920_v42 = vld [vmem:[%s5825_s20 + $0x18] sm:$0xf]  ;;  %v6106_v13 = vld [vmem:[%s5825_s20 + $0x1c] sm:$0xf] }
  0x3b   : > { %9074 = vst [vmem:[#allocation38_spill] sm:$0xff] %v6099_v52  ;;  %v611_v35 = vor.u32 %v610_v39, %v606_v58  ;;  %9075 = vst [vmem:[#allocation39_spill] sm:$0xff] %v6106_v13  ;;  %v598_v19 = vrot.slane %v596_v30, 1  ;;  %v6117_v39 = vcombine.low %v4920_v42, %v6106_v13  ;;  %v4918_v63 = vld [vmem:[%s5825_s20 + $0xc] sm:$0xf] }
  0x3c   : > { %v580_v28 = vsel %vm424_vm0, %v575_v7, %v6087_v60  ;;  %v6113_v53 = vrot.slane %v601_v20, 1  ;;  %v6121_v7 = vld [vmem:[%s5825_s20 + $0x10] sm:$0xf]  ;;  %v4922_v42 = vld [vmem:[%s5825_s20 + $0x24] sm:$0xf] }
  0x3d   : > { %641 = vrot.lane.b32.xlu0 %v580_v28, %s5780_s21  ;;  %v616_v40 = vsel %vm424_vm0, %v611_v35, %v6099_v52  ;;  %v599_v58 = vor.u32 %v598_v19, %v594_v37  ;;  %9076 = vst [vmem:[#allocation40_spill] sm:$0xff] %v6117_v39  ;;  %9077 = vst [vmem:[#allocation41_spill] sm:$0xff] %v6121_v7  ;;  %v4924_v30 = vld [vmem:[%s5825_s20 + $0x30] sm:$0xf]  ;;  %v6125_v28 = vld [vmem:[%s5825_s20 + $0x34] sm:$0xf]  ;;  %v6131_v37 = vcombine.low %v4918_v63, %v6121_v7 }
  0x3e   : > { %647 = vrot.lane.b32.xlu1 %v616_v40, %s5780_s21  ;;  %9078 = vst [vmem:[#allocation42_spill] sm:$0xff] %v6125_v28  ;;  %v6136_v35 = vcombine.low %v4924_v30, %v6125_v28  ;;  %v6140_v19 = vld [vmem:[%s5825_s20 + $0x28] sm:$0xf]  ;;  %v6158_v28 = vld [vmem:[%s5825_s20 + $0x40] sm:$0xf]  ;;  %v824_v62 = vshll.u32 %v6117_v39, 16 }
  0x3f   : > { %v604_v20 = vsel %vm424_vm0, %v599_v58, %v6113_v53  ;;  %9079 = vst [vmem:[#allocation43_spill] sm:$0xff] %v6131_v37  ;;  %9081 = vst [vmem:[#allocation45_spill] sm:$0xff] %v6140_v19  ;;  %v4928_v40 = vld [vmem:[%s5825_s20 + $0x48] sm:$0xf]  ;;  %v6144_v58 = vld [vmem:[%s5825_s20 + $0x4c] sm:$0xf]  ;;  %v6149_v63 = vcombine.low %v4922_v42, %v6140_v19 }
  0x40   : > { %9080 = vst [vmem:[#allocation44_spill] sm:$0xff] %v6136_v35  ;;  %9082 = vst [vmem:[#allocation46_spill] sm:$0xff] %v6144_v58  ;;  %v6154_v30 = vcombine.low %v4928_v40, %v6144_v58  ;;  %v4932_v2 = vld [vmem:[%s5825_s20 + $0x60] sm:$0xf]  ;;  %v4933_v10 = vld [vmem:[%s5825_s20 + $0x64] sm:$0xf] }
  0x41   : > { %645 = vrot.lane.b32.xlu0 %v604_v20, %s5780_s21  ;;  %9083 = vst [vmem:[#allocation47_spill] sm:$0xff] %v6149_v63  ;;  %v4926_v20 = vld [vmem:[%s5825_s20 + $0x3c] sm:$0xf]  ;;  %9085 = vst [vmem:[#allocation49_spill] sm:$0xff] %v6158_v28  ;;  %v4930_v19 = vld [vmem:[%s5825_s20 + $0x54] sm:$0xf]  ;;  %v6170_v40 = vcombine.low %v4932_v2, %v4933_v10 }
  0x42   : > { %731 = vrot.lane.b32.xlu1 %v6117_v39, %s5781_s22  ;;  %9084 = vst [vmem:[#allocation48_spill] sm:$0xff] %v6154_v30  ;;  %v6165_v42 = vcombine.low %v4926_v20, %v6158_v28  ;;  %v4931_v58 = vld [vmem:[%s5825_s20 + $0x58] sm:$0xf]  ;;  %v4937_v22 = vld [vmem:[%s5825_s20 + $0x7c] sm:$0xf]  ;;  %v812_v45 = vshll.u32 %v6131_v37, 16 }
  0x43   : > { %9087 = vst [vmem:[#allocation51_spill] sm:$0xff] %v6170_v40  ;;  %v4936_v13 = vld [vmem:[%s5825_s20 + $0x78] sm:$0xf]  ;;  %v6177_v7 = vcombine.low %v4930_v19, %v4931_v58  ;;  %v4934_v28 = vld [vmem:[%s5825_s20 + $0x6c] sm:$0xf]  ;;  %v5590_v19 = vld [vmem:[%s8856_s1] sm:$0xff]  }
  0x44   : > { %9086 = vst [vmem:[#allocation50_spill] sm:$0xff] %v6165_v42  ;;  %v6181_v20 = vcombine.low %v4936_v13, %v4937_v22  ;;  %v4935_v52 = vld [vmem:[%s5825_s20 + $0x70] sm:$0xf]  ;;  %v4941_v10 = vld [vmem:[%s5825_s20 + $0x94] sm:$0xf]  ;;  %5351 = vmatprep.subr.bf16.mxu0 %v5590_v19  ;;  %v826_v48 = vrot.slane %v824_v62, 1 }
  0x45   : > { %729 = vrot.lane.b32.xlu0 %v6131_v37, %s5781_s22  ;;  %9088 = vst [vmem:[#allocation52_spill] sm:$0xff] %v6177_v7  ;;  %v4940_v2 = vld [vmem:[%s5825_s20 + $0x90] sm:$0xf]  ;;  %v4938_v56 = vld [vmem:[%s5825_s20 + $0x84] sm:$0xf]  ;;  %v6195_v58 = vcombine.low %v4934_v28, %v4935_v52  ;;  %5352 = vmatpush3.bf16.msra.mxu0 %v5590_v19  ;;  %v822_v19 = vshrl.u32 %v6117_v39, 16 }
  0x46   : > { %735 = vrot.lane.b32.xlu1 %v6136_v35, %s5781_s22  ;;  %9089 = vst [vmem:[#allocation53_spill] sm:$0xff] %v6181_v20  ;;  %v4939_v4 = vld [vmem:[%s5825_s20 + $0x88] sm:$0xf]  ;;  %v4945_v22 = vld [vmem:[%s5825_s20 + $0xac] sm:$0xf]  ;;  %v6203_v14 = vcombine.low %v4940_v2, %v4941_v10  ;;  %v810_v23 = vshrl.u32 %v6131_v37, 16  ;;  %5353 = vmatprep.subr.bf16.mxu0 %v5591_v17 }
  0x47   : > { %v4944_v57 = vld [vmem:[%s5825_s20 + $0xa8] sm:$0xf]  ;;  %9090 = vst [vmem:[#allocation54_spill] sm:$0xff] %v6195_v58  ;;  %v6199_v13 = vld [vmem:[%s5825_s20 + $0x20] ss:$0 sps:$4 sm:$0x11]   ;;  %v6217_v2 = vcombine.low %v4938_v56, %v4939_v4  ;;  %v827_v32 = vor.u32 %v826_v48, %v822_v19 }
  0x48   : > { %9091 = vst [vmem:[#allocation55_spill] sm:$0xff] %v6199_v13  ;;  %9092 = vst [vmem:[#allocation56_spill] sm:$0xff] %v6203_v14  ;;  %v6207_v55 = vld [vmem:[%s5825_s20 + $0x14] ss:$0 sps:$4 sm:$0x11]   ;;  %v6219_v10 = vcombine.low %v4944_v57, %v4945_v22  ;;  %v829_v8 = vshll.u32 %v6199_v13, 16 }
  0x49   : > { %733 = vrot.lane.b32.xlu0 %v6149_v63, %s5781_s22  ;;  %9093 = vst [vmem:[#allocation57_spill] sm:$0xff] %v6207_v55  ;;  %v4942_v52 = vld [vmem:[%s5825_s20 + $0x9c] sm:$0xf]  ;;  %v4943_v28 = vld [vmem:[%s5825_s20 + $0xa0] sm:$0xf]  ;;  %9094 = vst [vmem:[#allocation58_spill] sm:$0xff] %v6217_v2  ;;  %5354 = vmatpush3.bf16.msra.mxu0 %v5591_v17 }
  0x4a   : > { %739 = vrot.lane.b32.xlu1 %v6154_v30, %s5781_s22  ;;  %9095 = vst [vmem:[#allocation59_spill] sm:$0xff] %v6219_v10  ;;  %v4948_v34 = vld [vmem:[%s5825_s20 + $0xc0] sm:$0xf]  ;;  %v4949_v50 = vld [vmem:[%s5825_s20 + $0xc4] sm:$0xf]  ;;  %v817_v36 = vshll.u32 %v6207_v55, 16  ;;  %v6239_v62 = vcombine.low %v4942_v52, %v4943_v28 }
  0x4b   : > { %v848_v56 = vshll.u32 %v6136_v35, 16  ;;  %v814_v57 = vrot.slane %v812_v45, 1  ;;  %v6231_v4 = vld [vmem:[%s5825_s20 + $0x38] ss:$0 sps:$4 sm:$0x11]   ;;  %v846_v13 = vshrl.u32 %v6136_v35, 16  ;;  %v6248_v17 = vcombine.low %v4948_v34, %v4949_v50 }
  0x4c   : > { %9096 = vst [vmem:[#allocation60_spill] sm:$0xff] %v6231_v4  ;;  %v4946_v22 = vld [vmem:[%s5825_s20 + $0xb4] sm:$0xf]  ;;  %v4947_v39 = vld [vmem:[%s5825_s20 + $0xb8] sm:$0xf]  ;;  %v836_v59 = vshll.u32 %v6149_v63, 16 }
  0x4d   : > { %737 = vrot.lane.b32.xlu0 %v6165_v42, %s5781_s22  ;;  %9097 = vst [vmem:[#allocation61_spill] sm:$0xff] %v6239_v62  ;;  %v6241_v37 = vrot.slane %v829_v8, 1  ;;  %v6244_v55 = vld [vmem:[%s5825_s20 + $0x2c] ss:$0 sps:$4 sm:$0x11]   ;;  %9100 = vst [vmem:[#allocation64_spill] sm:$0xff] %v6248_v17  ;;  %v815_v47 = vor.u32 %v814_v57, %v810_v23 }
  0x4e   : > { %743 = vrot.lane.b32.xlu1 %v6170_v40, %s5781_s22  ;;  %9099 = vst [vmem:[#allocation63_spill] sm:$0xff] %v6244_v55  ;;  %v6250_v45 = vrot.slane %v817_v36, 1  ;;  %v850_v35 = vrot.slane %v848_v56, 1  ;;  %v6253_v29 = vld [vmem:[%s5825_s20 + $0x50] ss:$0 sps:$4 sm:$0x11]   ;;  %v6266_v36 = vcombine.low %v4946_v22, %v4947_v39 }
  0x4f   : > { %9098 = vst [vmem:[#allocation62_spill] sm:$0xff] %v6241_v37  ;;  %9102 = vst [vmem:[#allocation66_spill] sm:$0xff] %v6253_v29  ;;  %v872_v51 = vshll.u32 %v6154_v30, 16  ;;  %v853_v52 = vshll.u32 %v6231_v4, 16  ;;  %v860_v28 = vshll.u32 %v6165_v42, 16  ;;  %v834_v50 = vshrl.u32 %v6149_v63, 16 }
  0x50   : > { %9101 = vst [vmem:[#allocation65_spill] sm:$0xff] %v6250_v45  ;;  %v6258_v8 = vld [vmem:[%s5825_s20 + $0x44] ss:$0 sps:$4 sm:$0x11]   ;;  %9105 = vst [vmem:[#allocation69_spill] sm:$0xff] %v6266_v36  ;;  %v838_v34 = vrot.slane %v836_v59, 1  ;;  %v6277_v39 = vsel %vm424_vm0, %v827_v32, %v6241_v37  ;;  %v6281_v59 = vsel %vm424_vm0, %v815_v47, %v6250_v45  ;;  %v851_v22 = vor.u32 %v850_v35, %v846_v13 }
  0x51   : > { %741 = vrot.lane.b32.xlu0 %v6177_v7, %s5781_s22  ;;  %9103 = vst [vmem:[#allocation67_spill] sm:$0xff] %v6258_v8  ;;  %v6262_v0 = vld [vmem:[%s5825_s20 + $0x68] ss:$0 sps:$4 sm:$0x11]   ;;  %v896_v56 = vshll.u32 %v6170_v40, 16  ;;  %v841_v23 = vshll.u32 %v6244_v55, 16 }
  0x52   : > { %747 = vrot.lane.b32.xlu1 %v6181_v20, %s5781_s22  ;;  %9104 = vst [vmem:[#allocation68_spill] sm:$0xff] %v6262_v0  ;;  %v870_v48 = vshrl.u32 %v6154_v30, 16  ;;  %v874_v19 = vrot.slane %v872_v51, 1  ;;  %v877_v57 = vshll.u32 %v6253_v29, 16  ;;  %9106 = vst [vmem:[#allocation70_spill] sm:$0xff] %v6277_v39  ;;  %v6283_v63 = vrot.slane %v853_v52, 1 }
  0x53   : > { %9107 = vst [vmem:[#allocation71_spill] sm:$0xff] %v6281_v59  ;;  %v858_v55 = vshrl.u32 %v6165_v42, 16  ;;  %v862_v4 = vrot.slane %v860_v28, 1  ;;  %v865_v30 = vshll.u32 %v6258_v8, 16  ;;  %v901_v51 = vshll.u32 %v6262_v0, 16 }
  0x54   : > { %9108 = vst [vmem:[#allocation72_spill] sm:$0xff] %v6283_v63  ;;  %v839_v32 = vor.u32 %v838_v34, %v834_v50  ;;  %v894_v47 = vshrl.u32 %v6170_v40, 16  ;;  %v898_v37 = vrot.slane %v896_v56, 1  ;;  %v6292_v35 = vld [vmem:[%s5825_s20 + $0x5c] ss:$0 sps:$4 sm:$0x11]   ;;  %v875_v28 = vor.u32 %v874_v19, %v870_v48 }
  0x55   : > { %745 = vrot.lane.b32.xlu0 %v6195_v58, %s5781_s22  ;;  %9109 = vst [vmem:[#allocation73_spill] sm:$0xff] %v6292_v35  ;;  %v884_v13 = vshll.u32 %v6177_v7, 16  ;;  %v6297_v52 = vrot.slane %v841_v23, 1  ;;  %v6299_v42 = vrot.slane %v877_v57, 1  ;;  %v920_v50 = vshll.u32 %v6181_v20, 16 }
  0x56   : > { %751 = vrot.lane.b32.xlu1 %v6203_v14, %s5781_s22  ;;  %v6302_v45 = vld [vmem:[%s5825_s20 + $0x80] ss:$0 sps:$4 sm:$0x11]   ;;  %v6307_v34 = vsel %vm424_vm0, %v851_v22, %v6283_v63  ;;  %v6310_v56 = vld [vmem:[%s5825_s20 + $0x74] ss:$0 sps:$4 sm:$0x11]   ;;  %v863_v0 = vor.u32 %v862_v4, %v858_v55  ;;  %v899_v57 = vor.u32 %v898_v37, %v894_v47 }
  0x57   : > { %9110 = vst [vmem:[#allocation74_spill] sm:$0xff] %v6297_v52  ;;  %9111 = vst [vmem:[#allocation75_spill] sm:$0xff] %v6299_v42  ;;  %v6313_v40 = vld [vmem:[%s5825_s20 + $0x98] ss:$0 sps:$4 sm:$0x11]   ;;  %v6315_v8 = vrot.slane %v865_v30, 1  ;;  %v6331_v55 = vsel %vm424_vm0, %v839_v32, %v6297_v52  ;;  %v6335_v30 = vsel %vm424_vm0, %v875_v28, %v6299_v42 }
  0x58   : > { %9112 = vst [vmem:[#allocation76_spill] sm:$0xff] %v6302_v45  ;;  %9113 = vst [vmem:[#allocation77_spill] sm:$0xff] %v6307_v34  ;;  %v6317_v23 = vrot.slane %v901_v51, 1  ;;  %v882_v48 = vshrl.u32 %v6177_v7, 16  ;;  %v889_v22 = vshll.u32 %v6292_v35, 16  ;;  %v908_v63 = vshll.u32 %v6195_v58, 16 }
  0x59   : > { %749 = vrot.lane.b32.xlu0 %v6217_v2, %s5781_s22  ;;  %9114 = vst [vmem:[#allocation78_spill] sm:$0xff] %v6310_v56  ;;  %9115 = vst [vmem:[#allocation79_spill] sm:$0xff] %v6315_v8  ;;  %v6321_v19 = vld [vmem:[%s5825_s20 + $0x8c] ss:$0 sps:$4 sm:$0x11]   ;;  %v925_v4 = vshll.u32 %v6302_v45, 16  ;;  %v6344_v32 = vsel %vm424_vm0, %v863_v0, %v6315_v8 }
  0x5a   : > { %755 = vrot.lane.b32.xlu1 %v6219_v10, %s5781_s22  ;;  %9116 = vst [vmem:[#allocation80_spill] sm:$0xff] %v6317_v23  ;;  %9117 = vst [vmem:[#allocation81_spill] sm:$0xff] %v6321_v19  ;;  %v944_v37 = vshll.u32 %v6203_v14, 16  ;;  %v918_v51 = vshrl.u32 %v6181_v20, 16  ;;  %v922_v47 = vrot.slane %v920_v50, 1  ;;  %v949_v7 = vshll.u32 %v6313_v40, 16 }
  0x5b   : > { %9118 = vst [vmem:[#allocation82_spill] sm:$0xff] %v6331_v55  ;;  %9119 = vst [vmem:[#allocation83_spill] sm:$0xff] %v6335_v30  ;;  %v932_v28 = vshll.u32 %v6217_v2, 16  ;;  %v6353_v50 = vsel %vm424_vm0, %v899_v57, %v6317_v23  ;;  %v6355_v42 = vrot.slane %v889_v22, 1  ;;  %v910_v52 = vrot.slane %v908_v63, 1 }
  0x5c   : > { %9120 = vst [vmem:[#allocation84_spill] sm:$0xff] %v6344_v32  ;;  %9121 = vst [vmem:[#allocation85_spill] sm:$0xff] %v6353_v50  ;;  %v6358_v0 = vld [vmem:[%s5825_s20 + $0xb0] ss:$0 sps:$4 sm:$0x11]   ;;  %v942_v8 = vshrl.u32 %v6203_v14, 16  ;;  %v923_v57 = vor.u32 %v922_v47, %v918_v51 }
  0x5d   : > { %753 = vrot.lane.b32.xlu0 %v6239_v62, %s5781_s22  ;;  %9122 = vst [vmem:[#allocation86_spill] sm:$0xff] %v6355_v42  ;;  %9123 = vst [vmem:[#allocation87_spill] sm:$0xff] %v6358_v0  ;;  %v930_v63 = vshrl.u32 %v6217_v2, 16  ;;  %v934_v22 = vrot.slane %v932_v28, 1  ;;  %v973_v47 = vshll.u32 %v6358_v0, 16  ;;  %v992_v2 = vshll.u32 %v6248_v17, 16 }
  0x5e   : > { %759 = vrot.lane.b32.xlu1 %v6248_v17, %s5781_s22  ;;  %v6386_v14 = vld [vmem:[%s5825_s20 + $0xbc] ss:$0 sps:$4 sm:$0x11]  }
  0x61   : > { %757 = vrot.lane.b32.xlu0 %v6266_v36, %s5781_s22 }
  0x62   : > { %1003 = vrot.lane.b32.xlu1 %v6277_v39, %s5782_s27  ;;  %v886_v39 = vrot.slane %v884_v13, 1  ;;  %v913_v13 = vshll.u32 %v6310_v56, 16 }
  0x64   : > { %v887_v20 = vor.u32 %v886_v39, %v882_v48  ;;  %v6366_v23 = vrot.slane %v913_v13, 1  ;;  %v6368_v39 = vrot.slane %v949_v7, 1  ;;  %v6372_v48 = vld [vmem:[%s5825_s20 + $0xa4] ss:$0 sps:$4 sm:$0x11]   ;;  %v954_v7 = vshrl.u32 %v6239_v62, 16 }
  0x65   : > { %1001 = vrot.lane.b32.xlu0 %v6281_v59, %s5782_s27  ;;  %v937_v59 = vshll.u32 %v6321_v19, 16  ;;  %v946_v19 = vrot.slane %v944_v37, 1  ;;  %9126 = vst [vmem:[#allocation90_spill] sm:$0xff] %v6372_v48  ;;  %v956_v37 = vshll.u32 %v6239_v62, 16  ;;  %v961_v62 = vshll.u32 %v6372_v48, 16 }
  0x66   : > { %1007 = vrot.lane.b32.xlu1 %v6307_v34, %s5782_s27  ;;  %v906_v34 = vshrl.u32 %v6195_v58, 16  ;;  %v6362_v58 = vrot.slane %v925_v4, 1  ;;  %9125 = vst [vmem:[#allocation89_spill] sm:$0xff] %v6366_v23  ;;  %v966_v4 = vshrl.u32 %v6219_v10, 16 }
  0x67   : > { %v6383_v13 = vld [vmem:[%s5825_s20 + $0xc8] ss:$0 sps:$4 sm:$0x11]   ;;  %v947_v28 = vor.u32 %v946_v19, %v942_v8  ;;  %v958_v0 = vrot.slane %v956_v37, 1  ;;  %v935_v8 = vor.u32 %v934_v22, %v930_v63  ;;  %v1354_v19 = vld [vmem:[%s5825_s20 + $0x90] sm:$0xe] }
  0x68   : > { %9124 = vst [vmem:[#allocation88_spill] sm:$0xff] %v6362_v58  ;;  %v911_v51 = vor.u32 %v910_v52, %v906_v34  ;;  %v990_v52 = vshrl.u32 %v6248_v17, 16  ;;  %v6397_v34 = vsel %vm424_vm0, %v923_v57, %v6362_v58  ;;  %v6416_v37 = vrot.slane %v973_v47, 1 }
  0x69   : > { %1005 = vrot.lane.b32.xlu0 %v6331_v55, %s5782_s27  ;;  %v968_v55 = vshll.u32 %v6219_v10, 16  ;;  %9128 = vst [vmem:[#allocation92_spill] sm:$0xff] %v6397_v34  ;;  %v6420_v58 = vrot.slane %v961_v62, 1  ;;  %v997_v63 = vshll.u32 %v6383_v13, 16  ;;  %v985_v22 = vshll.u32 %v6386_v14, 16 }
  0x6a   : > { %1011 = vrot.lane.b32.xlu1 %v6335_v30, %s5782_s27  ;;  %v6374_v30 = vrot.slane %v937_v59, 1  ;;  %v6392_v59 = vsel %vm424_vm0, %v887_v20, %v6355_v42  ;;  %v6407_v20 = vsel %vm424_vm0, %v911_v51, %v6366_v23  ;;  %v994_v51 = vrot.slane %v992_v2, 1 }
  0x6b   : > { %9127 = vst [vmem:[#allocation91_spill] sm:$0xff] %v6392_v59  ;;  %v970_v10 = vrot.slane %v968_v55, 1  ;;  %9129 = vst [vmem:[#allocation93_spill] sm:$0xff] %v6407_v20  ;;  %v6414_v55 = vsel %vm424_vm0, %v947_v28, %v6368_v39  ;;  %v959_v23 = vor.u32 %v958_v0, %v954_v7  ;;  %v5076_v42 = vcombine.low %v1354_v19, %v6046_v33 }
  0x6c   : > { %9130 = vst [vmem:[#allocation94_spill] sm:$0xff] %v6414_v55  ;;  %v6435_v2 = vsel %vm424_vm0, %v935_v8, %v6374_v30  ;;  %v995_v7 = vor.u32 %v994_v51, %v990_v52  ;;  %v1345_v51 = vld [vmem:[%s5825_s20 + $0x24] sm:$0xe] }
  0x6d   : > { %1009 = vrot.lane.b32.xlu0 %v6344_v32, %s5782_s27  ;;  %v1342_v32 = vld [vmem:[%s5825_s20] sm:$0xe]  ;;  %v971_v57 = vor.u32 %v970_v10, %v966_v4  ;;  %v978_v10 = vshrl.u32 %v6266_v36, 16  ;;  %9131 = vst [vmem:[#allocation95_spill] sm:$0xff] %v6435_v2  ;;  %v1543_v0 = vshrl.u32 %v5076_v42, 16  ;;  %v1545_v33 = vshll.u32 %v5076_v42, 16 }
  0x6e   : > { %1015 = vrot.lane.b32.xlu1 %v6353_v50, %s5782_s27  ;;  %v980_v50 = vshll.u32 %v6266_v36, 16  ;;  %v5064_v17 = vcombine.low %v1342_v32, %v5839_v5  ;;  %v1356_v32 = vld [vmem:[%s5825_s20 + $0xa8] sm:$0xe] }
  0x6f   : > { %v6439_v47 = vsel %vm424_vm0, %v971_v57, %v6416_v37  ;;  %v1547_v28 = vrot.slane %v1545_v33, 1  ;;  %v5078_v8 = vcombine.low %v1356_v32, %v6085_v16  ;;  %v5067_v32 = vcombine.low %v1345_v51, %v5852_v12  ;;  %v1346_v33 = vld [vmem:[%s5825_s20 + $0x30] sm:$0xe] }
  0x70   : > { %v982_v4 = vrot.slane %v980_v50, 1  ;;  %v1425_v62 = vshll.u32 %v5064_v17, 16  ;;  %9132 = vst [vmem:[#allocation96_spill] sm:$0xff] %v6439_v47  ;;  %v6441_v50 = vrot.slane %v997_v63, 1  ;;  %v1423_v19 = vshrl.u32 %v5064_v17, 16 }
  0x71   : > { %1013 = vrot.lane.b32.xlu0 %v6392_v59, %s5782_s27  ;;  %v1343_v59 = vld [vmem:[%s5825_s20 + $0xc] sm:$0xe]  ;;  %v1563_v63 = vshrl.u32 %v5078_v8, 16  ;;  %v1453_v51 = vshrl.u32 %v5067_v32, 16 }
  0x72   : > { %1019 = vrot.lane.b32.xlu1 %v6397_v34, %s5782_s27  ;;  %v1344_v34 = vld [vmem:[%s5825_s20 + $0x18] sm:$0xe]  ;;  %v5065_v5 = vcombine.low %v1343_v59, %v5860_v18  ;;  %9133 = vst [vmem:[#allocation97_spill] sm:$0xff] %v6441_v50  ;;  %v6445_v18 = vsel %vm424_vm0, %v959_v23, %v6420_v58  ;;  %v6447_v59 = vrot.slane %v985_v22, 1  ;;  %v983_v42 = vor.u32 %v982_v4, %v978_v10 }
  0x73   : > { %9134 = vst [vmem:[#allocation98_spill] sm:$0xff] %v6445_v18  ;;  %v5066_v57 = vcombine.low %v1344_v34, %v5829_v1  ;;  %v1427_v52 = vrot.slane %v1425_v62, 1  ;;  %v1548_v23 = vor.u32 %v1547_v28, %v1543_v0  ;;  %v1565_v22 = vshll.u32 %v5078_v8, 16 }
  0x74   : > { %9135 = vst [vmem:[#allocation99_spill] sm:$0xff] %v6447_v59  ;;  %v1435_v36 = vshll.u32 %v5065_v5, 16  ;;  %v6458_v16 = vsel %vm424_vm0, %v995_v7, %v6441_v50  ;;  %v1430_v1 = vshrl.u32 %v5849_v11, 16  ;;  %v1433_v34 = vshrl.u32 %v5065_v5, 16 }
  0x75   : > { %1017 = vrot.lane.b32.xlu0 %v6407_v20, %s5782_s27  ;;  %9136 = vst [vmem:[#allocation100_spill] sm:$0xff] %v6458_v16  ;;  %v6462_v10 = vsel %vm424_vm0, %v1548_v23, %v6087_v60  ;;  %v1567_v17 = vrot.slane %v1565_v22, 1  ;;  %v1445_v4 = vshll.u32 %v5066_v57, 16  ;;  %v6472_v62 = vsel %vm424_vm0, %v983_v42, %v6447_v59 }
  0x76   : > { %1023 = vrot.lane.b32.xlu1 %v6414_v55, %s5782_s27  ;;  %9137 = vst [vmem:[#allocation101_spill] sm:$0xff] %v6472_v62  ;;  %v1428_v60 = vor.u32 %v1427_v52, %v1423_v19  ;;  %v1437_v0 = vrot.slane %v1435_v36, 1  ;;  %v1440_v11 = vshrl.u32 %v5873_v25, 16  ;;  %v1443_v12 = vshrl.u32 %v5066_v57, 16  ;;  %v1347_v52 = vld [vmem:[%s5825_s20 + $0x3c] sm:$0xe] }
  0x77   : > { %v1568_v7 = vor.u32 %v1567_v17, %v1563_v63  ;;  %v5068_v5 = vcombine.low %v1346_v33, %v5902_v44  ;;  %v1447_v42 = vrot.slane %v1445_v4, 1  ;;  %v1455_v19 = vshll.u32 %v5067_v32, 16  ;;  %v1348_v63 = vld [vmem:[%s5825_s20 + $0x48] sm:$0xe]  ;;  %v1349_v4 = vld [vmem:[%s5825_s20 + $0x54] sm:$0xe] }
  0x78   : > { %v1429_v36 = vsel %vm424_vm0, %v1428_v60, %v5876_v27  ;;  %v1438_v8 = vor.u32 %v1437_v0, %v1433_v34  ;;  %v5069_v25 = vcombine.low %v1347_v52, %v5882_v31  ;;  %v1460_v22 = vshrl.u32 %v5867_v21, 16 }
  0x79   : > { %1021 = vrot.lane.b32.xlu0 %v6435_v2, %s5782_s27  ;;  %v6477_v28 = vsel %vm424_vm0, %v1568_v7, %v6113_v53  ;;  %v1450_v53 = vshrl.u32 %v5835_v3, 16  ;;  %v1448_v57 = vor.u32 %v1447_v42, %v1443_v12  ;;  %v1457_v23 = vrot.slane %v1455_v19, 1  ;;  %v1350_v7 = vld [vmem:[%s5825_s20 + $0x60] sm:$0xe]  ;;  %v1351_v19 = vld [vmem:[%s5825_s20 + $0x6c] sm:$0xe] }
  0x7a   : > { %1027 = vrot.lane.b32.xlu1 %v6439_v47, %s5782_s27  ;;  %v1439_v44 = vsel %vm424_vm0, %v1438_v8, %v5905_v46  ;;  %v1465_v27 = vshll.u32 %v5068_v5, 16  ;;  %v1463_v17 = vshrl.u32 %v5068_v5, 16  ;;  %v5070_v3 = vcombine.low %v1348_v63, %v5943_v9  ;;  %v9138_v63 = vld [vmem:[#allocation9_spill] sm:$0xff]  ;;  %v9183_v2 = vld [vmem:[#allocation3_spill] sm:$0xff] }
  0x7b   : > { %v1449_v31 = vsel %vm424_vm0, %v1448_v57, %v5855_v15  ;;  %v1475_v46 = vshll.u32 %v5069_v25, 16  ;;  %v1470_v32 = vshrl.u32 %v5910_v49, 16  ;;  %v1473_v60 = vshrl.u32 %v5069_v25, 16 }
  0x7c   : > { %v1467_v34 = vrot.slane %v1465_v27, 1  ;;  %v1485_v0 = vshll.u32 %v5070_v3, 16  ;;  %v5071_v15 = vcombine.low %v1349_v4, %v5918_v54  ;;  %v1480_v49 = vshrl.u32 %v5897_v41, 16 }
  0x7d   : > { %1025 = vrot.lane.b32.xlu0 %v6445_v18, %s5782_s27  ;;  %v1477_v33 = vrot.slane %v1475_v46, 1  ;;  %v1483_v5 = vshrl.u32 %v5070_v3, 16  ;;  %v1490_v41 = vshrl.u32 %v5953_v24, 16  ;;  %v5073_v57 = vcombine.low %v1351_v19, %v5956_v26  ;;  %v9139_v3 = vld [vmem:[#allocation14_spill] sm:$0xff]  ;;  %v9145_v19 = vld [vmem:[#allocation21_spill] sm:$0xff]  ;;  %v9182_v18 = vld [vmem:[#allocation39_spill] sm:$0xff] }
  0x7e   : > { %1031 = vrot.lane.b32.xlu1 %v6458_v16, %s5782_s27  ;;  %v1468_v9 = vor.u32 %v1467_v34, %v1463_v17  ;;  %v1487_v54 = vrot.slane %v1485_v0, 1  ;;  %v1495_v42 = vshll.u32 %v5071_v15, 16  ;;  %v9140_v34 = vld [vmem:[#allocation22_spill] sm:$0xff] }
  0x7f   : > { %v1478_v8 = vor.u32 %v1477_v33, %v1473_v60  ;;  %v1353_v26 = vld [vmem:[%s5825_s20 + $0x84] sm:$0xe]  ;;  %v9141_v60 = vld [vmem:[#allocation15_spill] sm:$0xff] }
  0x80   : > { %v1488_v25 = vor.u32 %v1487_v54, %v1483_v5  ;;  %v1510_v0 = vshrl.u32 %v9141_v60, 16  ;;  %v9142_v33 = vld [vmem:[#allocation11_spill] sm:$0xff]  ;;  %v9143_v5 = vld [vmem:[#allocation17_spill] sm:$0xff] }
  0x81   : > { %1029 = vrot.lane.b32.xlu0 %v6472_v62, %s5782_s27  ;;  %v9181_v62 = vld [vmem:[#allocation5_spill] sm:$0xff] }
  0x82   : > { %1584 = vrot.lane.b32.xlu1 %v1430_v1, %s5780_s21  ;;  %v1458_v1 = vor.u32 %v1457_v23, %v1453_v51  ;;  %v1493_v51 = vshrl.u32 %v5071_v15, 16  ;;  %v1352_v23 = vld [vmem:[%s5825_s20 + $0x78] sm:$0xe] }
  0x83   : > { %v5074_v46 = vcombine.low %v1352_v23, %v9140_v34  ;;  %v9146_v23 = vld [vmem:[#allocation24_spill] sm:$0xff] }
  0x84   : > { %v1459_v21 = vsel %vm424_vm0, %v1458_v1, %v5890_v38  ;;  %v1469_v38 = vsel %vm424_vm0, %v1468_v9, %v5938_v6  ;;  %v1479_v6 = vsel %vm424_vm0, %v1478_v8, %v5930_v61  ;;  %v1515_v1 = vshll.u32 %v5073_v57, 16  ;;  %v9144_v8 = vld [vmem:[#allocation13_spill] sm:$0xff] }
  0x85   : > { %1582 = vrot.lane.b32.xlu0 %v1429_v36, %s5780_s21  ;;  %v5072_v36 = vcombine.low %v1350_v7, %v5974_v43  ;;  %v1513_v9 = vshrl.u32 %v5073_v57, 16  ;;  %v1520_v54 = vshrl.u32 %v9144_v8, 16 }
  0x86   : > { %1588 = vrot.lane.b32.xlu1 %v1440_v11, %s5780_s21  ;;  %v1517_v7 = vrot.slane %v1515_v1, 1  ;;  %v9148_v1 = vld [vmem:[#allocation25_spill] sm:$0xff] }
  0x87   : > { %v1505_v43 = vshll.u32 %v5072_v36, 16  ;;  %v1503_v24 = vshrl.u32 %v5072_v36, 16  ;;  %v5075_v36 = vcombine.low %v1353_v26, %v9143_v5  ;;  %v9149_v26 = vld [vmem:[#allocation29_spill] sm:$0xff] }
  0x89   : > { %1586 = vrot.lane.b32.xlu0 %v1439_v44, %s5780_s21  ;;  %v1497_v44 = vrot.slane %v1495_v42, 1  ;;  %v1507_v17 = vrot.slane %v1505_v43, 1  ;;  %v1523_v42 = vshrl.u32 %v5074_v46, 16  ;;  %v1518_v43 = vor.u32 %v1517_v7, %v1513_v9 }
  0x8a   : > { %1592 = vrot.lane.b32.xlu1 %v1450_v53, %s5780_s21 }
  0x8b   : > { %v1498_v61 = vor.u32 %v1497_v44, %v1493_v51  ;;  %v1355_v44 = vld [vmem:[%s5825_s20 + $0x9c] sm:$0xe] }
  0x8c   : > { %v5077_v34 = vcombine.low %v1355_v44, %v9148_v1 }
  0x8d   : > { %1590 = vrot.lane.b32.xlu0 %v1449_v31, %s5780_s21  ;;  %v1489_v31 = vsel %vm424_vm0, %v1488_v25, %v9139_v3  ;;  %v1499_v15 = vsel %vm424_vm0, %v1498_v61, %v9142_v33  ;;  %v1535_v25 = vshll.u32 %v5075_v36, 16 }
  0x8e   : > { %1596 = vrot.lane.b32.xlu1 %v1460_v22, %s5780_s21  ;;  %v1500_v22 = vshrl.u32 %v9138_v63, 16  ;;  %v1530_v63 = vshrl.u32 %v9146_v23, 16  ;;  %v1555_v33 = vshll.u32 %v5077_v34, 16 }
  0x8f   : > { %v6508_v11 = vpop.permute.xlu1 %621  ;;  %v1537_v61 = vrot.slane %v1535_v25, 1  ;;  %v9154_v25 = vld [vmem:[#allocation28_spill] sm:$0xff] }
  0x90   : > { %v6511_v12 = vpop.permute.xlu0 %617  ;;  %v1560_v44 = vshrl.u32 %v9154_v25, 16 }
  0x91   : > { %1594 = vrot.lane.b32.xlu0 %v1459_v21, %s5780_s21  ;;  %v1508_v21 = vor.u32 %v1507_v17, %v1503_v24  ;;  %v9147_v24 = vld [vmem:[#allocation19_spill] sm:$0xff] }
  0x92   : > { %1600 = vrot.lane.b32.xlu1 %v1470_v32, %s5780_s21  ;;  %v1519_v17 = vsel %vm424_vm0, %v1518_v43, %v9147_v24 }
  0x93   : > { %v6519_v52 = vpop.permute.xlu1 %623 }
  0x94   : > { %v6522_v53 = vpop.permute.xlu0 %619 }
  0x95   : > { %1598 = vrot.lane.b32.xlu0 %v1469_v38, %s5780_s21  ;;  %v1037_v16 = vsel %vm1033_vm1, %v9181_v62, %v6522_v53 }
  0x96   : > { %1604 = vrot.lane.b32.xlu1 %v1480_v49, %s5780_s21  ;;  %v1525_v49 = vshll.u32 %v5074_v46, 16 }
  0x97   : > { %v6530_v27 = vpop.permute.xlu1 %627 }
  0x99   : > { %1602 = vrot.lane.b32.xlu0 %v1479_v6, %s5780_s21  ;;  %v1527_v6 = vrot.slane %v1525_v49, 1  ;;  %v9151_v49 = vld [vmem:[#allocation30_spill] sm:$0xff] }
  0x9a   : > { %1608 = vrot.lane.b32.xlu1 %v1490_v41, %s5780_s21  ;;  %v6538_v4 = vpop.permute.xlu0 %625  ;;  %v1509_v41 = vsel %vm424_vm0, %v1508_v21, %v9145_v19  ;;  %v1550_v5 = vshrl.u32 %v9151_v49, 16  ;;  %v9153_v19 = vld [vmem:[#allocation32_spill] sm:$0xff]  ;;  %v9162_v49 = vld [vmem:[#allocation38_spill] sm:$0xff] }
  0x9b   : > { %v6541_v32 = vpop.permute.xlu1 %631 }
  0x9d   : > { %1606 = vrot.lane.b32.xlu0 %v1489_v31, %s5780_s21  ;;  %v1528_v31 = vor.u32 %v1527_v6, %v1523_v42  ;;  %v1557_v42 = vrot.slane %v1555_v33, 1 }
  0x9e   : > { %1612 = vrot.lane.b32.xlu1 %v1500_v22, %s5780_s21  ;;  %v6549_v38 = vpop.permute.xlu0 %629  ;;  %v1533_v22 = vshrl.u32 %v5075_v36, 16  ;;  %v9152_v36 = vld [vmem:[#allocation26_spill] sm:$0xff] }
  0x9f   : > { %v1529_v60 = vsel %vm424_vm0, %v1528_v31, %v9149_v26 }
  0xa0   : > { %v6556_v51 = vpop.permute.xlu1 %635  ;;  %v1538_v9 = vor.u32 %v1537_v61, %v1533_v22  ;;  %v9157_v61 = vld [vmem:[#allocation37_spill] sm:$0xff] }
  0xa1   : > { %1610 = vrot.lane.b32.xlu0 %v1499_v15, %s5780_s21  ;;  %v1357_v15 = vld [vmem:[%s5825_s20 + $0xb4] sm:$0xe]  ;;  %v1570_v1 = vshrl.u32 %v9157_v61, 16 }
  0xa2   : > { %1616 = vrot.lane.b32.xlu1 %v1510_v0, %s5780_s21  ;;  %v9150_v0 = vld [vmem:[#allocation20_spill] sm:$0xff]  ;;  %v1539_v8 = vsel %vm424_vm0, %v1538_v9, %v9152_v36 }
  0xa3   : > { %v1540_v21 = vshrl.u32 %v9150_v0, 16  ;;  %v9176_v61 = vld [vmem:[#allocation68_spill] sm:$0xff] }
  0xa4   : > { %v6560_v57 = vpop.permute.xlu0 %633 }
  0xa5   : > { %1614 = vrot.lane.b32.xlu0 %v1509_v41, %s5780_s21  ;;  %v6566_v3 = vpop.permute.xlu1 %639  ;;  %v5079_v41 = vcombine.low %v1357_v15, %v9153_v19 }
  0xa6   : > { %1620 = vrot.lane.b32.xlu1 %v1520_v54, %s5780_s21  ;;  %v1553_v54 = vshrl.u32 %v5077_v34, 16 }
  0xa7   : > { %v1573_v34 = vshrl.u32 %v5079_v41, 16 }
  0xa8   : > { %v6570_v46 = vpop.permute.xlu0 %637  ;;  %v1558_v23 = vor.u32 %v1557_v42, %v1553_v54  ;;  %v9165_v54 = vld [vmem:[#allocation55_spill] sm:$0xff] }
  0xa9   : > { %1618 = vrot.lane.b32.xlu0 %v1519_v17, %s5780_s21  ;;  %v9156_v17 = vld [vmem:[#allocation34_spill] sm:$0xff] }
  0xaa   : > { %1624 = vrot.lane.b32.xlu1 %v1530_v63, %s5780_s21  ;;  %v1575_v63 = vshll.u32 %v5079_v41, 16  ;;  %v1559_v31 = vsel %vm424_vm0, %v1558_v23, %v9156_v17  ;;  %v9169_v41 = vld [vmem:[#allocation60_spill] sm:$0xff]  ;;  %v9172_v23 = vld [vmem:[#allocation63_spill] sm:$0xff] }
  0xab   : > { %v6577_v7 = vpop.permute.xlu1 %643 }
  0xac   : > { %v1577_v26 = vrot.slane %v1575_v63, 1 }
  0xad   : > { %1622 = vrot.lane.b32.xlu0 %v1529_v60, %s5780_s21 }
  0xae   : > { %1628 = vrot.lane.b32.xlu1 %v1540_v21, %s5780_s21  ;;  %v9159_v21 = vld [vmem:[#allocation35_spill] sm:$0xff] }
  0xaf   : > { %v6585_v43 = vpop.permute.xlu0 %641  ;;  %v1580_v9 = vshrl.u32 %v9159_v21, 16  ;;  %v9179_v21 = vld [vmem:[#allocation41_spill] sm:$0xff] }
  0xb0   : > { %v6587_v6 = vpop.permute.xlu1 %647 }
  0xb1   : > { %1626 = vrot.lane.b32.xlu0 %v1539_v8, %s5780_s21 }
  0xb2   : > { %1632 = vrot.lane.b32.xlu1 %v1550_v5, %s5780_s21 }
  0xb3   : > { %v6592_v22 = vpop.permute.xlu0 %645 }
  0xb4   : > { %v6594_v24 = vpop.permute.xlu1 %731 }
  0xb5   : > { %9155 = vst [vmem:[#allocation9_spill] sm:$0xff] %v6594_v24  ;;  %1630 = vrot.lane.b32.xlu0 %v6462_v10, %s5780_s21  ;;  %v1578_v10 = vor.u32 %v1577_v26, %v1573_v34  ;;  %v5048_v34 = vld [vmem:[%s5825_s20 + $0xc] sm:$0xe] }
  0xb6   : > { %1636 = vrot.lane.b32.xlu1 %v1560_v44, %s5780_s21 }
  0xb7   : > { %v6602_v60 = vpop.permute.xlu0 %729  ;;  %v1579_v5 = vsel %vm424_vm0, %v1578_v10, %v9162_v49  ;;  %v5049_v10 = vld [vmem:[%s5825_s20 + $0x18] sm:$0xe] }
  0xb8   : > { %9158 = vst [vmem:[#allocation14_spill] sm:$0xff] %v6602_v60  ;;  %v6604_v0 = vpop.permute.xlu1 %735  ;;  %v5081_v47 = vcombine.low %v5049_v10, %v9182_v18  ;;  %v5050_v18 = vld [vmem:[%s5825_s20 + $0x24] sm:$0xe] }
  0xb9   : > { %1634 = vrot.lane.b32.xlu0 %v1559_v31, %s5780_s21  ;;  %v9175_v31 = vld [vmem:[#allocation67_spill] sm:$0xff] }
  0xba   : > { %1640 = vrot.lane.b32.xlu1 %v1570_v1, %s5780_s21 }
  0xbb   : > { %v6609_v33 = vpop.permute.xlu0 %733 }
  0xbc   : > { %9160 = vst [vmem:[#allocation22_spill] sm:$0xff] %v6609_v33  ;;  %v6611_v15 = vpop.permute.xlu1 %739 }
  0xbd   : > { %9161 = vst [vmem:[#allocation15_spill] sm:$0xff] %v6611_v15  ;;  %1638 = vrot.lane.b32.xlu0 %v6477_v28, %s5780_s21  ;;  %v9168_v28 = vld [vmem:[#allocation57_spill] sm:$0xff] }
  0xbe   : > { %1644 = vrot.lane.b32.xlu1 %v1580_v9, %s5780_s21  ;;  %v5080_v9 = vcombine.low %v5048_v34, %v9179_v21  ;;  %v1035_v34 = vsel %vm1033_vm1, %v9183_v2, %v6511_v12  ;;  %v1070_v21 = vsel %vm1066_vm2, %v1037_v16, %v6594_v24  ;;  %v9184_v12 = vld [vmem:[#allocation81_spill] sm:$0xff]  ;;  %v1739_v16 = vshll.u32 %v5081_v47, 16  ;;  %v5614_v2 = vld [vmem:[%s8856_s1 + $0x10] sm:$0xff]  }
  0xbf   : > { %v6618_v36 = vpop.permute.xlu0 %737  ;;  %v1068_v20 = vsel %vm1066_vm2, %v1035_v34, %v6602_v60  ;;  %v9187_v60 = vld [vmem:[#allocation45_spill] sm:$0xff]  ;;  %5387 = vmatprep.subr.bf16.mxu1 %v5614_v2 }
  0xc0   : > { %9163 = vst [vmem:[#allocation11_spill] sm:$0xff] %v6618_v36  ;;  %v6620_v8 = vpop.permute.xlu1 %743  ;;  %v1729_v55 = vshll.u32 %v5080_v9, 16  ;;  %v1727_v34 = vshrl.u32 %v5080_v9, 16  ;;  %v9188_v9 = vld [vmem:[#allocation42_spill] sm:$0xff]  ;;  %5388 = vmatpush3.bf16.msra.mxu1 %v5614_v2 }
  0xc1   : > { %9164 = vst [vmem:[#allocation17_spill] sm:$0xff] %v6620_v8  ;;  %1642 = vrot.lane.b32.xlu0 %v1579_v5, %s5780_s21 }
  0xc2   : > { %1648 = vrot.lane.b32.xlu1 %v9165_v54, %s5781_s22 }
  0xc3   : > { %v6625_v42 = vpop.permute.xlu0 %741 }
  0xc4   : > { %9166 = vst [vmem:[#allocation13_spill] sm:$0xff] %v6625_v42  ;;  %v6627_v19 = vpop.permute.xlu1 %747 }
  0xc5   : > { %9167 = vst [vmem:[#allocation21_spill] sm:$0xff] %v6627_v19  ;;  %1646 = vrot.lane.b32.xlu0 %v9168_v28, %s5781_s22 }
  0xc6   : > { %1652 = vrot.lane.b32.xlu1 %v9169_v41, %s5781_s22 }
  0xc7   : > { %v6633_v25 = vpop.permute.xlu0 %745 }
  0xc8   : > { %9170 = vst [vmem:[#allocation24_spill] sm:$0xff] %v6633_v25  ;;  %v6635_v44 = vpop.permute.xlu1 %751 }
  0xc9   : > { %9171 = vst [vmem:[#allocation19_spill] sm:$0xff] %v6635_v44  ;;  %1650 = vrot.lane.b32.xlu0 %v9172_v23, %s5781_s22 }
  0xca   : > { %1656 = vrot.lane.b32.xlu1 %v6253_v29, %s5781_s22 }
  0xcb   : > { %v6641_v63 = vpop.permute.xlu0 %749 }
  0xcc   : > { %9173 = vst [vmem:[#allocation25_spill] sm:$0xff] %v6641_v63  ;;  %v6643_v17 = vpop.permute.xlu1 %755 }
  0xcd   : > { %9174 = vst [vmem:[#allocation29_spill] sm:$0xff] %v6643_v17  ;;  %1654 = vrot.lane.b32.xlu0 %v9175_v31, %s5781_s22 }
  0xce   : > { %1660 = vrot.lane.b32.xlu1 %v9176_v61, %s5781_s22 }
  0xcf   : > { %v6649_v1 = vpop.permute.xlu0 %753 }
  0xd0   : > { %9177 = vst [vmem:[#allocation20_spill] sm:$0xff] %v6649_v1  ;;  %v6652_v26 = vpop.permute.xlu1 %759 }
  0xd1   : > { %9178 = vst [vmem:[#allocation30_spill] sm:$0xff] %v6652_v26  ;;  %1658 = vrot.lane.b32.xlu0 %v6292_v35, %s5781_s22 }
  0xd2   : > { %1664 = vrot.lane.b32.xlu1 %v6302_v45, %s5781_s22 }
  0xd3   : > { %v6660_v49 = vpop.permute.xlu0 %757 }
  0xd4   : > { %9180 = vst [vmem:[#allocation26_spill] sm:$0xff] %v6660_v49  ;;  %v1004_v5 = vpop.permute.xlu1 %1003 }
  0xd5   : > { %1662 = vrot.lane.b32.xlu0 %v6310_v56, %s5781_s22  ;;  %v1103_v53 = vsel %vm1099_vm3, %v1070_v21, %v1004_v5  ;;  %v9186_v5 = vld [vmem:[#allocation87_spill] sm:$0xff]  ;;  %v1731_v21 = vrot.slane %v1729_v55, 1  ;;  %v1737_v55 = vshrl.u32 %v5081_v47, 16 }
  0xd6   : > { %1668 = vrot.lane.b32.xlu1 %v6313_v40, %s5781_s22  ;;  %v9185_v40 = vld [vmem:[#allocation2_spill] sm:$0xff] }
  0xd7   : > { %v1002_v62 = vpop.permute.xlu0 %1001  ;;  %v1039_v24 = vsel %vm1033_vm1, %v9185_v40, %v6508_v11 }
  0xd8   : > { %v1101_v10 = vsel %vm1099_vm3, %v1068_v20, %v1002_v62  ;;  %v1008_v50 = vpop.permute.xlu1 %1007  ;;  %v5082_v20 = vcombine.low %v5050_v18, %v9187_v60  ;;  %v5051_v62 = vld [vmem:[%s5825_s20 + $0x30] sm:$0xe]  ;;  %v1741_v60 = vrot.slane %v1739_v16, 1  ;;  %v5052_v16 = vld [vmem:[%s5825_s20 + $0x3c] sm:$0xe] }
  0xd9   : > { %1666 = vrot.lane.b32.xlu0 %v9184_v12, %s5781_s22  ;;  %5355 = vmatprep.mubr.msk.bf16.mxu0 %vm1148_vm4, %v1101_v10  ;;  %v1072_v10 = vsel %vm1066_vm2, %v1039_v24, %v6609_v33  ;;  %v5083_v18 = vcombine.low %v5051_v62, %v9188_v9  ;;  %v9190_v62 = vld [vmem:[#allocation7_spill] sm:$0xff] }
  0xda   : > { %5356 = vmatmul.mubr.msk.bf16.vlgmr.msra.gmra.mrb[0].mxu0 %vm1148_vm4, %v1103_v53  ;;  %1672 = vrot.lane.b32.xlu1 %v9186_v5, %s5781_s22  ;;  %v1732_v5 = vor.u32 %v1731_v21, %v1727_v34  ;;  %v1749_v33 = vshll.u32 %v5082_v20, 16  ;;  %v1043_v9 = vsel %vm1033_vm1, %v9190_v62, %v6538_v4  ;;  %v1747_v21 = vshrl.u32 %v5082_v20, 16  ;;  %v9192_v20 = vld [vmem:[#allocation65_spill] sm:$0xff] }
  0xdb   : > { %v1006_v59 = vpop.permute.xlu0 %1005  ;;  %v1076_v24 = vsel %vm1066_vm2, %v1043_v9, %v6618_v36  ;;  %v1759_v4 = vshll.u32 %v5083_v18, 16  ;;  %v9193_v36 = vld [vmem:[#allocation49_spill] sm:$0xff] }
  0xdc   : > { %v1105_v11 = vsel %vm1099_vm3, %v1072_v10, %v1006_v59  ;;  %v1012_v53 = vpop.permute.xlu1 %1011  ;;  %v5615_v59 = vld [vmem:[%s8856_s1 + $0x18] sm:$0xff]   ;;  %v9189_v10 = vld [vmem:[#allocation4_spill] sm:$0xff]  ;;  %v6731_v2 = vsel %vm424_vm0, %v1732_v5, %v9192_v20  ;;  %v1751_v9 = vrot.slane %v1749_v33, 1  ;;  %v9195_v33 = vshrl.u32 %v9165_v54, 16 }
  0xdd   : > { %1670 = vrot.lane.b32.xlu0 %v6372_v48, %s5781_s22  ;;  %5359 = vmatprep.mubr.msk.bf16.mxu0 %vm1148_vm4, %v1105_v11  ;;  %v1041_v11 = vsel %vm1033_vm1, %v9189_v10, %v6519_v52  ;;  %v1742_v10 = vor.u32 %v1741_v60, %v1737_v55  ;;  %v1757_v60 = vshrl.u32 %v5083_v18, 16 }
  0xde   : > { %1676 = vrot.lane.b32.xlu1 %v6383_v13, %s5781_s22  ;;  %v1074_v13 = vsel %vm1066_vm2, %v1041_v11, %v6604_v0  ;;  %5389 = vmatprep.subr.bf16.mxu1 %v5615_v59  ;;  %v9191_v11 = vshrl.u32 %v9168_v28, 16 }
  0xdf   : > { %v1010_v47 = vpop.permute.xlu0 %1009  ;;  %v1107_v52 = vsel %vm1099_vm3, %v1074_v13, %v1008_v50  ;;  %v5084_v50 = vcombine.low %v5052_v16, %v9193_v36  ;;  %v5053_v13 = vld [vmem:[%s5825_s20 + $0x48] sm:$0xe]  ;;  %5390 = vmatpush3.bf16.msra.mxu1 %v5615_v59  ;;  %v9196_v36 = vld [vmem:[#allocation62_spill] sm:$0xff]  ;;  %v1752_v59 = vor.u32 %v1751_v9, %v1747_v21 }
  0xe0   : > { %v6716_v34 = vpop.permute.xlu1 %1015  ;;  %v1109_v62 = vsel %vm1099_vm3, %v1076_v24, %v1010_v47  ;;  %v1761_v24 = vrot.slane %v1759_v4, 1  ;;  %v9194_v47 = vld [vmem:[#allocation46_spill] sm:$0xff]  ;;  %v6746_v5 = vsel %vm424_vm0, %v1742_v10, %v9196_v36  ;;  %v5054_v4 = vld [vmem:[%s5825_s20 + $0x54] sm:$0xe] }
  0xe1   : > { %1674 = vrot.lane.b32.xlu0 %v6386_v14, %s5781_s22  ;;  %v1767_v9 = vshrl.u32 %v5084_v50, 16 }
  0xe2   : > { %5360 = vmatmul.mubr.msk.bf16.gmra.mrb[4].mxu0 %vm1148_vm4, %v1107_v52  ;;  %1888 = vrot.lane.b32.xlu1 %v9191_v11, %s5782_s27  ;;  %v5085_v52 = vcombine.low %v5053_v13, %v9194_v47  ;;  %v9197_v11 = vld [vmem:[#allocation6_spill] sm:$0xff]  ;;  %v1762_v16 = vor.u32 %v1761_v24, %v1757_v60 }
  0xe3   : > { %5363 = vmatprep.mubr.msk.bf16.mxu0 %vm1148_vm4, %v1109_v62  ;;  %v1014_v14 = vpop.permute.xlu0 %1013  ;;  %v1769_v62 = vshll.u32 %v5084_v50, 16  ;;  %v1045_v20 = vsel %vm1033_vm1, %v9197_v11, %v6530_v27  ;;  %v9198_v13 = vld [vmem:[#allocation10_spill] sm:$0xff] }
  0xe4   : > { %v6736_v55 = vpop.permute.xlu1 %1019  ;;  %v1047_v47 = vsel %vm1033_vm1, %v9198_v13, %v6549_v38  ;;  %v1779_v38 = vshll.u32 %v5085_v52, 16  ;;  %v9200_v50 = vld [vmem:[#allocation74_spill] sm:$0xff] }
  0xe5   : > { %1886 = vrot.lane.b32.xlu0 %v6731_v2, %s5782_s27  ;;  %v1080_v36 = vsel %vm1066_vm2, %v1047_v47, %v6625_v42  ;;  %v6773_v21 = vsel %vm424_vm0, %v1752_v59, %v9200_v50  ;;  %v1771_v47 = vrot.slane %v1769_v62, 1  ;;  %v5055_v42 = vld [vmem:[%s5825_s20 + $0x60] sm:$0xe]  ;;  %v9201_v59 = vshrl.u32 %v9169_v41, 16  ;;  %v9202_v62 = vld [vmem:[#allocation72_spill] sm:$0xff] }
  0xe6   : > { %1892 = vrot.lane.b32.xlu1 %v9195_v33, %s5782_s27  ;;  %v1078_v33 = vsel %vm1066_vm2, %v1045_v20, %v6611_v15  ;;  %v1113_v13 = vsel %vm1099_vm3, %v1080_v36, %v1014_v14  ;;  %v9199_v20 = vshrl.u32 %v9172_v23, 16  ;;  %v1777_v14 = vshrl.u32 %v5085_v52, 16  ;;  %v9203_v15 = vld [vmem:[#allocation8_spill] sm:$0xff] }
  0xe7   : > { %v1018_v18 = vpop.permute.xlu0 %1017  ;;  %v1111_v27 = vsel %vm1099_vm3, %v1078_v33, %v1012_v53  ;;  %v5726_v53 = vld [vmem:[%s5825_s20 + $0x58] sm:$0xf]  ;;  %v1781_v36 = vrot.slane %v1779_v38, 1  ;;  %v1772_v50 = vor.u32 %v1771_v47, %v1767_v9  ;;  %v1049_v23 = vsel %vm1033_vm1, %v9203_v15, %v6541_v32  ;;  %v5056_v38 = vld [vmem:[%s5825_s20 + $0x6c] sm:$0xe] }
  0xe8   : > { %v6758_v10 = vpop.permute.xlu1 %1023  ;;  %v5086_v33 = vcombine.low %v5054_v4, %v5726_v53  ;;  %v6788_v4 = vsel %vm424_vm0, %v1762_v16, %v9202_v62  ;;  %v1082_v16 = vsel %vm1066_vm2, %v1049_v23, %v6620_v8  ;;  %v9205_v9 = vshrl.u32 %v9175_v31, 16  ;;  %v9211_v31 = vld [vmem:[#allocation12_spill] sm:$0xff] }
  0xe9   : > { %1890 = vrot.lane.b32.xlu0 %v6746_v5, %s5782_s27  ;;  %v1115_v62 = vsel %vm1099_vm3, %v1082_v16, %v6716_v34  ;;  %v5728_v34 = vld [vmem:[%s5825_s20 + $0x70] sm:$0xf] }
  0xea   : > { %5364 = vmatmul.mubr.msk.bf16.gmra.mrb[8].mxu0 %vm1148_vm4, %v1111_v27  ;;  %1896 = vrot.lane.b32.xlu1 %v9199_v20, %s5782_s27  ;;  %v5727_v27 = vld [vmem:[%s5825_s20 + $0x64] sm:$0xf]  ;;  %v1789_v53 = vshll.u32 %v5086_v33, 16  ;;  %v1787_v47 = vshrl.u32 %v5086_v33, 16  ;;  %v9206_v33 = vld [vmem:[#allocation79_spill] sm:$0xff]  ;;  %v5088_v16 = vcombine.low %v5056_v38, %v5728_v34 }
  0xeb   : > { %5367 = vmatprep.mubr.msk.bf16.mxu0 %vm1148_vm4, %v1113_v13  ;;  %v1022_v60 = vpop.permute.xlu0 %1021  ;;  %v5087_v20 = vcombine.low %v5055_v42, %v5727_v27  ;;  %v9204_v42 = vld [vmem:[#allocation16_spill] sm:$0xff]  ;;  %v1782_v13 = vor.u32 %v1781_v36, %v1777_v14 }
  0xec   : > { %v6778_v24 = vpop.permute.xlu1 %1027  ;;  %v1051_v27 = vsel %vm1033_vm1, %v9204_v42, %v6560_v57  ;;  %v5057_v42 = vld [vmem:[%s5825_s20 + $0x78] sm:$0xe]  ;;  %v1809_v34 = vshll.u32 %v5088_v16, 16 }
  0xed   : > { %1894 = vrot.lane.b32.xlu0 %v6773_v21, %s5782_s27  ;;  %v1084_v32 = vsel %vm1066_vm2, %v1051_v27, %v6633_v25  ;;  %v1799_v57 = vshll.u32 %v5087_v20, 16  ;;  %v6818_v27 = vsel %vm424_vm0, %v1772_v50, %v9206_v33  ;;  %v1791_v25 = vrot.slane %v1789_v53, 1  ;;  %v9209_v53 = vld [vmem:[#allocation75_spill] sm:$0xff] }
  0xee   : > { %1900 = vrot.lane.b32.xlu1 %v9201_v59, %s5782_s27  ;;  %v1117_v23 = vsel %vm1099_vm3, %v1084_v32, %v1018_v18  ;;  %9207 = vst [vmem:[#allocation32_spill] sm:$0xff] %v6818_v27  ;;  %v1797_v36 = vshrl.u32 %v5087_v20, 16  ;;  %v5729_v32 = vld [vmem:[%s5825_s20 + $0x7c] sm:$0xf]  ;;  %v9208_v50 = vshrl.u32 %v6253_v29, 16  ;;  %v6835_v38 = vsel %vm424_vm0, %v1782_v13, %v9209_v53 }
  0xef   : > { %v6794_v52 = vpop.permute.xlu0 %1025  ;;  %9210 = vst [vmem:[#allocation28_spill] sm:$0xff] %v6835_v38  ;;  %v1792_v33 = vor.u32 %v1791_v25, %v1787_v47  ;;  %v1807_v47 = vshrl.u32 %v5088_v16, 16  ;;  %v9213_v25 = vshrl.u32 %v6292_v35, 16  ;;  %v9214_v16 = vld [vmem:[#allocation86_spill] sm:$0xff]  ;;  %v1811_v29 = vrot.slane %v1809_v34, 1  ;;  %v9217_v34 = vld [vmem:[#allocation80_spill] sm:$0xff] }
  0xf0   : > { %v6802_v59 = vpop.permute.xlu1 %1031  ;;  %v9219_v35 = vld [vmem:[#allocation18_spill] sm:$0xff] }
  0xf1   : > { %1898 = vrot.lane.b32.xlu0 %v6788_v4, %s5782_s27 }
  0xf2   : > { %5368 = vmatmul.mubr.msk.bf16.gmra.mrb[12].mxu0 %vm1148_vm4, %v1115_v62  ;;  %1904 = vrot.lane.b32.xlu1 %v9205_v9, %s5782_s27  ;;  %v1801_v9 = vrot.slane %v1799_v57, 1  ;;  %v5089_v62 = vcombine.low %v5057_v42, %v5729_v32  ;;  %v5058_v57 = vld [vmem:[%s5825_s20 + $0x84] sm:$0xe]  ;;  %v9212_v42 = vld [vmem:[#allocation23_spill] sm:$0xff] }
  0xf3   : > { %5371 = vmatprep.mubr.msk.bf16.mxu0 %vm1148_vm4, %v1117_v23  ;;  %v6823_v14 = vpop.permute.xlu0 %1029  ;;  %v1055_v32 = vsel %vm1033_vm1, %v9212_v42, %v6570_v46  ;;  %v7173_v42 = vld [vmem:[%s8856_s1 + $0x30] sm:$0xff]  }
  0xf4   : > { %v6825_v18 = vpop.permute.xlu1 %1584  ;;  %v1802_v23 = vor.u32 %v1801_v9, %v1797_v36  ;;  %v1819_v46 = vshll.u32 %v5089_v62, 16  ;;  %v1817_v9 = vshrl.u32 %v5089_v62, 16  ;;  %5459 = vmatprep.subr.bf16.mxu1 %v7173_v42 }
  0xf5   : > { %1902 = vrot.lane.b32.xlu0 %v6818_v27, %s5782_s27  ;;  %v1053_v27 = vsel %vm1033_vm1, %v9211_v31, %v6556_v51  ;;  %v1088_v51 = vsel %vm1066_vm2, %v1055_v32, %v6641_v63  ;;  %v6865_v32 = vsel %vm424_vm0, %v1792_v33, %v9214_v16  ;;  %v5059_v63 = vld [vmem:[%s5825_s20 + $0x90] sm:$0xe]  ;;  %v9216_v33 = vshrl.u32 %v9176_v61, 16 }
  0xf6   : > { %1908 = vrot.lane.b32.xlu1 %v9208_v50, %s5782_s27  ;;  %v1086_v13 = vsel %vm1066_vm2, %v1053_v27, %v6627_v19  ;;  %v1121_v27 = vsel %vm1099_vm3, %v1088_v51, %v1022_v60  ;;  %9215 = vst [vmem:[#allocation34_spill] sm:$0xff] %v6865_v32  ;;  %v5731_v51 = vld [vmem:[%s5825_s20 + $0x94] sm:$0xf]  ;;  %v1812_v16 = vor.u32 %v1811_v29, %v1807_v47  ;;  %v9222_v29 = vld [vmem:[#allocation89_spill] sm:$0xff] }
  0xf7   : > { %v6841_v20 = vpop.permute.xlu0 %1582  ;;  %v1119_v53 = vsel %vm1099_vm3, %v1086_v13, %v6736_v55  ;;  %v5730_v55 = vld [vmem:[%s5825_s20 + $0x88] sm:$0xf] }
  0xf8   : > { %v6849_v50 = vpop.permute.xlu1 %1588  ;;  %v5090_v13 = vcombine.low %v5058_v57, %v5730_v55  ;;  %v6882_v57 = vsel %vm424_vm0, %v1802_v23, %v9217_v34 }
  0xf9   : > { %1906 = vrot.lane.b32.xlu0 %v6835_v38, %s5782_s27  ;;  %9218 = vst [vmem:[#allocation37_spill] sm:$0xff] %v6882_v57 }
  0xfa   : > { %5372 = vmatmul.mubr.msk.bf16.gmra.mrb[16].mxu0 %vm1148_vm4, %v1119_v53  ;;  %1912 = vrot.lane.b32.xlu1 %v9213_v25, %s5782_s27  ;;  %v1821_v25 = vrot.slane %v1819_v46, 1  ;;  %v5091_v53 = vcombine.low %v5059_v63, %v5731_v51  ;;  %v1829_v55 = vshll.u32 %v5090_v13, 16  ;;  %v5060_v46 = vld [vmem:[%s5825_s20 + $0x9c] sm:$0xe]  ;;  %v9220_v63 = vld [vmem:[#allocation31_spill] sm:$0xff]  ;;  %v1827_v47 = vshrl.u32 %v5090_v13, 16 }
  0xfb   : > { %5375 = vmatprep.mubr.msk.bf16.mxu0 %vm1148_vm4, %v1121_v27  ;;  %v6870_v36 = vpop.permute.xlu0 %1586  ;;  %v1059_v51 = vsel %vm1033_vm1, %v9220_v63, %v6585_v43  ;;  %v9221_v13 = vshrl.u32 %v6310_v56, 16  ;;  %v9227_v56 = vld [vmem:[#allocation27_spill] sm:$0xff] }
  0xfc   : > { %v6872_v60 = vpop.permute.xlu1 %1592  ;;  %v1822_v27 = vor.u32 %v1821_v25, %v1817_v9  ;;  %v1839_v43 = vshll.u32 %v5091_v53, 16  ;;  %v1837_v25 = vshrl.u32 %v5091_v53, 16 }
  0xfd   : > { %1910 = vrot.lane.b32.xlu0 %v6865_v32, %s5782_s27  ;;  %v1057_v32 = vsel %vm1033_vm1, %v9219_v35, %v6566_v3  ;;  %v1092_v3 = vsel %vm1066_vm2, %v1059_v51, %v6649_v1  ;;  %v6913_v51 = vsel %vm424_vm0, %v1812_v16, %v9222_v29 }
  0xfe   : > { %1916 = vrot.lane.b32.xlu1 %v9216_v33, %s5782_s27  ;;  %v1090_v23 = vsel %vm1066_vm2, %v1057_v32, %v6635_v44  ;;  %v1125_v32 = vsel %vm1099_vm3, %v1092_v3, %v6794_v52  ;;  %9223 = vst [vmem:[#allocation35_spill] sm:$0xff] %v6913_v51  ;;  %v1841_v3 = vrot.slane %v1839_v43, 1  ;;  %v5062_v43 = vld [vmem:[%s5825_s20 + $0xb4] sm:$0xe] }
  0xff   : > { %v6888_v62 = vpop.permute.xlu0 %1590  ;;  %v1123_v34 = vsel %vm1099_vm3, %v1090_v23, %v6758_v10  ;;  %v1831_v10 = vrot.slane %v1829_v55, 1  ;;  %v5732_v23 = vld [vmem:[%s5825_s20 + $0xa0] sm:$0xf]  ;;  %v9224_v55 = vshrl.u32 %v6302_v45, 16 }
 0x100   : > { %v6896_v33 = vpop.permute.xlu1 %1596  ;;  %v5092_v61 = vcombine.low %v5060_v46, %v5732_v23  ;;  %v9225_v46 = vld [vmem:[#allocation88_spill] sm:$0xff] }
 0x101   : > { %1914 = vrot.lane.b32.xlu0 %v6882_v57, %s5782_s27  ;;  %v5061_v57 = vld [vmem:[%s5825_s20 + $0xa8] sm:$0xe]  ;;  %v6930_v29 = vsel %vm424_vm0, %v1822_v27, %v9225_v46  ;;  %v6947_v46 = vld [vmem:[%s5825_s20 + $0x98] ss:$0 sps:$4 sm:$0x11]  }
 0x102   : > { %5376 = vmatmul.mubr.msk.bf16.gmra.mrb[20].mxu0 %vm1148_vm4, %v1123_v34  ;;  %1920 = vrot.lane.b32.xlu1 %v9221_v13, %s5782_s27  ;;  %v5733_v34 = vld [vmem:[%s5825_s20 + $0xac] sm:$0xf]  ;;  %9226 = vst [vmem:[#allocation38_spill] sm:$0xff] %v6930_v29  ;;  %v1832_v13 = vor.u32 %v1831_v10, %v1827_v47  ;;  %v1849_v23 = vshll.u32 %v5092_v61, 16  ;;  %9229 = vst [vmem:[#allocation55_spill] sm:$0xff] %v6947_v46  ;;  %v1847_v10 = vshrl.u32 %v5092_v61, 16 }
 0x103   : > { %5379 = vmatprep.mubr.msk.bf16.mxu0 %vm1148_vm4, %v1125_v32  ;;  %v6918_v9 = vpop.permute.xlu0 %1594  ;;  %v5093_v16 = vcombine.low %v5061_v57, %v5733_v34  ;;  %v9228_v57 = vld [vmem:[#allocation36_spill] sm:$0xff]  ;;  %v9230_v47 = vshrl.u32 %v9184_v12, 16  ;;  %v9234_v12 = vld [vmem:[#allocation33_spill] sm:$0xff] }
 0x104   : > { %v6920_v52 = vpop.permute.xlu1 %1600  ;;  %v1063_v34 = vsel %vm1033_vm1, %v9228_v57, %v6592_v22  ;;  %v1842_v22 = vor.u32 %v1841_v3, %v1837_v25  ;;  %v6964_v61 = vsel %vm424_vm0, %v1832_v13, %v6374_v30  ;;  %v5063_v3 = vld [vmem:[%s5825_s20 + $0xc0] sm:$0xe]  ;;  %v9232_v13 = vshrl.u32 %v6947_v46, 16  ;;  %v7117_v57 = vld [vmem:[%s5825_s20 + $0x20] ss:$0 sps:$4 sm:$0x11]  }
 0x105   : > { %1918 = vrot.lane.b32.xlu0 %v6913_v51, %s5782_s27  ;;  %v1061_v51 = vsel %vm1033_vm1, %v9227_v56, %v6577_v7  ;;  %v1096_v7 = vsel %vm1066_vm2, %v1063_v34, %v6660_v49  ;;  %v1859_v45 = vshll.u32 %v5093_v16, 16  ;;  %9231 = vst [vmem:[#allocation57_spill] sm:$0xff] %v6964_v61  ;;  %v5735_v34 = vld [vmem:[%s5825_s20 + $0xb8] sm:$0xf]  ;;  %v9272_v49 = vld [vmem:[#allocation96_spill] sm:$0xff] }
 0x106   : > { %1924 = vrot.lane.b32.xlu1 %v9224_v55, %s5782_s27  ;;  %v1094_v27 = vsel %vm1066_vm2, %v1061_v51, %v6643_v17  ;;  %v1129_v51 = vsel %vm1099_vm3, %v1096_v7, %v6823_v14  ;;  %v5221_v17 = vld [vmem:[%s5825_s20 + $0x24] sm:$0xe] }
 0x107   : > { %v6936_v53 = vpop.permute.xlu0 %1598  ;;  %v1127_v32 = vsel %vm1099_vm3, %v1094_v27, %v6778_v24  ;;  %v1851_v24 = vrot.slane %v1849_v23, 1  ;;  %v5094_v27 = vcombine.low %v5062_v43, %v5735_v34  ;;  %v1861_v30 = vrot.slane %v1859_v45, 1  ;;  %v5120_v56 = vld [vmem:[%s5825_s20 + $0x24] sm:$0xf] }
 0x108   : > { %v6944_v55 = vpop.permute.xlu1 %1604  ;;  %v6981_v23 = vsel %vm424_vm0, %v1842_v22, %v6368_v39  ;;  %v6998_v39 = vld [vmem:[%s5825_s20 + $0xb0] ss:$0 sps:$4 sm:$0x11]  }
 0x109   : > { %1922 = vrot.lane.b32.xlu0 %v6930_v29, %s5782_s27  ;;  %9233 = vst [vmem:[#allocation60_spill] sm:$0xff] %v6981_v23  ;;  %v1852_v43 = vor.u32 %v1851_v24, %v1847_v10  ;;  %v1869_v7 = vshll.u32 %v5094_v27, 16  ;;  %9235 = vst [vmem:[#allocation41_spill] sm:$0xff] %v6998_v39  ;;  %v9016_v10 = vshrl.u32 %v6998_v39, 16 }
 0x10a   : > { %5380 = vmatmul.mubr.msk.bf16.gmra.mrb[24].mxu0 %vm1148_vm4, %v1127_v32  ;;  %1928 = vrot.lane.b32.xlu1 %v9230_v47, %s5782_s27  ;;  %v9018_v32 = vshrl.u32 %v6372_v48, 16  ;;  %v1857_v47 = vshrl.u32 %v5093_v16, 16 }
 0x10b   : > { %5383 = vmatprep.mubr.msk.bf16.mxu0 %vm1148_vm4, %v1129_v51  ;;  %v6968_v25 = vpop.permute.xlu0 %1602  ;;  %v5736_v51 = vld [vmem:[%s5825_s20 + $0xc4] sm:$0xf] }
 0x10c   : > { %v6971_v14 = vpop.permute.xlu1 %1608  ;;  %v5095_v34 = vcombine.low %v5063_v3, %v5736_v51  ;;  %v1862_v22 = vor.u32 %v1861_v30, %v1857_v47 }
 0x10d   : > { %1926 = vrot.lane.b32.xlu0 %v6964_v61, %s5782_s27  ;;  %v1065_v61 = vsel %vm1033_vm1, %v9234_v12, %v6587_v6  ;;  %v7007_v6 = vsel %vm424_vm0, %v1852_v43, %v6420_v58  ;;  %v7023_v58 = vld [vmem:[%s5825_s20 + $0xbc] ss:$0 sps:$4 sm:$0x11]  }
 0x10e   : > { %1932 = vrot.lane.b32.xlu1 %v9232_v13, %s5782_s27  ;;  %v1098_v45 = vsel %vm1066_vm2, %v1065_v61, %v6652_v26  ;;  %9236 = vst [vmem:[#allocation39_spill] sm:$0xff] %v7007_v6  ;;  %v1871_v61 = vrot.slane %v1869_v7, 1  ;;  %v1879_v24 = vshll.u32 %v5095_v34, 16  ;;  %v7017_v47 = vsel %vm424_vm0, %v1862_v22, %v6416_v37  ;;  %9239 = vst [vmem:[#allocation45_spill] sm:$0xff] %v7023_v58  ;;  %v9242_v37 = vld [vmem:[#allocation99_spill] sm:$0xff]  ;;  %v9270_v26 = vld [vmem:[#allocation94_spill] sm:$0xff] }
 0x10f   : > { %v6987_v29 = vpop.permute.xlu0 %1606  ;;  %v1131_v13 = vsel %vm1099_vm3, %v1098_v45, %v6802_v59  ;;  %v1867_v59 = vshrl.u32 %v5094_v27, 16  ;;  %9238 = vst [vmem:[#allocation87_spill] sm:$0xff] %v7017_v47  ;;  %v9017_v27 = vshrl.u32 %v7023_v58, 16  ;;  %v1877_v43 = vshrl.u32 %v5095_v34, 16 }
 0x110   : > { %v6991_v16 = vpop.permute.xlu1 %1612  ;;  %v1881_v7 = vrot.slane %v1879_v24, 1 }
 0x111   : > { %1930 = vrot.lane.b32.xlu0 %v6981_v23, %s5782_s27  ;;  %v1872_v30 = vor.u32 %v1871_v61, %v1867_v59  ;;  %v5220_v23 = vld [vmem:[%s5825_s20 + $0x18] sm:$0xe] }
 0x112   : > { %5384 = vmatmul.mubr.msk.bf16.gmra.mrb[28].mxu0 %vm1148_vm4, %v1131_v13  ;;  %1936 = vrot.lane.b32.xlu1 %v9018_v32, %s5782_s27  ;;  %v1882_v59 = vor.u32 %v1881_v7, %v1877_v43  ;;  %v9251_v43 = vld [vmem:[#allocation70_spill] sm:$0xff] }
 0x113   : > { %v7009_v3 = vpop.permute.xlu0 %1610  ;;  %v7037_v22 = vsel %vm424_vm0, %v1872_v30, %v9242_v37 }
 0x114   : > { %v7011_v51 = vpop.permute.xlu1 %1616  ;;  %9243 = vst [vmem:[#allocation49_spill] sm:$0xff] %v7037_v22 }
 0x115   : > { %9237 = vst [vmem:[#allocation2_spill] sm:$0xff] %v7011_v51  ;;  %1934 = vrot.lane.b32.xlu0 %v7007_v6, %s5782_s27 }
 0x116   : > { %1940 = vrot.lane.b32.xlu1 %v9016_v10, %s5782_s27  ;;  %v7040_v10 = vld [vmem:[%s5825_s20 + $0xc8] ss:$0 sps:$4 sm:$0x11]  }
 0x117   : > { %v7026_v45 = vpop.permute.xlu0 %1614  ;;  %9244 = vst [vmem:[#allocation46_spill] sm:$0xff] %v7040_v10  ;;  %v9020_v34 = vshrl.u32 %v7040_v10, 16 }
 0x118   : > { %9240 = vst [vmem:[#allocation42_spill] sm:$0xff] %v7026_v45  ;;  %v7028_v13 = vpop.permute.xlu1 %1620 }
 0x119   : > { %9241 = vst [vmem:[#allocation65_spill] sm:$0xff] %v7028_v13  ;;  %1938 = vrot.lane.b32.xlu0 %v7017_v47, %s5782_s27 }
 0x11a   : > { %1944 = vrot.lane.b32.xlu1 %v9017_v27, %s5782_s27  ;;  %v9247_v27 = vld [vmem:[#allocation97_spill] sm:$0xff] }
 0x11b   : > { %v7043_v61 = vpop.permute.xlu0 %1618  ;;  %v7054_v30 = vsel %vm424_vm0, %v1882_v59, %v9247_v27  ;;  %v9255_v27 = vld [vmem:[#allocation77_spill] sm:$0xff] }
 0x11c   : > { %9245 = vst [vmem:[#allocation62_spill] sm:$0xff] %v7043_v61  ;;  %v7045_v24 = vpop.permute.xlu1 %1624  ;;  %9248 = vst [vmem:[#allocation74_spill] sm:$0xff] %v7054_v30 }
 0x11d   : > { %9246 = vst [vmem:[#allocation6_spill] sm:$0xff] %v7045_v24  ;;  %1942 = vrot.lane.b32.xlu0 %v7037_v22, %s5782_s27  ;;  %v5122_v24 = vld [vmem:[%s5825_s20 + $0x30] sm:$0xf] }
 0x11e   : > { %1948 = vrot.lane.b32.xlu1 %v9020_v34, %s5782_s27  ;;  %v9254_v34 = vld [vmem:[#allocation71_spill] sm:$0xff] }
 0x11f   : > { %v7056_v37 = vpop.permute.xlu0 %1622 }
 0x120   : > { %9249 = vst [vmem:[#allocation72_spill] sm:$0xff] %v7056_v37  ;;  %v7058_v32 = vpop.permute.xlu1 %1628 }
 0x121   : > { %9250 = vst [vmem:[#allocation8_spill] sm:$0xff] %v7058_v32  ;;  %1946 = vrot.lane.b32.xlu0 %v7054_v30, %s5782_s27  ;;  %v9258_v30 = vld [vmem:[#allocation82_spill] sm:$0xff] }
 0x122   : > { %2563 = vrot.lane.b32.xlu1 %v9251_v43, %s5780_s21  ;;  %v9259_v43 = vld [vmem:[#allocation83_spill] sm:$0xff]  ;;  %v7168_v32 = vld [vmem:[%s5825_s20 + $0x40] sm:$0xf] }
 0x123   : > { %v7064_v7 = vpop.permute.xlu0 %1626 }
 0x124   : > { %9252 = vst [vmem:[#allocation79_spill] sm:$0xff] %v7064_v7  ;;  %v7066_v58 = vpop.permute.xlu1 %1632 }
 0x125   : > { %9253 = vst [vmem:[#allocation75_spill] sm:$0xff] %v7066_v58  ;;  %2561 = vrot.lane.b32.xlu0 %v9254_v34, %s5780_s21  ;;  %v9262_v34 = vld [vmem:[#allocation84_spill] sm:$0xff] }
 0x126   : > { %2567 = vrot.lane.b32.xlu1 %v9255_v27, %s5780_s21  ;;  %v9263_v27 = vld [vmem:[#allocation85_spill] sm:$0xff] }
 0x127   : > { %v7072_v59 = vpop.permute.xlu0 %1630 }
 0x128   : > { %9256 = vst [vmem:[#allocation86_spill] sm:$0xff] %v7072_v59  ;;  %v7074_v10 = vpop.permute.xlu1 %1636 }
 0x129   : > { %9257 = vst [vmem:[#allocation80_spill] sm:$0xff] %v7074_v10  ;;  %2565 = vrot.lane.b32.xlu0 %v9258_v30, %s5780_s21  ;;  %v9266_v30 = vld [vmem:[#allocation91_spill] sm:$0xff] }
 0x12a   : > { %2571 = vrot.lane.b32.xlu1 %v9259_v43, %s5780_s21  ;;  %v9267_v43 = vld [vmem:[#allocation92_spill] sm:$0xff] }
 0x12b   : > { %v7080_v22 = vpop.permute.xlu0 %1634 }
 0x12c   : > { %9260 = vst [vmem:[#allocation89_spill] sm:$0xff] %v7080_v22  ;;  %v7082_v39 = vpop.permute.xlu1 %1640  ;;  %v2761_v22 = vshll.u32 %v7117_v57, 16 }
 0x12d   : > { %9261 = vst [vmem:[#allocation88_spill] sm:$0xff] %v7082_v39  ;;  %2569 = vrot.lane.b32.xlu0 %v9262_v34, %s5780_s21  ;;  %v5119_v34 = vld [vmem:[%s5825_s20 + $0x1c] sm:$0xf]  ;;  %v5118_v39 = vld [vmem:[%s5825_s20 + $0x18] sm:$0xf] }
 0x12e   : > { %2575 = vrot.lane.b32.xlu1 %v9263_v27, %s5780_s21  ;;  %v9269_v27 = vld [vmem:[#allocation93_spill] sm:$0xff]  ;;  %v5236_v12 = vcombine.low %v5220_v23, %v5119_v34  ;;  %v9274_v23 = vld [vmem:[#allocation100_spill] sm:$0xff] }
 0x12f   : > { %v7088_v48 = vpop.permute.xlu0 %1638 }
 0x130   : > { %9264 = vst [vmem:[#allocation99_spill] sm:$0xff] %v7088_v48  ;;  %v7090_v47 = vpop.permute.xlu1 %1644  ;;  %v3444_v1 = vshrl.u32 %v5236_v12, 16 }
 0x131   : > { %9265 = vst [vmem:[#allocation97_spill] sm:$0xff] %v7090_v47  ;;  %2573 = vrot.lane.b32.xlu0 %v9266_v30, %s5780_s21 }
 0x132   : > { %2579 = vrot.lane.b32.xlu1 %v9267_v43, %s5780_s21 }
 0x133   : > { %v7096_v6 = vpop.permute.xlu0 %1642 }
 0x134   : > { %9268 = vst [vmem:[#allocation70_spill] sm:$0xff] %v7096_v6  ;;  %v7098_v46 = vpop.permute.xlu1 %1648  ;;  %v9271_v6 = vld [vmem:[#allocation95_spill] sm:$0xff] }
 0x135   : > { %2577 = vrot.lane.b32.xlu0 %v9269_v27, %s5780_s21  ;;  %v3446_v27 = vshll.u32 %v5236_v12, 16  ;;  %v7144_v12 = vrot.slane %v2761_v22, 1 }
 0x136   : > { %2583 = vrot.lane.b32.xlu1 %v9270_v26, %s5780_s21  ;;  %v9273_v26 = vld [vmem:[#allocation98_spill] sm:$0xff] }
 0x137   : > { %v7106_v30 = vpop.permute.xlu0 %1646  ;;  %v3448_v10 = vrot.slane %v3446_v27, 1 }
 0x138   : > { %v7108_v43 = vpop.permute.xlu1 %1652 }
 0x139   : > { %2581 = vrot.lane.b32.xlu0 %v9271_v6, %s5780_s21  ;;  %v3449_v27 = vor.u32 %v3448_v10, %v3444_v1  ;;  %v5223_v1 = vld [vmem:[%s5825_s20 + $0x3c] sm:$0xe] }
 0x13a   : > { %2587 = vrot.lane.b32.xlu1 %v9272_v49, %s5780_s21  ;;  %v5121_v49 = vld [vmem:[%s5825_s20 + $0x28] sm:$0xf] }
 0x13b   : > { %v7114_v47 = vpop.permute.xlu0 %1650  ;;  %v5237_v59 = vcombine.low %v5221_v17, %v5121_v49  ;;  %v7140_v44 = vcombine.low %v5120_v56, %v5121_v49  ;;  %v7149_v17 = vld [vmem:[%s5825_s20 + $0x2c] ss:$0 sps:$4 sm:$0x11]   ;;  %v5222_v56 = vld [vmem:[%s5825_s20 + $0x30] sm:$0xe]  ;;  %v3450_v22 = vsel %vm424_vm0, %v3449_v27, %v7144_v12  ;;  %v5239_v27 = vcombine.low %v5223_v1, %v7168_v32 }
 0x13c   : > { %v7119_v48 = vpop.permute.xlu1 %1656  ;;  %v3461_v61 = vshrl.u32 %v7149_v17, 16 }
 0x13d   : > { %2585 = vrot.lane.b32.xlu0 %v9273_v26, %s5780_s21  ;;  %v9275_v26 = vld [vmem:[#allocation101_spill] sm:$0xff]  ;;  %v3456_v35 = vshll.u32 %v5237_v59, 16  ;;  %v3454_v49 = vshrl.u32 %v5237_v59, 16  ;;  %v2768_v1 = vshll.u32 %v7140_v44, 16  ;;  %v2766_v13 = vshrl.u32 %v7140_v44, 16 }
 0x13e   : > { %2591 = vrot.lane.b32.xlu1 %v9274_v23, %s5780_s21  ;;  %v7136_v23 = vcombine.low %v5118_v39, %v5119_v34  ;;  %v2773_v34 = vshll.u32 %v7149_v17, 16  ;;  %v3474_v45 = vshrl.u32 %v5239_v27, 16 }
 0x13f   : > { %v7128_v6 = vpop.permute.xlu0 %1654 }
 0x140   : > { %v7132_v63 = vpop.permute.xlu1 %1660 }
 0x141   : > { %2589 = vrot.lane.b32.xlu0 %v9275_v26, %s5780_s21  ;;  %v3458_v26 = vrot.slane %v3456_v35, 1  ;;  %v2756_v35 = vshll.u32 %v7136_v23, 16 }
 0x142   : > { %3299 = vrot.lane.b32.xlu1 %v6731_v2, %s5780_s21  ;;  %v5123_v2 = vld [vmem:[%s5825_s20 + $0x34] sm:$0xf] }
 0x143   : > { %v7142_v58 = vpop.permute.xlu0 %1658  ;;  %v5238_v7 = vcombine.low %v5222_v56, %v5123_v2  ;;  %v3459_v37 = vor.u32 %v3458_v26, %v3454_v49  ;;  %v2754_v49 = vshrl.u32 %v7136_v23, 16  ;;  %v5643_v26 = vld [vmem:[%s8856_s1 + $0x28] sm:$0xff]  }
 0x144   : > { %v7146_v38 = vpop.permute.xlu1 %1664 }
 0x145   : > { %9276 = vst [vmem:[#allocation71_spill] sm:$0xff] %v7146_v38  ;;  %2673 = vrot.lane.b32.xlu0 %v7136_v23, %s5781_s22  ;;  %v3466_v19 = vshll.u32 %v5238_v7, 16  ;;  %v7199_v38 = vld [vmem:[%s5825_s20 + $0x44] ss:$0 sps:$4 sm:$0x11]   ;;  %v2770_v23 = vrot.slane %v2768_v1, 1 }
 0x146   : > { %2675 = vrot.lane.b32.xlu1 %v7140_v44, %s5781_s22  ;;  %v5740_v1 = vld [vmem:[%s5825_s20 + $0x8] ss:$0 sps:$4 sm:$0x11]  }
 0x147   : > { %v7157_v39 = vpop.permute.xlu0 %1662 }
 0x148   : > { %9277 = vst [vmem:[#allocation77_spill] sm:$0xff] %v7157_v39  ;;  %v7162_v10 = vpop.permute.xlu1 %1668  ;;  %v3468_v39 = vrot.slane %v3466_v19, 1  ;;  %v9286_v19 = vld [vmem:[#allocation3_spill] sm:$0xff] }
 0x149   : > { %9278 = vst [vmem:[#allocation82_spill] sm:$0xff] %v7162_v10  ;;  %3303 = vrot.lane.b32.xlu0 %v6746_v5, %s5780_s21  ;;  %v5641_v5 = vld [vmem:[%s8856_s1 + $0x20] sm:$0xff]   ;;  %v7186_v10 = vrot.slane %v2773_v34, 1 }
 0x14a   : > { %3603 = vrot.lane.b32.xlu1 %v3450_v22, %s5782_s27  ;;  %v9281_v22 = vshrl.u32 %v9168_v28, 16  ;;  %5423 = vmatprep.subr.bf16.mxu0 %v5641_v5  ;;  %v2758_v28 = vrot.slane %v2756_v35, 1  ;;  %v7216_v35 = vcombine.low %v5122_v24, %v5123_v2  ;;  %v1953_v24 = vsel %vm1033_vm1, %v5740_v1, %v6825_v18 }
 0x14b   : > { %v7177_v59 = vpop.permute.xlu0 %1666  ;;  %5424 = vmatpush3.bf16.msra.mxu0 %v5641_v5  ;;  %v3460_v31 = vsel %vm424_vm0, %v3459_v37, %v7186_v10  ;;  %v9284_v5 = vshrl.u32 %v9165_v54, 16 }
 0x14c   : > { %9279 = vst [vmem:[#allocation83_spill] sm:$0xff] %v7177_v59  ;;  %v7184_v56 = vpop.permute.xlu1 %1672  ;;  %v7193_v59 = vld [vmem:[%s5825_s20 + $0x38] ss:$0 sps:$4 sm:$0x11]   ;;  %5425 = vmatprep.subr.bf16.mxu0 %v5643_v26  ;;  %v2759_v54 = vor.u32 %v2758_v28, %v2754_v49  ;;  %v2771_v49 = vor.u32 %v2770_v23, %v2766_v13  ;;  %v2778_v13 = vshrl.u32 %v7216_v35, 16 }
 0x14d   : > { %9280 = vst [vmem:[#allocation84_spill] sm:$0xff] %v7184_v56  ;;  %3301 = vrot.lane.b32.xlu0 %v9281_v22, %s5780_s21  ;;  %v3476_v56 = vshll.u32 %v5239_v27, 16  ;;  %v2785_v37 = vshll.u32 %v7193_v59, 16  ;;  %v2016_v27 = vsel %vm1066_vm2, %v1953_v24, %v7106_v30  ;;  %v5741_v30 = vld [vmem:[%s5825_s20 + $0x14] ss:$0 sps:$4 sm:$0x11]  }
 0x14e   : > { %3363 = vrot.lane.b32.xlu1 %v7117_v57, %s5781_s22 }
 0x14f   : > { %v7201_v34 = vpop.permute.xlu0 %1670  ;;  %v3478_v44 = vrot.slane %v3476_v56, 1  ;;  %5426 = vmatpush3.bf16.msra.mxu0 %v5643_v26  ;;  %v3451_v56 = vshrl.u32 %v7117_v57, 16  ;;  %v7238_v26 = vrot.slane %v2785_v37, 1 }
 0x150   : > { %9282 = vst [vmem:[#allocation85_spill] sm:$0xff] %v7201_v34  ;;  %v7207_v22 = vpop.permute.xlu1 %1676  ;;  %v3464_v34 = vshrl.u32 %v5238_v7, 16  ;;  %v1951_v7 = vsel %vm1033_vm1, %v9286_v19, %v6841_v20  ;;  %v9287_v19 = vld [vmem:[#allocation14_spill] sm:$0xff] }
 0x151   : > { %9283 = vst [vmem:[#allocation91_spill] sm:$0xff] %v7207_v22  ;;  %3305 = vrot.lane.b32.xlu0 %v9284_v5, %s5780_s21  ;;  %v2797_v22 = vshll.u32 %v7199_v38, 16  ;;  %v2780_v5 = vshll.u32 %v7216_v35, 16  ;;  %v3479_v1 = vor.u32 %v3478_v44, %v3474_v45  ;;  %v2776_v44 = vsel %vm424_vm0, %v2771_v49, %v7186_v10 }
 0x152   : > { %3365 = vrot.lane.b32.xlu1 %v7149_v17, %s5781_s22  ;;  %v5124_v17 = vld [vmem:[%s5825_s20 + $0x3c] sm:$0xf]  ;;  %v3469_v28 = vor.u32 %v3468_v39, %v3464_v34 }
 0x153   : > { %v7222_v8 = vpop.permute.xlu0 %1674  ;;  %v7240_v20 = vrot.slane %v2797_v22, 1  ;;  %v7247_v57 = vcombine.low %v5124_v17, %v7168_v32  ;;  %v9288_v39 = vld [vmem:[#allocation5_spill] sm:$0xff]  ;;  %v2782_v23 = vrot.slane %v2780_v5, 1  ;;  %v1959_v17 = vsel %vm1033_vm1, %v9185_v40, %v6888_v62 }
 0x154   : > { %9285 = vst [vmem:[#allocation92_spill] sm:$0xff] %v7222_v8  ;;  %v1889_v2 = vpop.permute.xlu1 %1888  ;;  %v2014_v8 = vsel %vm1066_vm2, %v1951_v7, %v9287_v19  ;;  %v1955_v45 = vsel %vm1033_vm1, %v9288_v39, %v6870_v36  ;;  %v9289_v7 = vld [vmem:[#allocation9_spill] sm:$0xff]  ;;  %v5743_v19 = vld [vmem:[%s5825_s20 + $0x2c] ss:$0 sps:$4 sm:$0x11]   ;;  %v9290_v39 = vld [vmem:[#allocation22_spill] sm:$0xff] }
 0x155   : > { %3607 = vrot.lane.b32.xlu0 %v3460_v31, %s5782_s27  ;;  %v2065_v18 = vsel %vm1099_vm3, %v2016_v27, %v1889_v2  ;;  %v2764_v31 = vsel %vm424_vm0, %v2759_v54, %v7144_v12  ;;  %v7271_v36 = vsel %vm424_vm0, %v3479_v1, %v7240_v20  ;;  %v2783_v49 = vor.u32 %v2782_v23, %v2778_v13 }
 0x156   : > { %3609 = vrot.lane.b32.xlu1 %v3461_v61, %s5782_s27  ;;  %v1957_v61 = vsel %vm1033_vm1, %v5741_v30, %v6849_v50  ;;  %v2132_v32 = vshll.u32 %v2065_v18, 16  ;;  %v1965_v30 = vsel %vm1033_vm1, %v5743_v19, %v6896_v33  ;;  %v2790_v62 = vshrl.u32 %v7247_v57, 16  ;;  %v9291_v33 = vld [vmem:[#allocation4_spill] sm:$0xff] }
 0x157   : > { %v1887_v51 = vpop.permute.xlu0 %1886  ;;  %v2019_v12 = vsel %vm1066_vm2, %v1957_v61, %v7098_v46  ;;  %v2792_v46 = vshll.u32 %v7247_v57, 16  ;;  %v2025_v23 = vsel %vm1066_vm2, %v1965_v30, %v7108_v43 }
 0x158   : > { %v2063_v34 = vsel %vm1099_vm3, %v2014_v8, %v1887_v51  ;;  %v1893_v22 = vpop.permute.xlu1 %1892  ;;  %v7267_v8 = vsel %vm424_vm0, %v3469_v28, %v7238_v26  ;;  %v5742_v51 = vld [vmem:[%s5825_s20 + $0x20] ss:$0 sps:$4 sm:$0x11]   ;;  %v2134_v28 = vrot.slane %v2132_v32, 1 }
 0x159   : > { %v2128_v37 = vshll.u32 %v2063_v34, 16  ;;  %3605 = vrot.lane.b32.xlu0 %v3451_v56, %s5782_s27  ;;  %v2069_v50 = vsel %vm1099_vm3, %v2019_v12, %v1893_v22  ;;  %v1961_v10 = vsel %vm1033_vm1, %v5742_v51, %v6872_v60  ;;  %v2126_v54 = vshrl.u32 %v2063_v34, 16 }
 0x15a   : > { %3307 = vrot.lane.b32.xlu1 %v6773_v21, %s5780_s21  ;;  %v2017_v21 = vsel %vm1066_vm2, %v1955_v45, %v9289_v7  ;;  %v2022_v5 = vsel %vm1066_vm2, %v1961_v10, %v7114_v47  ;;  %v2142_v60 = vshll.u32 %v2069_v50, 16  ;;  %v2794_v47 = vrot.slane %v2792_v46, 1 }
 0x15b   : > { %v2130_v24 = vrot.slane %v2128_v37, 1  ;;  %v1891_v2 = vpop.permute.xlu0 %1890  ;;  %v2020_v45 = vsel %vm1066_vm2, %v1959_v17, %v9290_v39  ;;  %v1963_v22 = vsel %vm1033_vm1, %v9291_v33, %v6918_v9  ;;  %v3481_v37 = vshrl.u32 %v7199_v38, 16  ;;  %v5127_v9 = vld [vmem:[%s5825_s20 + $0x4c] sm:$0xf] }
 0x15c   : > { %v2067_v27 = vsel %vm1099_vm3, %v2017_v21, %v1891_v2  ;;  %v1897_v56 = vpop.permute.xlu1 %1896  ;;  %v2144_v50 = vrot.slane %v2142_v60, 1  ;;  %v7315_v7 = vsel %vm424_vm0, %v2783_v49, %v7238_v26  ;;  %v2795_v21 = vor.u32 %v2794_v47, %v2790_v62  ;;  %v5642_v2 = vld [vmem:[%s8856_s1 + $0x38] sm:$0xff]   ;;  %v9293_v39 = vld [vmem:[#allocation11_spill] sm:$0xff] }
 0x15d   : > { %v2131_v18 = vor.u32 %v2130_v24, %v2126_v54  ;;  %v2138_v1 = vshll.u32 %v2067_v27, 16  ;;  %2945 = vrot.lane.b32.xlu0 %v2764_v31, %s5782_s27  ;;  %v2073_v40 = vsel %vm1099_vm3, %v2022_v5, %v1897_v56  ;;  %v2136_v61 = vshrl.u32 %v2067_v27, 16  ;;  %v5744_v54 = vld [vmem:[%s5825_s20 + $0x38] ss:$0 sps:$4 sm:$0x11]  }
 0x15e   : > { %2947 = vrot.lane.b32.xlu1 %v2776_v44, %s5782_s27  ;;  %v5126_v44 = vld [vmem:[%s5825_s20 + $0x48] sm:$0xf]  ;;  %v2152_v51 = vshll.u32 %v2073_v40, 16  ;;  %v1969_v43 = vsel %vm1033_vm1, %v5744_v54, %v6920_v52  ;;  %v2023_v5 = vsel %vm1066_vm2, %v1963_v22, %v6604_v0  ;;  %v3471_v62 = vshrl.u32 %v7193_v59, 16 }
 0x15f   : > { %v2140_v13 = vrot.slane %v2138_v1, 1  ;;  %v1895_v31 = vpop.permute.xlu0 %1894  ;;  %v2135_v34 = vsel %vm424_vm0, %v2131_v18, %v2134_v28  ;;  %v5224_v56 = vld [vmem:[%s5825_s20 + $0x48] sm:$0xe]  ;;  %v2028_v49 = vsel %vm1066_vm2, %v1969_v43, %v7128_v6  ;;  %v7331_v60 = vcombine.low %v5126_v44, %v5127_v9 }
 0x160   : > { %v2071_v12 = vsel %vm1099_vm3, %v2020_v45, %v1895_v31  ;;  %5391 = vmatprep.mubr.msk.bf16.mxu1 %vm1148_vm4, %v2135_v34  ;;  %v1901_v32 = vpop.permute.xlu1 %1900  ;;  %v2154_v0 = vrot.slane %v2152_v51, 1  ;;  %v7343_v47 = vcombine.low %v5224_v56, %v5127_v9  ;;  %v5129_v31 = vld [vmem:[%s5825_s20 + $0x58] sm:$0xf]  ;;  %v9296_v43 = vld [vmem:[#allocation15_spill] sm:$0xff] }
 0x161   : > { %v2141_v46 = vor.u32 %v2140_v13, %v2136_v61  ;;  %v2148_v10 = vshll.u32 %v2071_v12, 16  ;;  %2677 = vrot.lane.b32.xlu0 %v7216_v35, %s5781_s22  ;;  %v2077_v24 = vsel %vm1099_vm3, %v2025_v23, %v1901_v32  ;;  %v2146_v35 = vshrl.u32 %v2071_v12, 16  ;;  %v7385_v56 = vld [vmem:[%s5825_s20 + $0x50] ss:$0 sps:$4 sm:$0x11]  }
 0x162   : > { %2679 = vrot.lane.b32.xlu1 %v7247_v57, %s5781_s22  ;;  %v9292_v57 = vld [vmem:[#allocation7_spill] sm:$0xff]  ;;  %v2162_v19 = vshll.u32 %v2077_v24, 16  ;;  %v7359_v23 = vsel %vm424_vm0, %v2795_v21, %v7240_v20 }
 0x163   : > { %v2150_v17 = vrot.slane %v2148_v10, 1  ;;  %v1899_v52 = vpop.permute.xlu0 %1898  ;;  %v2145_v27 = vsel %vm424_vm0, %v2141_v46, %v2144_v50  ;;  %v1967_v26 = vsel %vm1033_vm1, %v9292_v57, %v6936_v53  ;;  %v5745_v53 = vld [vmem:[%s5825_s20 + $0x44] ss:$0 sps:$4 sm:$0x11]   ;;  %v9294_v46 = vld [vmem:[#allocation63_spill] sm:$0xff]  ;;  %v3486_v10 = vshll.u32 %v7343_v47, 16 }
 0x164   : > { %v2075_v28 = vsel %vm1099_vm3, %v2023_v5, %v1899_v52  ;;  %5392 = vmatmul.mubr.msk.bf16.vlgmr.msra.gmra.mrb[0].mxu1 %vm1148_vm4, %v2145_v27  ;;  %v1905_v18 = vpop.permute.xlu1 %1904  ;;  %v1973_v6 = vsel %vm1033_vm1, %v5745_v53, %v6944_v55  ;;  %v5128_v55 = vld [vmem:[%s5825_s20 + $0x54] sm:$0xf]  ;;  %v2164_v12 = vrot.slane %v2162_v19, 1  ;;  %v3484_v57 = vshrl.u32 %v7343_v47, 16 }
 0x165   : > { %v2151_v1 = vor.u32 %v2150_v17, %v2146_v35  ;;  %v2158_v30 = vshll.u32 %v2075_v28, 16  ;;  %3311 = vrot.lane.b32.xlu0 %v6788_v4, %s5780_s21  ;;  %5460 = vmatpush3.bf16.msra.mxu1 %v7173_v42  ;;  %v2081_v40 = vsel %vm1099_vm3, %v2028_v49, %v1905_v18  ;;  %v2156_v61 = vshrl.u32 %v2075_v28, 16  ;;  %v9297_v35 = vld [vmem:[#allocation10_spill] sm:$0xff] }
 0x166   : > { %3611 = vrot.lane.b32.xlu1 %v7267_v8, %s5782_s27  ;;  %5461 = vmatprep.subr.bf16.mxu1 %v5642_v2  ;;  %v2026_v4 = vsel %vm1066_vm2, %v1967_v26, %v9293_v39  ;;  %v1971_v8 = vsel %vm1033_vm1, %v9197_v11, %v6968_v25  ;;  %v2031_v34 = vsel %vm1066_vm2, %v1973_v6, %v7119_v48  ;;  %v2172_v44 = vshll.u32 %v2081_v40, 16  ;;  %v5746_v48 = vld [vmem:[%s5825_s20 + $0x50] ss:$0 sps:$4 sm:$0x11]   ;;  %v9299_v40 = vld [vmem:[#allocation13_spill] sm:$0xff] }
 0x167   : > { %v2160_v13 = vrot.slane %v2158_v30, 1  ;;  %v1903_v42 = vpop.permute.xlu0 %1902  ;;  %v2155_v45 = vsel %vm424_vm0, %v2151_v1, %v2154_v0  ;;  %v9295_v11 = vshrl.u32 %v9294_v46, 16  ;;  %v1977_v25 = vsel %vm1033_vm1, %v5746_v48, %v6971_v14  ;;  %v5225_v14 = vld [vmem:[%s5825_s20 + $0x54] sm:$0xe]  ;;  %v9302_v48 = vld [vmem:[#allocation42_spill] sm:$0xff] }
 0x168   : > { %v2079_v33 = vsel %vm1099_vm3, %v2026_v4, %v1903_v42  ;;  %5395 = vmatprep.mubr.msk.bf16.mxu1 %vm1148_vm4, %v2155_v45  ;;  %v1909_v22 = vpop.permute.xlu1 %1908  ;;  %v7370_v20 = vcombine.low %v5128_v55, %v5129_v31  ;;  %v2029_v24 = vsel %vm1066_vm2, %v1971_v8, %v9296_v43  ;;  %v1975_v17 = vsel %vm1033_vm1, %v9297_v35, %v6987_v29  ;;  %v5747_v29 = vld [vmem:[%s5825_s20 + $0x5c] ss:$0 sps:$4 sm:$0x11]  }
 0x169   : > { %v2161_v32 = vor.u32 %v2160_v13, %v2156_v61  ;;  %v2168_v50 = vshll.u32 %v2079_v33, 16  ;;  %3309 = vrot.lane.b32.xlu0 %v9295_v11, %s5780_s21  ;;  %5462 = vmatpush3.bf16.msra.mxu1 %v5642_v2  ;;  %v2085_v51 = vsel %vm1099_vm3, %v2031_v34, %v1909_v22  ;;  %v2166_v9 = vshrl.u32 %v2079_v33, 16  ;;  %v7411_v45 = vld [vmem:[%s5825_s20 + $0x5c] ss:$0 sps:$4 sm:$0x11]  }
 0x16a   : > { %3367 = vrot.lane.b32.xlu1 %v7193_v59, %s5781_s22  ;;  %v2034_v5 = vsel %vm1066_vm2, %v1977_v25, %v7142_v58  ;;  %v2174_v26 = vrot.slane %v2172_v44, 1  ;;  %v2182_v28 = vshll.u32 %v2085_v51, 16  ;;  %v9298_v0 = vshrl.u32 %v9169_v41, 16  ;;  %v9303_v25 = vld [vmem:[#allocation16_spill] sm:$0xff]  ;;  %v9305_v35 = vld [vmem:[#allocation65_spill] sm:$0xff] }
 0x16b   : > { %v2170_v54 = vrot.slane %v2168_v50, 1  ;;  %v1907_v21 = vpop.permute.xlu0 %1906  ;;  %v2165_v2 = vsel %vm424_vm0, %v2161_v32, %v2164_v12  ;;  %v1981_v58 = vsel %vm1033_vm1, %v5747_v29, %v6991_v16  ;;  %v7397_v19 = vcombine.low %v5225_v14, %v5129_v31  ;;  %v9301_v50 = vld [vmem:[#allocation17_spill] sm:$0xff]  ;;  %v5749_v14 = vld [vmem:[%s5825_s20 + $0x74] ss:$0 sps:$4 sm:$0x11]  }
 0x16c   : > { %v2083_v52 = vsel %vm1099_vm3, %v2029_v24, %v1907_v21  ;;  %5396 = vmatmul.mubr.msk.bf16.gmra.mrb[4].mxu1 %vm1148_vm4, %v2165_v2  ;;  %v1913_v27 = vpop.permute.xlu1 %1912  ;;  %v3488_v30 = vrot.slane %v3486_v10, 1  ;;  %v2032_v41 = vsel %vm1066_vm2, %v1975_v17, %v9299_v40  ;;  %v1979_v16 = vsel %vm1033_vm1, %v9203_v15, %v7009_v3  ;;  %v5748_v15 = vld [vmem:[%s5825_s20 + $0x68] ss:$0 sps:$4 sm:$0x11]   ;;  %v9300_v3 = vld [vmem:[#allocation2_spill] sm:$0xff]  ;;  %v9304_v10 = vld [vmem:[#allocation77_spill] sm:$0xff] }
 0x16d   : > { %v2171_v49 = vor.u32 %v2170_v54, %v2166_v9  ;;  %v2178_v18 = vshll.u32 %v2083_v52, 16  ;;  %3313 = vrot.lane.b32.xlu0 %v9298_v0, %s5780_s21  ;;  %v2089_v1 = vsel %vm1099_vm3, %v2034_v5, %v1913_v27  ;;  %v2176_v53 = vshrl.u32 %v2083_v52, 16  ;;  %v9306_v52 = vld [vmem:[#allocation32_spill] sm:$0xff]  ;;  %v9308_v0 = vld [vmem:[#allocation62_spill] sm:$0xff] }
 0x16e   : > { %3369 = vrot.lane.b32.xlu1 %v7199_v38, %s5781_s22  ;;  %v2037_v13 = vsel %vm1066_vm2, %v1981_v58, %v7132_v63  ;;  %v2809_v42 = vshll.u32 %v7385_v56, 16  ;;  %v2184_v55 = vrot.slane %v2182_v28, 1  ;;  %v2192_v8 = vshll.u32 %v2089_v1, 16  ;;  %v9307_v28 = vld [vmem:[#allocation24_spill] sm:$0xff]  ;;  %v9310_v1 = vld [vmem:[#allocation71_spill] sm:$0xff] }
 0x16f   : > { %v2180_v6 = vrot.slane %v2178_v18, 1  ;;  %v1911_v47 = vpop.permute.xlu0 %1910  ;;  %v2175_v61 = vsel %vm424_vm0, %v2171_v49, %v2174_v26  ;;  %v1985_v63 = vsel %vm1033_vm1, %v5748_v15, %v9300_v3  ;;  %v3489_v22 = vor.u32 %v3488_v30, %v3484_v57  ;;  %v9309_v29 = vld [vmem:[#allocation12_spill] sm:$0xff] }
 0x170   : > { %v2087_v39 = vsel %vm1099_vm3, %v2032_v41, %v1911_v47  ;;  %5399 = vmatprep.mubr.msk.bf16.mxu1 %vm1148_vm4, %v2175_v61  ;;  %v1917_v4 = vpop.permute.xlu1 %1916  ;;  %v3496_v12 = vshll.u32 %v7397_v19, 16  ;;  %v2035_v46 = vsel %vm1066_vm2, %v1979_v16, %v9301_v50  ;;  %v1983_v51 = vsel %vm1033_vm1, %v9303_v25, %v9302_v48  ;;  %v5750_v16 = vld [vmem:[%s5825_s20 + $0x80] ss:$0 sps:$4 sm:$0x11]  }
 0x171   : > { %v2181_v31 = vor.u32 %v2180_v6, %v2176_v53  ;;  %v2188_v34 = vshll.u32 %v2087_v39, 16  ;;  %3615 = vrot.lane.b32.xlu0 %v7271_v36, %s5782_s27  ;;  %v2093_v33 = vsel %vm1099_vm3, %v2037_v13, %v1917_v4  ;;  %v2186_v32 = vshrl.u32 %v2087_v39, 16  ;;  %v9311_v13 = vld [vmem:[#allocation6_spill] sm:$0xff] }
 0x172   : > { %3617 = vrot.lane.b32.xlu1 %v3481_v37, %s5782_s27  ;;  %v2040_v38 = vsel %vm1066_vm2, %v1985_v63, %v9304_v10  ;;  %v2821_v54 = vshll.u32 %v7411_v45, 16  ;;  %v2194_v43 = vrot.slane %v2192_v8, 1  ;;  %v2202_v21 = vshll.u32 %v2093_v33, 16  ;;  %v9313_v63 = vld [vmem:[#allocation72_spill] sm:$0xff]  ;;  %v9314_v33 = vld [vmem:[#allocation23_spill] sm:$0xff] }
 0x173   : > { %v2190_v44 = vrot.slane %v2188_v34, 1  ;;  %v1915_v36 = vpop.permute.xlu0 %1914  ;;  %v2185_v11 = vsel %vm424_vm0, %v2181_v31, %v2184_v55  ;;  %v1989_v17 = vsel %vm1033_vm1, %v5749_v14, %v9305_v35  ;;  %v3494_v27 = vshrl.u32 %v7397_v19, 16  ;;  %v9312_v34 = vld [vmem:[#allocation21_spill] sm:$0xff]  ;;  %v9316_v10 = vld [vmem:[#allocation8_spill] sm:$0xff]  ;;  %v9318_v35 = vld [vmem:[#allocation79_spill] sm:$0xff] }
 0x174   : > { %v2091_v37 = vsel %vm1099_vm3, %v2035_v46, %v1915_v36  ;;  %5400 = vmatmul.mubr.msk.bf16.gmra.mrb[8].mxu1 %vm1148_vm4, %v2185_v11  ;;  %v1921_v9 = vpop.permute.xlu1 %1920  ;;  %v3498_v57 = vrot.slane %v3496_v12, 1  ;;  %v2038_v18 = vsel %vm1066_vm2, %v1983_v51, %v9307_v28  ;;  %v1987_v58 = vsel %vm1033_vm1, %v9309_v29, %v9308_v0  ;;  %v5751_v51 = vld [vmem:[%s5825_s20 + $0x8c] ss:$0 sps:$4 sm:$0x11]   ;;  %v9321_v0 = vld [vmem:[#allocation28_spill] sm:$0xff] }
 0x175   : > { %v2191_v24 = vor.u32 %v2190_v44, %v2186_v32  ;;  %v2198_v2 = vshll.u32 %v2091_v37, 16  ;;  %3613 = vrot.lane.b32.xlu0 %v3471_v62, %s5782_s27  ;;  %v2097_v5 = vsel %vm1099_vm3, %v2040_v38, %v1921_v9  ;;  %v2196_v26 = vshrl.u32 %v2091_v37, 16  ;;  %v9315_v32 = vld [vmem:[#allocation83_spill] sm:$0xff]  ;;  %v5752_v29 = vld [vmem:[%s5825_s20 + $0x98] ss:$0 sps:$4 sm:$0x11]  }
 0x176   : > { %3315 = vrot.lane.b32.xlu1 %v9306_v52, %s5780_s21  ;;  %v2043_v30 = vsel %vm1066_vm2, %v1989_v17, %v9310_v1  ;;  %v7454_v6 = vrot.slane %v2809_v42, 1  ;;  %v2204_v40 = vrot.slane %v2202_v21, 1  ;;  %v2212_v47 = vshll.u32 %v2097_v5, 16  ;;  %v9319_v17 = vld [vmem:[#allocation18_spill] sm:$0xff] }
 0x177   : > { %v2200_v49 = vrot.slane %v2198_v2, 1  ;;  %v1919_v59 = vpop.permute.xlu0 %1918  ;;  %v2195_v62 = vsel %vm424_vm0, %v2191_v24, %v2194_v43  ;;  %v1993_v39 = vsel %vm1033_vm1, %v5750_v16, %v9311_v13  ;;  %v7464_v55 = vrot.slane %v2821_v54, 1  ;;  %v9317_v24 = vld [vmem:[#allocation25_spill] sm:$0xff]  ;;  %v9320_v52 = vld [vmem:[#allocation82_spill] sm:$0xff] }
 0x178   : > { %v2095_v53 = vsel %vm1099_vm3, %v2038_v18, %v1919_v59  ;;  %5403 = vmatprep.mubr.msk.bf16.mxu1 %vm1148_vm4, %v2195_v62  ;;  %v1925_v19 = vpop.permute.xlu1 %1924  ;;  %v3499_v42 = vor.u32 %v3498_v57, %v3494_v27  ;;  %v2041_v15 = vsel %vm1066_vm2, %v1987_v58, %v9312_v34  ;;  %v1991_v12 = vsel %vm1033_vm1, %v9314_v33, %v9313_v63  ;;  %v9322_v58 = vld [vmem:[#allocation75_spill] sm:$0xff] }
 0x179   : > { %v2201_v41 = vor.u32 %v2200_v49, %v2196_v26  ;;  %v2208_v61 = vshll.u32 %v2095_v53, 16  ;;  %2949 = vrot.lane.b32.xlu0 %v7315_v7, %s5782_s27  ;;  %v2101_v4 = vsel %vm1099_vm3, %v2043_v30, %v1925_v19  ;;  %v2206_v31 = vshrl.u32 %v2095_v53, 16 }
 0x17a   : > { %2951 = vrot.lane.b32.xlu1 %v7359_v23, %s5782_s27  ;;  %v2046_v44 = vsel %vm1066_vm2, %v1993_v39, %v9315_v32  ;;  %v3490_v46 = vsel %vm424_vm0, %v3489_v22, %v7454_v6  ;;  %v2214_v36 = vrot.slane %v2212_v47, 1  ;;  %v2222_v48 = vshll.u32 %v2101_v4, 16  ;;  %v9323_v47 = vld [vmem:[#allocation19_spill] sm:$0xff]  ;;  %v9324_v39 = vld [vmem:[#allocation86_spill] sm:$0xff] }
 0x17b   : > { %v2210_v8 = vrot.slane %v2208_v61, 1  ;;  %v1923_v3 = vpop.permute.xlu0 %1922  ;;  %v2205_v7 = vsel %vm424_vm0, %v2201_v41, %v2204_v40  ;;  %v1997_v38 = vsel %vm1033_vm1, %v5751_v51, %v9316_v10  ;;  %v7488_v9 = vsel %vm424_vm0, %v3499_v42, %v7464_v55  ;;  %v9325_v4 = vld [vmem:[#allocation31_spill] sm:$0xff]  ;;  %v9330_v51 = vld [vmem:[#allocation20_spill] sm:$0xff] }
 0x17c   : > { %v2099_v23 = vsel %vm1099_vm3, %v2041_v15, %v1923_v3  ;;  %5404 = vmatmul.mubr.msk.bf16.gmra.mrb[12].mxu1 %vm1148_vm4, %v2205_v7  ;;  %v1929_v50 = vpop.permute.xlu1 %1928  ;;  %v2804_v22 = vshll.u32 %v7331_v60, 16  ;;  %v2044_v21 = vsel %vm1066_vm2, %v1991_v12, %v9317_v24  ;;  %v1995_v5 = vsel %vm1033_vm1, %v9319_v17, %v9318_v35  ;;  %v9327_v12 = vld [vmem:[#allocation67_spill] sm:$0xff]  ;;  %v9331_v24 = vld [vmem:[#allocation89_spill] sm:$0xff] }
 0x17d   : > { %v2211_v11 = vor.u32 %v2210_v8, %v2206_v31  ;;  %v2218_v25 = vshll.u32 %v2099_v23, 16  ;;  %2681 = vrot.lane.b32.xlu0 %v7331_v60, %s5781_s22  ;;  %v2105_v37 = vsel %vm1099_vm3, %v2046_v44, %v1929_v50  ;;  %v2216_v54 = vshrl.u32 %v2099_v23, 16  ;;  %v9326_v31 = vld [vmem:[#allocation85_spill] sm:$0xff]  ;;  %v5753_v44 = vld [vmem:[%s5825_s20 + $0xa4] ss:$0 sps:$4 sm:$0x11]  }
 0x17e   : > { %2683 = vrot.lane.b32.xlu1 %v7370_v20, %s5781_s22  ;;  %v2049_v27 = vsel %vm1066_vm2, %v1997_v38, %v9320_v52  ;;  %v3501_v49 = vshrl.u32 %v7411_v45, 16  ;;  %v2224_v28 = vrot.slane %v2222_v48, 1  ;;  %v2232_v59 = vshll.u32 %v2105_v37, 16  ;;  %v9329_v23 = vld [vmem:[#allocation80_spill] sm:$0xff] }
 0x17f   : > { %v2220_v43 = vrot.slane %v2218_v25, 1  ;;  %v1927_v2 = vpop.permute.xlu0 %1926  ;;  %v2215_v14 = vsel %vm424_vm0, %v2211_v11, %v2214_v36  ;;  %v2001_v1 = vsel %vm1033_vm1, %v5752_v29, %v9322_v58  ;;  %v3491_v53 = vshrl.u32 %v7385_v56, 16 }
 0x180   : > { %v2103_v57 = vsel %vm1099_vm3, %v2044_v21, %v1927_v2  ;;  %5407 = vmatprep.mubr.msk.bf16.mxu1 %vm1148_vm4, %v2215_v14  ;;  %v1933_v26 = vpop.permute.xlu1 %1932  ;;  %v2802_v19 = vshrl.u32 %v7331_v60, 16  ;;  %v2047_v61 = vsel %vm1066_vm2, %v1995_v5, %v9323_v47  ;;  %v1999_v42 = vsel %vm1033_vm1, %v9325_v4, %v9324_v39  ;;  %v9332_v21 = vld [vmem:[#allocation27_spill] sm:$0xff]  ;;  %v9333_v14 = vld [vmem:[#allocation84_spill] sm:$0xff] }
 0x181   : > { %v2221_v18 = vor.u32 %v2220_v43, %v2216_v54  ;;  %v2228_v62 = vshll.u32 %v2103_v57, 16  ;;  %3319 = vrot.lane.b32.xlu0 %v9321_v0, %s5780_s21  ;;  %v2109_v30 = vsel %vm1099_vm3, %v2049_v27, %v1933_v26  ;;  %v2226_v40 = vshrl.u32 %v2103_v57, 16  ;;  %v7536_v54 = vld [vmem:[%s5825_s20 + $0x64] sm:$0xf]  ;;  %v5226_v43 = vld [vmem:[%s5825_s20 + $0x60] sm:$0xe] }
 0x182   : > { %3619 = vrot.lane.b32.xlu1 %v3490_v46, %s5782_s27  ;;  %v2052_v8 = vsel %vm1066_vm2, %v2001_v1, %v9326_v31  ;;  %v2816_v15 = vshll.u32 %v7370_v20, 16  ;;  %v2234_v3 = vrot.slane %v2232_v59, 1  ;;  %v2242_v63 = vshll.u32 %v2109_v30, 16  ;;  %v9334_v26 = vld [vmem:[#allocation66_spill] sm:$0xff]  ;;  %v9336_v59 = vld [vmem:[#allocation88_spill] sm:$0xff] }
 0x183   : > { %v2230_v41 = vrot.slane %v2228_v62, 1  ;;  %v1931_v16 = vpop.permute.xlu0 %1930  ;;  %v2225_v13 = vsel %vm424_vm0, %v2221_v18, %v2224_v28  ;;  %v9328_v32 = vshrl.u32 %v9327_v12, 16  ;;  %v2005_v50 = vsel %vm1033_vm1, %v5753_v44, %v9329_v23  ;;  %v5754_v18 = vld [vmem:[%s5825_s20 + $0xb0] ss:$0 sps:$4 sm:$0x11]  }
 0x184   : > { %v2107_v34 = vsel %vm1099_vm3, %v2047_v61, %v1931_v16  ;;  %5408 = vmatmul.mubr.msk.bf16.gmra.mrb[16].mxu1 %vm1148_vm4, %v2225_v13  ;;  %v1937_v60 = vpop.permute.xlu1 %1936  ;;  %v2806_v36 = vrot.slane %v2804_v22, 1  ;;  %v2814_v11 = vshrl.u32 %v7370_v20, 16  ;;  %v2050_v10 = vsel %vm1066_vm2, %v1999_v42, %v9330_v51  ;;  %v9338_v16 = vld [vmem:[#allocation99_spill] sm:$0xff]  ;;  %v9339_v13 = vld [vmem:[#allocation36_spill] sm:$0xff] }
 0x185   : > { %v2231_v7 = vor.u32 %v2230_v41, %v2226_v40  ;;  %v2238_v33 = vshll.u32 %v2107_v34, 16  ;;  %3317 = vrot.lane.b32.xlu0 %v9328_v32, %s5780_s21  ;;  %v2113_v46 = vsel %vm1099_vm3, %v2052_v8, %v1937_v60  ;;  %v2236_v48 = vshrl.u32 %v2107_v34, 16  ;;  %v9337_v40 = vld [vmem:[#allocation29_spill] sm:$0xff]  ;;  %v9340_v4 = vld [vmem:[#allocation92_spill] sm:$0xff]  ;;  %v9345_v51 = vld [vmem:[#allocation91_spill] sm:$0xff] }
 0x186   : > { %3371 = vrot.lane.b32.xlu1 %v7385_v56, %s5781_s22  ;;  %v2003_v2 = vsel %vm1033_vm1, %v9332_v21, %v9331_v24  ;;  %v2055_v22 = vsel %vm1066_vm2, %v2005_v50, %v9333_v14  ;;  %v2818_v17 = vrot.slane %v2816_v15, 1  ;;  %v2244_v5 = vrot.slane %v2242_v63, 1  ;;  %v9341_v63 = vld [vmem:[#allocation97_spill] sm:$0xff]  ;;  %v7580_v44 = vld [vmem:[%s5825_s20 + $0x68] ss:$0 sps:$4 sm:$0x11]  }
 0x187   : > { %v2240_v25 = vrot.slane %v2238_v33, 1  ;;  %v1935_v38 = vpop.permute.xlu0 %1934  ;;  %v2235_v37 = vsel %vm424_vm0, %v2231_v7, %v2234_v3  ;;  %v2252_v27 = vshll.u32 %v2113_v46, 16  ;;  %v9335_v28 = vshrl.u32 %v9334_v26, 16  ;;  %v5755_v7 = vld [vmem:[%s5825_s20 + $0xbc] ss:$0 sps:$4 sm:$0x11]  }
 0x188   : > { %v2111_v20 = vsel %vm1099_vm3, %v2050_v10, %v1935_v38  ;;  %5411 = vmatprep.mubr.msk.bf16.mxu1 %vm1148_vm4, %v2235_v37  ;;  %v1941_v35 = vpop.permute.xlu1 %1940  ;;  %v2009_v62 = vsel %vm1033_vm1, %v5754_v18, %v9336_v59  ;;  %v2807_v29 = vor.u32 %v2806_v36, %v2802_v19  ;;  %v7556_v58 = vcombine.low %v5226_v43, %v7536_v54  ;;  %v9342_v46 = vld [vmem:[#allocation26_spill] sm:$0xff]  ;;  %v5227_v18 = vld [vmem:[%s5825_s20 + $0x6c] sm:$0xe] }
 0x189   : > { %v2241_v52 = vor.u32 %v2240_v25, %v2236_v48  ;;  %v2248_v57 = vshll.u32 %v2111_v20, 16  ;;  %3321 = vrot.lane.b32.xlu0 %v9335_v28, %s5780_s21  ;;  %v2117_v0 = vsel %vm1099_vm3, %v2055_v22, %v1941_v35  ;;  %v2246_v1 = vshrl.u32 %v2111_v20, 16  ;;  %v9343_v25 = vld [vmem:[#allocation70_spill] sm:$0xff]  ;;  %v5132_v35 = vld [vmem:[%s5825_s20 + $0x6c] sm:$0xf] }
 0x18a   : > { %3373 = vrot.lane.b32.xlu1 %v7411_v45, %s5781_s22  ;;  %v2053_v41 = vsel %vm1066_vm2, %v2003_v2, %v9337_v40  ;;  %v2007_v39 = vsel %vm1033_vm1, %v9339_v13, %v9338_v16  ;;  %v2058_v19 = vsel %vm1066_vm2, %v2009_v62, %v9340_v4  ;;  %v2819_v8 = vor.u32 %v2818_v17, %v2814_v11  ;;  %v9344_v45 = vld [vmem:[#allocation33_spill] sm:$0xff]  ;;  %v5130_v14 = vld [vmem:[%s5825_s20 + $0x60] sm:$0xf] }
 0x18b   : > { %v2250_v30 = vrot.slane %v2248_v57, 1  ;;  %v1939_v47 = vpop.permute.xlu0 %1938  ;;  %v2245_v61 = vsel %vm424_vm0, %v2241_v52, %v2244_v5  ;;  %v2254_v34 = vrot.slane %v2252_v27, 1  ;;  %v2262_v15 = vshll.u32 %v2117_v0, 16  ;;  %v9346_v20 = vld [vmem:[#allocation34_spill] sm:$0xff] }
 0x18c   : > { %v2115_v42 = vsel %vm1099_vm3, %v2053_v41, %v1939_v47  ;;  %5412 = vmatmul.mubr.msk.bf16.gmra.mrb[20].mxu1 %vm1148_vm4, %v2245_v61  ;;  %v1945_v31 = vpop.permute.xlu1 %1944  ;;  %v2013_v33 = vsel %vm1033_vm1, %v5755_v7, %v9341_v63  ;;  %v2812_v32 = vsel %vm424_vm0, %v2807_v29, %v7454_v6  ;;  %v3506_v23 = vshll.u32 %v7556_v58, 16  ;;  %v9347_v57 = vld [vmem:[#allocation30_spill] sm:$0xff]  ;;  %v9348_v7 = vld [vmem:[#allocation37_spill] sm:$0xff] }
 0x18d   : > { %v2251_v60 = vor.u32 %v2250_v30, %v2246_v1  ;;  %v2258_v3 = vshll.u32 %v2115_v42, 16  ;;  %3623 = vrot.lane.b32.xlu0 %v7488_v9, %s5782_s27  ;;  %v2121_v12 = vsel %vm1099_vm3, %v2058_v19, %v1945_v31  ;;  %v2256_v50 = vshrl.u32 %v2115_v42, 16  ;;  %v5633_v31 = vld [vmem:[%s5825_s20 + $0x74] ss:$0 sps:$4 sm:$0x11]  }
 0x18e   : > { %3625 = vrot.lane.b32.xlu1 %v3501_v49, %s5782_s27  ;;  %v2056_v36 = vsel %vm1066_vm2, %v2007_v39, %v9342_v46  ;;  %v2011_v49 = vsel %vm1033_vm1, %v9344_v45, %v9343_v25  ;;  %v2061_v6 = vsel %vm1066_vm2, %v2013_v33, %v9345_v51  ;;  %v2824_v37 = vsel %vm424_vm0, %v2819_v8, %v7464_v55  ;;  %v5228_v51 = vld [vmem:[%s5825_s20 + $0x78] sm:$0xe] }
 0x18f   : > { %v2260_v9 = vrot.slane %v2258_v3, 1  ;;  %v1943_v11 = vpop.permute.xlu0 %1942  ;;  %v2255_v48 = vsel %vm424_vm0, %v2251_v60, %v2254_v34  ;;  %v2264_v43 = vrot.slane %v2262_v15, 1  ;;  %v2272_v21 = vshll.u32 %v2121_v12, 16 }
 0x190   : > { %v2119_v10 = vsel %vm1099_vm3, %v2056_v36, %v1943_v11  ;;  %5415 = vmatprep.mubr.msk.bf16.mxu1 %vm1148_vm4, %v2255_v48  ;;  %v1949_v38 = vpop.permute.xlu1 %1948  ;;  %v2833_v17 = vshll.u32 %v7580_v44, 16  ;;  %v3504_v55 = vshrl.u32 %v7556_v58, 16  ;;  %v3508_v5 = vrot.slane %v3506_v23, 1 }
 0x191   : > { %v2261_v24 = vor.u32 %v2260_v9, %v2256_v50  ;;  %v2268_v2 = vshll.u32 %v2119_v10, 16  ;;  %3621 = vrot.lane.b32.xlu0 %v3491_v53, %s5782_s27  ;;  %v2125_v22 = vsel %vm1099_vm3, %v2061_v6, %v1949_v38  ;;  %v2266_v52 = vshrl.u32 %v2119_v10, 16  ;;  %v5133_v53 = vld [vmem:[%s5825_s20 + $0x70] sm:$0xf]  ;;  %v9349_v50 = vld [vmem:[#allocation73_spill] sm:$0xff] }
 0x192   : > { %3323 = vrot.lane.b32.xlu1 %v9346_v20, %s5780_s21  ;;  %v2059_v26 = vsel %vm1066_vm2, %v2011_v49, %v9347_v57  ;;  %v5172_v0 = vcombine.low %v5130_v14, %v7536_v54  ;;  %v2274_v29 = vrot.slane %v2272_v21, 1  ;;  %v2282_v1 = vshll.u32 %v2125_v22, 16  ;;  %v5135_v49 = vld [vmem:[%s5825_s20 + $0x7c] sm:$0xf]  ;;  %v9351_v6 = vld [vmem:[#allocation68_spill] sm:$0xff] }
 0x193   : > { %v2270_v27 = vrot.slane %v2268_v2, 1  ;;  %v1947_v28 = vpop.permute.xlu0 %1946  ;;  %v2265_v56 = vsel %vm424_vm0, %v2261_v24, %v2264_v43  ;;  %v5173_v40 = vcombine.low %v5132_v35, %v5133_v53  ;;  %v5243_v41 = vcombine.low %v5227_v18, %v5133_v53  ;;  %v5136_v18 = vld [vmem:[%s5825_s20 + $0x84] sm:$0xf] }
 0x194   : > { %v2123_v59 = vsel %vm1099_vm3, %v2059_v26, %v1947_v28  ;;  %5416 = vmatmul.mubr.msk.bf16.gmra.mrb[24].mxu1 %vm1148_vm4, %v2265_v56  ;;  %v7612_v62 = vpop.permute.xlu1 %2563  ;;  %v3509_v47 = vor.u32 %v3508_v5, %v3504_v55  ;;  %v2835_v4 = vrot.slane %v2833_v17, 1  ;;  %v2284_v19 = vrot.slane %v2282_v1, 1  ;;  %v5134_v28 = vld [vmem:[%s5825_s20 + $0x78] sm:$0xf]  ;;  %v5229_v1 = vld [vmem:[%s5825_s20 + $0x84] sm:$0xe] }
 0x195   : > { %v2271_v58 = vor.u32 %v2270_v27, %v2266_v52  ;;  %v2278_v30 = vshll.u32 %v2123_v59, 16  ;;  %2953 = vrot.lane.b32.xlu0 %v2812_v32, %s5782_s27  ;;  %v2276_v61 = vshrl.u32 %v2123_v59, 16  ;;  %v3516_v8 = vshll.u32 %v5243_v41, 16  ;;  %v7666_v52 = vld [vmem:[%s5825_s20 + $0x80] ss:$0 sps:$4 sm:$0x11]  }
 0x196   : > { %2955 = vrot.lane.b32.xlu1 %v2824_v37, %s5782_s27  ;;  %v3510_v15 = vsel %vm424_vm0, %v3509_v47, %v2835_v4  ;;  %v2845_v63 = vshll.u32 %v5633_v31, 16  ;;  %v3514_v33 = vshrl.u32 %v5243_v41, 16  ;;  %v9350_v9 = vshrl.u32 %v9349_v50, 16  ;;  %v5137_v59 = vld [vmem:[%s5825_s20 + $0x88] sm:$0xf] }
 0x197   : > { %v2280_v16 = vrot.slane %v2278_v30, 1  ;;  %v7617_v13 = vpop.permute.xlu0 %2561  ;;  %v2275_v39 = vsel %vm424_vm0, %v2271_v58, %v2274_v29  ;;  %v3518_v12 = vrot.slane %v3516_v8, 1  ;;  %v2828_v11 = vshll.u32 %v5172_v0, 16 }
 0x198   : > { %5419 = vmatprep.mubr.msk.bf16.mxu1 %vm1148_vm4, %v2275_v39  ;;  %v7621_v54 = vpop.permute.xlu1 %2567  ;;  %v2847_v46 = vrot.slane %v2845_v63, 1  ;;  %v2840_v25 = vshll.u32 %v5173_v40, 16  ;;  %v9352_v10 = vshrl.u32 %v9351_v6, 16  ;;  %v3521_v37 = vshrl.u32 %v5633_v31, 16 }
 0x199   : > { %v2281_v42 = vor.u32 %v2280_v16, %v2276_v61  ;;  %2685 = vrot.lane.b32.xlu0 %v5172_v0, %s5781_s22  ;;  %v3519_v36 = vor.u32 %v3518_v12, %v3514_v33  ;;  %v2826_v43 = vshrl.u32 %v5172_v0, 16  ;;  %v2830_v24 = vrot.slane %v2828_v11, 1 }
 0x19a   : > { %2687 = vrot.lane.b32.xlu1 %v5173_v40, %s5781_s22  ;;  %v2838_v2 = vshrl.u32 %v5173_v40, 16  ;;  %v2842_v14 = vrot.slane %v2840_v25, 1  ;;  %v5244_v22 = vcombine.low %v5228_v51, %v5135_v49  ;;  %v3511_v35 = vshrl.u32 %v7580_v44, 16 }
 0x19b   : > { %v7626_v34 = vpop.permute.xlu0 %2565  ;;  %v2285_v60 = vsel %vm424_vm0, %v2281_v42, %v2284_v19  ;;  %v3520_v38 = vsel %vm424_vm0, %v3519_v36, %v2847_v46  ;;  %v2831_v17 = vor.u32 %v2830_v24, %v2826_v43  ;;  %v2857_v30 = vshll.u32 %v7666_v52, 16  ;;  %v9354_v36 = vld [vmem:[#allocation38_spill] sm:$0xff] }
 0x19c   : > { %5420 = vmatmul.mubr.msk.bf16.gmra.mrb[28].mxu1 %vm1148_vm4, %v2285_v60  ;;  %v7631_v3 = vpop.permute.xlu1 %2571  ;;  %v2843_v5 = vor.u32 %v2842_v14, %v2838_v2  ;;  %v3526_v27 = vshll.u32 %v5244_v22, 16  ;;  %v3524_v40 = vshrl.u32 %v5244_v22, 16  ;;  %v5174_v16 = vcombine.low %v5134_v28, %v5135_v49  ;;  %v9358_v28 = vld [vmem:[#allocation43_spill] sm:$0xff] }
 0x19d   : > { %3327 = vrot.lane.b32.xlu0 %v9348_v7, %s5780_s21  ;;  %v2836_v53 = vsel %vm424_vm0, %v2831_v17, %v2835_v4  ;;  %v7694_v39 = vcombine.low %v5136_v18, %v5137_v59  ;;  %v5245_v4 = vcombine.low %v5229_v1, %v5137_v59  ;;  %v7698_v42 = vrot.slane %v2857_v30, 1  ;;  %v5639_v7 = vld [vmem:[%s5825_s20 + $0x8c] ss:$0 sps:$4 sm:$0x11]   ;;  %v9359_v59 = vld [vmem:[#allocation76_spill] sm:$0xff] }
 0x19e   : > { %3627 = vrot.lane.b32.xlu1 %v3510_v15, %s5782_s27  ;;  %v2848_v58 = vsel %vm424_vm0, %v2843_v5, %v2847_v46  ;;  %v3528_v41 = vrot.slane %v3526_v27, 1  ;;  %v2869_v11 = vshll.u32 %v5639_v7, 16  ;;  %v2852_v43 = vshll.u32 %v5174_v16, 16  ;;  %v5139_v5 = vld [vmem:[%s5825_s20 + $0x94] sm:$0xf] }
 0x19f   : > { %v7636_v32 = vpop.permute.xlu0 %2569  ;;  %v3536_v63 = vshll.u32 %v5245_v4, 16  ;;  %v3534_v25 = vshrl.u32 %v5245_v4, 16  ;;  %v2864_v17 = vshll.u32 %v7694_v39, 16  ;;  %v5230_v27 = vld [vmem:[%s5825_s20 + $0x90] sm:$0xe]  ;;  %v2850_v1 = vshrl.u32 %v5174_v16, 16 }
 0x1a0   : > { %v7638_v23 = vpop.permute.xlu1 %2575  ;;  %v7730_v2 = vrot.slane %v2869_v11, 1  ;;  %v2854_v30 = vrot.slane %v2852_v43, 1  ;;  %v7747_v4 = vcombine.low %v5230_v27, %v5139_v5 }
 0x1a1   : > { %3325 = vrot.lane.b32.xlu0 %v9350_v9, %s5780_s21  ;;  %v3538_v49 = vrot.slane %v3536_v63, 1  ;;  %v2862_v63 = vshrl.u32 %v7694_v39, 16 }
 0x1a2   : > { %3375 = vrot.lane.b32.xlu1 %v7580_v44, %s5781_s22  ;;  %v9353_v44 = vld [vmem:[#allocation35_spill] sm:$0xff]  ;;  %v3546_v43 = vshll.u32 %v7747_v4, 16 }
 0x1a3   : > { %v7645_v48 = vpop.permute.xlu0 %2573  ;;  %v3539_v14 = vor.u32 %v3538_v49, %v3534_v25 }
 0x1a4   : > { %v7647_v45 = vpop.permute.xlu1 %2579 }
 0x1a5   : > { %3329 = vrot.lane.b32.xlu0 %v9352_v10, %s5780_s21 }
 0x1a6   : > { %3377 = vrot.lane.b32.xlu1 %v5633_v31, %s5781_s22  ;;  %v3529_v31 = vor.u32 %v3528_v41, %v3524_v40  ;;  %v3540_v40 = vsel %vm424_vm0, %v3539_v14, %v7730_v2  ;;  %v3541_v41 = vshrl.u32 %v5639_v7, 16 }
 0x1a7   : > { %v7656_v21 = vpop.permute.xlu0 %2577 }
 0x1a8   : > { %v7658_v20 = vpop.permute.xlu1 %2583  ;;  %v3530_v50 = vsel %vm424_vm0, %v3529_v31, %v7698_v42 }
 0x1a9   : > { %3631 = vrot.lane.b32.xlu0 %v3520_v38, %s5782_s27  ;;  %v9355_v38 = vld [vmem:[#allocation78_spill] sm:$0xff] }
 0x1aa   : > { %3633 = vrot.lane.b32.xlu1 %v3521_v37, %s5782_s27  ;;  %v9356_v37 = vshrl.u32 %v9355_v38, 16  ;;  %v2855_v38 = vor.u32 %v2854_v30, %v2850_v1 }
 0x1ab   : > { %v7663_v55 = vpop.permute.xlu0 %2581 }
 0x1ac   : > { %v7668_v57 = vpop.permute.xlu1 %2587 }
 0x1ad   : > { %v7670_v26 = vpop.f32.mrb[0].mxu0  ;;  %3629 = vrot.lane.b32.xlu0 %v3511_v35, %s5782_s27 }
 0x1ae   : > { %v7674_v56 = vpop.f32.mrb[1].mxu0  ;;  %3331 = vrot.lane.b32.xlu1 %v9353_v44, %s5780_s21 }
 0x1af   : > { %v7681_v0 = vpop.f32.mrb[2].mxu0  ;;  %v7683_v29 = vpop.permute.xlu0 %2585 }
 0x1b0   : > { %v7688_v47 = vpop.f32.mrb[3].mxu0  ;;  %v7690_v61 = vpop.permute.xlu1 %2591 }
 0x1b1   : > { %2957 = vrot.lane.b32.xlu0 %v2836_v53, %s5782_s27 }
 0x1b2   : > { %2959 = vrot.lane.b32.xlu1 %v2848_v58, %s5782_s27  ;;  %v9360_v58 = vshrl.u32 %v9359_v59, 16 }
 0x1b3   : > { %v7696_v19 = vpop.permute.xlu0 %2589 }
 0x1b4   : > { %v3300_v8 = vpop.permute.xlu1 %3299 }
 0x1b5   : > { %v7700_v60 = vpop.f32.mrb[4].mxu0  ;;  %2689 = vrot.lane.b32.xlu0 %v5174_v16, %s5781_s22  ;;  %v3668_v44 = vsel %vm1033_vm1, %v9358_v28, %v3300_v8 }
 0x1b6   : > { %v7703_v15 = vpop.f32.mrb[5].mxu0  ;;  %2691 = vrot.lane.b32.xlu1 %v7694_v39, %s5781_s22  ;;  %v7763_v39 = vld [vmem:[%s5825_s20 + $0x98] ss:$0 sps:$4 sm:$0x11]  }
 0x1b7   : > { %v7708_v33 = vpop.f32.mrb[6].mxu0  ;;  %v7710_v12 = vpop.permute.xlu0 %2673 }
 0x1b8   : > { %v7714_v9 = vpop.f32.mrb[7].mxu0  ;;  %v7716_v46 = vpop.permute.xlu1 %2675  ;;  %v3731_v31 = vsel %vm1066_vm2, %v3668_v44, %v7710_v12 }
 0x1b9   : > { %3335 = vrot.lane.b32.xlu0 %v9354_v36, %s5780_s21  ;;  %v9361_v36 = vld [vmem:[#allocation40_spill] sm:$0xff] }
 0x1ba   : > { %3635 = vrot.lane.b32.xlu1 %v3530_v50, %s5782_s27  ;;  %v2866_v50 = vrot.slane %v2864_v17, 1 }
 0x1bb   : > { %v3304_v51 = vpop.permute.xlu0 %3303 }
 0x1bc   : > { %v3604_v6 = vpop.permute.xlu1 %3603  ;;  %v3672_v16 = vsel %vm1033_vm1, %v9361_v36, %v3304_v51  ;;  %v2867_v44 = vor.u32 %v2866_v50, %v2862_v63  ;;  %v3544_v63 = vshrl.u32 %v7747_v4, 16  ;;  %v5757_v50 = vld [vmem:[%s5825_s20 + $0x14] ss:$0 sps:$4 sm:$0x11]  }
 0x1bd   : > { %v7721_v10 = vpop.f32.mrb[8].mxu0  ;;  %3333 = vrot.lane.b32.xlu0 %v9356_v37, %s5780_s21  ;;  %v3780_v11 = vsel %vm1099_vm3, %v3731_v31, %v3604_v6  ;;  %v5756_v6 = vld [vmem:[%s5825_s20 + $0x20] ss:$0 sps:$4 sm:$0x11]  }
 0x1be   : > { %v7726_v24 = vpop.f32.mrb[9].mxu0  ;;  %3379 = vrot.lane.b32.xlu1 %v7666_v52, %s5781_s22  ;;  %v3845_v51 = vshll.u32 %v3780_v11, 16 }
 0x1bf   : > { %v7732_v22 = vpop.f32.mrb[10].mxu0  ;;  %v3302_v35 = vpop.permute.xlu0 %3301 }
 0x1c0   : > { %9357 = vst [vmem:[#allocation93_spill] sm:$0xff] %v7732_v22  ;;  %v7739_v53 = vpop.f32.mrb[11].mxu0  ;;  %v3364_v18 = vpop.permute.xlu1 %3363 }
 0x1c1   : > { %3337 = vrot.lane.b32.xlu0 %v9360_v58, %s5780_s21 }
 0x1c2   : > { %3381 = vrot.lane.b32.xlu1 %v5639_v7, %s5781_s22  ;;  %v3531_v7 = vshrl.u32 %v7666_v52, 16  ;;  %v3734_v52 = vsel %vm1066_vm2, %v3672_v16, %v7716_v46  ;;  %v5140_v16 = vld [vmem:[%s5825_s20 + $0x9c] sm:$0xf] }
 0x1c3   : > { %v3306_v8 = vpop.permute.xlu0 %3305 }
 0x1c4   : > { %v3366_v25 = vpop.permute.xlu1 %3365  ;;  %v3674_v14 = vsel %vm1033_vm1, %v5756_v6, %v3306_v8  ;;  %v2860_v8 = vsel %vm424_vm0, %v2855_v38, %v7698_v42  ;;  %v5141_v6 = vld [vmem:[%s5825_s20 + $0xa0] sm:$0xf]  ;;  %v2872_v38 = vsel %vm424_vm0, %v2867_v44, %v7730_v2  ;;  %v2978_v2 = vsel %vm1033_vm1, %v9358_v28, %v7617_v13 }
 0x1c5   : > { %v7755_v49 = vpop.f32.mrb[12].mxu0  ;;  %3639 = vrot.lane.b32.xlu0 %v3540_v40, %s5782_s27  ;;  %v3736_v59 = vsel %vm1066_vm2, %v3674_v14, %v3366_v25  ;;  %v5138_v40 = vld [vmem:[%s5825_s20 + $0x90] sm:$0xf]  ;;  %v3670_v25 = vsel %vm1033_vm1, %v5757_v50, %v3302_v35 }
 0x1c6   : > { %9362 = vst [vmem:[#allocation94_spill] sm:$0xff] %v7755_v49  ;;  %v7759_v37 = vpop.f32.mrb[13].mxu0  ;;  %3641 = vrot.lane.b32.xlu1 %v3541_v41, %s5782_s27  ;;  %v3847_v49 = vrot.slane %v3845_v51, 1  ;;  %v7796_v50 = vcombine.low %v5138_v40, %v5139_v5  ;;  %v3010_v40 = vsel %vm1066_vm2, %v2978_v2, %v7710_v12  ;;  %v9373_v2 = vld [vmem:[#allocation81_spill] sm:$0xff] }
 0x1c7   : > { %9363 = vst [vmem:[#allocation95_spill] sm:$0xff] %v7759_v37  ;;  %v7768_v17 = vpop.f32.mrb[14].mxu0  ;;  %v3608_v27 = vpop.permute.xlu0 %3607 }
 0x1c8   : > { %9364 = vst [vmem:[#allocation96_spill] sm:$0xff] %v7768_v17  ;;  %v3784_v58 = vsel %vm1099_vm3, %v3734_v52, %v3608_v27  ;;  %v7774_v1 = vpop.f32.mrb[15].mxu0  ;;  %v3610_v30 = vpop.permute.xlu1 %3609  ;;  %v9366_v52 = vld [vmem:[#allocation57_spill] sm:$0xff]  ;;  %v2881_v17 = vshll.u32 %v7763_v39, 16 }
 0x1c9   : > { %9365 = vst [vmem:[#allocation98_spill] sm:$0xff] %v7774_v1  ;;  %v3855_v41 = vshll.u32 %v3784_v58, 16  ;;  %3637 = vrot.lane.b32.xlu0 %v3531_v7, %s5782_s27  ;;  %v3786_v31 = vsel %vm1099_vm3, %v3736_v59, %v3610_v30  ;;  %v5231_v27 = vld [vmem:[%s5825_s20 + $0x9c] sm:$0xe]  ;;  %v3548_v7 = vrot.slane %v3546_v43, 1  ;;  %v3733_v59 = vsel %vm1066_vm2, %v3670_v25, %v3364_v18 }
 0x1ca   : > { %v3859_v14 = vshll.u32 %v3786_v31, 16  ;;  %3339 = vrot.lane.b32.xlu1 %v9366_v52, %s5780_s21  ;;  %v3853_v4 = vshrl.u32 %v3784_v58, 16  ;;  %v3843_v52 = vshrl.u32 %v3780_v11, 16  ;;  %v7801_v18 = vcombine.low %v5140_v16, %v5141_v6 }
 0x1cb   : > { %v3857_v30 = vrot.slane %v3855_v41, 1  ;;  %v3606_v42 = vpop.permute.xlu0 %3605  ;;  %v5247_v43 = vcombine.low %v5231_v27, %v5141_v6  ;;  %v7809_v5 = vrot.slane %v2881_v17, 1  ;;  %v3549_v11 = vor.u32 %v3548_v7, %v3544_v63  ;;  %v9369_v27 = vld [vmem:[#allocation60_spill] sm:$0xff] }
 0x1cc   : > { %v3861_v1 = vrot.slane %v3859_v14, 1  ;;  %v3782_v35 = vsel %vm1099_vm3, %v3733_v59, %v3606_v42  ;;  %v7794_v31 = vpop.permute.xlu1 %3307  ;;  %v2980_v58 = vsel %vm1033_vm1, %v9361_v36, %v7612_v62  ;;  %v3848_v41 = vor.u32 %v3847_v49, %v3843_v52 }
 0x1cd   : > { %v3849_v37 = vshll.u32 %v3782_v35, 16  ;;  %v7798_v22 = vpop.f32.mrb[16].mxu0  ;;  %2961 = vrot.lane.b32.xlu0 %v2860_v8, %s5782_s27  ;;  %v3858_v51 = vor.u32 %v3857_v30, %v3853_v4  ;;  %v3012_v28 = vsel %vm1066_vm2, %v2980_v58, %v7716_v46  ;;  %v5649_v46 = vld [vmem:[%s5825_s20 + $0xa4] ss:$0 sps:$4 sm:$0x11]   ;;  %v3556_v36 = vshll.u32 %v5247_v43, 16 }
 0x1ce   : > { %v7806_v44 = vpop.f32.mrb[17].mxu0  ;;  %2963 = vrot.lane.b32.xlu1 %v2872_v38, %s5782_s27  ;;  %v2893_v59 = vshll.u32 %v5649_v46, 16  ;;  %v3554_v30 = vshrl.u32 %v5247_v43, 16 }
 0x1cf   : > { %v3851_v8 = vrot.slane %v3849_v37, 1  ;;  %v7816_v16 = vpop.f32.mrb[18].mxu0  ;;  %v2946_v13 = vpop.permute.xlu0 %2945  ;;  %v3862_v17 = vsel %vm424_vm0, %v3858_v51, %v3861_v1  ;;  %v3550_v37 = vsel %vm424_vm0, %v3549_v11, %v7809_v5  ;;  %v3558_v42 = vrot.slane %v3556_v36, 1  ;;  %v9378_v36 = vld [vmem:[#allocation47_spill] sm:$0xff] }
 0x1d0   : > { %9367 = vst [vmem:[#allocation100_spill] sm:$0xff] %v7816_v16  ;;  %v3042_v6 = vsel %vm1099_vm3, %v3010_v40, %v2946_v13  ;;  %v7822_v63 = vpop.f32.mrb[19].mxu0  ;;  %v2948_v25 = vpop.permute.xlu1 %2947  ;;  %v9374_v51 = vshrl.u32 %v9373_v2, 16  ;;  %v2876_v11 = vshll.u32 %v7796_v50, 16  ;;  %v7858_v58 = vrot.slane %v2893_v59, 1 }
 0x1d1   : > { %2693 = vrot.lane.b32.xlu0 %v7796_v50, %s5781_s22  ;;  %5427 = vmatprep.mubr.msk.bf16.mxu0 %vm1148_vm4, %v3042_v6  ;;  %v3852_v62 = vsel %vm424_vm0, %v3848_v41, %v3851_v8  ;;  %v3044_v12 = vsel %vm1099_vm3, %v3012_v28, %v2948_v25  ;;  %v3559_v40 = vor.u32 %v3558_v42, %v3554_v30  ;;  %v2888_v41 = vshll.u32 %v7801_v18, 16  ;;  %v7862_v8 = vld [vmem:[%s5825_s20 + $0xac] sm:$0xf]  ;;  %v5232_v13 = vld [vmem:[%s5825_s20 + $0xa8] sm:$0xe] }
 0x1d2   : > { %5463 = vmatprep.mubr.msk.bf16.mxu1 %vm1148_vm4, %v3852_v62  ;;  %2695 = vrot.lane.b32.xlu1 %v7801_v18, %s5781_s22  ;;  %v9376_v6 = vld [vmem:[#allocation55_spill] sm:$0xff]  ;;  %v2874_v62 = vshrl.u32 %v7796_v50, 16  ;;  %v3561_v30 = vshrl.u32 %v5649_v46, 16  ;;  %v7880_v42 = vcombine.low %v5232_v13, %v7862_v8  ;;  %v3551_v13 = vshrl.u32 %v7763_v39, 16 }
 0x1d3   : > { %5464 = vmatmul.mubr.msk.bf16.vlgmr.msra.gmra.mrb[32].mxu1 %vm1148_vm4, %v3862_v17  ;;  %v7834_v49 = vpop.permute.xlu0 %2677  ;;  %5428 = vmatmul.mubr.msk.bf16.vlgmr.msra.gmra.mrb[32].mxu0 %vm1148_vm4, %v3044_v12  ;;  %v9377_v25 = vshrl.u32 %v9376_v6, 16  ;;  %v2878_v12 = vrot.slane %v2876_v11, 1  ;;  %v3560_v59 = vsel %vm424_vm0, %v3559_v40, %v7858_v58  ;;  %v2890_v11 = vrot.slane %v2888_v41, 1  ;;  %v9381_v6 = vld [vmem:[#allocation44_spill] sm:$0xff] }
 0x1d4   : > { %v7839_v1 = vpop.permute.xlu1 %2679 }
 0x1d5   : > { %v7841_v14 = vpop.f32.mrb[20].mxu0  ;;  %3343 = vrot.lane.b32.xlu0 %v9369_v27, %s5780_s21 }
 0x1d6   : > { %9368 = vst [vmem:[#allocation101_spill] sm:$0xff] %v7841_v14  ;;  %v7845_v7 = vpop.f32.mrb[21].mxu0  ;;  %3643 = vrot.lane.b32.xlu1 %v3550_v37, %s5782_s27  ;;  %v3676_v37 = vsel %vm1033_vm1, %v9378_v36, %v7794_v31  ;;  %v2886_v31 = vshrl.u32 %v7801_v18, 16  ;;  %v3566_v18 = vshll.u32 %v7880_v42, 16 }
 0x1d7   : > { %9370 = vst [vmem:[#allocation3_spill] sm:$0xff] %v7845_v7  ;;  %v7848_v38 = vpop.f32.mrb[22].mxu0  ;;  %v3312_v4 = vpop.permute.xlu0 %3311  ;;  %v3737_v50 = vsel %vm1066_vm2, %v3676_v37, %v7834_v49  ;;  %v2879_v37 = vor.u32 %v2878_v12, %v2874_v62 }
 0x1d8   : > { %9371 = vst [vmem:[#allocation14_spill] sm:$0xff] %v7848_v38  ;;  %v7850_v35 = vpop.f32.mrb[23].mxu0  ;;  %v3612_v52 = vpop.permute.xlu1 %3611 }
 0x1d9   : > { %9372 = vst [vmem:[#allocation5_spill] sm:$0xff] %v7850_v35  ;;  %3341 = vrot.lane.b32.xlu0 %v9374_v51, %s5780_s21  ;;  %v3788_v40 = vsel %vm1099_vm3, %v3737_v50, %v3612_v52  ;;  %v3568_v35 = vrot.slane %v3566_v18, 1 }
 0x1da   : > { %3383 = vrot.lane.b32.xlu1 %v7763_v39, %s5781_s22  ;;  %v3865_v41 = vshll.u32 %v3788_v40, 16  ;;  %v3863_v18 = vshrl.u32 %v3788_v40, 16 }
 0x1db   : > { %v3310_v43 = vpop.permute.xlu0 %3309 }
 0x1dc   : > { %v3368_v28 = vpop.permute.xlu1 %3367 }
 0x1dd   : > { %v7865_v17 = vpop.f32.mrb[24].mxu0  ;;  %3345 = vrot.lane.b32.xlu0 %v9377_v25, %s5780_s21  ;;  %v3680_v25 = vsel %vm1033_vm1, %v9381_v6, %v3312_v4  ;;  %v5758_v4 = vld [vmem:[%s5825_s20 + $0x38] ss:$0 sps:$4 sm:$0x11]  }
 0x1de   : > { %9375 = vst [vmem:[#allocation9_spill] sm:$0xff] %v7865_v17  ;;  %v7874_v27 = vpop.f32.mrb[25].mxu0  ;;  %3385 = vrot.lane.b32.xlu1 %v5649_v46, %s5781_s22  ;;  %v3740_v50 = vsel %vm1066_vm2, %v3680_v25, %v7839_v1  ;;  %v2884_v25 = vsel %vm424_vm0, %v2879_v37, %v7809_v5 }
 0x1df   : > { %9379 = vst [vmem:[#allocation22_spill] sm:$0xff] %v7874_v27  ;;  %v7884_v2 = vpop.f32.mrb[26].mxu0  ;;  %v3314_v51 = vpop.permute.xlu0 %3313  ;;  %v5144_v27 = vld [vmem:[%s5825_s20 + $0xb4] sm:$0xf] }
 0x1e0   : > { %9380 = vst [vmem:[#allocation4_spill] sm:$0xff] %v7884_v2  ;;  %v7890_v17 = vpop.f32.mrb[27].mxu0  ;;  %v3370_v46 = vpop.permute.xlu1 %3369  ;;  %v7896_v2 = vld [vmem:[%s5825_s20 + $0xb0] ss:$0 sps:$4 sm:$0x11]   ;;  %v3682_v52 = vsel %vm1033_vm1, %v5758_v4, %v3314_v51 }
 0x1e1   : > { %9382 = vst [vmem:[#allocation7_spill] sm:$0xff] %v7890_v17  ;;  %3647 = vrot.lane.b32.xlu0 %v3560_v59, %s5782_s27  ;;  %v2891_v17 = vor.u32 %v2890_v11, %v2886_v31  ;;  %v3742_v39 = vsel %vm1066_vm2, %v3682_v52, %v3370_v46  ;;  %v5145_v4 = vld [vmem:[%s5825_s20 + $0xb8] sm:$0xf]  ;;  %v3564_v31 = vshrl.u32 %v7880_v42, 16 }
 0x1e2   : > { %3649 = vrot.lane.b32.xlu1 %v3561_v30, %s5782_s27  ;;  %v5142_v30 = vld [vmem:[%s5825_s20 + $0xa8] sm:$0xf]  ;;  %v5759_v11 = vld [vmem:[%s5825_s20 + $0x2c] ss:$0 sps:$4 sm:$0x11]  }
 0x1e3   : > { %v3616_v59 = vpop.permute.xlu0 %3615  ;;  %v3678_v46 = vsel %vm1033_vm1, %v5759_v11, %v3310_v43  ;;  %v2896_v43 = vsel %vm424_vm0, %v2891_v17, %v7858_v58  ;;  %v7932_v16 = vcombine.low %v5142_v30, %v7862_v8  ;;  %v2982_v58 = vsel %vm1033_vm1, %v9378_v36, %v7626_v34 }
 0x1e4   : > { %v3792_v62 = vsel %vm1099_vm3, %v3740_v50, %v3616_v59  ;;  %v3618_v12 = vpop.permute.xlu1 %3617  ;;  %v9385_v59 = vld [vmem:[#allocation39_spill] sm:$0xff]  ;;  %v2984_v8 = vsel %vm1033_vm1, %v9381_v6, %v7621_v54 }
 0x1e5   : > { %v3875_v38 = vshll.u32 %v3792_v62, 16  ;;  %v7907_v14 = vpop.f32.mrb[28].mxu0  ;;  %3645 = vrot.lane.b32.xlu0 %v3551_v13, %s5782_s27  ;;  %v3794_v51 = vsel %vm1099_vm3, %v3742_v39, %v3618_v12  ;;  %v2905_v13 = vshll.u32 %v7896_v2, 16  ;;  %v3867_v39 = vrot.slane %v3865_v41, 1 }
 0x1e6   : > { %9383 = vst [vmem:[#allocation11_spill] sm:$0xff] %v7907_v14  ;;  %v7917_v52 = vpop.f32.mrb[29].mxu0  ;;  %v3879_v50 = vshll.u32 %v3794_v51, 16  ;;  %3347 = vrot.lane.b32.xlu1 %v9385_v59, %s5780_s21  ;;  %v5233_v14 = vld [vmem:[%s5825_s20 + $0xb4] sm:$0xe]  ;;  %v3739_v12 = vsel %vm1066_vm2, %v3678_v46, %v3368_v28  ;;  %v3873_v11 = vshrl.u32 %v3792_v62, 16  ;;  %v3569_v46 = vor.u32 %v3568_v35, %v3564_v31 }
 0x1e7   : > { %9384 = vst [vmem:[#allocation63_spill] sm:$0xff] %v7917_v52  ;;  %v3877_v5 = vrot.slane %v3875_v38, 1  ;;  %v7924_v37 = vpop.f32.mrb[30].mxu0  ;;  %v3614_v42 = vpop.permute.xlu0 %3613  ;;  %v7935_v38 = vcombine.low %v5144_v27, %v5145_v4  ;;  %v5249_v28 = vcombine.low %v5233_v14, %v5145_v4  ;;  %v7941_v62 = vrot.slane %v2905_v13, 1 }
 0x1e8   : > { %9386 = vst [vmem:[#allocation15_spill] sm:$0xff] %v7924_v37  ;;  %v3881_v52 = vrot.slane %v3879_v50, 1  ;;  %v3790_v51 = vsel %vm1099_vm3, %v3739_v12, %v3614_v42  ;;  %v7929_v7 = vpop.f32.mrb[31].mxu0  ;;  %v3316_v59 = vpop.permute.xlu1 %3315  ;;  %v3014_v27 = vsel %vm1066_vm2, %v2982_v58, %v7834_v49  ;;  %v3868_v40 = vor.u32 %v3867_v39, %v3863_v18  ;;  %v9387_v50 = vld [vmem:[#allocation87_spill] sm:$0xff] }
 0x1e9   : > { %v3869_v41 = vshll.u32 %v3790_v51, 16  ;;  %2965 = vrot.lane.b32.xlu0 %v2884_v25, %s5782_s27  ;;  %v3878_v17 = vor.u32 %v3877_v5, %v3873_v11  ;;  %v3016_v34 = vsel %vm1066_vm2, %v2984_v8, %v7839_v1  ;;  %v5655_v1 = vld [vmem:[%s5825_s20 + $0xbc] ss:$0 sps:$4 sm:$0x11]   ;;  %v3576_v35 = vshll.u32 %v5249_v28, 16 }
 0x1ea   : > { %2967 = vrot.lane.b32.xlu1 %v2896_v43, %s5782_s27  ;;  %v3570_v31 = vsel %vm424_vm0, %v3569_v46, %v7941_v62  ;;  %v2917_v13 = vshll.u32 %v5655_v1, 16  ;;  %v3574_v39 = vshrl.u32 %v5249_v28, 16  ;;  %v9388_v43 = vld [vmem:[#allocation90_spill] sm:$0xff]  ;;  %v2900_v51 = vshll.u32 %v7932_v16, 16 }
 0x1eb   : > { %v3871_v14 = vrot.slane %v3869_v41, 1  ;;  %v2950_v30 = vpop.permute.xlu0 %2949  ;;  %v3882_v4 = vsel %vm424_vm0, %v3878_v17, %v3881_v52  ;;  %v3578_v12 = vrot.slane %v3576_v35, 1  ;;  %v9389_v11 = vshrl.u32 %v9388_v43, 16  ;;  %v5147_v46 = vld [vmem:[%s5825_s20 + $0xc4] sm:$0xf] }
 0x1ec   : > { %v3046_v36 = vsel %vm1099_vm3, %v3014_v27, %v2950_v30  ;;  %v2952_v25 = vpop.permute.xlu1 %2951  ;;  %v2919_v18 = vrot.slane %v2917_v13, 1  ;;  %v2912_v17 = vshll.u32 %v7935_v38, 16  ;;  %v5234_v8 = vld [vmem:[%s5825_s20 + $0xc0] sm:$0xe]  ;;  %v9390_v27 = vld [vmem:[#allocation41_spill] sm:$0xff]  ;;  %v2902_v30 = vrot.slane %v2900_v51, 1 }
 0x1ed   : > { %2697 = vrot.lane.b32.xlu0 %v7932_v16, %s5781_s22  ;;  %5431 = vmatprep.mubr.msk.bf16.mxu0 %vm1148_vm4, %v3046_v36  ;;  %v3872_v54 = vsel %vm424_vm0, %v3868_v40, %v3871_v14  ;;  %v3048_v49 = vsel %vm1099_vm3, %v3016_v34, %v2952_v25  ;;  %v3579_v41 = vor.u32 %v3578_v12, %v3574_v39  ;;  %v9391_v40 = vshrl.u32 %v9390_v27, 16  ;;  %v9392_v34 = vld [vmem:[#allocation50_spill] sm:$0xff]  ;;  %v7999_v43 = vld [vmem:[%s5825_s20 + $0xc8] ss:$0 sps:$4 sm:$0x11]  }
 0x1ee   : > { %5467 = vmatprep.mubr.msk.bf16.mxu1 %vm1148_vm4, %v3872_v54  ;;  %2699 = vrot.lane.b32.xlu1 %v7935_v38, %s5781_s22  ;;  %v2898_v14 = vshrl.u32 %v7932_v16, 16  ;;  %v3684_v36 = vsel %vm1033_vm1, %v9392_v34, %v3316_v59  ;;  %v5250_v54 = vcombine.low %v5234_v8, %v5147_v46  ;;  %v9393_v16 = vld [vmem:[#allocation48_spill] sm:$0xff] }
 0x1ef   : > { %5468 = vmatmul.mubr.msk.bf16.gmra.mrb[36].mxu1 %vm1148_vm4, %v3882_v4  ;;  %v7962_v6 = vpop.permute.xlu0 %2681  ;;  %5432 = vmatmul.mubr.msk.bf16.gmra.mrb[36].mxu0 %vm1148_vm4, %v3048_v49  ;;  %v3580_v25 = vsel %vm424_vm0, %v3579_v41, %v2919_v18  ;;  %v3581_v4 = vshrl.u32 %v5655_v1, 16  ;;  %v5760_v51 = vld [vmem:[%s5825_s20 + $0x50] ss:$0 sps:$4 sm:$0x11]  }
 0x1f0   : > { %v7967_v52 = vpop.permute.xlu1 %2683  ;;  %v3743_v49 = vsel %vm1066_vm2, %v3684_v36, %v7962_v6  ;;  %v2903_v12 = vor.u32 %v2902_v30, %v2898_v14 }
 0x1f1   : > { %3351 = vrot.lane.b32.xlu0 %v9387_v50, %s5780_s21  ;;  %v2914_v50 = vrot.slane %v2912_v17, 1 }
 0x1f2   : > { %3651 = vrot.lane.b32.xlu1 %v3570_v31, %s5782_s27  ;;  %v2910_v31 = vshrl.u32 %v7935_v38, 16  ;;  %v2908_v36 = vsel %vm424_vm0, %v2903_v12, %v7941_v62 }
 0x1f3   : > { %v3320_v5 = vpop.permute.xlu0 %3319 }
 0x1f4   : > { %v3620_v42 = vpop.permute.xlu1 %3619  ;;  %v3688_v13 = vsel %vm1033_vm1, %v9393_v16, %v3320_v5  ;;  %v2915_v17 = vor.u32 %v2914_v50, %v2910_v31 }
 0x1f5   : > { %3349 = vrot.lane.b32.xlu0 %v9389_v11, %s5780_s21  ;;  %v3796_v59 = vsel %vm1099_vm3, %v3743_v49, %v3620_v42  ;;  %v3586_v11 = vshll.u32 %v5250_v54, 16  ;;  %v3746_v42 = vsel %vm1066_vm2, %v3688_v13, %v7967_v52  ;;  %v3584_v49 = vshrl.u32 %v5250_v54, 16  ;;  %v9394_v13 = vld [vmem:[#allocation49_spill] sm:$0xff] }
 0x1f6   : > { %3387 = vrot.lane.b32.xlu1 %v7896_v2, %s5781_s22  ;;  %v3885_v38 = vshll.u32 %v3796_v59, 16  ;;  %v2920_v62 = vsel %vm424_vm0, %v2915_v17, %v2919_v18 }
 0x1f7   : > { %v3318_v58 = vpop.permute.xlu0 %3317 }
 0x1f8   : > { %v3372_v28 = vpop.permute.xlu1 %3371 }
 0x1f9   : > { %3353 = vrot.lane.b32.xlu0 %v9391_v40, %s5780_s21  ;;  %v5146_v40 = vld [vmem:[%s5825_s20 + $0xc0] sm:$0xf] }
 0x1fa   : > { %3389 = vrot.lane.b32.xlu1 %v5655_v1, %s5781_s22  ;;  %v3571_v1 = vshrl.u32 %v7896_v2, 16 }
 0x1fb   : > { %v3322_v35 = vpop.permute.xlu0 %3321 }
 0x1fc   : > { %v3374_v39 = vpop.permute.xlu1 %3373  ;;  %v3690_v5 = vsel %vm1033_vm1, %v5760_v51, %v3322_v35  ;;  %v5761_v35 = vld [vmem:[%s5825_s20 + $0x44] ss:$0 sps:$4 sm:$0x11]   ;;  %v2929_v51 = vshll.u32 %v7999_v43, 16 }
 0x1fd   : > { %3655 = vrot.lane.b32.xlu0 %v3580_v25, %s5782_s27  ;;  %v3748_v2 = vsel %vm1066_vm2, %v3690_v5, %v3374_v39  ;;  %v5148_v25 = vld [vmem:[%s5825_s20 + $0xcc] sm:$0xf]  ;;  %v3686_v31 = vsel %vm1033_vm1, %v5761_v35, %v3318_v58  ;;  %v3588_v5 = vrot.slane %v3586_v11, 1  ;;  %v3883_v35 = vshrl.u32 %v3796_v59, 16 }
 0x1fe   : > { %3657 = vrot.lane.b32.xlu1 %v3581_v4, %s5782_s27  ;;  %v5149_v4 = vld [vmem:[%s5825_s20 + $0xd0] sm:$0xf]  ;;  %v5235_v39 = vld [vmem:[%s5825_s20 + $0xcc] sm:$0xe]  ;;  %v8030_v18 = vrot.slane %v2929_v51, 1 }
 0x1ff   : > { %v3624_v41 = vpop.permute.xlu0 %3623  ;;  %v5181_v37 = vcombine.low %v5148_v25, %v5149_v4  ;;  %v5251_v11 = vcombine.low %v5235_v39, %v5149_v4  ;;  %v3589_v17 = vor.u32 %v3588_v5, %v3584_v49 }
 0x200   : > { %v3800_v8 = vsel %vm1099_vm3, %v3746_v42, %v3624_v41  ;;  %v3626_v27 = vpop.permute.xlu1 %3625  ;;  %v3745_v42 = vsel %vm1066_vm2, %v3686_v31, %v3372_v28  ;;  %v2986_v28 = vsel %vm1033_vm1, %v9392_v34, %v7636_v32 }
 0x201   : > { %v3895_v14 = vshll.u32 %v3800_v8, 16  ;;  %3653 = vrot.lane.b32.xlu0 %v3571_v1, %s5782_s27  ;;  %v3802_v30 = vsel %vm1099_vm3, %v3748_v2, %v3626_v27  ;;  %v3887_v1 = vrot.slane %v3885_v38, 1  ;;  %v3893_v12 = vshrl.u32 %v3800_v8, 16 }
 0x202   : > { %v3899_v50 = vshll.u32 %v3802_v30, 16  ;;  %3355 = vrot.lane.b32.xlu1 %v9394_v13, %s5780_s21  ;;  %v8023_v30 = vcombine.low %v5146_v40, %v5147_v46  ;;  %v2988_v46 = vsel %vm1033_vm1, %v9393_v16, %v7631_v3  ;;  %v3018_v59 = vsel %vm1066_vm2, %v2986_v28, %v7962_v6  ;;  %v5661_v16 = vld [vmem:[%s5825_s20 + $0xd4] ss:$0 sps:$4 sm:$0x11]  }
 0x203   : > { %v3897_v41 = vrot.slane %v3895_v14, 1  ;;  %v3622_v2 = vpop.permute.xlu0 %3621  ;;  %v3888_v8 = vor.u32 %v3887_v1, %v3883_v35  ;;  %v3020_v32 = vsel %vm1066_vm2, %v2988_v46, %v7967_v52  ;;  %v3596_v4 = vshll.u32 %v5251_v11, 16 }
 0x204   : > { %v3901_v54 = vrot.slane %v3899_v50, 1  ;;  %v3798_v27 = vsel %vm1099_vm3, %v3745_v42, %v3622_v2  ;;  %v3324_v58 = vpop.permute.xlu1 %3323  ;;  %v3590_v49 = vsel %vm424_vm0, %v3589_v17, %v8030_v18  ;;  %v9395_v50 = vld [vmem:[#allocation74_spill] sm:$0xff]  ;;  %v2941_v39 = vshll.u32 %v5661_v16, 16  ;;  %v9396_v2 = vld [vmem:[#allocation45_spill] sm:$0xff] }
 0x205   : > { %v3889_v13 = vshll.u32 %v3798_v27, 16  ;;  %2969 = vrot.lane.b32.xlu0 %v2908_v36, %s5782_s27  ;;  %v3898_v38 = vor.u32 %v3897_v41, %v3893_v12  ;;  %v3594_v51 = vshrl.u32 %v5251_v11, 16  ;;  %v3598_v5 = vrot.slane %v3596_v4, 1 }
 0x206   : > { %2971 = vrot.lane.b32.xlu1 %v2920_v62, %s5782_s27  ;;  %v2936_v42 = vshll.u32 %v5181_v37, 16  ;;  %v9397_v62 = vshrl.u32 %v9396_v2, 16  ;;  %v2943_v12 = vrot.slane %v2941_v39, 1  ;;  %v2924_v27 = vshll.u32 %v8023_v30, 16 }
 0x207   : > { %v3891_v40 = vrot.slane %v3889_v13, 1  ;;  %v2954_v14 = vpop.permute.xlu0 %2953  ;;  %v3902_v25 = vsel %vm424_vm0, %v3898_v38, %v3901_v54  ;;  %v3599_v54 = vor.u32 %v3598_v5, %v3594_v51  ;;  %v2934_v13 = vshrl.u32 %v5181_v37, 16  ;;  %v9398_v38 = vld [vmem:[#allocation46_spill] sm:$0xff] }
 0x208   : > { %v3050_v34 = vsel %vm1099_vm3, %v3018_v59, %v2954_v14  ;;  %v2956_v36 = vpop.permute.xlu1 %2955  ;;  %v2938_v11 = vrot.slane %v2936_v42, 1  ;;  %v9399_v17 = vshrl.u32 %v9398_v38, 16  ;;  %v9400_v59 = vld [vmem:[#allocation52_spill] sm:$0xff]  ;;  %v2922_v14 = vshrl.u32 %v8023_v30, 16 }
 0x209   : > { %2701 = vrot.lane.b32.xlu0 %v8023_v30, %s5781_s22  ;;  %5435 = vmatprep.mubr.msk.bf16.mxu0 %vm1148_vm4, %v3050_v34  ;;  %v3892_v3 = vsel %vm424_vm0, %v3888_v8, %v3891_v40  ;;  %v3052_v6 = vsel %vm1099_vm3, %v3020_v32, %v2956_v36  ;;  %v3600_v46 = vsel %vm424_vm0, %v3599_v54, %v2943_v12  ;;  %v3601_v40 = vshrl.u32 %v5661_v16, 16 }
 0x20a   : > { %5471 = vmatprep.mubr.msk.bf16.mxu1 %vm1148_vm4, %v3892_v3  ;;  %2703 = vrot.lane.b32.xlu1 %v5181_v37, %s5781_s22  ;;  %v3692_v8 = vsel %vm1033_vm1, %v9400_v59, %v3324_v58  ;;  %v2926_v32 = vrot.slane %v2924_v27, 1  ;;  %v2939_v36 = vor.u32 %v2938_v11, %v2934_v13  ;;  %v3591_v58 = vshrl.u32 %v7999_v43, 16 }
 0x20b   : > { %5472 = vmatmul.mubr.msk.bf16.gmra.mrb[40].mxu1 %vm1148_vm4, %v3902_v25  ;;  %v8050_v52 = vpop.permute.xlu0 %2685  ;;  %5436 = vmatmul.mubr.msk.bf16.gmra.mrb[40].mxu0 %vm1148_vm4, %v3052_v6  ;;  %v9401_v25 = vld [vmem:[#allocation51_spill] sm:$0xff] }
 0x20c   : > { %v8055_v31 = vpop.permute.xlu1 %2687  ;;  %v3749_v37 = vsel %vm1066_vm2, %v3692_v8, %v8050_v52  ;;  %v2927_v30 = vor.u32 %v2926_v32, %v2922_v14  ;;  %v2944_v5 = vsel %vm424_vm0, %v2939_v36, %v2943_v12 }
 0x20d   : > { %3359 = vrot.lane.b32.xlu0 %v9395_v50, %s5780_s21 }
 0x20e   : > { %3659 = vrot.lane.b32.xlu1 %v3590_v49, %s5782_s27  ;;  %v5762_v49 = vld [vmem:[%s5825_s20 + $0x68] ss:$0 sps:$4 sm:$0x11]   ;;  %v2932_v13 = vsel %vm424_vm0, %v2927_v30, %v8030_v18  ;;  %v2992_v18 = vsel %vm1033_vm1, %v9401_v25, %v7638_v23 }
 0x20f   : > { %v3328_v1 = vpop.permute.xlu0 %3327 }
 0x210   : > { %v3628_v41 = vpop.permute.xlu1 %3627  ;;  %v3696_v3 = vsel %vm1033_vm1, %v9401_v25, %v3328_v1 }
 0x211   : > { %3357 = vrot.lane.b32.xlu0 %v9397_v62, %s5780_s21  ;;  %v3804_v6 = vsel %vm1099_vm3, %v3749_v37, %v3628_v41  ;;  %v3752_v39 = vsel %vm1066_vm2, %v3696_v3, %v8055_v31  ;;  %v5763_v62 = vld [vmem:[%s5825_s20 + $0x5c] ss:$0 sps:$4 sm:$0x11]  }
 0x212   : > { %3391 = vrot.lane.b32.xlu1 %v7999_v43, %s5781_s22  ;;  %v3903_v32 = vshrl.u32 %v3804_v6, 16 }
 0x213   : > { %v3326_v35 = vpop.permute.xlu0 %3325 }
 0x214   : > { %v3376_v28 = vpop.permute.xlu1 %3375  ;;  %v3694_v54 = vsel %vm1033_vm1, %v5763_v62, %v3326_v35  ;;  %v2990_v35 = vsel %vm1033_vm1, %v9400_v59, %v7645_v48 }
 0x215   : > { %3361 = vrot.lane.b32.xlu0 %v9399_v17, %s5780_s21  ;;  %v3751_v11 = vsel %vm1066_vm2, %v3694_v54, %v3376_v28  ;;  %v3022_v28 = vsel %vm1066_vm2, %v2990_v35, %v8050_v52  ;;  %v5764_v54 = vld [vmem:[%s5825_s20 + $0x80] ss:$0 sps:$4 sm:$0x11]  }
 0x216   : > { %3393 = vrot.lane.b32.xlu1 %v5661_v16, %s5781_s22  ;;  %v3905_v16 = vshll.u32 %v3804_v6, 16  ;;  %v3024_v6 = vsel %vm1066_vm2, %v2992_v18, %v8055_v31 }
 0x217   : > { %v3330_v34 = vpop.permute.xlu0 %3329 }
 0x218   : > { %v3378_v4 = vpop.permute.xlu1 %3377  ;;  %v3698_v50 = vsel %vm1033_vm1, %v5762_v49, %v3330_v34  ;;  %v3907_v12 = vrot.slane %v3905_v16, 1 }
 0x219   : > { %3663 = vrot.lane.b32.xlu0 %v3600_v46, %s5782_s27  ;;  %v3754_v1 = vsel %vm1066_vm2, %v3698_v50, %v3378_v4 }
 0x21a   : > { %3665 = vrot.lane.b32.xlu1 %v3601_v40, %s5782_s27  ;;  %v3908_v36 = vor.u32 %v3907_v12, %v3903_v32 }
 0x21b   : > { %v3632_v51 = vpop.permute.xlu0 %3631 }
 0x21c   : > { %v3808_v42 = vsel %vm1099_vm3, %v3752_v39, %v3632_v51  ;;  %v3634_v41 = vpop.permute.xlu1 %3633  ;;  %v9402_v39 = vld [vmem:[#allocation54_spill] sm:$0xff] }
 0x21d   : > { %v3915_v2 = vshll.u32 %v3808_v42, 16  ;;  %3661 = vrot.lane.b32.xlu0 %v3591_v58, %s5782_s27  ;;  %v3810_v43 = vsel %vm1099_vm3, %v3754_v1, %v3634_v41  ;;  %v3913_v46 = vshrl.u32 %v3808_v42, 16  ;;  %v9403_v42 = vld [vmem:[#allocation53_spill] sm:$0xff] }
 0x21e   : > { %v3919_v27 = vshll.u32 %v3810_v43, 16  ;;  %2975 = vrot.lane.b32.xlu1 %v2944_v5, %s5782_s27 }
 0x21f   : > { %v3917_v38 = vrot.slane %v3915_v2, 1  ;;  %v3630_v17 = vpop.permute.xlu0 %3629 }
 0x220   : > { %v3921_v8 = vrot.slane %v3919_v27, 1  ;;  %v3806_v40 = vsel %vm1099_vm3, %v3751_v11, %v3630_v17  ;;  %v3332_v14 = vpop.permute.xlu1 %3331 }
 0x221   : > { %v3909_v37 = vshll.u32 %v3806_v40, 16  ;;  %2973 = vrot.lane.b32.xlu0 %v2932_v13, %s5782_s27  ;;  %v3918_v34 = vor.u32 %v3917_v38, %v3913_v46  ;;  %v3700_v51 = vsel %vm1033_vm1, %v9402_v39, %v3332_v14 }
 0x223   : > { %v3911_v3 = vrot.slane %v3909_v37, 1  ;;  %v2958_v4 = vpop.permute.xlu0 %2957  ;;  %v3922_v16 = vsel %vm424_vm0, %v3918_v34, %v3921_v8  ;;  %v5765_v37 = vld [vmem:[%s5825_s20 + $0x74] ss:$0 sps:$4 sm:$0x11]  }
 0x224   : > { %v3054_v58 = vsel %vm1099_vm3, %v3022_v28, %v2958_v4  ;;  %v2960_v30 = vpop.permute.xlu1 %2959 }
 0x225   : > { %5439 = vmatprep.mubr.msk.bf16.mxu0 %vm1148_vm4, %v3054_v58  ;;  %v3912_v48 = vsel %vm424_vm0, %v3908_v36, %v3911_v3  ;;  %v3056_v23 = vsel %vm1099_vm3, %v3024_v6, %v2960_v30 }
 0x226   : > { %5475 = vmatprep.mubr.msk.bf16.mxu1 %vm1148_vm4, %v3912_v48  ;;  %5440 = vmatmul.mubr.msk.bf16.gmra.mrb[44].mxu0 %vm1148_vm4, %v3056_v23 }
 0x227   : > { %5476 = vmatmul.mubr.msk.bf16.gmra.mrb[44].mxu1 %vm1148_vm4, %v3922_v16  ;;  %v2690_v52 = vpop.permute.xlu0 %2689 }
 0x228   : > { %v2692_v31 = vpop.permute.xlu1 %2691  ;;  %v3755_v5 = vsel %vm1066_vm2, %v3700_v51, %v2690_v52 }
 0x22b   : > { %v3336_v59 = vpop.permute.xlu0 %3335 }
 0x22c   : > { %v3636_v25 = vpop.permute.xlu1 %3635  ;;  %v3704_v41 = vsel %vm1033_vm1, %v9403_v42, %v3336_v59  ;;  %v2994_v59 = vsel %vm1033_vm1, %v9402_v39, %v7656_v21 }
 0x22d   : > { %v3812_v2 = vsel %vm1099_vm3, %v3755_v5, %v3636_v25  ;;  %v3758_v12 = vsel %vm1066_vm2, %v3704_v41, %v2692_v31 }
 0x22e   : > { %v3925_v62 = vshll.u32 %v3812_v2, 16  ;;  %v3923_v48 = vshrl.u32 %v3812_v2, 16 }
 0x22f   : > { %v3334_v49 = vpop.permute.xlu0 %3333 }
 0x230   : > { %v3380_v50 = vpop.permute.xlu1 %3379  ;;  %v3702_v35 = vsel %vm1033_vm1, %v5765_v37, %v3334_v49  ;;  %v3927_v28 = vrot.slane %v3925_v62, 1  ;;  %v2996_v49 = vsel %vm1033_vm1, %v9403_v42, %v7647_v45 }
 0x231   : > { %v3757_v36 = vsel %vm1066_vm2, %v3702_v35, %v3380_v50  ;;  %v3026_v50 = vsel %vm1066_vm2, %v2994_v59, %v2690_v52  ;;  %v3028_v2 = vsel %vm1066_vm2, %v2996_v49, %v2692_v31 }
 0x232   : > { %v3928_v51 = vor.u32 %v3927_v28, %v3923_v48 }
 0x233   : > { %v3338_v1 = vpop.permute.xlu0 %3337 }
 0x234   : > { %v3382_v43 = vpop.permute.xlu1 %3381  ;;  %v3706_v27 = vsel %vm1033_vm1, %v5764_v54, %v3338_v1 }
 0x235   : > { %v3760_v38 = vsel %vm1066_vm2, %v3706_v27, %v3382_v43 }
 0x237   : > { %v5393_v13 = vpop.f32.mrb[0].mxu1  ;;  %v3640_v11 = vpop.permute.xlu0 %3639 }
 0x238   : > { %v3816_v17 = vsel %vm1099_vm3, %v3758_v12, %v3640_v11  ;;  %v2385_v46 = vpop.f32.mrb[1].mxu1  ;;  %v3642_v8 = vpop.permute.xlu1 %3641 }
 0x239   : > { %v3935_v40 = vshll.u32 %v3816_v17, 16  ;;  %v5394_v14 = vpop.f32.mrb[2].mxu1  ;;  %4261 = vrot.lane.b32.xlu0 %v2385_v46, %s5783_s14  ;;  %v3818_v32 = vsel %vm1099_vm3, %v3760_v38, %v3642_v8  ;;  %v3933_v6 = vshrl.u32 %v3816_v17, 16 }
 0x23a   : > { %v2388_v34 = vpop.f32.mrb[3].mxu1  ;;  %v3939_v18 = vshll.u32 %v3818_v32, 16 }
 0x23b   : > { %v3937_v3 = vrot.slane %v3935_v40, 1  ;;  %4263 = vrot.lane.b32.xlu1 %v2388_v34, %s5783_s14  ;;  %v3638_v4 = vpop.permute.xlu0 %3637 }
 0x23c   : > { %v3941_v58 = vrot.slane %v3939_v18, 1  ;;  %v3814_v30 = vsel %vm1099_vm3, %v3757_v36, %v3638_v4  ;;  %v3340_v16 = vpop.permute.xlu1 %3339  ;;  %v9405_v18 = vld [vmem:[#allocation56_spill] sm:$0xff] }
 0x23d   : > { %v3929_v23 = vshll.u32 %v3814_v30, 16  ;;  %4265 = vrot.lane.b32.xlu0 %v5393_v13, %s5783_s14  ;;  %v3938_v25 = vor.u32 %v3937_v3, %v3933_v6 }
 0x23f   : > { %v3931_v5 = vrot.slane %v3929_v23, 1  ;;  %4267 = vrot.lane.b32.xlu1 %v5394_v14, %s5783_s14  ;;  %v5397_v1 = vpop.f32.mrb[4].mxu1  ;;  %v2962_v41 = vpop.permute.xlu0 %2961  ;;  %v3942_v21 = vsel %vm424_vm0, %v3938_v25, %v3941_v58  ;;  %v9404_v14 = vld [vmem:[#allocation58_spill] sm:$0xff] }
 0x240   : > { %v3058_v43 = vsel %vm1099_vm3, %v3026_v50, %v2962_v41  ;;  %v2401_v62 = vpop.f32.mrb[5].mxu1  ;;  %v2964_v54 = vpop.permute.xlu1 %2963  ;;  %v3708_v32 = vsel %vm1033_vm1, %v9404_v14, %v3340_v16  ;;  %v5766_v16 = vld [vmem:[%s5825_s20 + $0x98] ss:$0 sps:$4 sm:$0x11]  }
 0x241   : > { %v5398_v39 = vpop.f32.mrb[6].mxu1  ;;  %4269 = vrot.lane.b32.xlu0 %v2401_v62, %s5783_s14  ;;  %5443 = vmatprep.mubr.msk.bf16.mxu0 %vm1148_vm4, %v3058_v43  ;;  %v3932_v45 = vsel %vm424_vm0, %v3928_v51, %v3931_v5  ;;  %v3060_v52 = vsel %vm1099_vm3, %v3028_v2, %v2964_v54 }
 0x242   : > { %v2404_v42 = vpop.f32.mrb[7].mxu1  ;;  %5479 = vmatprep.mubr.msk.bf16.mxu1 %vm1148_vm4, %v3932_v45  ;;  %5444 = vmatmul.mubr.msk.bf16.gmra.mrb[48].mxu0 %vm1148_vm4, %v3060_v52 }
 0x243   : > { %4271 = vrot.lane.b32.xlu1 %v2404_v42, %s5783_s14  ;;  %5480 = vmatmul.mubr.msk.bf16.gmra.mrb[48].mxu1 %vm1148_vm4, %v3942_v21  ;;  %v2694_v31 = vpop.permute.xlu0 %2693 }
 0x244   : > { %v8155_v27 = vpop.permute.xlu1 %2695  ;;  %v3761_v37 = vsel %vm1066_vm2, %v3708_v32, %v2694_v31  ;;  %v3000_v32 = vsel %vm1033_vm1, %v9405_v18, %v7658_v20 }
 0x245   : > { %4273 = vrot.lane.b32.xlu0 %v5397_v1, %s5783_s14  ;;  %v5767_v1 = vld [vmem:[%s5825_s20 + $0x8c] ss:$0 sps:$4 sm:$0x11]  }
 0x247   : > { %4275 = vrot.lane.b32.xlu1 %v5398_v39, %s5783_s14  ;;  %v5401_v13 = vpop.f32.mrb[8].mxu1  ;;  %v3344_v12 = vpop.permute.xlu0 %3343 }
 0x248   : > { %v2417_v11 = vpop.f32.mrb[9].mxu1  ;;  %v3644_v38 = vpop.permute.xlu1 %3643  ;;  %v3712_v28 = vsel %vm1033_vm1, %v9405_v18, %v3344_v12 }
 0x249   : > { %v5402_v17 = vpop.f32.mrb[10].mxu1  ;;  %4277 = vrot.lane.b32.xlu0 %v2417_v11, %s5783_s14  ;;  %v3820_v36 = vsel %vm1099_vm3, %v3761_v37, %v3644_v38  ;;  %v3764_v23 = vsel %vm1066_vm2, %v3712_v28, %v8155_v27 }
 0x24a   : > { %v2420_v46 = vpop.f32.mrb[11].mxu1  ;;  %v3945_v30 = vshll.u32 %v3820_v36, 16  ;;  %v3943_v11 = vshrl.u32 %v3820_v36, 16  ;;  %v3032_v36 = vsel %vm1066_vm2, %v3000_v32, %v8155_v27 }
 0x24b   : > { %4279 = vrot.lane.b32.xlu1 %v2420_v46, %s5783_s14  ;;  %v3342_v8 = vpop.permute.xlu0 %3341  ;;  %v2998_v46 = vsel %vm1033_vm1, %v9404_v14, %v7663_v55 }
 0x24c   : > { %v3384_v40 = vpop.permute.xlu1 %3383  ;;  %v3710_v41 = vsel %vm1033_vm1, %v5767_v1, %v3342_v8  ;;  %v3947_v43 = vrot.slane %v3945_v30, 1  ;;  %v3030_v37 = vsel %vm1066_vm2, %v2998_v46, %v2694_v31 }
 0x24d   : > { %4281 = vrot.lane.b32.xlu0 %v5401_v13, %s5783_s14  ;;  %v3763_v62 = vsel %vm1066_vm2, %v3710_v41, %v3384_v40 }
 0x24f   : > { %4283 = vrot.lane.b32.xlu1 %v5402_v17, %s5783_s14  ;;  %v5405_v35 = vpop.f32.mrb[12].mxu1  ;;  %v3346_v34 = vpop.permute.xlu0 %3345 }
 0x250   : > { %v2433_v3 = vpop.f32.mrb[13].mxu1  ;;  %v3386_v4 = vpop.permute.xlu1 %3385  ;;  %v3714_v48 = vsel %vm1033_vm1, %v5766_v16, %v3346_v34 }
 0x251   : > { %v5406_v6 = vpop.f32.mrb[14].mxu1  ;;  %4285 = vrot.lane.b32.xlu0 %v2433_v3, %s5783_s14  ;;  %v3766_v25 = vsel %vm1066_vm2, %v3714_v48, %v3386_v4 }
 0x252   : > { %v2436_v58 = vpop.f32.mrb[15].mxu1 }
 0x253   : > { %4287 = vrot.lane.b32.xlu1 %v2436_v58, %s5783_s14  ;;  %v3648_v59 = vpop.permute.xlu0 %3647 }
 0x254   : > { %v3824_v49 = vsel %vm1099_vm3, %v3764_v23, %v3648_v59  ;;  %v3650_v50 = vpop.permute.xlu1 %3649 }
 0x255   : > { %v3955_v51 = vshll.u32 %v3824_v49, 16  ;;  %4289 = vrot.lane.b32.xlu0 %v5405_v35, %s5783_s14  ;;  %v3826_v5 = vsel %vm1099_vm3, %v3766_v25, %v3650_v50  ;;  %v3953_v45 = vshrl.u32 %v3824_v49, 16  ;;  %v3948_v35 = vor.u32 %v3947_v43, %v3943_v11  ;;  %v9407_v43 = vld [vmem:[#allocation59_spill] sm:$0xff] }
 0x256   : > { %v3959_v2 = vshll.u32 %v3826_v5, 16 }
 0x257   : > { %v3957_v54 = vrot.slane %v3955_v51, 1  ;;  %4291 = vrot.lane.b32.xlu1 %v5406_v6, %s5783_s14  ;;  %v5409_v21 = vpop.f32.mrb[16].mxu1  ;;  %v3646_v39 = vpop.permute.xlu0 %3645  ;;  %v9406_v51 = vld [vmem:[#allocation61_spill] sm:$0xff] }
 0x258   : > { %v3961_v52 = vrot.slane %v3959_v2, 1  ;;  %v3822_v42 = vsel %vm1099_vm3, %v3763_v62, %v3646_v39  ;;  %v2449_v13 = vpop.f32.mrb[17].mxu1  ;;  %v3348_v12 = vpop.permute.xlu1 %3347 }
 0x259   : > { %v3949_v38 = vshll.u32 %v3822_v42, 16  ;;  %v5410_v17 = vpop.f32.mrb[18].mxu1  ;;  %4293 = vrot.lane.b32.xlu0 %v2449_v13, %s5783_s14  ;;  %v3958_v8 = vor.u32 %v3957_v54, %v3953_v45  ;;  %v3716_v5 = vsel %vm1033_vm1, %v9406_v51, %v3348_v12  ;;  %v5768_v45 = vld [vmem:[%s5825_s20 + $0xb0] ss:$0 sps:$4 sm:$0x11]  }
 0x25a   : > { %v2452_v40 = vpop.f32.mrb[19].mxu1 }
 0x25b   : > { %v3951_v34 = vrot.slane %v3949_v38, 1  ;;  %4295 = vrot.lane.b32.xlu1 %v2452_v40, %s5783_s14  ;;  %v2966_v28 = vpop.permute.xlu0 %2965  ;;  %v3962_v55 = vsel %vm424_vm0, %v3958_v8, %v3961_v52 }
 0x25c   : > { %v3062_v3 = vsel %vm1099_vm3, %v3030_v37, %v2966_v28  ;;  %v2968_v4 = vpop.permute.xlu1 %2967  ;;  %v5769_v37 = vld [vmem:[%s5825_s20 + $0xa4] ss:$0 sps:$4 sm:$0x11]  }
 0x25d   : > { %4297 = vrot.lane.b32.xlu0 %v5409_v21, %s5783_s14  ;;  %5447 = vmatprep.mubr.msk.bf16.mxu0 %vm1148_vm4, %v3062_v3  ;;  %v3952_v20 = vsel %vm424_vm0, %v3948_v35, %v3951_v34  ;;  %v3064_v31 = vsel %vm1099_vm3, %v3032_v36, %v2968_v4 }
 0x25e   : > { %5483 = vmatprep.mubr.msk.bf16.mxu1 %vm1148_vm4, %v3952_v20  ;;  %5448 = vmatmul.mubr.msk.bf16.gmra.mrb[52].mxu0 %vm1148_vm4, %v3064_v31 }
 0x25f   : > { %4299 = vrot.lane.b32.xlu1 %v5410_v17, %s5783_s14  ;;  %v5413_v27 = vpop.f32.mrb[20].mxu1  ;;  %5484 = vmatmul.mubr.msk.bf16.gmra.mrb[52].mxu1 %vm1148_vm4, %v3962_v55  ;;  %v2698_v14 = vpop.permute.xlu0 %2697 }
 0x260   : > { %v2465_v18 = vpop.f32.mrb[21].mxu1  ;;  %v8205_v6 = vpop.permute.xlu1 %2699  ;;  %v3767_v41 = vsel %vm1066_vm2, %v3716_v5, %v2698_v14 }
 0x261   : > { %v5414_v58 = vpop.f32.mrb[22].mxu1  ;;  %4301 = vrot.lane.b32.xlu0 %v2465_v18, %s5783_s14 }
 0x262   : > { %v2468_v30 = vpop.f32.mrb[23].mxu1 }
 0x263   : > { %4303 = vrot.lane.b32.xlu1 %v2468_v30, %s5783_s14  ;;  %v3352_v16 = vpop.permute.xlu0 %3351 }
 0x264   : > { %v3652_v48 = vpop.permute.xlu1 %3651  ;;  %v3720_v62 = vsel %vm1033_vm1, %v9407_v43, %v3352_v16  ;;  %v3002_v16 = vsel %vm1033_vm1, %v9406_v51, %v7683_v29 }
 0x265   : > { %4305 = vrot.lane.b32.xlu0 %v5413_v27, %s5783_s14  ;;  %v3828_v54 = vsel %vm1099_vm3, %v3767_v41, %v3652_v48  ;;  %v3770_v13 = vsel %vm1066_vm2, %v3720_v62, %v8205_v6 }
 0x266   : > { %v3965_v39 = vshll.u32 %v3828_v54, 16 }
 0x267   : > { %4307 = vrot.lane.b32.xlu1 %v5414_v58, %s5783_s14  ;;  %v5417_v23 = vpop.f32.mrb[24].mxu1  ;;  %v3350_v59 = vpop.permute.xlu0 %3349  ;;  %v3963_v58 = vshrl.u32 %v3828_v54, 16 }
 0x268   : > { %v2481_v25 = vpop.f32.mrb[25].mxu1  ;;  %v3388_v49 = vpop.permute.xlu1 %3387  ;;  %v3718_v35 = vsel %vm1033_vm1, %v5769_v37, %v3350_v59  ;;  %v3967_v36 = vrot.slane %v3965_v39, 1  ;;  %v3034_v59 = vsel %vm1066_vm2, %v3002_v16, %v2698_v14 }
 0x269   : > { %v5418_v50 = vpop.f32.mrb[26].mxu1  ;;  %4309 = vrot.lane.b32.xlu0 %v2481_v25, %s5783_s14  ;;  %v3769_v3 = vsel %vm1066_vm2, %v3718_v35, %v3388_v49 }
 0x26a   : > { %v2484_v1 = vpop.f32.mrb[27].mxu1  ;;  %v3968_v25 = vor.u32 %v3967_v36, %v3963_v58  ;;  %v5771_v36 = vld [vmem:[%s5825_s20 + $0xbc] ss:$0 sps:$4 sm:$0x11]  }
 0x26b   : > { %4311 = vrot.lane.b32.xlu1 %v2484_v1, %s5783_s14  ;;  %v3354_v2 = vpop.permute.xlu0 %3353 }
 0x26c   : > { %v3390_v21 = vpop.permute.xlu1 %3389  ;;  %v3722_v52 = vsel %vm1033_vm1, %v5768_v45, %v3354_v2 }
 0x26d   : > { %4313 = vrot.lane.b32.xlu0 %v5417_v23, %s5783_s14  ;;  %v3772_v11 = vsel %vm1066_vm2, %v3722_v52, %v3390_v21  ;;  %v3004_v23 = vsel %vm1033_vm1, %v9407_v43, %v7668_v57  ;;  %v9408_v21 = vld [vmem:[#allocation69_spill] sm:$0xff] }
 0x26e   : > { %v3036_v5 = vsel %vm1066_vm2, %v3004_v23, %v8205_v6 }
 0x26f   : > { %4315 = vrot.lane.b32.xlu1 %v5418_v50, %s5783_s14  ;;  %v5421_v42 = vpop.f32.mrb[28].mxu1  ;;  %v3656_v12 = vpop.permute.xlu0 %3655 }
 0x270   : > { %v3832_v38 = vsel %vm1099_vm3, %v3770_v13, %v3656_v12  ;;  %v2497_v17 = vpop.f32.mrb[29].mxu1  ;;  %v3658_v46 = vpop.permute.xlu1 %3657 }
 0x271   : > { %v3975_v8 = vshll.u32 %v3832_v38, 16  ;;  %v5422_v40 = vpop.f32.mrb[30].mxu1  ;;  %4317 = vrot.lane.b32.xlu0 %v2497_v17, %s5783_s14  ;;  %v3834_v32 = vsel %vm1099_vm3, %v3772_v11, %v3658_v46  ;;  %v3973_v20 = vshrl.u32 %v3832_v38, 16  ;;  %v5770_v17 = vld [vmem:[%s5825_s20 + $0xc8] ss:$0 sps:$4 sm:$0x11]  }
 0x272   : > { %v2500_v34 = vpop.f32.mrb[31].mxu1  ;;  %v3979_v28 = vshll.u32 %v3834_v32, 16 }
 0x273   : > { %v3977_v4 = vrot.slane %v3975_v8, 1  ;;  %4319 = vrot.lane.b32.xlu1 %v2500_v34, %s5783_s14  ;;  %v3654_v55 = vpop.permute.xlu0 %3653 }
 0x274   : > { %v3981_v31 = vrot.slane %v3979_v28, 1  ;;  %v3830_v27 = vsel %vm1099_vm3, %v3769_v3, %v3654_v55  ;;  %v3356_v18 = vpop.permute.xlu1 %3355 }
 0x275   : > { %v3969_v30 = vshll.u32 %v3830_v27, 16  ;;  %4321 = vrot.lane.b32.xlu0 %v5421_v42, %s5783_s14  ;;  %v3978_v48 = vor.u32 %v3977_v4, %v3973_v20  ;;  %v3724_v39 = vsel %vm1033_vm1, %v9408_v21, %v3356_v18  ;;  %v9409_v42 = vld [vmem:[#allocation64_spill] sm:$0xff] }
 0x277   : > { %v3971_v49 = vrot.slane %v3969_v30, 1  ;;  %4323 = vrot.lane.b32.xlu1 %v5422_v40, %s5783_s14  ;;  %v2970_v50 = vpop.permute.xlu0 %2969  ;;  %v3982_v29 = vsel %vm424_vm0, %v3978_v48, %v3981_v31  ;;  %v3008_v48 = vsel %vm1033_vm1, %v9409_v42, %v7690_v61 }
 0x278   : > { %v3066_v1 = vsel %vm1099_vm3, %v3034_v59, %v2970_v50  ;;  %v2972_v41 = vpop.permute.xlu1 %2971 }
 0x279   : > { %5451 = vmatprep.mubr.msk.bf16.mxu0 %vm1148_vm4, %v3066_v1  ;;  %v3972_v51 = vsel %vm424_vm0, %v3968_v25, %v3971_v49  ;;  %v3068_v57 = vsel %vm1099_vm3, %v3036_v5, %v2972_v41  ;;  %v3006_v25 = vsel %vm1033_vm1, %v9408_v21, %v7696_v19 }
 0x27a   : > { %5487 = vmatprep.mubr.msk.bf16.mxu1 %vm1148_vm4, %v3972_v51  ;;  %5452 = vmatmul.mubr.msk.bf16.gmra.mrb[56].mxu0 %vm1148_vm4, %v3068_v57 }
 0x27b   : > { %5488 = vmatmul.mubr.msk.bf16.gmra.mrb[56].mxu1 %vm1148_vm4, %v3982_v29  ;;  %v2702_v14 = vpop.permute.xlu0 %2701 }
 0x27c   : > { %v2704_v6 = vpop.permute.xlu1 %2703  ;;  %v3773_v45 = vsel %vm1066_vm2, %v3724_v39, %v2702_v14  ;;  %v3038_v5 = vsel %vm1066_vm2, %v3006_v25, %v2702_v14 }
 0x27d   : > { %v3040_v49 = vsel %vm1066_vm2, %v3008_v48, %v2704_v6 }
 0x27f   : > { %v3360_v2 = vpop.permute.xlu0 %3359 }
 0x280   : > { %v3660_v43 = vpop.permute.xlu1 %3659  ;;  %v3728_v13 = vsel %vm1033_vm1, %v9409_v42, %v3360_v2 }
 0x281   : > { %v3836_v12 = vsel %vm1099_vm3, %v3773_v45, %v3660_v43  ;;  %v3776_v8 = vsel %vm1066_vm2, %v3728_v13, %v2704_v6 }
 0x282   : > { %v3985_v38 = vshll.u32 %v3836_v12, 16  ;;  %v3983_v23 = vshrl.u32 %v3836_v12, 16 }
 0x283   : > { %v3358_v62 = vpop.permute.xlu0 %3357 }
 0x284   : > { %v3392_v54 = vpop.permute.xlu1 %3391  ;;  %v3726_v3 = vsel %vm1033_vm1, %v5771_v36, %v3358_v62  ;;  %v3987_v55 = vrot.slane %v3985_v38, 1  ;;  %v9410_v36 = vld [vmem:[#allocation93_spill] sm:$0xff] }
 0x285   : > { %v3775_v20 = vsel %vm1066_vm2, %v3726_v3, %v3392_v54 }
 0x286   : > { %v3988_v1 = vor.u32 %v3987_v55, %v3983_v23 }
 0x287   : > { %v3362_v52 = vpop.permute.xlu0 %3361 }
 0x288   : > { %v3394_v11 = vpop.permute.xlu1 %3393  ;;  %v3730_v46 = vsel %vm1033_vm1, %v5770_v17, %v3362_v52 }
 0x289   : > { %v3778_v32 = vsel %vm1066_vm2, %v3730_v46, %v3394_v11 }
 0x28b   : > { %v3664_v40 = vpop.permute.xlu0 %3663 }
 0x28c   : > { %v3840_v37 = vsel %vm1099_vm3, %v3776_v8, %v3664_v40  ;;  %v3666_v35 = vpop.permute.xlu1 %3665 }
 0x28d   : > { %v3995_v34 = vshll.u32 %v3840_v37, 16  ;;  %v3842_v28 = vsel %vm1099_vm3, %v3778_v32, %v3666_v35  ;;  %v3993_v18 = vshrl.u32 %v3840_v37, 16 }
 0x28e   : > { %v3999_v4 = vshll.u32 %v3842_v28, 16 }
 0x28f   : > { %v3997_v31 = vrot.slane %v3995_v34, 1  ;;  %v3662_v27 = vpop.permute.xlu0 %3661 }
 0x290   : > { %v4001_v58 = vrot.slane %v3999_v4, 1  ;;  %v3838_v30 = vsel %vm1099_vm3, %v3775_v20, %v3662_v27  ;;  %v2976_v16 = vpop.permute.xlu1 %2975  ;;  %v9411_v20 = vld [vmem:[#allocation95_spill] sm:$0xff] }
 0x291   : > { %v3989_v59 = vshll.u32 %v3838_v30, 16  ;;  %v3998_v50 = vor.u32 %v3997_v31, %v3993_v18  ;;  %v3072_v29 = vsel %vm1099_vm3, %v3040_v49, %v2976_v16 }
 0x293   : > { %v3991_v41 = vrot.slane %v3989_v59, 1  ;;  %v2974_v51 = vpop.permute.xlu0 %2973  ;;  %v4002_v61 = vsel %vm424_vm0, %v3998_v50, %v4001_v58  ;;  %v9412_v58 = vld [vmem:[#allocation98_spill] sm:$0xff]  ;;  %v9414_v50 = vld [vmem:[#allocation96_spill] sm:$0xff] }
 0x294   : > { %v3070_v57 = vsel %vm1099_vm3, %v3038_v5, %v2974_v51  ;;  %v9413_v59 = vld [vmem:[#allocation94_spill] sm:$0xff] }
 0x295   : > { %5455 = vmatprep.mubr.msk.bf16.mxu0 %vm1148_vm4, %v3070_v57  ;;  %v3992_v2 = vsel %vm424_vm0, %v3988_v1, %v3991_v41 }
 0x296   : > { %5456 = vmatmul.mubr.msk.bf16.gmra.mrb[60].mxu0 %vm1148_vm4, %v3072_v29  ;;  %5491 = vmatprep.mubr.msk.bf16.mxu1 %vm1148_vm4, %v3992_v2 }
 0x297   : > { %5492 = vmatmul.mubr.msk.bf16.gmra.mrb[60].mxu1 %vm1148_vm4, %v4002_v61 }
 0x2a6   : > { %v8285_v19 = vpop.f32.mrb[32].mxu1  ;;  %v5429_v14 = vpop.f32.mrb[32].mxu0 }
 0x2a7   : > { %v8287_v6 = vpop.f32.mrb[33].mxu1  ;;  %v3156_v43 = vpop.f32.mrb[33].mxu0 }
 0x2a8   : > { %v8289_v62 = vpop.f32.mrb[34].mxu1  ;;  %v5430_v54 = vpop.f32.mrb[34].mxu0  ;;  %4389 = vrot.lane.b32.xlu0 %v3156_v43, %s5784_s17 }
 0x2a9   : > { %v8292_v21 = vpop.f32.mrb[35].mxu1  ;;  %v3159_v39 = vpop.f32.mrb[35].mxu0 }
 0x2aa   : > { %4391 = vrot.lane.b32.xlu1 %v3159_v39, %s5784_s17 }
 0x2ab   : > { %v4262_v45 = vpop.permute.xlu0 %4261 }
 0x2ac   : > { %v8297_v52 = vsel %vm4613_vm5, %v7674_v56, %v4262_v45  ;;  %4393 = vrot.lane.b32.xlu0 %v5429_v14, %s5784_s17  ;;  %v9415_v14 = vld [vmem:[#allocation100_spill] sm:$0xff] }
 0x2ad   : > { %v4264_v42 = vpop.permute.xlu1 %4263 }
 0x2ae   : > { %v8302_v13 = vsel %vm4613_vm5, %v7688_v47, %v4264_v42  ;;  %4395 = vrot.lane.b32.xlu1 %v5430_v54, %s5784_s17  ;;  %v9417_v42 = vld [vmem:[#allocation5_spill] sm:$0xff] }
 0x2af   : > { %v4266_v12 = vpop.permute.xlu0 %4265 }
 0x2b0   : > { %v8307_v11 = vsel %vm4613_vm5, %v7670_v26, %v4266_v12 }
 0x2b1   : > { %v4268_v38 = vpop.permute.xlu1 %4267 }
 0x2b2   : > { %v8311_v17 = vsel %vm4613_vm5, %v7681_v0, %v4268_v38  ;;  %v9418_v38 = vld [vmem:[#allocation101_spill] sm:$0xff] }
 0x2b3   : > { %v4270_v56 = vpop.permute.xlu0 %4269 }
 0x2b4   : > { %v8315_v46 = vsel %vm4613_vm5, %v7703_v15, %v4270_v56 }
 0x2b5   : > { %v4272_v8 = vpop.permute.xlu1 %4271 }
 0x2b6   : > { %v8319_v47 = vsel %vm4613_vm5, %v7714_v9, %v4272_v8  ;;  %v9419_v8 = vld [vmem:[#allocation14_spill] sm:$0xff] }
 0x2b7   : > { %v4274_v40 = vpop.permute.xlu0 %4273 }
 0x2b8   : > { %v8323_v26 = vsel %vm4613_vm5, %v7700_v60, %v4274_v40 }
 0x2b9   : > { %v4276_v32 = vpop.permute.xlu1 %4275 }
 0x2ba   : > { %v8327_v0 = vsel %vm4613_vm5, %v7708_v33, %v4276_v32 }
 0x2bb   : > { %v4278_v37 = vpop.permute.xlu0 %4277 }
 0x2bc   : > { %v8331_v15 = vsel %vm4613_vm5, %v7726_v24, %v4278_v37  ;;  %v9420_v37 = vld [vmem:[#allocation22_spill] sm:$0xff] }
 0x2bd   : > { %v4280_v35 = vpop.permute.xlu1 %4279 }
 0x2be   : > { %v8335_v9 = vsel %vm4613_vm5, %v7739_v53, %v4280_v35 }
 0x2bf   : > { %v4282_v34 = vpop.permute.xlu0 %4281 }
 0x2c0   : > { %v8339_v60 = vsel %vm4613_vm5, %v7721_v10, %v4282_v34 }
 0x2c1   : > { %v4284_v28 = vpop.permute.xlu1 %4283 }
 0x2c2   : > { %v8343_v33 = vsel %vm4613_vm5, %v9410_v36, %v4284_v28  ;;  %v8345_v3 = vpop.f32.mrb[36].mxu1  ;;  %v5433_v4 = vpop.f32.mrb[36].mxu0  ;;  %v9421_v28 = vld [vmem:[#allocation7_spill] sm:$0xff] }
 0x2c3   : > { %v8347_v24 = vpop.f32.mrb[37].mxu1  ;;  %v4286_v55 = vpop.permute.xlu0 %4285 }
 0x2c4   : > { %v8351_v53 = vsel %vm4613_vm5, %v9411_v20, %v4286_v55  ;;  %v8353_v31 = vpop.f32.mrb[38].mxu1  ;;  %v3172_v27 = vpop.f32.mrb[37].mxu0 }
 0x2c5   : > { %v4288_v10 = vpop.permute.xlu1 %4287  ;;  %v8355_v18 = vpop.f32.mrb[39].mxu1  ;;  %4397 = vrot.lane.b32.xlu0 %v3172_v27, %s5784_s17 }
 0x2c6   : > { %v8360_v30 = vsel %vm4613_vm5, %v9412_v58, %v4288_v10  ;;  %v5434_v16 = vpop.f32.mrb[38].mxu0  ;;  %v9423_v10 = vld [vmem:[#allocation9_spill] sm:$0xff] }
 0x2c7   : > { %v3175_v48 = vpop.f32.mrb[39].mxu0  ;;  %v4290_v23 = vpop.permute.xlu0 %4289 }
 0x2c8   : > { %v8364_v25 = vsel %vm4613_vm5, %v9413_v59, %v4290_v23  ;;  %4399 = vrot.lane.b32.xlu1 %v3175_v48, %s5784_s17 }
 0x2c9   : > { %v4292_v49 = vpop.permute.xlu1 %4291  ;;  %4401 = vrot.lane.b32.xlu0 %v5433_v4, %s5784_s17 }
 0x2ca   : > { %v8370_v5 = vsel %vm4613_vm5, %v9414_v50, %v4292_v49  ;;  %v9425_v49 = vld [vmem:[#allocation4_spill] sm:$0xff] }
 0x2cb   : > { %v4294_v1 = vpop.permute.xlu0 %4293 }
 0x2cc   : > { %v8374_v41 = vsel %vm4613_vm5, %v7806_v44, %v4294_v1  ;;  %4403 = vrot.lane.b32.xlu1 %v5434_v16, %s5784_s17  ;;  %v9416_v44 = vld [vmem:[#allocation3_spill] sm:$0xff] }
 0x2cd   : > { %v4296_v29 = vpop.permute.xlu1 %4295 }
 0x2ce   : > { %v8379_v51 = vsel %vm4613_vm5, %v7822_v63, %v4296_v29 }
 0x2cf   : > { %v4298_v57 = vpop.permute.xlu0 %4297 }
 0x2d0   : > { %v8383_v61 = vsel %vm4613_vm5, %v7798_v22, %v4298_v57 }
 0x2d1   : > { %v4300_v2 = vpop.permute.xlu1 %4299 }
 0x2d2   : > { %v8387_v43 = vsel %vm4613_vm5, %v9415_v14, %v4300_v2  ;;  %v9427_v2 = vld [vmem:[#allocation63_spill] sm:$0xff] }
 0x2d3   : > { %v4302_v54 = vpop.permute.xlu0 %4301 }
 0x2d4   : > { %v8391_v39 = vsel %vm4613_vm5, %v9416_v44, %v4302_v54 }
 0x2d5   : > { %v4304_v45 = vpop.permute.xlu1 %4303 }
 0x2d6   : > { %v8395_v63 = vsel %vm4613_vm5, %v9417_v42, %v4304_v45  ;;  %v9430_v42 = vld [vmem:[#allocation11_spill] sm:$0xff] }
 0x2d7   : > { %v4306_v12 = vpop.permute.xlu0 %4305 }
 0x2d8   : > { %v8399_v22 = vsel %vm4613_vm5, %v9418_v38, %v4306_v12 }
 0x2d9   : > { %v4308_v56 = vpop.permute.xlu1 %4307 }
 0x2da   : > { %v8403_v40 = vsel %vm4613_vm5, %v9419_v8, %v4308_v56  ;;  %v9432_v56 = vld [vmem:[#allocation15_spill] sm:$0xff] }
 0x2db   : > { %v4310_v32 = vpop.permute.xlu0 %4309 }
 0x2dc   : > { %v8407_v35 = vsel %vm4613_vm5, %v9420_v37, %v4310_v32 }
 0x2dd   : > { %v4312_v34 = vpop.permute.xlu1 %4311 }
 0x2de   : > { %v8411_v36 = vsel %vm4613_vm5, %v9421_v28, %v4312_v34  ;;  %v8413_v4 = vpop.f32.mrb[40].mxu1  ;;  %v5437_v55 = vpop.f32.mrb[40].mxu0 }
 0x2df   : > { %9422 = vst [vmem:[#allocation10_spill] sm:$0xff] %v8411_v36  ;;  %v8415_v20 = vpop.f32.mrb[41].mxu1  ;;  %v4314_v27 = vpop.permute.xlu0 %4313 }
 0x2e0   : > { %v8419_v58 = vsel %vm4613_vm5, %v9423_v10, %v4314_v27  ;;  %v8421_v16 = vpop.f32.mrb[42].mxu1  ;;  %v3188_v48 = vpop.f32.mrb[41].mxu0 }
 0x2e1   : > { %9424 = vst [vmem:[#allocation13_spill] sm:$0xff] %v8419_v58  ;;  %v4316_v23 = vpop.permute.xlu1 %4315  ;;  %v8423_v59 = vpop.f32.mrb[43].mxu1  ;;  %4405 = vrot.lane.b32.xlu0 %v3188_v48, %s5784_s17 }
 0x2e2   : > { %v8428_v50 = vsel %vm4613_vm5, %v9425_v49, %v4316_v23  ;;  %v5438_v1 = vpop.f32.mrb[42].mxu0 }
 0x2e3   : > { %9426 = vst [vmem:[#allocation2_spill] sm:$0xff] %v8428_v50  ;;  %v3191_v29 = vpop.f32.mrb[43].mxu0  ;;  %v4318_v57 = vpop.permute.xlu0 %4317 }
 0x2e4   : > { %v8432_v14 = vsel %vm4613_vm5, %v9427_v2, %v4318_v57  ;;  %4407 = vrot.lane.b32.xlu1 %v3191_v29, %s5784_s17 }
 0x2e5   : > { %9428 = vst [vmem:[#allocation17_spill] sm:$0xff] %v8432_v14  ;;  %v4320_v54 = vpop.permute.xlu1 %4319  ;;  %4409 = vrot.lane.b32.xlu0 %v5437_v55, %s5784_s17 }
 0x2e6   : > { %v8438_v44 = vsel %vm4613_vm5, %v7929_v7, %v4320_v54 }
 0x2e7   : > { %9429 = vst [vmem:[#allocation42_spill] sm:$0xff] %v8438_v44  ;;  %v4322_v45 = vpop.permute.xlu0 %4321 }
 0x2e8   : > { %v8442_v12 = vsel %vm4613_vm5, %v9430_v42, %v4322_v45  ;;  %4411 = vrot.lane.b32.xlu1 %v5438_v1, %s5784_s17 }
 0x2e9   : > { %9431 = vst [vmem:[#allocation16_spill] sm:$0xff] %v8442_v12  ;;  %v4324_v38 = vpop.permute.xlu1 %4323 }
 0x2ea   : > { %v8447_v8 = vsel %vm4613_vm5, %v9432_v56, %v4324_v38 }
 0x2eb   : > { %9433 = vst [vmem:[#allocation77_spill] sm:$0xff] %v8447_v8 }
 0x2f9   : > { %v5441_v32 = vpop.f32.mrb[44].mxu0 }
 0x2fa   : > { %v8449_v37 = vpop.f32.mrb[44].mxu1  ;;  %v3204_v34 = vpop.f32.mrb[45].mxu0 }
 0x2fb   : > { %v8451_v28 = vpop.f32.mrb[45].mxu1  ;;  %v5442_v7 = vpop.f32.mrb[46].mxu0  ;;  %4413 = vrot.lane.b32.xlu0 %v3204_v34, %s5784_s17 }
 0x2fc   : > { %v8454_v55 = vpop.f32.mrb[46].mxu1  ;;  %v3207_v27 = vpop.f32.mrb[47].mxu0 }
 0x2fd   : > { %v8456_v10 = vpop.f32.mrb[47].mxu1  ;;  %4415 = vrot.lane.b32.xlu1 %v3207_v27, %s5784_s17 }
 0x2ff   : > { %4417 = vrot.lane.b32.xlu0 %v5441_v32, %s5784_s17 }
 0x301   : > { %4419 = vrot.lane.b32.xlu1 %v5442_v7, %s5784_s17 }
 0x315   : > { %v5445_v48 = vpop.f32.mrb[48].mxu0 }
 0x316   : > { %v8461_v23 = vpop.f32.mrb[48].mxu1  ;;  %v3220_v49 = vpop.f32.mrb[49].mxu0 }
 0x317   : > { %v4166_v1 = vpop.f32.mrb[49].mxu1  ;;  %4421 = vrot.lane.b32.xlu0 %v3220_v49, %s5784_s17  ;;  %v5446_v29 = vpop.f32.mrb[50].mxu0 }
 0x318   : > { %v8464_v57 = vpop.f32.mrb[50].mxu1  ;;  %v3223_v2 = vpop.f32.mrb[51].mxu0 }
 0x319   : > { %v4169_v54 = vpop.f32.mrb[51].mxu1  ;;  %4423 = vrot.lane.b32.xlu1 %v3223_v2, %s5784_s17 }
 0x31b   : > { %4425 = vrot.lane.b32.xlu0 %v5445_v48, %s5784_s17 }
 0x31d   : > { %4427 = vrot.lane.b32.xlu1 %v5446_v29, %s5784_s17 }
 0x331   : > { %v5449_v45 = vpop.f32.mrb[52].mxu0 }
 0x332   : > { %v5485_v42 = vpop.f32.mrb[52].mxu1  ;;  %v3236_v38 = vpop.f32.mrb[53].mxu0 }
 0x333   : > { %v4182_v56 = vpop.f32.mrb[53].mxu1  ;;  %4429 = vrot.lane.b32.xlu0 %v3236_v38, %s5784_s17  ;;  %v5450_v32 = vpop.f32.mrb[54].mxu0 }
 0x334   : > { %v5486_v34 = vpop.f32.mrb[54].mxu1  ;;  %v3239_v7 = vpop.f32.mrb[55].mxu0 }
 0x335   : > { %v4185_v27 = vpop.f32.mrb[55].mxu1  ;;  %4431 = vrot.lane.b32.xlu1 %v3239_v7, %s5784_s17 }
 0x337   : > { %4433 = vrot.lane.b32.xlu0 %v5449_v45, %s5784_s17 }
 0x339   : > { %4435 = vrot.lane.b32.xlu1 %v5450_v32, %s5784_s17 }
 0x34d   : > { %v5453_v49 = vpop.f32.mrb[56].mxu0 }
 0x34e   : > { %v5489_v48 = vpop.f32.mrb[56].mxu1  ;;  %v3252_v2 = vpop.f32.mrb[57].mxu0 }
 0x34f   : > { %v4198_v29 = vpop.f32.mrb[57].mxu1  ;;  %4437 = vrot.lane.b32.xlu0 %v3252_v2, %s5784_s17  ;;  %v5454_v8 = vpop.f32.mrb[58].mxu0 }
 0x350   : > { %v5490_v12 = vpop.f32.mrb[58].mxu1  ;;  %v3255_v44 = vpop.f32.mrb[59].mxu0 }
 0x351   : > { %v4201_v38 = vpop.f32.mrb[59].mxu1  ;;  %4439 = vrot.lane.b32.xlu1 %v3255_v44, %s5784_s17 }
 0x353   : > { %4441 = vrot.lane.b32.xlu0 %v5453_v49, %s5784_s17 }
 0x355   : > { %4443 = vrot.lane.b32.xlu1 %v5454_v8, %s5784_s17 }
 0x369   : > { %v5457_v7 = vpop.f32.mrb[60].mxu0 }
 0x36a   : > { %v3268_v45 = vpop.f32.mrb[61].mxu0  ;;  %v5493_v14 = vpop.f32.mrb[60].mxu1 }
 0x36b   : > { %v4214_v32 = vpop.f32.mrb[61].mxu1  ;;  %4445 = vrot.lane.b32.xlu0 %v3268_v45, %s5784_s17  ;;  %v5458_v50 = vpop.f32.mrb[62].mxu0 }
 0x36c   : > { %v3271_v58 = vpop.f32.mrb[63].mxu0  ;;  %v5494_v36 = vpop.f32.mrb[62].mxu1 }
 0x36d   : > { %v4217_v2 = vpop.f32.mrb[63].mxu1  ;;  %4447 = vrot.lane.b32.xlu1 %v3271_v58, %s5784_s17 }
 0x36f   : > { %4449 = vrot.lane.b32.xlu0 %v5457_v7, %s5784_s17  ;;  %v8595_v7 = vld [vmem:[%s8858_s3] ss:$0 sm:$0xff] }
 0x371   : > { %4451 = vrot.lane.b32.xlu1 %v5458_v50, %s5784_s17 }
 0x373   : > { %4517 = vrot.lane.b32.xlu0 %v8287_v6, %s5785_s18  ;;  %v4392_v6 = vpop.permute.xlu1 %4391 }
 0x375   : > { %4519 = vrot.lane.b32.xlu1 %v8292_v21, %s5785_s18 }
 0x377   : > { %4521 = vrot.lane.b32.xlu0 %v8285_v19, %s5785_s18  ;;  %v4390_v19 = vpop.permute.xlu0 %4389  ;;  %v4396_v21 = vpop.permute.xlu1 %4395 }
 0x379   : > { %4523 = vrot.lane.b32.xlu1 %v8289_v62, %s5785_s18 }
 0x37b   : > { %4525 = vrot.lane.b32.xlu0 %v8347_v24, %s5785_s18  ;;  %v4394_v62 = vpop.permute.xlu0 %4393  ;;  %v8523_v24 = vpop.permute.xlu1 %4399 }
 0x37d   : > { %4527 = vrot.lane.b32.xlu1 %v8355_v18, %s5785_s18 }
 0x37f   : > { %4529 = vrot.lane.b32.xlu0 %v8345_v3, %s5785_s18  ;;  %v4398_v3 = vpop.permute.xlu0 %4397  ;;  %v8530_v18 = vpop.permute.xlu1 %4403 }
 0x381   : > { %4531 = vrot.lane.b32.xlu1 %v8353_v31, %s5785_s18 }
 0x383   : > { %4533 = vrot.lane.b32.xlu0 %v8415_v20, %s5785_s18  ;;  %v8527_v31 = vpop.permute.xlu0 %4401  ;;  %v8536_v20 = vpop.permute.xlu1 %4407 }
 0x385   : > { %4535 = vrot.lane.b32.xlu1 %v8423_v59, %s5785_s18 }
 0x387   : > { %4537 = vrot.lane.b32.xlu0 %v8413_v4, %s5785_s18  ;;  %v8533_v4 = vpop.permute.xlu0 %4405 }
 0x389   : > { %4539 = vrot.lane.b32.xlu1 %v8421_v16, %s5785_s18  ;;  %v8543_v16 = vpop.permute.xlu1 %4411 }
 0x38b   : > { %4541 = vrot.lane.b32.xlu0 %v8451_v28, %s5785_s18  ;;  %v8540_v58 = vpop.permute.xlu0 %4409 }
 0x38d   : > { %4543 = vrot.lane.b32.xlu1 %v8456_v10, %s5785_s18  ;;  %v8547_v50 = vpop.permute.xlu1 %4415 }
 0x38f   : > { %4545 = vrot.lane.b32.xlu0 %v8449_v37, %s5785_s18  ;;  %v8545_v59 = vpop.permute.xlu0 %4413 }
 0x391   : > { %4547 = vrot.lane.b32.xlu1 %v8454_v55, %s5785_s18 }
 0x393   : > { %4549 = vrot.lane.b32.xlu0 %v4166_v1, %s5785_s18  ;;  %v8549_v44 = vpop.permute.xlu0 %4417 }
 0x395   : > { %4551 = vrot.lane.b32.xlu1 %v4169_v54, %s5785_s18 }
 0x397   : > { %4553 = vrot.lane.b32.xlu0 %v8461_v23, %s5785_s18  ;;  %v8553_v8 = vpop.permute.xlu0 %4421 }
 0x399   : > { %4555 = vrot.lane.b32.xlu1 %v8464_v57, %s5785_s18 }
 0x39b   : > { %4557 = vrot.lane.b32.xlu0 %v4182_v56, %s5785_s18  ;;  %v8557_v28 = vpop.permute.xlu0 %4425 }
 0x39d   : > { %4559 = vrot.lane.b32.xlu1 %v4185_v27, %s5785_s18 }
 0x39f   : > { %4561 = vrot.lane.b32.xlu0 %v5485_v42, %s5785_s18 }
 0x3a1   : > { %4563 = vrot.lane.b32.xlu1 %v5486_v34, %s5785_s18 }
 0x3a3   : > { %4565 = vrot.lane.b32.xlu0 %v4198_v29, %s5785_s18  ;;  %v4647_v29 = vsel %vm4646_vm6, %v8297_v52, %v4390_v19 }
 0x3a5   : > { %4567 = vrot.lane.b32.xlu1 %v4201_v38, %s5785_s18  ;;  %v8561_v55 = vpop.permute.xlu0 %4429 }
 0x3a7   : > { %4569 = vrot.lane.b32.xlu0 %v5489_v48, %s5785_s18  ;;  %v8588_v48 = vld [vmem:[%s8857_s2] ss:$0 sm:$0xff] }
 0x3a9   : > { %4571 = vrot.lane.b32.xlu1 %v5490_v12, %s5785_s18  ;;  %v8551_v12 = vpop.permute.xlu1 %4419  ;;  %v8565_v10 = vpop.permute.xlu0 %4433 }
 0x3ab   : > { %4573 = vrot.lane.b32.xlu0 %v4214_v32, %s5785_s18  ;;  %v4648_v32 = vsel %vm4646_vm6, %v8302_v13, %v4392_v6 }
 0x3ad   : > { %4575 = vrot.lane.b32.xlu1 %v4217_v2, %s5785_s18  ;;  %v8555_v37 = vpop.permute.xlu1 %4423 }
 0x3af   : > { %4577 = vrot.lane.b32.xlu0 %v5493_v14, %s5785_s18 }
 0x3b1   : > { %4579 = vrot.lane.b32.xlu1 %v5494_v36, %s5785_s18  ;;  %v8559_v14 = vpop.permute.xlu1 %4427 }
 0x3b5   : > { %v8563_v36 = vpop.permute.xlu1 %4431 }
 0x3b9   : > { %v8567_v23 = vpop.permute.xlu1 %4435 }
 0x3c1   : > { %v8569_v1 = vpop.permute.xlu0 %4437 }
 0x3c3   : > { %v8571_v57 = vpop.permute.xlu1 %4439 }
 0x3c5   : > { %v8573_v54 = vpop.permute.xlu0 %4441 }
 0x3c7   : > { %v8575_v42 = vpop.permute.xlu1 %4443 }
 0x3c8   : > { %9434 = vst [vmem:[#allocation65_spill] sm:$0xff] %v8575_v42 }
 0x3dd   : > { %v8577_v56 = vpop.permute.xlu0 %4445 }
 0x3de   : > { %9435 = vst [vmem:[#allocation32_spill] sm:$0xff] %v8577_v56 }
 0x3df   : > { %v8579_v34 = vpop.permute.xlu1 %4447 }
 0x3e0   : > { %9436 = vst [vmem:[#allocation24_spill] sm:$0xff] %v8579_v34  ;;  %v4649_v34 = vsel %vm4646_vm6, %v8307_v11, %v4394_v62  ;;  %v4651_v11 = vsel %vm4646_vm6, %v8315_v46, %v4398_v3  ;;  %v4653_v3 = vsel %vm4646_vm6, %v8323_v26, %v8527_v31 }
 0x3e1   : > { %v8581_v27 = vpop.permute.xlu0 %4449 }
 0x3e2   : > { %9437 = vst [vmem:[#allocation62_spill] sm:$0xff] %v8581_v27 }
 0x3e3   : > { %v8583_v49 = vpop.permute.xlu1 %4451 }
 0x3e4   : > { %9438 = vst [vmem:[#allocation12_spill] sm:$0xff] %v8583_v49 }
 0x3e5   : > { %v4518_v38 = vpop.permute.xlu0 %4517 }
 0x3e6   : > { %v4680_v45 = vsel %vm4679_vm7, %v4647_v29, %v4518_v38  ;;  %v4650_v29 = vsel %vm4646_vm6, %v8311_v17, %v4396_v21  ;;  %v4652_v21 = vsel %vm4646_vm6, %v8319_v47, %v8523_v24  ;;  %v4654_v47 = vsel %vm4646_vm6, %v8327_v0, %v8530_v18 }
 0x3e7   : > { %v4719_v2 = vmul.f32 %v8588_v48, %v4680_v45  ;;  %v4520_v49 = vpop.permute.xlu1 %4519  ;;  %v4655_v0 = vsel %vm4646_vm6, %v8331_v15, %v8533_v4 }
 0x3e8   : > { %v4681_v27 = vsel %vm4679_vm7, %v4648_v32, %v4520_v49 }
 0x3e9   : > { %v4758_v52 = vadd.f32 %v8595_v7, %v4719_v2  ;;  %v4720_v19 = vmul.f32 %v8588_v48, %v4681_v27  ;;  %v4522_v56 = vpop.permute.xlu0 %4521 }
 0x3ea   : > { %v4682_v42 = vsel %vm4679_vm7, %v4649_v34, %v4522_v56 }
 0x3eb   : > { %5662 = vtanh.f32 %v4758_v52  ;;  %v4759_v13 = vadd.f32 %v8595_v7, %v4720_v19  ;;  %v4721_v6 = vmul.f32 %v8588_v48, %v4682_v42  ;;  %v4524_v49 = vpop.permute.xlu1 %4523 }
 0x3ec   : > { %v4683_v38 = vsel %vm4679_vm7, %v4650_v29, %v4524_v49 }
 0x3ed   : > { %5664 = vtanh.f32 %v4759_v13  ;;  %v4760_v62 = vadd.f32 %v8595_v7, %v4721_v6  ;;  %v4722_v56 = vmul.f32 %v8588_v48, %v4683_v38  ;;  %v4526_v34 = vpop.permute.xlu0 %4525 }
 0x3ee   : > { %v4684_v17 = vsel %vm4679_vm7, %v4651_v11, %v4526_v34 }
 0x3ef   : > { %5666 = vtanh.f32 %v4760_v62  ;;  %v4761_v42 = vadd.f32 %v8595_v7, %v4722_v56  ;;  %v4723_v27 = vmul.f32 %v8588_v48, %v4684_v17  ;;  %v4528_v45 = vpop.permute.xlu1 %4527  ;;  %v4656_v62 = vsel %vm4646_vm6, %v8335_v9, %v8536_v20 }
 0x3f0   : > { %v4685_v46 = vsel %vm4679_vm7, %v4652_v21, %v4528_v45  ;;  %v4657_v21 = vsel %vm4646_vm6, %v8339_v60, %v8540_v58 }
 0x3f1   : > { %5668 = vtanh.f32 %v4761_v42  ;;  %v4762_v32 = vadd.f32 %v8595_v7, %v4723_v27  ;;  %v4724_v2 = vmul.f32 %v8588_v48, %v4685_v46  ;;  %v4530_v52 = vpop.permute.xlu0 %4529  ;;  %v4658_v46 = vsel %vm4646_vm6, %v8343_v33, %v8543_v16 }
 0x3f2   : > { %v4686_v24 = vsel %vm4679_vm7, %v4653_v3, %v4530_v52  ;;  %v4659_v52 = vsel %vm4646_vm6, %v8351_v53, %v8545_v59 }
 0x3f3   : > { %5670 = vtanh.f32 %v4762_v32  ;;  %v4763_v26 = vadd.f32 %v8595_v7, %v4724_v2  ;;  %v4725_v31 = vmul.f32 %v8588_v48, %v4686_v24  ;;  %v4532_v19 = vpop.permute.xlu1 %4531 }
 0x3f4   : > { %v4687_v29 = vsel %vm4679_vm7, %v4654_v47, %v4532_v19 }
 0x3f5   : > { %v5663_v13 = vpop.eup %5662  ;;  %5672 = vtanh.f32 %v4763_v26  ;;  %v4764_v18 = vadd.f32 %v8595_v7, %v4725_v31  ;;  %v4726_v6 = vmul.f32 %v8588_v48, %v4687_v29  ;;  %v4534_v49 = vpop.permute.xlu0 %4533  ;;  %v4660_v31 = vsel %vm4646_vm6, %v8360_v30, %v8547_v50 }
 0x3f6   : > { %4823 = vst.msk [vmem:[%s8636_s25] sm:$0xff] %vm4822_vm8, %v5663_v13  ;;  %v4688_v38 = vsel %vm4679_vm7, %v4655_v0, %v4534_v49  ;;  %v4661_v0 = vsel %vm4646_vm6, %v8364_v25, %v8549_v44 }
 0x3f7   : > { %v5665_v11 = vpop.eup %5664  ;;  %5674 = vtanh.f32 %v4764_v18  ;;  %v4765_v56 = vadd.f32 %v8595_v7, %v4726_v6  ;;  %v4727_v15 = vmul.f32 %v8588_v48, %v4688_v38  ;;  %v4536_v4 = vpop.permute.xlu1 %4535  ;;  %v4662_v38 = vsel %vm4646_vm6, %v8370_v5, %v8551_v12 }
 0x3f8   : > { %4824 = vst.msk [vmem:[%s8636_s25 + $0x8] sm:$0xff] %vm4822_vm8, %v5665_v11  ;;  %v4689_v34 = vsel %vm4679_vm7, %v4656_v62, %v4536_v4 }
 0x3f9   : > { %v5667_v17 = vpop.eup %5666  ;;  %5676 = vtanh.f32 %v4765_v56  ;;  %v4766_v42 = vadd.f32 %v8595_v7, %v4727_v15  ;;  %v4728_v9 = vmul.f32 %v8588_v48, %v4689_v34  ;;  %v4538_v20 = vpop.permute.xlu0 %4537  ;;  %v4663_v15 = vsel %vm4646_vm6, %v8374_v41, %v8553_v8 }
 0x3fa   : > { %4825 = vst.msk [vmem:[%s8636_s25 + $0x10] sm:$0xff] %vm4822_vm8, %v5667_v17  ;;  %v4690_v27 = vsel %vm4679_vm7, %v4657_v21, %v4538_v20  ;;  %v4664_v21 = vsel %vm4646_vm6, %v8379_v51, %v8555_v37 }
 0x3fb   : > { %v5669_v45 = vpop.eup %5668  ;;  %5678 = vtanh.f32 %v4766_v42  ;;  %v4767_v3 = vadd.f32 %v8595_v7, %v4728_v9  ;;  %v4729_v60 = vmul.f32 %v8588_v48, %v4690_v27  ;;  %v4540_v58 = vpop.permute.xlu1 %4539  ;;  %v4665_v27 = vsel %vm4646_vm6, %v8383_v61, %v8557_v28 }
 0x3fc   : > { %4826 = vst.msk [vmem:[%s8636_s25 + $0x18] sm:$0xff] %vm4822_vm8, %v5669_v45  ;;  %v4691_v32 = vsel %vm4679_vm7, %v4658_v46, %v4540_v58 }
 0x3fd   : > { %v5671_v2 = vpop.eup %5670  ;;  %5680 = vtanh.f32 %v4767_v3  ;;  %v4768_v47 = vadd.f32 %v8595_v7, %v4729_v60  ;;  %v4730_v33 = vmul.f32 %v8588_v48, %v4691_v32  ;;  %v4542_v16 = vpop.permute.xlu0 %4541  ;;  %v4666_v60 = vsel %vm4646_vm6, %v8387_v43, %v8559_v14 }
 0x3fe   : > { %4827 = vst.msk [vmem:[%s8636_s25 + $0x20] sm:$0xff] %vm4822_vm8, %v5671_v2  ;;  %v4692_v24 = vsel %vm4679_vm7, %v4659_v52, %v4542_v16  ;;  %v4667_v52 = vsel %vm4646_vm6, %v8391_v39, %v8561_v55 }
 0x3ff   : > { %v5673_v26 = vpop.eup %5672  ;;  %5682 = vtanh.f32 %v4768_v47  ;;  %v4769_v19 = vadd.f32 %v8595_v7, %v4730_v33  ;;  %v4731_v53 = vmul.f32 %v8588_v48, %v4692_v24  ;;  %v4544_v59 = vpop.permute.xlu1 %4543  ;;  %v4668_v24 = vsel %vm4646_vm6, %v8395_v63, %v8563_v36 }
 0x400   : > { %4828 = vst.msk [vmem:[%s8636_s25 + $0x28] sm:$0xff] %vm4822_vm8, %v5673_v26  ;;  %v4693_v29 = vsel %vm4679_vm7, %v4660_v31, %v4544_v59 }
 0x401   : > { %v5675_v13 = vpop.eup %5674  ;;  %5684 = vtanh.f32 %v4769_v19  ;;  %v4770_v18 = vadd.f32 %v8595_v7, %v4731_v53  ;;  %v4732_v30 = vmul.f32 %v8588_v48, %v4693_v29  ;;  %v4546_v50 = vpop.permute.xlu0 %4545  ;;  %v4669_v53 = vsel %vm4646_vm6, %v8399_v22, %v8565_v10 }
 0x402   : > { %4829 = vst.msk [vmem:[%s8636_s25 + $0x30] sm:$0xff] %vm4822_vm8, %v5675_v13  ;;  %v4694_v6 = vsel %vm4679_vm7, %v4661_v0, %v4546_v50  ;;  %v4670_v0 = vsel %vm4646_vm6, %v8403_v40, %v8567_v23 }
 0x403   : > { %v5677_v49 = vpop.eup %5676  ;;  %5686 = vtanh.f32 %v4770_v18  ;;  %v4771_v11 = vadd.f32 %v8595_v7, %v4732_v30  ;;  %v4733_v25 = vmul.f32 %v8588_v48, %v4694_v6  ;;  %v4548_v44 = vpop.permute.xlu1 %4547  ;;  %v4671_v6 = vsel %vm4646_vm6, %v8407_v35, %v8569_v1 }
 0x404   : > { %4830 = vst.msk [vmem:[%s8636_s25 + $0x38] sm:$0xff] %vm4822_vm8, %v5677_v49  ;;  %v4695_v62 = vsel %vm4679_vm7, %v4662_v38, %v4548_v44 }
 0x405   : > { %v5679_v56 = vpop.eup %5678  ;;  %5688 = vtanh.f32 %v4771_v11  ;;  %v4772_v4 = vadd.f32 %v8595_v7, %v4733_v25  ;;  %v4734_v5 = vmul.f32 %v8588_v48, %v4695_v62  ;;  %v4550_v12 = vpop.permute.xlu0 %4549  ;;  %v9439_v25 = vld [vmem:[#allocation10_spill] sm:$0xff] }
 0x406   : > { %4831 = vst.msk [vmem:[%s8636_s25 + $0x40] sm:$0xff] %vm4822_vm8, %v5679_v56  ;;  %v4696_v34 = vsel %vm4679_vm7, %v4663_v15, %v4550_v12  ;;  %v4672_v44 = vsel %vm4646_vm6, %v9439_v25, %v8571_v57 }
 0x407   : > { %v5681_v17 = vpop.eup %5680  ;;  %5690 = vtanh.f32 %v4772_v4  ;;  %v4773_v42 = vadd.f32 %v8595_v7, %v4734_v5  ;;  %v4735_v41 = vmul.f32 %v8588_v48, %v4696_v34  ;;  %v4552_v8 = vpop.permute.xlu1 %4551  ;;  %v9440_v4 = vld [vmem:[#allocation13_spill] sm:$0xff] }
 0x408   : > { %4832 = vst.msk [vmem:[%s8636_s25 + $0x48] sm:$0xff] %vm4822_vm8, %v5681_v17  ;;  %v4697_v9 = vsel %vm4679_vm7, %v4664_v21, %v4552_v8  ;;  %v4673_v5 = vsel %vm4646_vm6, %v9440_v4, %v8573_v54 }
 0x409   : > { %v5683_v20 = vpop.eup %5682  ;;  %5692 = vtanh.f32 %v4773_v42  ;;  %v4774_v45 = vadd.f32 %v8595_v7, %v4735_v41  ;;  %v4736_v51 = vmul.f32 %v8588_v48, %v4697_v9  ;;  %v4554_v37 = vpop.permute.xlu0 %4553  ;;  %v9441_v42 = vld [vmem:[#allocation65_spill] sm:$0xff]  ;;  %v9442_v41 = vld [vmem:[#allocation2_spill] sm:$0xff] }
 0x40a   : > { %4833 = vst.msk [vmem:[%s8636_s25 + $0x50] sm:$0xff] %vm4822_vm8, %v5683_v20  ;;  %v4698_v46 = vsel %vm4679_vm7, %v4665_v27, %v4554_v37  ;;  %v4674_v8 = vsel %vm4646_vm6, %v9442_v41, %v9441_v42  ;;  %v9444_v37 = vld [vmem:[#allocation17_spill] sm:$0xff] }
 0x40b   : > { %v5685_v3 = vpop.eup %5684  ;;  %5694 = vtanh.f32 %v4774_v45  ;;  %v4775_v58 = vadd.f32 %v8595_v7, %v4736_v51  ;;  %v4737_v61 = vmul.f32 %v8588_v48, %v4698_v46  ;;  %v4556_v28 = vpop.permute.xlu1 %4555  ;;  %v9443_v51 = vld [vmem:[#allocation32_spill] sm:$0xff] }
 0x40c   : > { %4834 = vst.msk [vmem:[%s8636_s25 + $0x58] sm:$0xff] %vm4822_vm8, %v5685_v3  ;;  %v4699_v32 = vsel %vm4679_vm7, %v4666_v60, %v4556_v28  ;;  %v4675_v46 = vsel %vm4646_vm6, %v9444_v37, %v9443_v51 }
 0x40d   : > { %v5687_v2 = vpop.eup %5686  ;;  %5696 = vtanh.f32 %v4775_v58  ;;  %v4776_v47 = vadd.f32 %v8595_v7, %v4737_v61  ;;  %v4738_v43 = vmul.f32 %v8588_v48, %v4699_v32  ;;  %v4558_v14 = vpop.permute.xlu0 %4557  ;;  %v9445_v32 = vld [vmem:[#allocation24_spill] sm:$0xff] }
 0x40e   : > { %4835 = vst.msk [vmem:[%s8636_s25 + $0x60] sm:$0xff] %vm4822_vm8, %v5687_v2  ;;  %v4700_v33 = vsel %vm4679_vm7, %v4667_v52, %v4558_v14  ;;  %v9446_v2 = vld [vmem:[#allocation42_spill] sm:$0xff] }
 0x40f   : > { %v5689_v16 = vpop.eup %5688  ;;  %5698 = vtanh.f32 %v4776_v47  ;;  %v4777_v26 = vadd.f32 %v8595_v7, %v4738_v43  ;;  %v4739_v39 = vmul.f32 %v8588_v48, %v4700_v33  ;;  %v4560_v55 = vpop.permute.xlu1 %4559  ;;  %v4676_v52 = vsel %vm4646_vm6, %v9446_v2, %v9445_v32 }
 0x410   : > { %4836 = vst.msk [vmem:[%s8636_s25 + $0x68] sm:$0xff] %vm4822_vm8, %v5689_v16  ;;  %v4701_v31 = vsel %vm4679_vm7, %v4668_v24, %v4560_v55  ;;  %v9447_v24 = vld [vmem:[#allocation62_spill] sm:$0xff] }
 0x411   : > { %v5691_v19 = vpop.eup %5690  ;;  %5700 = vtanh.f32 %v4777_v26  ;;  %v4778_v59 = vadd.f32 %v8595_v7, %v4739_v39  ;;  %v4740_v63 = vmul.f32 %v8588_v48, %v4701_v31  ;;  %v4562_v36 = vpop.permute.xlu0 %4561  ;;  %v9448_v26 = vld [vmem:[#allocation16_spill] sm:$0xff] }
 0x412   : > { %4837 = vst.msk [vmem:[%s8636_s25 + $0x70] sm:$0xff] %vm4822_vm8, %v5691_v19  ;;  %v4702_v29 = vsel %vm4679_vm7, %v4669_v53, %v4562_v36  ;;  %v4677_v39 = vsel %vm4646_vm6, %v9448_v26, %v9447_v24  ;;  %v9450_v36 = vld [vmem:[#allocation77_spill] sm:$0xff] }
 0x413   : > { %v5693_v13 = vpop.eup %5692  ;;  %5702 = vtanh.f32 %v4778_v59  ;;  %v4779_v18 = vadd.f32 %v8595_v7, %v4740_v63  ;;  %v4741_v22 = vmul.f32 %v8588_v48, %v4702_v29  ;;  %v4564_v10 = vpop.permute.xlu1 %4563  ;;  %v9449_v63 = vld [vmem:[#allocation12_spill] sm:$0xff] }
 0x414   : > { %4838 = vst.msk [vmem:[%s8636_s25 + $0x78] sm:$0xff] %vm4822_vm8, %v5693_v13  ;;  %v4703_v30 = vsel %vm4679_vm7, %v4670_v0, %v4564_v10  ;;  %v4678_v29 = vsel %vm4646_vm6, %v9450_v36, %v9449_v63 }
 0x415   : > { %v5695_v50 = vpop.eup %5694  ;;  %5704 = vtanh.f32 %v4779_v18  ;;  %v4780_v49 = vadd.f32 %v8595_v7, %v4741_v22  ;;  %v4742_v40 = vmul.f32 %v8588_v48, %v4703_v30  ;;  %v4566_v23 = vpop.permute.xlu0 %4565 }
 0x416   : > { %4839 = vst.msk [vmem:[%s8636_s25 + $0x80] sm:$0xff] %vm4822_vm8, %v5695_v50  ;;  %v4704_v38 = vsel %vm4679_vm7, %v4671_v6, %v4566_v23 }
 0x417   : > { %v5697_v11 = vpop.eup %5696  ;;  %5706 = vtanh.f32 %v4780_v49  ;;  %v4781_v62 = vadd.f32 %v8595_v7, %v4742_v40  ;;  %v4743_v35 = vmul.f32 %v8588_v48, %v4704_v38  ;;  %v4568_v1 = vpop.permute.xlu1 %4567 }
 0x418   : > { %4840 = vst.msk [vmem:[%s8636_s25 + $0x88] sm:$0xff] %vm4822_vm8, %v5697_v11  ;;  %v4705_v56 = vsel %vm4679_vm7, %v4672_v44, %v4568_v1 }
 0x419   : > { %v5699_v15 = vpop.eup %5698  ;;  %5708 = vtanh.f32 %v4781_v62  ;;  %v4782_v12 = vadd.f32 %v8595_v7, %v4743_v35  ;;  %v4744_v57 = vmul.f32 %v8588_v48, %v4705_v56  ;;  %v4570_v34 = vpop.permute.xlu0 %4569 }
 0x41a   : > { %4841 = vst.msk [vmem:[%s8636_s25 + $0x90] sm:$0xff] %vm4822_vm8, %v5699_v15  ;;  %v4706_v17 = vsel %vm4679_vm7, %v4673_v5, %v4570_v34 }
 0x41b   : > { %v5701_v21 = vpop.eup %5700  ;;  %5710 = vtanh.f32 %v4782_v12  ;;  %v4783_v9 = vadd.f32 %v8595_v7, %v4744_v57  ;;  %v4745_v54 = vmul.f32 %v8588_v48, %v4706_v17  ;;  %v4572_v20 = vpop.permute.xlu1 %4571 }
 0x41c   : > { %4842 = vst.msk [vmem:[%s8636_s25 + $0x98] sm:$0xff] %vm4822_vm8, %v5701_v21  ;;  %v4707_v27 = vsel %vm4679_vm7, %v4674_v8, %v4572_v20 }
 0x41d   : > { %v5703_v45 = vpop.eup %5702  ;;  %5712 = vtanh.f32 %v4783_v9  ;;  %v4784_v3 = vadd.f32 %v8595_v7, %v4745_v54  ;;  %v4746_v60 = vmul.f32 %v8588_v48, %v4707_v27  ;;  %v4574_v58 = vpop.permute.xlu0 %4573 }
 0x41e   : > { %4843 = vst.msk [vmem:[%s8636_s25 + $0xa0] sm:$0xff] %vm4822_vm8, %v5703_v45  ;;  %v4708_v61 = vsel %vm4679_vm7, %v4675_v46, %v4574_v58 }
 0x41f   : > { %v5705_v28 = vpop.eup %5704  ;;  %5714 = vtanh.f32 %v4784_v3  ;;  %v4785_v47 = vadd.f32 %v8595_v7, %v4746_v60  ;;  %v4747_v43 = vmul.f32 %v8588_v48, %v4708_v61  ;;  %v4576_v14 = vpop.permute.xlu1 %4575 }
 0x420   : > { %4844 = vst.msk [vmem:[%s8636_s25 + $0xa8] sm:$0xff] %vm4822_vm8, %v5705_v28  ;;  %v4709_v33 = vsel %vm4679_vm7, %v4676_v52, %v4576_v14 }
 0x421   : > { %v5707_v16 = vpop.eup %5706  ;;  %5716 = vtanh.f32 %v4785_v47  ;;  %v4786_v55 = vadd.f32 %v8595_v7, %v4747_v43  ;;  %v4748_v31 = vmul.f32 %v8588_v48, %v4709_v33  ;;  %v4578_v19 = vpop.permute.xlu0 %4577 }
 0x422   : > { %4845 = vst.msk [vmem:[%s8636_s25 + $0xb0] sm:$0xff] %vm4822_vm8, %v5707_v16  ;;  %v4710_v53 = vsel %vm4679_vm7, %v4677_v39, %v4578_v19 }
 0x423   : > { %v5709_v59 = vpop.eup %5708  ;;  %5718 = vtanh.f32 %v4786_v55  ;;  %v4787_v13 = vadd.f32 %v8595_v7, %v4748_v31  ;;  %v4749_v0 = vmul.f32 %v8588_v48, %v4710_v53  ;;  %v4580_v18 = vpop.permute.xlu1 %4579 }
 0x424   : > { %4846 = vst.msk [vmem:[%s8636_s25 + $0xb8] sm:$0xff] %vm4822_vm8, %v5709_v59  ;;  %v4711_v22 = vsel %vm4679_vm7, %v4678_v29, %v4580_v18 }
 0x425   : > { %v5711_v10 = vpop.eup %5710  ;;  %5720 = vtanh.f32 %v4787_v13  ;;  %v4788_v30 = vadd.f32 %v8595_v7, %v4749_v0  ;;  %v4750_v50 = vmul.f32 %v8588_v48, %v4711_v22 }
 0x426   : > { %4847 = vst.msk [vmem:[%s8636_s25 + $0xc0] sm:$0xff] %vm4822_vm8, %v5711_v10 }
 0x427   : > { %v5713_v6 = vpop.eup %5712  ;;  %5722 = vtanh.f32 %v4788_v30  ;;  %v4789_v49 = vadd.f32 %v8595_v7, %v4750_v50 }
 0x428   : > { %4848 = vst.msk [vmem:[%s8636_s25 + $0xc8] sm:$0xff] %vm4822_vm8, %v5713_v6 }
 0x429   : > { %v5715_v40 = vpop.eup %5714  ;;  %5724 = vtanh.f32 %v4789_v49 }
 0x42a   : > { %4849 = vst.msk [vmem:[%s8636_s25 + $0xd0] sm:$0xff] %vm4822_vm8, %v5715_v40 }
 0x42b   : > { %v5717_v23 = vpop.eup %5716 }
 0x42c   : > { %4850 = vst.msk [vmem:[%s8636_s25 + $0xd8] sm:$0xff] %vm4822_vm8, %v5717_v23 }
 0x42d   : > { %v5719_v38 = vpop.eup %5718 }
 0x42e   : > { %4851 = vst.msk [vmem:[%s8636_s25 + $0xe0] sm:$0xff] %vm4822_vm8, %v5719_v38 }
 0x42f   : > { %v5721_v48 = vpop.eup %5720 }
 0x430   : > { %4852 = vst.msk [vmem:[%s8636_s25 + $0xe8] sm:$0xff] %vm4822_vm8, %v5721_v48 }
 0x431   : > { %v5723_v11 = vpop.eup %5722 }
 0x432   : > { %4853 = vst.msk [vmem:[%s8636_s25 + $0xf0] sm:$0xff] %vm4822_vm8, %v5723_v11 }
 0x433   : > { %v5725_v25 = vpop.eup %5724 }
 0x434   : > { %4854 = vst.msk [vmem:[%s8636_s25 + $0xf8] sm:$0xff] %vm4822_vm8, %v5725_v25 }
 0x435 PF: > { %s14_s15 = sadd.s32 1, %s5778_s15  }
 0x436   : > { %p11_p4 = scmp.ge.s32.totalorder %s14_s15, 4  }
 0x438   :  { %13 = sbr.rel (!%p11_p4) target bundleno = 1 (0x1), region = 71 }

</bundles_post_ra>
